<compile_context>
chip_gen: v7x
topology: tpu7x:2x2x1
jax: 0.10.0
libtpu: 0.0.40
codegen_flags: <defaults>
</compile_context>

<pallas_src>
import jax
import jax.numpy as jnp
from jax.experimental import pallas as pl
from jax.experimental.pallas import tpu as pltpu

BN_EPS = 1e-3  # BatchNorm2d eps used by the PyTorch module


# -----------------------------------------------------------------------------
# Fused per-level kernel: tower (sepconv + BN + swish) x L, header, sigmoid
# -----------------------------------------------------------------------------
def _classifier_level_kernel(x_ref, wt_ref, sc_ref, sh_ref, wh_ref, bh_ref,
                             o_ref, buf_a, buf_b, patch):
    # x_ref : (H, W, C)          input feature (batch squeezed by BlockSpec)
    # wt_ref: (L, 9*C, C) bf16   fused full-conv tower weights
    # sc_ref: (L, 1, C)  f32     folded BN scale
    # sh_ref: (L, 1, C)  f32     folded BN shift (includes pointwise bias)
    # wh_ref: (9*C, CP) bf16     fused header weights, channel-padded to CP=128k
    # bh_ref: (1, CP)   f32      header bias (padded)
    # o_ref : (H, W, CP) f32     sigmoid(header) output, lane-dense
    # buf_a/buf_b: (H+2, W+2, C) f32 ping-pong padded feature buffers
    # patch : (H, W, 9*C) bf16   im2col scratch
    H, W, C = x_ref.shape
    L = wt_ref.shape[0]
    cp = o_ref.shape[-1]

    # Zero both padded buffers once: the halo stays zero across all layers
    # ("same" zero padding); interiors are overwritten every layer.
    buf_a[...] = jnp.zeros(buf_a.shape, buf_a.dtype)
    buf_b[...] = jnp.zeros(buf_b.shape, buf_b.dtype)
    buf_a[1:H + 1, 1:W + 1, :] = x_ref[...]
    bufs = (buf_a, buf_b)

    def im2col_bf16(src):
        # Build the (H, W, 9*C) patch once; one K=9*C MXU matmul per layer.
        for dy in range(3):
            for dx in range(3):
                t = dy * 3 + dx
                patch[:, :, t * C:(t + 1) * C] = (
                    src[dy:dy + H, dx:dx + W, :].astype(jnp.bfloat16))
        return patch[...].reshape(H * W, 9 * C)

    def sigmoid(z):
        return 1.0 / (1.0 + jnp.exp(-z))

    # Tower: static unroll over layers (L is known at trace time and small).
    for l in range(L):
        src, dst = bufs[l % 2], bufs[(l + 1) % 2]
        p = im2col_bf16(src)
        acc = jnp.dot(p, wt_ref[l], preferred_element_type=jnp.float32)  # (H*W, C)
        z = acc * sc_ref[l] + sh_ref[l]       # pointwise bias + BatchNorm (folded)
        z = z * sigmoid(z)                    # Swish
        dst[1:H + 1, 1:W + 1, :] = z.reshape(H, W, C)

    # Header conv + bias + sigmoid (lane-dense padded output channels).
    p = im2col_bf16(bufs[L % 2])
    y = jnp.dot(p, wh_ref[...], preferred_element_type=jnp.float32) + bh_ref[...]
    o_ref[...] = sigmoid(y).reshape(H, W, cp)


def _classifier_level(x_nhwc, wt, sc, sh, wh, bh):
    B, H, W, C = x_nhwc.shape
    L = wt.shape[0]
    cp = wh.shape[-1]
    return pl.pallas_call(
        _classifier_level_kernel,
        out_shape=jax.ShapeDtypeStruct((B, H, W, cp), jnp.float32),
        grid=(B,),
        in_specs=[
            pl.BlockSpec((None, H, W, C), lambda b: (b, 0, 0, 0)),
            pl.BlockSpec((L, 9 * C, C), lambda b: (0, 0, 0)),
            pl.BlockSpec((L, 1, C), lambda b: (0, 0, 0)),
            pl.BlockSpec((L, 1, C), lambda b: (0, 0, 0)),
            pl.BlockSpec((9 * C, cp), lambda b: (0, 0)),
            pl.BlockSpec((1, cp), lambda b: (0, 0)),
        ],
        out_specs=pl.BlockSpec((None, H, W, cp), lambda b: (b, 0, 0, 0)),
        scratch_shapes=[
            pltpu.VMEM((H + 2, W + 2, C), jnp.float32),
            pltpu.VMEM((H + 2, W + 2, C), jnp.float32),
            pltpu.VMEM((H, W, 9 * C), jnp.bfloat16),
        ],
        compiler_params=pltpu.CompilerParams(dimension_semantics=("parallel",)),
    )(x_nhwc, wt, sc, sh, wh, bh)


# -----------------------------------------------------------------------------
# Classifier module (parameters + forward), mirroring the PyTorch module
# -----------------------------------------------------------------------------
class ClassifierPallas:
    def __init__(self, in_channels, num_anchors, num_classes, num_layers, key=None):
        self.in_channels = in_channels
        self.num_anchors = num_anchors
        self.num_classes = num_classes
        self.num_layers = num_layers
        C = in_channels
        head_ch = num_anchors * num_classes
        self.cout_pad = ((head_ch + 127) // 128) * 128  # lane-dense head width

        key = jax.random.PRNGKey(0) if key is None else key
        n_keys = num_layers * 3 + 3 + 5 * num_layers * 4
        ks = iter(jax.random.split(key, n_keys))
        normal = lambda k, shp, s: (s * jax.random.normal(k, shp)).astype(jnp.float32)

        # --- raw parameters (same structure as the PyTorch module) ---
        # conv_list: shared across levels; depthwise (C,3,3) no bias, pointwise (C,C)+bias
        self.dw_w, self.pw_w, self.pw_b = [], [], []
        for _ in range(num_layers):
            self.dw_w.append(normal(next(ks), (C, 3, 3), 0.25))
            self.pw_w.append(normal(next(ks), (C, C), 0.12))
            self.pw_b.append(normal(next(ks), (C,), 0.10))
        # header: depthwise (C,3,3), pointwise (A*nc, C) + bias
        self.h_dw = normal(next(ks), (C, 3, 3), 0.25)
        self.h_pw = normal(next(ks), (head_ch, C), 0.12)
        self.h_b = normal(next(ks), (head_ch,), 0.05)
        # bn_list: 5 pyramid levels x num_layers BatchNorm2d(C) (inference stats)
        self.bn_raw = []
        for _ in range(5):
            lvl = []
            for _ in range(num_layers):
                gamma = 1.0 + normal(next(ks), (C,), 0.10)
                beta = normal(next(ks), (C,), 0.10)
                mean = normal(next(ks), (C,), 0.10)
                var = 0.5 + jax.random.uniform(next(ks), (C,), dtype=jnp.float32)
                lvl.append((gamma, beta, mean, var))
            self.bn_raw.append(lvl)

        # --- fused parameters for the Pallas kernel ---
        def fuse_sepconv(wdw, wpw):
            # separable conv == full 3x3 conv with W[tap, ci, co] = dw[ci,tap]*pw[co,ci]
            taps = wdw.reshape(C, 9).T                     # (9, C), tap = dy*3+dx
            full = taps[:, :, None] * wpw.T[None, :, :]    # (9, C, Cout)
            return full.reshape(9 * C, wpw.shape[0])       # (9*C, Cout)

        self.wt = jnp.stack(
            [fuse_sepconv(self.dw_w[l], self.pw_w[l]) for l in range(num_layers)]
        ).astype(jnp.bfloat16)                              # (L, 9C, C)

        wh = fuse_sepconv(self.h_dw, self.h_pw)             # (9C, A*nc)
        self.wh = jnp.pad(wh, ((0, 0), (0, self.cout_pad - head_ch))).astype(jnp.bfloat16)
        self.bh = jnp.pad(self.h_b, (0, self.cout_pad - head_ch)).reshape(1, self.cout_pad)

        # fold pointwise bias + inference BatchNorm into per-channel scale/shift
        self.eff_scale, self.eff_shift = [], []
        for j in range(5):
            scs, shs = [], []
            for l in range(num_layers):
                gamma, beta, mean, var = self.bn_raw[j][l]
                s = gamma * jax.lax.rsqrt(var + BN_EPS)
                scs.append(s)
                shs.append(beta + (self.pw_b[l] - mean) * s)
            self.eff_scale.append(jnp.stack(scs)[:, None, :])   # (L, 1, C)
            self.eff_shift.append(jnp.stack(shs)[:, None, :])   # (L, 1, C)

    def __call__(self, inputs):
        # inputs: list of NCHW pyramid feature maps (PyTorch convention)
        A, NC = self.num_anchors, self.num_classes
        outs = []
        for j, x in enumerate(inputs):
            xh = jnp.transpose(x, (0, 2, 3, 1)).astype(jnp.float32)   # NCHW -> NHWC
            y = _classifier_level(xh, self.wt, self.eff_scale[j], self.eff_shift[j],
                                  self.wh, self.bh)                    # (B,H,W,CP), sigmoid'd
            B, H, W, _ = y.shape
            outs.append(y[..., :A * NC].reshape(B, H * W * A, NC))
        return jnp.concatenate(outs, axis=1)


# -----------------------------------------------------------------------------
# Pure-JAX reference (independent math path: explicit depthwise + pointwise, f32)
# -----------------------------------------------------------------------------
def _reference_classifier(clf, inputs):
    A, NC = clf.num_anchors, clf.num_classes

    def sepconv(z, wdw, wpw, bpw):
        B, H, W, C = z.shape
        zp = jnp.pad(z, ((0, 0), (1, 1), (1, 1), (0, 0)))
        dw = jnp.zeros_like(z)
        for dy in range(3):
            for dx in range(3):
                dw = dw + zp[:, dy:dy + H, dx:dx + W, :] * wdw[:, dy, dx]
        return jnp.einsum('bhwc,oc->bhwo', dw, wpw) + bpw

    outs = []
    for j, x in enumerate(inputs):
        z = jnp.transpose(x, (0, 2, 3, 1)).astype(jnp.float32)
        for l in range(clf.num_layers):
            z = sepconv(z, clf.dw_w[l], clf.pw_w[l], clf.pw_b[l])
            gamma, beta, mean, var = clf.bn_raw[j][l]
            z = (z - mean) * (gamma / jnp.sqrt(var + BN_EPS)) + beta
            z = z * jax.nn.sigmoid(z)
        z = sepconv(z, clf.h_dw, clf.h_pw, clf.h_b)
        B, H, W, _ = z.shape
        outs.append(z.reshape(B, H * W * A, NC))
    return jax.nn.sigmoid(jnp.concatenate(outs, axis=1))


# -----------------------------------------------------------------------------
if __name__ == "__main__":
    root = jax.random.PRNGKey(0)
    kparams, kx1, kx2 = jax.random.split(root, 3)

    B, C = 2, 64                      # EfficientDet-D0-like channel width
    num_anchors, num_classes, num_layers = 9, 4, 3

    clf = ClassifierPallas(in_channels=C, num_anchors=num_anchors,
                           num_classes=num_classes, num_layers=num_layers,
                           key=kparams)

    # Two pyramid levels, PyTorch NCHW convention.
    feats = [
        jax.random.normal(kx1, (B, C, 16, 16), jnp.float32),
        jax.random.normal(kx2, (B, C, 8, 8), jnp.float32),
    ]

    out = clf(feats)
    out = jax.block_until_ready(out)

    n_rows = (16 * 16 + 8 * 8) * num_anchors
    assert out.shape == (B, n_rows, num_classes), out.shape

    ref = _reference_classifier(clf, feats)
    err = float(jnp.max(jnp.abs(out - ref)))
    assert jnp.allclose(out, ref, atol=2e-2, rtol=2e-2), f"max abs err {err}"

    print("KERNEL_OK")
</pallas_src>

<mosaic_0001>
module attributes {stable_mosaic.version = 11 : i64} {
  func.func @_classifier_level_kernel(%arg0: i32, %arg1: memref<1x16x16x64xf32, #tpu.memory_space<vmem>>, %arg2: memref<3x576x64xbf16, #tpu.memory_space<vmem>>, %arg3: memref<3x1x64xf32, #tpu.memory_space<vmem>>, %arg4: memref<3x1x64xf32, #tpu.memory_space<vmem>>, %arg5: memref<576x128xbf16, #tpu.memory_space<vmem>>, %arg6: memref<1x128xf32, #tpu.memory_space<vmem>>, %arg7: memref<1x16x16x128xf32, #tpu.memory_space<vmem>>, %arg8: memref<18x18x64xf32, #tpu.memory_space<vmem>>, %arg9: memref<18x18x64xf32, #tpu.memory_space<vmem>>, %arg10: memref<16x16x576xbf16, #tpu.memory_space<vmem>>) attributes {dimension_semantics = [#tpu.dimension_semantics<parallel>], iteration_bounds = array<i64: 2>, scalar_prefetch = 0 : i64, scratch_operands = 3 : i64, tpu.core_type = #tpu.core_type<tc>, window_params = [{transform_indices = @transform_0, window_bounds = array<i64: 1, 16, 16, 64>}, {pipeline_mode = #tpu.pipeline_mode<synchronous>, transform_indices = @transform_1, window_bounds = array<i64: 3, 576, 64>}, {pipeline_mode = #tpu.pipeline_mode<synchronous>, transform_indices = @transform_2, window_bounds = array<i64: 3, 1, 64>}, {pipeline_mode = #tpu.pipeline_mode<synchronous>, transform_indices = @transform_3, window_bounds = array<i64: 3, 1, 64>}, {pipeline_mode = #tpu.pipeline_mode<synchronous>, transform_indices = @transform_4, window_bounds = array<i64: 576, 128>}, {pipeline_mode = #tpu.pipeline_mode<synchronous>, transform_indices = @transform_5, window_bounds = array<i64: 1, 128>}, {transform_indices = @transform_6, window_bounds = array<i64: 1, 16, 16, 128>}]} {
    %cst = arith.constant 0.000000e+00 : f32
    %0 = vector.broadcast %cst : f32 to vector<18x18x64xf32>
    %c0 = arith.constant 0 : index
    %c0_0 = arith.constant 0 : index
    %c0_1 = arith.constant 0 : index
    %1 = vector.load %arg8[%c0, %c0_0, %c0_1] : memref<18x18x64xf32, #tpu.memory_space<vmem>>, vector<18x18x64xf32>
    tpu.vector_store %arg8[%c0, %c0_0, %c0_1], %0 {strides = array<i32>} : memref<18x18x64xf32, #tpu.memory_space<vmem>>, vector<18x18x64xf32>,
    %cst_2 = arith.constant 0.000000e+00 : f32
    %2 = vector.broadcast %cst_2 : f32 to vector<18x18x64xf32>
    %c0_3 = arith.constant 0 : index
    %c0_4 = arith.constant 0 : index
    %c0_5 = arith.constant 0 : index
    %3 = vector.load %arg9[%c0_3, %c0_4, %c0_5] : memref<18x18x64xf32, #tpu.memory_space<vmem>>, vector<18x18x64xf32>
    tpu.vector_store %arg9[%c0_3, %c0_4, %c0_5], %2 {strides = array<i32>} : memref<18x18x64xf32, #tpu.memory_space<vmem>>, vector<18x18x64xf32>,
    %c0_6 = arith.constant 0 : index
    %c0_7 = arith.constant 0 : index
    %c0_8 = arith.constant 0 : index
    %c0_9 = arith.constant 0 : index
    %4 = vector.load %arg1[%c0_6, %c0_7, %c0_8, %c0_9] : memref<1x16x16x64xf32, #tpu.memory_space<vmem>>, vector<1x16x16x64xf32>
    %5 = vector.shape_cast %4 : vector<1x16x16x64xf32> to vector<16x16x64xf32>
    %c1 = arith.constant 1 : index
    %c1_10 = arith.constant 1 : index
    %c0_11 = arith.constant 0 : index
    %6 = vector.load %arg8[%c1, %c1_10, %c0_11] : memref<18x18x64xf32, #tpu.memory_space<vmem>>, vector<16x16x64xf32>
    tpu.vector_store %arg8[%c1, %c1_10, %c0_11], %5 {strides = array<i32>} : memref<18x18x64xf32, #tpu.memory_space<vmem>>, vector<16x16x64xf32>,
    %c0_12 = arith.constant 0 : index
    %c0_13 = arith.constant 0 : index
    %c0_14 = arith.constant 0 : index
    %7 = vector.load %arg8[%c0_12, %c0_13, %c0_14] : memref<18x18x64xf32, #tpu.memory_space<vmem>>, vector<16x16x64xf32>
    %8 = arith.truncf %7 : vector<16x16x64xf32> to vector<16x16x64xbf16>
    %c0_15 = arith.constant 0 : index
    %c0_16 = arith.constant 0 : index
    %c0_17 = arith.constant 0 : index
    %9 = vector.load %arg10[%c0_15, %c0_16, %c0_17] : memref<16x16x576xbf16, #tpu.memory_space<vmem>>, vector<16x16x64xbf16>
    tpu.vector_store %arg10[%c0_15, %c0_16, %c0_17], %8 {strides = array<i32>} : memref<16x16x576xbf16, #tpu.memory_space<vmem>>, vector<16x16x64xbf16>,
    %c0_18 = arith.constant 0 : index
    %c1_19 = arith.constant 1 : index
    %c0_20 = arith.constant 0 : index
    %10 = vector.load %arg8[%c0_18, %c1_19, %c0_20] : memref<18x18x64xf32, #tpu.memory_space<vmem>>, vector<16x16x64xf32>
    %11 = arith.truncf %10 : vector<16x16x64xf32> to vector<16x16x64xbf16>
    %c0_21 = arith.constant 0 : index
    %c0_22 = arith.constant 0 : index
    %c64 = arith.constant 64 : index
    %12 = vector.load %arg10[%c0_21, %c0_22, %c64] : memref<16x16x576xbf16, #tpu.memory_space<vmem>>, vector<16x16x64xbf16>
    tpu.vector_store %arg10[%c0_21, %c0_22, %c64], %11 {strides = array<i32>} : memref<16x16x576xbf16, #tpu.memory_space<vmem>>, vector<16x16x64xbf16>,
    %c0_23 = arith.constant 0 : index
    %c2 = arith.constant 2 : index
    %c0_24 = arith.constant 0 : index
    %13 = vector.load %arg8[%c0_23, %c2, %c0_24] : memref<18x18x64xf32, #tpu.memory_space<vmem>>, vector<16x16x64xf32>
    %14 = arith.truncf %13 : vector<16x16x64xf32> to vector<16x16x64xbf16>
    %c0_25 = arith.constant 0 : index
    %c0_26 = arith.constant 0 : index
    %c128 = arith.constant 128 : index
    %15 = vector.load %arg10[%c0_25, %c0_26, %c128] : memref<16x16x576xbf16, #tpu.memory_space<vmem>>, vector<16x16x64xbf16>
    tpu.vector_store %arg10[%c0_25, %c0_26, %c128], %14 {strides = array<i32>} : memref<16x16x576xbf16, #tpu.memory_space<vmem>>, vector<16x16x64xbf16>,
    %c1_27 = arith.constant 1 : index
    %c0_28 = arith.constant 0 : index
    %c0_29 = arith.constant 0 : index
    %16 = vector.load %arg8[%c1_27, %c0_28, %c0_29] : memref<18x18x64xf32, #tpu.memory_space<vmem>>, vector<16x16x64xf32>
    %17 = arith.truncf %16 : vector<16x16x64xf32> to vector<16x16x64xbf16>
    %c0_30 = arith.constant 0 : index
    %c0_31 = arith.constant 0 : index
    %c192 = arith.constant 192 : index
    %18 = vector.load %arg10[%c0_30, %c0_31, %c192] : memref<16x16x576xbf16, #tpu.memory_space<vmem>>, vector<16x16x64xbf16>
    tpu.vector_store %arg10[%c0_30, %c0_31, %c192], %17 {strides = array<i32>} : memref<16x16x576xbf16, #tpu.memory_space<vmem>>, vector<16x16x64xbf16>,
    %c1_32 = arith.constant 1 : index
    %c1_33 = arith.constant 1 : index
    %c0_34 = arith.constant 0 : index
    %19 = vector.load %arg8[%c1_32, %c1_33, %c0_34] : memref<18x18x64xf32, #tpu.memory_space<vmem>>, vector<16x16x64xf32>
    %20 = arith.truncf %19 : vector<16x16x64xf32> to vector<16x16x64xbf16>
    %c0_35 = arith.constant 0 : index
    %c0_36 = arith.constant 0 : index
    %c256 = arith.constant 256 : index
    %21 = vector.load %arg10[%c0_35, %c0_36, %c256] : memref<16x16x576xbf16, #tpu.memory_space<vmem>>, vector<16x16x64xbf16>
    tpu.vector_store %arg10[%c0_35, %c0_36, %c256], %20 {strides = array<i32>} : memref<16x16x576xbf16, #tpu.memory_space<vmem>>, vector<16x16x64xbf16>,
    %c1_37 = arith.constant 1 : index
    %c2_38 = arith.constant 2 : index
    %c0_39 = arith.constant 0 : index
    %22 = vector.load %arg8[%c1_37, %c2_38, %c0_39] : memref<18x18x64xf32, #tpu.memory_space<vmem>>, vector<16x16x64xf32>
    %23 = arith.truncf %22 : vector<16x16x64xf32> to vector<16x16x64xbf16>
    %c0_40 = arith.constant 0 : index
    %c0_41 = arith.constant 0 : index
    %c320 = arith.constant 320 : index
    %24 = vector.load %arg10[%c0_40, %c0_41, %c320] : memref<16x16x576xbf16, #tpu.memory_space<vmem>>, vector<16x16x64xbf16>
    tpu.vector_store %arg10[%c0_40, %c0_41, %c320], %23 {strides = array<i32>} : memref<16x16x576xbf16, #tpu.memory_space<vmem>>, vector<16x16x64xbf16>,
    %c2_42 = arith.constant 2 : index
    %c0_43 = arith.constant 0 : index
    %c0_44 = arith.constant 0 : index
    %25 = vector.load %arg8[%c2_42, %c0_43, %c0_44] : memref<18x18x64xf32, #tpu.memory_space<vmem>>, vector<16x16x64xf32>
    %26 = arith.truncf %25 : vector<16x16x64xf32> to vector<16x16x64xbf16>
    %c0_45 = arith.constant 0 : index
    %c0_46 = arith.constant 0 : index
    %c384 = arith.constant 384 : index
    %27 = vector.load %arg10[%c0_45, %c0_46, %c384] : memref<16x16x576xbf16, #tpu.memory_space<vmem>>, vector<16x16x64xbf16>
    tpu.vector_store %arg10[%c0_45, %c0_46, %c384], %26 {strides = array<i32>} : memref<16x16x576xbf16, #tpu.memory_space<vmem>>, vector<16x16x64xbf16>,
    %c2_47 = arith.constant 2 : index
    %c1_48 = arith.constant 1 : index
    %c0_49 = arith.constant 0 : index
    %28 = vector.load %arg8[%c2_47, %c1_48, %c0_49] : memref<18x18x64xf32, #tpu.memory_space<vmem>>, vector<16x16x64xf32>
    %29 = arith.truncf %28 : vector<16x16x64xf32> to vector<16x16x64xbf16>
    %c0_50 = arith.constant 0 : index
    %c0_51 = arith.constant 0 : index
    %c448 = arith.constant 448 : index
    %30 = vector.load %arg10[%c0_50, %c0_51, %c448] : memref<16x16x576xbf16, #tpu.memory_space<vmem>>, vector<16x16x64xbf16>
    tpu.vector_store %arg10[%c0_50, %c0_51, %c448], %29 {strides = array<i32>} : memref<16x16x576xbf16, #tpu.memory_space<vmem>>, vector<16x16x64xbf16>,
    %c2_52 = arith.constant 2 : index
    %c2_53 = arith.constant 2 : index
    %c0_54 = arith.constant 0 : index
    %31 = vector.load %arg8[%c2_52, %c2_53, %c0_54] : memref<18x18x64xf32, #tpu.memory_space<vmem>>, vector<16x16x64xf32>
    %32 = arith.truncf %31 : vector<16x16x64xf32> to vector<16x16x64xbf16>
    %c0_55 = arith.constant 0 : index
    %c0_56 = arith.constant 0 : index
    %c512 = arith.constant 512 : index
    %33 = vector.load %arg10[%c0_55, %c0_56, %c512] : memref<16x16x576xbf16, #tpu.memory_space<vmem>>, vector<16x16x64xbf16>
    tpu.vector_store %arg10[%c0_55, %c0_56, %c512], %32 {strides = array<i32>} : memref<16x16x576xbf16, #tpu.memory_space<vmem>>, vector<16x16x64xbf16>,
    %c0_57 = arith.constant 0 : index
    %c0_58 = arith.constant 0 : index
    %c0_59 = arith.constant 0 : index
    %34 = vector.load %arg10[%c0_57, %c0_58, %c0_59] : memref<16x16x576xbf16, #tpu.memory_space<vmem>>, vector<16x16x576xbf16>
    %35 = vector.shape_cast %34 : vector<16x16x576xbf16> to vector<256x576xbf16>
    %c0_60 = arith.constant 0 : index
    %c0_61 = arith.constant 0 : index
    %c0_62 = arith.constant 0 : index
    %36 = vector.load %arg2[%c0_60, %c0_61, %c0_62] : memref<3x576x64xbf16, #tpu.memory_space<vmem>>, vector<1x576x64xbf16>
    %37 = vector.shape_cast %36 : vector<1x576x64xbf16> to vector<576x64xbf16>
    %cst_63 = arith.constant dense<0.000000e+00> : vector<256x64xf32>
    %38 = tpu.matmul %35, %37, %cst_63 {dimension_numbers = #tpu.dot_dimension_numbers<[1], [0], [0], [1], [0, 0, 1, 1], [], []>} : vector<256x576xbf16>, vector<576x64xbf16>, vector<256x64xf32> -> vector<256x64xf32>
    %c0_64 = arith.constant 0 : index
    %c0_65 = arith.constant 0 : index
    %c0_66 = arith.constant 0 : index
    %39 = vector.load %arg3[%c0_64, %c0_65, %c0_66] : memref<3x1x64xf32, #tpu.memory_space<vmem>>, vector<1x1x64xf32>
    %40 = vector.shape_cast %39 : vector<1x1x64xf32> to vector<1x64xf32>
    %41 = vector.broadcast %40 : vector<1x64xf32> to vector<256x64xf32>
    %42 = arith.mulf %38, %41 : vector<256x64xf32>
    %c0_67 = arith.constant 0 : index
    %c0_68 = arith.constant 0 : index
    %c0_69 = arith.constant 0 : index
    %43 = vector.load %arg4[%c0_67, %c0_68, %c0_69] : memref<3x1x64xf32, #tpu.memory_space<vmem>>, vector<1x1x64xf32>
    %44 = vector.shape_cast %43 : vector<1x1x64xf32> to vector<1x64xf32>
    %45 = vector.broadcast %44 : vector<1x64xf32> to vector<256x64xf32>
    %46 = arith.addf %42, %45 : vector<256x64xf32>
    %cst_70 = arith.constant 0.000000e+00 : f32
    %47 = vector.broadcast %cst_70 : f32 to vector<256x64xf32>
    %48 = arith.subf %47, %46 : vector<256x64xf32>
    %49 = math.exp %48 : vector<256x64xf32>
    %cst_71 = arith.constant 1.000000e+00 : f32
    %50 = vector.broadcast %cst_71 : f32 to vector<256x64xf32>
    %51 = arith.addf %50, %49 : vector<256x64xf32>
    %cst_72 = arith.constant 1.000000e+00 : f32
    %52 = vector.broadcast %cst_72 : f32 to vector<256x64xf32>
    %53 = arith.divf %52, %51 : vector<256x64xf32>
    %54 = arith.mulf %46, %53 : vector<256x64xf32>
    %55 = vector.shape_cast %54 : vector<256x64xf32> to vector<16x16x64xf32>
    %c1_73 = arith.constant 1 : index
    %c1_74 = arith.constant 1 : index
    %c0_75 = arith.constant 0 : index
    %56 = vector.load %arg9[%c1_73, %c1_74, %c0_75] : memref<18x18x64xf32, #tpu.memory_space<vmem>>, vector<16x16x64xf32>
    tpu.vector_store %arg9[%c1_73, %c1_74, %c0_75], %55 {strides = array<i32>} : memref<18x18x64xf32, #tpu.memory_space<vmem>>, vector<16x16x64xf32>,
    %c0_76 = arith.constant 0 : index
    %c0_77 = arith.constant 0 : index
    %c0_78 = arith.constant 0 : index
    %57 = vector.load %arg9[%c0_76, %c0_77, %c0_78] : memref<18x18x64xf32, #tpu.memory_space<vmem>>, vector<16x16x64xf32>
    %58 = arith.truncf %57 : vector<16x16x64xf32> to vector<16x16x64xbf16>
    %c0_79 = arith.constant 0 : index
    %c0_80 = arith.constant 0 : index
    %c0_81 = arith.constant 0 : index
    %59 = vector.load %arg10[%c0_79, %c0_80, %c0_81] : memref<16x16x576xbf16, #tpu.memory_space<vmem>>, vector<16x16x64xbf16>
    tpu.vector_store %arg10[%c0_79, %c0_80, %c0_81], %58 {strides = array<i32>} : memref<16x16x576xbf16, #tpu.memory_space<vmem>>, vector<16x16x64xbf16>,
    %c0_82 = arith.constant 0 : index
    %c1_83 = arith.constant 1 : index
    %c0_84 = arith.constant 0 : index
    %60 = vector.load %arg9[%c0_82, %c1_83, %c0_84] : memref<18x18x64xf32, #tpu.memory_space<vmem>>, vector<16x16x64xf32>
    %61 = arith.truncf %60 : vector<16x16x64xf32> to vector<16x16x64xbf16>
    %c0_85 = arith.constant 0 : index
    %c0_86 = arith.constant 0 : index
    %c64_87 = arith.constant 64 : index
    %62 = vector.load %arg10[%c0_85, %c0_86, %c64_87] : memref<16x16x576xbf16, #tpu.memory_space<vmem>>, vector<16x16x64xbf16>
    tpu.vector_store %arg10[%c0_85, %c0_86, %c64_87], %61 {strides = array<i32>} : memref<16x16x576xbf16, #tpu.memory_space<vmem>>, vector<16x16x64xbf16>,
    %c0_88 = arith.constant 0 : index
    %c2_89 = arith.constant 2 : index
    %c0_90 = arith.constant 0 : index
    %63 = vector.load %arg9[%c0_88, %c2_89, %c0_90] : memref<18x18x64xf32, #tpu.memory_space<vmem>>, vector<16x16x64xf32>
    %64 = arith.truncf %63 : vector<16x16x64xf32> to vector<16x16x64xbf16>
    %c0_91 = arith.constant 0 : index
    %c0_92 = arith.constant 0 : index
    %c128_93 = arith.constant 128 : index
    %65 = vector.load %arg10[%c0_91, %c0_92, %c128_93] : memref<16x16x576xbf16, #tpu.memory_space<vmem>>, vector<16x16x64xbf16>
    tpu.vector_store %arg10[%c0_91, %c0_92, %c128_93], %64 {strides = array<i32>} : memref<16x16x576xbf16, #tpu.memory_space<vmem>>, vector<16x16x64xbf16>,
    %c1_94 = arith.constant 1 : index
    %c0_95 = arith.constant 0 : index
    %c0_96 = arith.constant 0 : index
    %66 = vector.load %arg9[%c1_94, %c0_95, %c0_96] : memref<18x18x64xf32, #tpu.memory_space<vmem>>, vector<16x16x64xf32>
    %67 = arith.truncf %66 : vector<16x16x64xf32> to vector<16x16x64xbf16>
    %c0_97 = arith.constant 0 : index
    %c0_98 = arith.constant 0 : index
    %c192_99 = arith.constant 192 : index
    %68 = vector.load %arg10[%c0_97, %c0_98, %c192_99] : memref<16x16x576xbf16, #tpu.memory_space<vmem>>, vector<16x16x64xbf16>
    tpu.vector_store %arg10[%c0_97, %c0_98, %c192_99], %67 {strides = array<i32>} : memref<16x16x576xbf16, #tpu.memory_space<vmem>>, vector<16x16x64xbf16>,
    %c1_100 = arith.constant 1 : index
    %c1_101 = arith.constant 1 : index
    %c0_102 = arith.constant 0 : index
    %69 = vector.load %arg9[%c1_100, %c1_101, %c0_102] : memref<18x18x64xf32, #tpu.memory_space<vmem>>, vector<16x16x64xf32>
    %70 = arith.truncf %69 : vector<16x16x64xf32> to vector<16x16x64xbf16>
    %c0_103 = arith.constant 0 : index
    %c0_104 = arith.constant 0 : index
    %c256_105 = arith.constant 256 : index
    %71 = vector.load %arg10[%c0_103, %c0_104, %c256_105] : memref<16x16x576xbf16, #tpu.memory_space<vmem>>, vector<16x16x64xbf16>
    tpu.vector_store %arg10[%c0_103, %c0_104, %c256_105], %70 {strides = array<i32>} : memref<16x16x576xbf16, #tpu.memory_space<vmem>>, vector<16x16x64xbf16>,
    %c1_106 = arith.constant 1 : index
    %c2_107 = arith.constant 2 : index
    %c0_108 = arith.constant 0 : index
    %72 = vector.load %arg9[%c1_106, %c2_107, %c0_108] : memref<18x18x64xf32, #tpu.memory_space<vmem>>, vector<16x16x64xf32>
    %73 = arith.truncf %72 : vector<16x16x64xf32> to vector<16x16x64xbf16>
    %c0_109 = arith.constant 0 : index
    %c0_110 = arith.constant 0 : index
    %c320_111 = arith.constant 320 : index
    %74 = vector.load %arg10[%c0_109, %c0_110, %c320_111] : memref<16x16x576xbf16, #tpu.memory_space<vmem>>, vector<16x16x64xbf16>
    tpu.vector_store %arg10[%c0_109, %c0_110, %c320_111], %73 {strides = array<i32>} : memref<16x16x576xbf16, #tpu.memory_space<vmem>>, vector<16x16x64xbf16>,
    %c2_112 = arith.constant 2 : index
    %c0_113 = arith.constant 0 : index
    %c0_114 = arith.constant 0 : index
    %75 = vector.load %arg9[%c2_112, %c0_113, %c0_114] : memref<18x18x64xf32, #tpu.memory_space<vmem>>, vector<16x16x64xf32>
    %76 = arith.truncf %75 : vector<16x16x64xf32> to vector<16x16x64xbf16>
    %c0_115 = arith.constant 0 : index
    %c0_116 = arith.constant 0 : index
    %c384_117 = arith.constant 384 : index
    %77 = vector.load %arg10[%c0_115, %c0_116, %c384_117] : memref<16x16x576xbf16, #tpu.memory_space<vmem>>, vector<16x16x64xbf16>
    tpu.vector_store %arg10[%c0_115, %c0_116, %c384_117], %76 {strides = array<i32>} : memref<16x16x576xbf16, #tpu.memory_space<vmem>>, vector<16x16x64xbf16>,
    %c2_118 = arith.constant 2 : index
    %c1_119 = arith.constant 1 : index
    %c0_120 = arith.constant 0 : index
    %78 = vector.load %arg9[%c2_118, %c1_119, %c0_120] : memref<18x18x64xf32, #tpu.memory_space<vmem>>, vector<16x16x64xf32>
    %79 = arith.truncf %78 : vector<16x16x64xf32> to vector<16x16x64xbf16>
    %c0_121 = arith.constant 0 : index
    %c0_122 = arith.constant 0 : index
    %c448_123 = arith.constant 448 : index
    %80 = vector.load %arg10[%c0_121, %c0_122, %c448_123] : memref<16x16x576xbf16, #tpu.memory_space<vmem>>, vector<16x16x64xbf16>
    tpu.vector_store %arg10[%c0_121, %c0_122, %c448_123], %79 {strides = array<i32>} : memref<16x16x576xbf16, #tpu.memory_space<vmem>>, vector<16x16x64xbf16>,
    %c2_124 = arith.constant 2 : index
    %c2_125 = arith.constant 2 : index
    %c0_126 = arith.constant 0 : index
    %81 = vector.load %arg9[%c2_124, %c2_125, %c0_126] : memref<18x18x64xf32, #tpu.memory_space<vmem>>, vector<16x16x64xf32>
    %82 = arith.truncf %81 : vector<16x16x64xf32> to vector<16x16x64xbf16>
    %c0_127 = arith.constant 0 : index
    %c0_128 = arith.constant 0 : index
    %c512_129 = arith.constant 512 : index
    %83 = vector.load %arg10[%c0_127, %c0_128, %c512_129] : memref<16x16x576xbf16, #tpu.memory_space<vmem>>, vector<16x16x64xbf16>
    tpu.vector_store %arg10[%c0_127, %c0_128, %c512_129], %82 {strides = array<i32>} : memref<16x16x576xbf16, #tpu.memory_space<vmem>>, vector<16x16x64xbf16>,
    %c0_130 = arith.constant 0 : index
    %c0_131 = arith.constant 0 : index
    %c0_132 = arith.constant 0 : index
    %84 = vector.load %arg10[%c0_130, %c0_131, %c0_132] : memref<16x16x576xbf16, #tpu.memory_space<vmem>>, vector<16x16x576xbf16>
    %85 = vector.shape_cast %84 : vector<16x16x576xbf16> to vector<256x576xbf16>
    %c1_133 = arith.constant 1 : index
    %c0_134 = arith.constant 0 : index
    %c0_135 = arith.constant 0 : index
    %86 = vector.load %arg2[%c1_133, %c0_134, %c0_135] : memref<3x576x64xbf16, #tpu.memory_space<vmem>>, vector<1x576x64xbf16>
    %87 = vector.shape_cast %86 : vector<1x576x64xbf16> to vector<576x64xbf16>
    %cst_136 = arith.constant dense<0.000000e+00> : vector<256x64xf32>
    %88 = tpu.matmul %85, %87, %cst_136 {dimension_numbers = #tpu.dot_dimension_numbers<[1], [0], [0], [1], [0, 0, 1, 1], [], []>} : vector<256x576xbf16>, vector<576x64xbf16>, vector<256x64xf32> -> vector<256x64xf32>
    %c1_137 = arith.constant 1 : index
    %c0_138 = arith.constant 0 : index
    %c0_139 = arith.constant 0 : index
    %89 = vector.load %arg3[%c1_137, %c0_138, %c0_139] : memref<3x1x64xf32, #tpu.memory_space<vmem>>, vector<1x1x64xf32>
    %90 = vector.shape_cast %89 : vector<1x1x64xf32> to vector<1x64xf32>
    %91 = vector.broadcast %90 : vector<1x64xf32> to vector<256x64xf32>
    %92 = arith.mulf %88, %91 : vector<256x64xf32>
    %c1_140 = arith.constant 1 : index
    %c0_141 = arith.constant 0 : index
    %c0_142 = arith.constant 0 : index
    %93 = vector.load %arg4[%c1_140, %c0_141, %c0_142] : memref<3x1x64xf32, #tpu.memory_space<vmem>>, vector<1x1x64xf32>
    %94 = vector.shape_cast %93 : vector<1x1x64xf32> to vector<1x64xf32>
    %95 = vector.broadcast %94 : vector<1x64xf32> to vector<256x64xf32>
    %96 = arith.addf %92, %95 : vector<256x64xf32>
    %cst_143 = arith.constant 0.000000e+00 : f32
    %97 = vector.broadcast %cst_143 : f32 to vector<256x64xf32>
    %98 = arith.subf %97, %96 : vector<256x64xf32>
    %99 = math.exp %98 : vector<256x64xf32>
    %cst_144 = arith.constant 1.000000e+00 : f32
    %100 = vector.broadcast %cst_144 : f32 to vector<256x64xf32>
    %101 = arith.addf %100, %99 : vector<256x64xf32>
    %cst_145 = arith.constant 1.000000e+00 : f32
    %102 = vector.broadcast %cst_145 : f32 to vector<256x64xf32>
    %103 = arith.divf %102, %101 : vector<256x64xf32>
    %104 = arith.mulf %96, %103 : vector<256x64xf32>
    %105 = vector.shape_cast %104 : vector<256x64xf32> to vector<16x16x64xf32>
    %c1_146 = arith.constant 1 : index
    %c1_147 = arith.constant 1 : index
    %c0_148 = arith.constant 0 : index
    %106 = vector.load %arg8[%c1_146, %c1_147, %c0_148] : memref<18x18x64xf32, #tpu.memory_space<vmem>>, vector<16x16x64xf32>
    tpu.vector_store %arg8[%c1_146, %c1_147, %c0_148], %105 {strides = array<i32>} : memref<18x18x64xf32, #tpu.memory_space<vmem>>, vector<16x16x64xf32>,
    %c0_149 = arith.constant 0 : index
    %c0_150 = arith.constant 0 : index
    %c0_151 = arith.constant 0 : index
    %107 = vector.load %arg8[%c0_149, %c0_150, %c0_151] : memref<18x18x64xf32, #tpu.memory_space<vmem>>, vector<16x16x64xf32>
    %108 = arith.truncf %107 : vector<16x16x64xf32> to vector<16x16x64xbf16>
    %c0_152 = arith.constant 0 : index
    %c0_153 = arith.constant 0 : index
    %c0_154 = arith.constant 0 : index
    %109 = vector.load %arg10[%c0_152, %c0_153, %c0_154] : memref<16x16x576xbf16, #tpu.memory_space<vmem>>, vector<16x16x64xbf16>
    tpu.vector_store %arg10[%c0_152, %c0_153, %c0_154], %108 {strides = array<i32>} : memref<16x16x576xbf16, #tpu.memory_space<vmem>>, vector<16x16x64xbf16>,
    %c0_155 = arith.constant 0 : index
    %c1_156 = arith.constant 1 : index
    %c0_157 = arith.constant 0 : index
    %110 = vector.load %arg8[%c0_155, %c1_156, %c0_157] : memref<18x18x64xf32, #tpu.memory_space<vmem>>, vector<16x16x64xf32>
    %111 = arith.truncf %110 : vector<16x16x64xf32> to vector<16x16x64xbf16>
    %c0_158 = arith.constant 0 : index
    %c0_159 = arith.constant 0 : index
    %c64_160 = arith.constant 64 : index
    %112 = vector.load %arg10[%c0_158, %c0_159, %c64_160] : memref<16x16x576xbf16, #tpu.memory_space<vmem>>, vector<16x16x64xbf16>
    tpu.vector_store %arg10[%c0_158, %c0_159, %c64_160], %111 {strides = array<i32>} : memref<16x16x576xbf16, #tpu.memory_space<vmem>>, vector<16x16x64xbf16>,
    %c0_161 = arith.constant 0 : index
    %c2_162 = arith.constant 2 : index
    %c0_163 = arith.constant 0 : index
    %113 = vector.load %arg8[%c0_161, %c2_162, %c0_163] : memref<18x18x64xf32, #tpu.memory_space<vmem>>, vector<16x16x64xf32>
    %114 = arith.truncf %113 : vector<16x16x64xf32> to vector<16x16x64xbf16>
    %c0_164 = arith.constant 0 : index
    %c0_165 = arith.constant 0 : index
    %c128_166 = arith.constant 128 : index
    %115 = vector.load %arg10[%c0_164, %c0_165, %c128_166] : memref<16x16x576xbf16, #tpu.memory_space<vmem>>, vector<16x16x64xbf16>
    tpu.vector_store %arg10[%c0_164, %c0_165, %c128_166], %114 {strides = array<i32>} : memref<16x16x576xbf16, #tpu.memory_space<vmem>>, vector<16x16x64xbf16>,
    %c1_167 = arith.constant 1 : index
    %c0_168 = arith.constant 0 : index
    %c0_169 = arith.constant 0 : index
    %116 = vector.load %arg8[%c1_167, %c0_168, %c0_169] : memref<18x18x64xf32, #tpu.memory_space<vmem>>, vector<16x16x64xf32>
    %117 = arith.truncf %116 : vector<16x16x64xf32> to vector<16x16x64xbf16>
    %c0_170 = arith.constant 0 : index
    %c0_171 = arith.constant 0 : index
    %c192_172 = arith.constant 192 : index
    %118 = vector.load %arg10[%c0_170, %c0_171, %c192_172] : memref<16x16x576xbf16, #tpu.memory_space<vmem>>, vector<16x16x64xbf16>
    tpu.vector_store %arg10[%c0_170, %c0_171, %c192_172], %117 {strides = array<i32>} : memref<16x16x576xbf16, #tpu.memory_space<vmem>>, vector<16x16x64xbf16>,
    %c1_173 = arith.constant 1 : index
    %c1_174 = arith.constant 1 : index
    %c0_175 = arith.constant 0 : index
    %119 = vector.load %arg8[%c1_173, %c1_174, %c0_175] : memref<18x18x64xf32, #tpu.memory_space<vmem>>, vector<16x16x64xf32>
    %120 = arith.truncf %119 : vector<16x16x64xf32> to vector<16x16x64xbf16>
    %c0_176 = arith.constant 0 : index
    %c0_177 = arith.constant 0 : index
    %c256_178 = arith.constant 256 : index
    %121 = vector.load %arg10[%c0_176, %c0_177, %c256_178] : memref<16x16x576xbf16, #tpu.memory_space<vmem>>, vector<16x16x64xbf16>
    tpu.vector_store %arg10[%c0_176, %c0_177, %c256_178], %120 {strides = array<i32>} : memref<16x16x576xbf16, #tpu.memory_space<vmem>>, vector<16x16x64xbf16>,
    %c1_179 = arith.constant 1 : index
    %c2_180 = arith.constant 2 : index
    %c0_181 = arith.constant 0 : index
    %122 = vector.load %arg8[%c1_179, %c2_180, %c0_181] : memref<18x18x64xf32, #tpu.memory_space<vmem>>, vector<16x16x64xf32>
    %123 = arith.truncf %122 : vector<16x16x64xf32> to vector<16x16x64xbf16>
    %c0_182 = arith.constant 0 : index
    %c0_183 = arith.constant 0 : index
    %c320_184 = arith.constant 320 : index
    %124 = vector.load %arg10[%c0_182, %c0_183, %c320_184] : memref<16x16x576xbf16, #tpu.memory_space<vmem>>, vector<16x16x64xbf16>
    tpu.vector_store %arg10[%c0_182, %c0_183, %c320_184], %123 {strides = array<i32>} : memref<16x16x576xbf16, #tpu.memory_space<vmem>>, vector<16x16x64xbf16>,
    %c2_185 = arith.constant 2 : index
    %c0_186 = arith.constant 0 : index
    %c0_187 = arith.constant 0 : index
    %125 = vector.load %arg8[%c2_185, %c0_186, %c0_187] : memref<18x18x64xf32, #tpu.memory_space<vmem>>, vector<16x16x64xf32>
    %126 = arith.truncf %125 : vector<16x16x64xf32> to vector<16x16x64xbf16>
    %c0_188 = arith.constant 0 : index
    %c0_189 = arith.constant 0 : index
    %c384_190 = arith.constant 384 : index
    %127 = vector.load %arg10[%c0_188, %c0_189, %c384_190] : memref<16x16x576xbf16, #tpu.memory_space<vmem>>, vector<16x16x64xbf16>
    tpu.vector_store %arg10[%c0_188, %c0_189, %c384_190], %126 {strides = array<i32>} : memref<16x16x576xbf16, #tpu.memory_space<vmem>>, vector<16x16x64xbf16>,
    %c2_191 = arith.constant 2 : index
    %c1_192 = arith.constant 1 : index
    %c0_193 = arith.constant 0 : index
    %128 = vector.load %arg8[%c2_191, %c1_192, %c0_193] : memref<18x18x64xf32, #tpu.memory_space<vmem>>, vector<16x16x64xf32>
    %129 = arith.truncf %128 : vector<16x16x64xf32> to vector<16x16x64xbf16>
    %c0_194 = arith.constant 0 : index
    %c0_195 = arith.constant 0 : index
    %c448_196 = arith.constant 448 : index
    %130 = vector.load %arg10[%c0_194, %c0_195, %c448_196] : memref<16x16x576xbf16, #tpu.memory_space<vmem>>, vector<16x16x64xbf16>
    tpu.vector_store %arg10[%c0_194, %c0_195, %c448_196], %129 {strides = array<i32>} : memref<16x16x576xbf16, #tpu.memory_space<vmem>>, vector<16x16x64xbf16>,
    %c2_197 = arith.constant 2 : index
    %c2_198 = arith.constant 2 : index
    %c0_199 = arith.constant 0 : index
    %131 = vector.load %arg8[%c2_197, %c2_198, %c0_199] : memref<18x18x64xf32, #tpu.memory_space<vmem>>, vector<16x16x64xf32>
    %132 = arith.truncf %131 : vector<16x16x64xf32> to vector<16x16x64xbf16>
    %c0_200 = arith.constant 0 : index
    %c0_201 = arith.constant 0 : index
    %c512_202 = arith.constant 512 : index
    %133 = vector.load %arg10[%c0_200, %c0_201, %c512_202] : memref<16x16x576xbf16, #tpu.memory_space<vmem>>, vector<16x16x64xbf16>
    tpu.vector_store %arg10[%c0_200, %c0_201, %c512_202], %132 {strides = array<i32>} : memref<16x16x576xbf16, #tpu.memory_space<vmem>>, vector<16x16x64xbf16>,
    %c0_203 = arith.constant 0 : index
    %c0_204 = arith.constant 0 : index
    %c0_205 = arith.constant 0 : index
    %134 = vector.load %arg10[%c0_203, %c0_204, %c0_205] : memref<16x16x576xbf16, #tpu.memory_space<vmem>>, vector<16x16x576xbf16>
    %135 = vector.shape_cast %134 : vector<16x16x576xbf16> to vector<256x576xbf16>
    %c2_206 = arith.constant 2 : index
    %c0_207 = arith.constant 0 : index
    %c0_208 = arith.constant 0 : index
    %136 = vector.load %arg2[%c2_206, %c0_207, %c0_208] : memref<3x576x64xbf16, #tpu.memory_space<vmem>>, vector<1x576x64xbf16>
    %137 = vector.shape_cast %136 : vector<1x576x64xbf16> to vector<576x64xbf16>
    %cst_209 = arith.constant dense<0.000000e+00> : vector<256x64xf32>
    %138 = tpu.matmul %135, %137, %cst_209 {dimension_numbers = #tpu.dot_dimension_numbers<[1], [0], [0], [1], [0, 0, 1, 1], [], []>} : vector<256x576xbf16>, vector<576x64xbf16>, vector<256x64xf32> -> vector<256x64xf32>
    %c2_210 = arith.constant 2 : index
    %c0_211 = arith.constant 0 : index
    %c0_212 = arith.constant 0 : index
    %139 = vector.load %arg3[%c2_210, %c0_211, %c0_212] : memref<3x1x64xf32, #tpu.memory_space<vmem>>, vector<1x1x64xf32>
    %140 = vector.shape_cast %139 : vector<1x1x64xf32> to vector<1x64xf32>
    %141 = vector.broadcast %140 : vector<1x64xf32> to vector<256x64xf32>
    %142 = arith.mulf %138, %141 : vector<256x64xf32>
    %c2_213 = arith.constant 2 : index
    %c0_214 = arith.constant 0 : index
    %c0_215 = arith.constant 0 : index
    %143 = vector.load %arg4[%c2_213, %c0_214, %c0_215] : memref<3x1x64xf32, #tpu.memory_space<vmem>>, vector<1x1x64xf32>
    %144 = vector.shape_cast %143 : vector<1x1x64xf32> to vector<1x64xf32>
    %145 = vector.broadcast %144 : vector<1x64xf32> to vector<256x64xf32>
    %146 = arith.addf %142, %145 : vector<256x64xf32>
    %cst_216 = arith.constant 0.000000e+00 : f32
    %147 = vector.broadcast %cst_216 : f32 to vector<256x64xf32>
    %148 = arith.subf %147, %146 : vector<256x64xf32>
    %149 = math.exp %148 : vector<256x64xf32>
    %cst_217 = arith.constant 1.000000e+00 : f32
    %150 = vector.broadcast %cst_217 : f32 to vector<256x64xf32>
    %151 = arith.addf %150, %149 : vector<256x64xf32>
    %cst_218 = arith.constant 1.000000e+00 : f32
    %152 = vector.broadcast %cst_218 : f32 to vector<256x64xf32>
    %153 = arith.divf %152, %151 : vector<256x64xf32>
    %154 = arith.mulf %146, %153 : vector<256x64xf32>
    %155 = vector.shape_cast %154 : vector<256x64xf32> to vector<16x16x64xf32>
    %c1_219 = arith.constant 1 : index
    %c1_220 = arith.constant 1 : index
    %c0_221 = arith.constant 0 : index
    %156 = vector.load %arg9[%c1_219, %c1_220, %c0_221] : memref<18x18x64xf32, #tpu.memory_space<vmem>>, vector<16x16x64xf32>
    tpu.vector_store %arg9[%c1_219, %c1_220, %c0_221], %155 {strides = array<i32>} : memref<18x18x64xf32, #tpu.memory_space<vmem>>, vector<16x16x64xf32>,
    %c0_222 = arith.constant 0 : index
    %c0_223 = arith.constant 0 : index
    %c0_224 = arith.constant 0 : index
    %157 = vector.load %arg9[%c0_222, %c0_223, %c0_224] : memref<18x18x64xf32, #tpu.memory_space<vmem>>, vector<16x16x64xf32>
    %158 = arith.truncf %157 : vector<16x16x64xf32> to vector<16x16x64xbf16>
    %c0_225 = arith.constant 0 : index
    %c0_226 = arith.constant 0 : index
    %c0_227 = arith.constant 0 : index
    %159 = vector.load %arg10[%c0_225, %c0_226, %c0_227] : memref<16x16x576xbf16, #tpu.memory_space<vmem>>, vector<16x16x64xbf16>
    tpu.vector_store %arg10[%c0_225, %c0_226, %c0_227], %158 {strides = array<i32>} : memref<16x16x576xbf16, #tpu.memory_space<vmem>>, vector<16x16x64xbf16>,
    %c0_228 = arith.constant 0 : index
    %c1_229 = arith.constant 1 : index
    %c0_230 = arith.constant 0 : index
    %160 = vector.load %arg9[%c0_228, %c1_229, %c0_230] : memref<18x18x64xf32, #tpu.memory_space<vmem>>, vector<16x16x64xf32>
    %161 = arith.truncf %160 : vector<16x16x64xf32> to vector<16x16x64xbf16>
    %c0_231 = arith.constant 0 : index
    %c0_232 = arith.constant 0 : index
    %c64_233 = arith.constant 64 : index
    %162 = vector.load %arg10[%c0_231, %c0_232, %c64_233] : memref<16x16x576xbf16, #tpu.memory_space<vmem>>, vector<16x16x64xbf16>
    tpu.vector_store %arg10[%c0_231, %c0_232, %c64_233], %161 {strides = array<i32>} : memref<16x16x576xbf16, #tpu.memory_space<vmem>>, vector<16x16x64xbf16>,
    %c0_234 = arith.constant 0 : index
    %c2_235 = arith.constant 2 : index
    %c0_236 = arith.constant 0 : index
    %163 = vector.load %arg9[%c0_234, %c2_235, %c0_236] : memref<18x18x64xf32, #tpu.memory_space<vmem>>, vector<16x16x64xf32>
    %164 = arith.truncf %163 : vector<16x16x64xf32> to vector<16x16x64xbf16>
    %c0_237 = arith.constant 0 : index
    %c0_238 = arith.constant 0 : index
    %c128_239 = arith.constant 128 : index
    %165 = vector.load %arg10[%c0_237, %c0_238, %c128_239] : memref<16x16x576xbf16, #tpu.memory_space<vmem>>, vector<16x16x64xbf16>
    tpu.vector_store %arg10[%c0_237, %c0_238, %c128_239], %164 {strides = array<i32>} : memref<16x16x576xbf16, #tpu.memory_space<vmem>>, vector<16x16x64xbf16>,
    %c1_240 = arith.constant 1 : index
    %c0_241 = arith.constant 0 : index
    %c0_242 = arith.constant 0 : index
    %166 = vector.load %arg9[%c1_240, %c0_241, %c0_242] : memref<18x18x64xf32, #tpu.memory_space<vmem>>, vector<16x16x64xf32>
    %167 = arith.truncf %166 : vector<16x16x64xf32> to vector<16x16x64xbf16>
    %c0_243 = arith.constant 0 : index
    %c0_244 = arith.constant 0 : index
    %c192_245 = arith.constant 192 : index
    %168 = vector.load %arg10[%c0_243, %c0_244, %c192_245] : memref<16x16x576xbf16, #tpu.memory_space<vmem>>, vector<16x16x64xbf16>
    tpu.vector_store %arg10[%c0_243, %c0_244, %c192_245], %167 {strides = array<i32>} : memref<16x16x576xbf16, #tpu.memory_space<vmem>>, vector<16x16x64xbf16>,
    %c1_246 = arith.constant 1 : index
    %c1_247 = arith.constant 1 : index
    %c0_248 = arith.constant 0 : index
    %169 = vector.load %arg9[%c1_246, %c1_247, %c0_248] : memref<18x18x64xf32, #tpu.memory_space<vmem>>, vector<16x16x64xf32>
    %170 = arith.truncf %169 : vector<16x16x64xf32> to vector<16x16x64xbf16>
    %c0_249 = arith.constant 0 : index
    %c0_250 = arith.constant 0 : index
    %c256_251 = arith.constant 256 : index
    %171 = vector.load %arg10[%c0_249, %c0_250, %c256_251] : memref<16x16x576xbf16, #tpu.memory_space<vmem>>, vector<16x16x64xbf16>
    tpu.vector_store %arg10[%c0_249, %c0_250, %c256_251], %170 {strides = array<i32>} : memref<16x16x576xbf16, #tpu.memory_space<vmem>>, vector<16x16x64xbf16>,
    %c1_252 = arith.constant 1 : index
    %c2_253 = arith.constant 2 : index
    %c0_254 = arith.constant 0 : index
    %172 = vector.load %arg9[%c1_252, %c2_253, %c0_254] : memref<18x18x64xf32, #tpu.memory_space<vmem>>, vector<16x16x64xf32>
    %173 = arith.truncf %172 : vector<16x16x64xf32> to vector<16x16x64xbf16>
    %c0_255 = arith.constant 0 : index
    %c0_256 = arith.constant 0 : index
    %c320_257 = arith.constant 320 : index
    %174 = vector.load %arg10[%c0_255, %c0_256, %c320_257] : memref<16x16x576xbf16, #tpu.memory_space<vmem>>, vector<16x16x64xbf16>
    tpu.vector_store %arg10[%c0_255, %c0_256, %c320_257], %173 {strides = array<i32>} : memref<16x16x576xbf16, #tpu.memory_space<vmem>>, vector<16x16x64xbf16>,
    %c2_258 = arith.constant 2 : index
    %c0_259 = arith.constant 0 : index
    %c0_260 = arith.constant 0 : index
    %175 = vector.load %arg9[%c2_258, %c0_259, %c0_260] : memref<18x18x64xf32, #tpu.memory_space<vmem>>, vector<16x16x64xf32>
    %176 = arith.truncf %175 : vector<16x16x64xf32> to vector<16x16x64xbf16>
    %c0_261 = arith.constant 0 : index
    %c0_262 = arith.constant 0 : index
    %c384_263 = arith.constant 384 : index
    %177 = vector.load %arg10[%c0_261, %c0_262, %c384_263] : memref<16x16x576xbf16, #tpu.memory_space<vmem>>, vector<16x16x64xbf16>
    tpu.vector_store %arg10[%c0_261, %c0_262, %c384_263], %176 {strides = array<i32>} : memref<16x16x576xbf16, #tpu.memory_space<vmem>>, vector<16x16x64xbf16>,
    %c2_264 = arith.constant 2 : index
    %c1_265 = arith.constant 1 : index
    %c0_266 = arith.constant 0 : index
    %178 = vector.load %arg9[%c2_264, %c1_265, %c0_266] : memref<18x18x64xf32, #tpu.memory_space<vmem>>, vector<16x16x64xf32>
    %179 = arith.truncf %178 : vector<16x16x64xf32> to vector<16x16x64xbf16>
    %c0_267 = arith.constant 0 : index
    %c0_268 = arith.constant 0 : index
    %c448_269 = arith.constant 448 : index
    %180 = vector.load %arg10[%c0_267, %c0_268, %c448_269] : memref<16x16x576xbf16, #tpu.memory_space<vmem>>, vector<16x16x64xbf16>
    tpu.vector_store %arg10[%c0_267, %c0_268, %c448_269], %179 {strides = array<i32>} : memref<16x16x576xbf16, #tpu.memory_space<vmem>>, vector<16x16x64xbf16>,
    %c2_270 = arith.constant 2 : index
    %c2_271 = arith.constant 2 : index
    %c0_272 = arith.constant 0 : index
    %181 = vector.load %arg9[%c2_270, %c2_271, %c0_272] : memref<18x18x64xf32, #tpu.memory_space<vmem>>, vector<16x16x64xf32>
    %182 = arith.truncf %181 : vector<16x16x64xf32> to vector<16x16x64xbf16>
    %c0_273 = arith.constant 0 : index
    %c0_274 = arith.constant 0 : index
    %c512_275 = arith.constant 512 : index
    %183 = vector.load %arg10[%c0_273, %c0_274, %c512_275] : memref<16x16x576xbf16, #tpu.memory_space<vmem>>, vector<16x16x64xbf16>
    tpu.vector_store %arg10[%c0_273, %c0_274, %c512_275], %182 {strides = array<i32>} : memref<16x16x576xbf16, #tpu.memory_space<vmem>>, vector<16x16x64xbf16>,
    %c0_276 = arith.constant 0 : index
    %c0_277 = arith.constant 0 : index
    %c0_278 = arith.constant 0 : index
    %184 = vector.load %arg10[%c0_276, %c0_277, %c0_278] : memref<16x16x576xbf16, #tpu.memory_space<vmem>>, vector<16x16x576xbf16>
    %185 = vector.shape_cast %184 : vector<16x16x576xbf16> to vector<256x576xbf16>
    %c0_279 = arith.constant 0 : index
    %c0_280 = arith.constant 0 : index
    %186 = vector.load %arg5[%c0_279, %c0_280] : memref<576x128xbf16, #tpu.memory_space<vmem>>, vector<576x128xbf16>
    %cst_281 = arith.constant dense<0.000000e+00> : vector<256x128xf32>
    %187 = tpu.matmul %185, %186, %cst_281 {dimension_numbers = #tpu.dot_dimension_numbers<[1], [0], [0], [1], [0, 0, 1, 1], [], []>} : vector<256x576xbf16>, vector<576x128xbf16>, vector<256x128xf32> -> vector<256x128xf32>
    %c0_282 = arith.constant 0 : index
    %c0_283 = arith.constant 0 : index
    %188 = vector.load %arg6[%c0_282, %c0_283] : memref<1x128xf32, #tpu.memory_space<vmem>>, vector<1x128xf32>
    %189 = vector.broadcast %188 : vector<1x128xf32> to vector<256x128xf32>
    %190 = arith.addf %187, %189 : vector<256x128xf32>
    %cst_284 = arith.constant 0.000000e+00 : f32
    %191 = vector.broadcast %cst_284 : f32 to vector<256x128xf32>
    %192 = arith.subf %191, %190 : vector<256x128xf32>
    %193 = math.exp %192 : vector<256x128xf32>
    %cst_285 = arith.constant 1.000000e+00 : f32
    %194 = vector.broadcast %cst_285 : f32 to vector<256x128xf32>
    %195 = arith.addf %194, %193 : vector<256x128xf32>
    %cst_286 = arith.constant 1.000000e+00 : f32
    %196 = vector.broadcast %cst_286 : f32 to vector<256x128xf32>
    %197 = arith.divf %196, %195 : vector<256x128xf32>
    %198 = vector.shape_cast %197 : vector<256x128xf32> to vector<16x16x128xf32>
    %c0_287 = arith.constant 0 : index
    %c0_288 = arith.constant 0 : index
    %c0_289 = arith.constant 0 : index
    %c0_290 = arith.constant 0 : index
    %199 = vector.load %arg7[%c0_287, %c0_288, %c0_289, %c0_290] : memref<1x16x16x128xf32, #tpu.memory_space<vmem>>, vector<1x16x16x128xf32>
    %200 = vector.shape_cast %199 : vector<1x16x16x128xf32> to vector<16x16x128xf32>
    %201 = vector.shape_cast %198 : vector<16x16x128xf32> to vector<1x16x16x128xf32>
    tpu.vector_store %arg7[%c0_287, %c0_288, %c0_289, %c0_290], %201 {strides = array<i32>} : memref<1x16x16x128xf32, #tpu.memory_space<vmem>>, vector<1x16x16x128xf32>,
    return
  }
  func.func @transform_0(%arg0: i32) -> (i32, i32, i32, i32) {
    %c0_i32 = arith.constant 0 : i32
    %c0_i32_0 = arith.constant 0 : i32
    %c0_i32_1 = arith.constant 0 : i32
    %c0_i32_2 = arith.constant 0 : i32
    return %arg0, %c0_i32, %c0_i32_0, %c0_i32_1 : i32, i32, i32, i32
  }
  func.func @transform_1(%arg0: i32) -> (i32, i32, i32) {
    %c0_i32 = arith.constant 0 : i32
    %c0_i32_0 = arith.constant 0 : i32
    %c0_i32_1 = arith.constant 0 : i32
    %c0_i32_2 = arith.constant 0 : i32
    return %c0_i32, %c0_i32_0, %c0_i32_1 : i32, i32, i32
  }
  func.func @transform_2(%arg0: i32) -> (i32, i32, i32) {
    %c0_i32 = arith.constant 0 : i32
    %c0_i32_0 = arith.constant 0 : i32
    %c0_i32_1 = arith.constant 0 : i32
    %c0_i32_2 = arith.constant 0 : i32
    return %c0_i32, %c0_i32_0, %c0_i32_1 : i32, i32, i32
  }
  func.func @transform_3(%arg0: i32) -> (i32, i32, i32) {
    %c0_i32 = arith.constant 0 : i32
    %c0_i32_0 = arith.constant 0 : i32
    %c0_i32_1 = arith.constant 0 : i32
    %c0_i32_2 = arith.constant 0 : i32
    return %c0_i32, %c0_i32_0, %c0_i32_1 : i32, i32, i32
  }
  func.func @transform_4(%arg0: i32) -> (i32, i32) {
    %c0_i32 = arith.constant 0 : i32
    %c0_i32_0 = arith.constant 0 : i32
    %c0_i32_1 = arith.constant 0 : i32
    return %c0_i32, %c0_i32_0 : i32, i32
  }
  func.func @transform_5(%arg0: i32) -> (i32, i32) {
    %c0_i32 = arith.constant 0 : i32
    %c0_i32_0 = arith.constant 0 : i32
    %c0_i32_1 = arith.constant 0 : i32
    return %c0_i32, %c0_i32_0 : i32, i32
  }
  func.func @transform_6(%arg0: i32) -> (i32, i32, i32, i32) {
    %c0_i32 = arith.constant 0 : i32
    %c0_i32_0 = arith.constant 0 : i32
    %c0_i32_1 = arith.constant 0 : i32
    %c0_i32_2 = arith.constant 0 : i32
    return %arg0, %c0_i32, %c0_i32_0, %c0_i32_1 : i32, i32, i32, i32
  }
}

</mosaic_0001>

<bundles_post_ra>
// kernel: tpu_custom_call.1
= control target key start
LH: loop header
LB: loop body
LE: loop exit
PB: predicated region body
PF: predicated region fallthrough
CT: control target
= control target key end

     0   :  { %11 = vsyncpa [#allocation6], 0  ;;  %s15401_s0 = inlined_call_operand.vmem [shape: f32[2,16,16,64], index: 0, kind: input, shape index: {}]   ;;  %s15402_s1 = inlined_call_operand.vmem [shape: bf16[3,576,64], index: 1, kind: input, shape index: {}]   ;;  %s15403_s2 = inlined_call_operand.vmem [shape: f32[3,1,64], index: 2, kind: input, shape index: {}]   ;;  %s15404_s3 = inlined_call_operand.vmem [shape: f32[3,1,64], index: 3, kind: input, shape index: {}]   ;;  %s15405_s4 = inlined_call_operand.vmem [shape: bf16[576,128], index: 4, kind: input, shape index: {}]   ;;  %s15406_s5 = inlined_call_operand.vmem [shape: f32[1,128], index: 5, kind: input, shape index: {}]   ;;  %s15407_s6 = inlined_call_operand.hbm [shape: f32[2,16,16,128], index: 6, kind: output, shape index: {}]  }
   0x1   :  { %13 = vsyncpa [#allocation6 + $0x1], 0  ;;  %s10988_s21 = smov 0   ;;  %s10990_s22 = smov 0  }
   0x2   :  { %s10992_s23 = smov 0   ;;  %s10994_s24 = smov 0  }
   0x3 LB: > { %s11009_s25 = sadd.s32 4294967295, %s10946_s24   ;;  %s8669_s26 = sadd.s32 4294967294, %s10946_s24   ;;  %s10946_s24 = sphi %s10994_s24, %s15434_s24   ;;  %s10942_s23 = sphi %s10992_s23, %s15433_s23   ;;  %s10938_s22 = sphi %s10990_s22, %s15432_s22   ;;  %s10934_s21 = sphi %s10988_s21, %s15431_s21  }
   0x4   : > { %s11013_s27 = sadd.s32 1, %s10946_s24   ;;  %s157_s28 = sadd.s32 1, %s10942_s23 }
   0x5   : > { %s154_s29 = ssub.s32 %s10946_s24, %s11013_s27  ;;  %p167_p0 = scmp.ne.s32.totalorder %s10942_s23, %s10938_s22 }
   0x6   : > { %p155_p1 = scmp.eq.s32.totalorder %s154_s29, 0  ;;  %p168_p2 = scmp.eq.s32.totalorder %s11009_s25, 1 }
   0x7   : > { %p173_p3 = scmp.ne.s32.totalorder %s10938_s22, %s10934_s21  ;;  %p174_p4 = scmp.eq.s32.totalorder %s8669_s26, 1 }
   0x8   : > { %s11024_s30 = scalar_select %p155_p1, %s10942_s23, %s157_s28  }
   0x9   : > { %p11026_p5 = por %p168_p2, %p167_p0  ;;  %p11030_p6 = por %p174_p4, %p173_p3 }
   0xa   : > { %p8672_p7 = scmp.ge.s32.totalorder %s10946_s24, 1  ;;  %p215_p8 = scmp.lt.s32.totalorder %s10946_s24, 3 }
   0xc   : > { %p216_p9 = pnand %p8672_p7, %p215_p8 }
   0xe   : > { %219 = sbr.rel (%p216_p9) target bundleno = 2272 (0x8e0), region = 44 }
  0x15   : > { %p245_p10 = scmp.lt.s32.totalorder %s11009_s25, 1  ;;  %vm251_vm0 = vcmask 523264   ;;  %vm254_vm1 = vcmask 517120   ;;  %v11040_v0 = vld [vmem:[%s15402_s1 + $0x40] sm:$0xff]   ;;  %v10948_v1 = vmov 0.0   ;;  %v10227_v3 = vld [vmem:[%s15402_s1 + $0x48] sm:$0xff]  }
  0x16   : > { %256 = vst.msk [vmem:[#allocation2 + $0x18] sm:$0xff] %vm251_vm0, %v10948_v1  ;;  %257 = vst.msk [vmem:[#allocation2 + $0x20] sm:$0xff] %vm251_vm0, %v10948_v1  ;;  %9046 = vmatprep.subr.bf16.mxu0 %v11040_v0  ;;  %v10226_v2 = vld [vmem:[%s15402_s1] sm:$0xff]   ;;  %v10228_v4 = vld [vmem:[%s15402_s1 + $0x8] sm:$0xff]   ;;  %s10949_s9 = smov 64   ;;  %vm602_vm2 = vcmask 1048064  }
  0x17   : > { %258 = vst.msk [vmem:[#allocation2 + $0x28] sm:$0x3] %vm254_vm1, %v10948_v1  ;;  %255 = vst.msk [vmem:[#allocation2 + $0x10] sm:$0x3] %vm254_vm1, %v10948_v1  ;;  %s246_s11 = scalar_select %p245_p10, %s11009_s25, 1  ;;  %9047 = vmatpush3.bf16.msra.mxu0 %v10226_v2  ;;  %v10229_v5 = vld [vmem:[%s15402_s1 + $0x50] sm:$0xff]  }
  0x18   : > { %252 = vst.msk [vmem:[#allocation2] sm:$0xff] %vm251_vm0, %v10948_v1  ;;  %253 = vst.msk [vmem:[#allocation2 + $0x8] sm:$0xff] %vm251_vm0, %v10948_v1  ;;  %9048 = vmatprep.subr.bf16.mxu0 %v10227_v3  ;;  %s242_s13 = sand.u32 1, %s10938_s22   ;;  %s10950_s28 = smov [#allocation5]  }
  0x19   : > { %259 = vst.msk [vmem:[#allocation2 + $0x30] sm:$0xff] %vm251_vm0, %v10948_v1  ;;  %260 = vst.msk [vmem:[#allocation2 + $0x38] sm:$0xff] %vm251_vm0, %v10948_v1  ;;  %s9044_s16 = sshll.u32 %s246_s11, 8  ;;  %s15286_s14 = sshll.u32 %s242_s13, 8 }
  0x1a   : > { %261 = vst.msk [vmem:[#allocation2 + $0x40] sm:$0x3] %vm254_vm1, %v10948_v1  ;;  %264 = vst.msk [vmem:[#allocation2 + $0x58] sm:$0x3] %vm254_vm1, %v10948_v1  ;;  %s11274_s26 = scalar_lea.vmem %s15401_s0, %s9044_s16  ;;  %s15295_s15 = scalar_lea.vmem [#allocation5], %s15286_s14 }
  0x1b   : > { %262 = vst.msk [vmem:[#allocation2 + $0x48] sm:$0xff] %vm251_vm0, %v10948_v1  ;;  %263 = vst.msk [vmem:[#allocation2 + $0x50] sm:$0xff] %vm251_vm0, %v10948_v1  ;;  %v361_v6 = vld [vmem:[%s11274_s26] sm:$0xff]  ;;  %v362_v7 = vld [vmem:[%s11274_s26 + $0x8] sm:$0xff]  ;;  %9049 = vmatpush3.bf16.msra.mxu0 %v10228_v4  ;;  %s9045_s16 = sshll.u32 %s11009_s25, 12  ;;  %s8607_s17 = sshll.u32 %s15295_s15, 4  ;;  %s15353_s17 = int_to_ptr.vmem [resolvable:$true] %s8607_s17 }
  0x1c   : > { %265 = vst.msk [vmem:[#allocation2 + $0x60] sm:$0xff] %vm251_vm0, %v10948_v1  ;;  %266 = vst.msk [vmem:[#allocation2 + $0x68] sm:$0xff] %vm251_vm0, %v10948_v1  ;;  %v363_v8 = vld [vmem:[%s11274_s26 + $0x10] sm:$0xff]  ;;  %v364_v9 = vld [vmem:[%s11274_s26 + $0x18] sm:$0xff]  ;;  %9050 = vmatprep.subr.bf16.mxu0 %v10229_v5  ;;  %s15351_s20 = scalar_lea.hbm %s15407_s6, %s9045_s16  ;;  %s15360_s25 = scalar_lea.sflag [#allocation6], %s242_s13 }
  0x1d   : > { %267 = vst.msk [vmem:[#allocation2 + $0x70] sm:$0x3] %vm254_vm1, %v10948_v1  ;;  %270 = vst.msk [vmem:[#allocation2 + $0x88] sm:$0x3] %vm254_vm1, %v10948_v1  ;;  %v365_v10 = vld [vmem:[%s11274_s26 + $0x20] sm:$0xff]  ;;  %v366_v11 = vld [vmem:[%s11274_s26 + $0x28] sm:$0xff] }
  0x1e   : > { %268 = vst.msk [vmem:[#allocation2 + $0x78] sm:$0xff] %vm251_vm0, %v10948_v1  ;;  %269 = vst.msk [vmem:[#allocation2 + $0x80] sm:$0xff] %vm251_vm0, %v10948_v1  ;;  %v367_v12 = vld [vmem:[%s11274_s26 + $0x30] sm:$0xff]  ;;  %v368_v13 = vld [vmem:[%s11274_s26 + $0x38] sm:$0xff]  ;;  %s10888_s29 = sshll.u32 %s10950_s28, 4  ;;  %s10889_s29 = int_to_ptr.vmem [resolvable:$false] %s10888_s29 }
  0x1f   : > { %271 = vst.msk [vmem:[#allocation2 + $0x90] sm:$0xff] %vm251_vm0, %v10948_v1  ;;  %272 = vst.msk [vmem:[#allocation2 + $0x98] sm:$0xff] %vm251_vm0, %v10948_v1  ;;  %v369_v14 = vld [vmem:[%s11274_s26 + $0x40] sm:$0xff]  ;;  %v370_v15 = vld [vmem:[%s11274_s26 + $0x48] sm:$0xff]  ;;  %s10890_s10 = scalar_lea.vmem %s10889_s29, 8192  ;;  %p10891_p0 = scmp.lt.s32.totalorder %s15353_s17, %s10889_s29 }
  0x20   : > { %273 = vst.msk [vmem:[#allocation2 + $0xa0] sm:$0x3] %vm254_vm1, %v10948_v1  ;;  %276 = vst.msk [vmem:[#allocation2 + $0xb8] sm:$0x3] %vm254_vm1, %v10948_v1  ;;  %v371_v16 = vld [vmem:[%s11274_s26 + $0x50] sm:$0xff]  ;;  %v372_v17 = vld [vmem:[%s11274_s26 + $0x58] sm:$0xff] }
  0x21   : > { %274 = vst.msk [vmem:[#allocation2 + $0xa8] sm:$0xff] %vm251_vm0, %v10948_v1  ;;  %275 = vst.msk [vmem:[#allocation2 + $0xb0] sm:$0xff] %vm251_vm0, %v10948_v1  ;;  %v373_v18 = vld [vmem:[%s11274_s26 + $0x60] sm:$0xff]  ;;  %v374_v19 = vld [vmem:[%s11274_s26 + $0x68] sm:$0xff] }
  0x22   : > { %277 = vst.msk [vmem:[#allocation2 + $0xc0] sm:$0xff] %vm251_vm0, %v10948_v1  ;;  %278 = vst.msk [vmem:[#allocation2 + $0xc8] sm:$0xff] %vm251_vm0, %v10948_v1  ;;  %v375_v20 = vld [vmem:[%s11274_s26 + $0x70] sm:$0xff]  ;;  %v376_v21 = vld [vmem:[%s11274_s26 + $0x78] sm:$0xff] }
  0x23   : > { %279 = vst.msk [vmem:[#allocation2 + $0xd0] sm:$0x3] %vm254_vm1, %v10948_v1  ;;  %282 = vst.msk [vmem:[#allocation2 + $0xe8] sm:$0x3] %vm254_vm1, %v10948_v1  ;;  %v490_v22 = vld [vmem:[#allocation2 + $0x1] sm:$0xff]  ;;  %v491_v23 = vld [vmem:[#allocation2 + $0x9] sm:$0xff] }
  0x24   : > { %280 = vst.msk [vmem:[#allocation2 + $0xd8] sm:$0xff] %vm251_vm0, %v10948_v1  ;;  %281 = vst.msk [vmem:[#allocation2 + $0xe0] sm:$0xff] %vm251_vm0, %v10948_v1  ;;  %v377_v24 = vld [vmem:[%s11274_s26 + $0x80] sm:$0xff]  ;;  %v378_v25 = vld [vmem:[%s11274_s26 + $0x88] sm:$0xff]  ;;  %v522_v40 = vpack.c.bf16 %v491_v23, %v490_v22 }
  0x25   : > { %283 = vst.msk [vmem:[#allocation2 + $0xf0] sm:$0xff] %vm251_vm0, %v10948_v1  ;;  %284 = vst.msk [vmem:[#allocation2 + $0xf8] sm:$0xff] %vm251_vm0, %v10948_v1  ;;  %v379_v26 = vld [vmem:[%s11274_s26 + $0x90] sm:$0xff]  ;;  %v380_v27 = vld [vmem:[%s11274_s26 + $0x98] sm:$0xff] }
  0x26   : > { %285 = vst.msk [vmem:[#allocation2 + $0x100] sm:$0x3] %vm254_vm1, %v10948_v1  ;;  %288 = vst.msk [vmem:[#allocation2 + $0x118] sm:$0x3] %vm254_vm1, %v10948_v1  ;;  %v381_v28 = vld [vmem:[%s11274_s26 + $0xa0] sm:$0xff]  ;;  %v382_v29 = vld [vmem:[%s11274_s26 + $0xa8] sm:$0xff] }
  0x27   : > { %286 = vst.msk [vmem:[#allocation2 + $0x108] sm:$0xff] %vm251_vm0, %v10948_v1  ;;  %287 = vst.msk [vmem:[#allocation2 + $0x110] sm:$0xff] %vm251_vm0, %v10948_v1  ;;  %v391_v22 = vld [vmem:[%s11274_s26 + $0xf0] sm:$0xff]  ;;  %v392_v23 = vld [vmem:[%s11274_s26 + $0xf8] sm:$0xff] }
  0x28   : > { %289 = vst.msk [vmem:[#allocation2 + $0x120] sm:$0xff] %vm251_vm0, %v10948_v1  ;;  %290 = vst.msk [vmem:[#allocation2 + $0x128] sm:$0xff] %vm251_vm0, %v10948_v1 }
  0x29   : > { %291 = vst.msk [vmem:[#allocation2 + $0x130] sm:$0x3] %vm254_vm1, %v10948_v1  ;;  %294 = vst.msk [vmem:[#allocation2 + $0x148] sm:$0x3] %vm254_vm1, %v10948_v1 }
  0x2a   : > { %292 = vst.msk [vmem:[#allocation2 + $0x138] sm:$0xff] %vm251_vm0, %v10948_v1  ;;  %293 = vst.msk [vmem:[#allocation2 + $0x140] sm:$0xff] %vm251_vm0, %v10948_v1 }
  0x2b   : > { %295 = vst.msk [vmem:[#allocation2 + $0x150] sm:$0xff] %vm251_vm0, %v10948_v1  ;;  %296 = vst.msk [vmem:[#allocation2 + $0x158] sm:$0xff] %vm251_vm0, %v10948_v1 }
  0x2c   : > { %297 = vst.msk [vmem:[#allocation2 + $0x160] sm:$0x3] %vm254_vm1, %v10948_v1  ;;  %300 = vst.msk [vmem:[#allocation2 + $0x178] sm:$0x3] %vm254_vm1, %v10948_v1 }
  0x2d   : > { %298 = vst.msk [vmem:[#allocation2 + $0x168] sm:$0xff] %vm251_vm0, %v10948_v1  ;;  %299 = vst.msk [vmem:[#allocation2 + $0x170] sm:$0xff] %vm251_vm0, %v10948_v1 }
  0x2e   : > { %301 = vst.msk [vmem:[#allocation2 + $0x180] sm:$0xff] %vm251_vm0, %v10948_v1  ;;  %302 = vst.msk [vmem:[#allocation2 + $0x188] sm:$0xff] %vm251_vm0, %v10948_v1 }
  0x2f   : > { %303 = vst.msk [vmem:[#allocation2 + $0x190] sm:$0x3] %vm254_vm1, %v10948_v1  ;;  %306 = vst.msk [vmem:[#allocation2 + $0x1a8] sm:$0x3] %vm254_vm1, %v10948_v1 }
  0x30   : > { %304 = vst.msk [vmem:[#allocation2 + $0x198] sm:$0xff] %vm251_vm0, %v10948_v1  ;;  %305 = vst.msk [vmem:[#allocation2 + $0x1a0] sm:$0xff] %vm251_vm0, %v10948_v1 }
  0x31   : > { %307 = vst.msk [vmem:[#allocation3] sm:$0xff] %vm251_vm0, %v10948_v1  ;;  %308 = vst.msk [vmem:[#allocation3 + $0x8] sm:$0xff] %vm251_vm0, %v10948_v1 }
  0x32   : > { %309 = vst.msk [vmem:[#allocation3 + $0x10] sm:$0x3] %vm254_vm1, %v10948_v1  ;;  %312 = vst.msk [vmem:[#allocation3 + $0x28] sm:$0x3] %vm254_vm1, %v10948_v1 }
  0x33   : > { %310 = vst.msk [vmem:[#allocation3 + $0x18] sm:$0xff] %vm251_vm0, %v10948_v1  ;;  %311 = vst.msk [vmem:[#allocation3 + $0x20] sm:$0xff] %vm251_vm0, %v10948_v1 }
  0x34   : > { %313 = vst.msk [vmem:[#allocation3 + $0x30] sm:$0xff] %vm251_vm0, %v10948_v1  ;;  %314 = vst.msk [vmem:[#allocation3 + $0x38] sm:$0xff] %vm251_vm0, %v10948_v1 }
  0x35   : > { %315 = vst.msk [vmem:[#allocation3 + $0x40] sm:$0x3] %vm254_vm1, %v10948_v1  ;;  %318 = vst.msk [vmem:[#allocation3 + $0x58] sm:$0x3] %vm254_vm1, %v10948_v1 }
  0x36   : > { %316 = vst.msk [vmem:[#allocation3 + $0x48] sm:$0xff] %vm251_vm0, %v10948_v1  ;;  %317 = vst.msk [vmem:[#allocation3 + $0x50] sm:$0xff] %vm251_vm0, %v10948_v1 }
  0x37   : > { %319 = vst.msk [vmem:[#allocation3 + $0x60] sm:$0xff] %vm251_vm0, %v10948_v1  ;;  %320 = vst.msk [vmem:[#allocation3 + $0x68] sm:$0xff] %vm251_vm0, %v10948_v1 }
  0x38   : > { %321 = vst.msk [vmem:[#allocation3 + $0x70] sm:$0x3] %vm254_vm1, %v10948_v1  ;;  %324 = vst.msk [vmem:[#allocation3 + $0x88] sm:$0x3] %vm254_vm1, %v10948_v1 }
  0x39   : > { %322 = vst.msk [vmem:[#allocation3 + $0x78] sm:$0xff] %vm251_vm0, %v10948_v1  ;;  %323 = vst.msk [vmem:[#allocation3 + $0x80] sm:$0xff] %vm251_vm0, %v10948_v1 }
  0x3a   : > { %325 = vst.msk [vmem:[#allocation3 + $0x90] sm:$0xff] %vm251_vm0, %v10948_v1  ;;  %326 = vst.msk [vmem:[#allocation3 + $0x98] sm:$0xff] %vm251_vm0, %v10948_v1 }
  0x3b   : > { %327 = vst.msk [vmem:[#allocation3 + $0xa0] sm:$0x3] %vm254_vm1, %v10948_v1  ;;  %330 = vst.msk [vmem:[#allocation3 + $0xb8] sm:$0x3] %vm254_vm1, %v10948_v1 }
  0x3c   : > { %328 = vst.msk [vmem:[#allocation3 + $0xa8] sm:$0xff] %vm251_vm0, %v10948_v1  ;;  %329 = vst.msk [vmem:[#allocation3 + $0xb0] sm:$0xff] %vm251_vm0, %v10948_v1 }
  0x3d   : > { %331 = vst.msk [vmem:[#allocation3 + $0xc0] sm:$0xff] %vm251_vm0, %v10948_v1  ;;  %332 = vst.msk [vmem:[#allocation3 + $0xc8] sm:$0xff] %vm251_vm0, %v10948_v1 }
  0x3e   : > { %333 = vst.msk [vmem:[#allocation3 + $0xd0] sm:$0x3] %vm254_vm1, %v10948_v1  ;;  %336 = vst.msk [vmem:[#allocation3 + $0xe8] sm:$0x3] %vm254_vm1, %v10948_v1 }
  0x3f   : > { %334 = vst.msk [vmem:[#allocation3 + $0xd8] sm:$0xff] %vm251_vm0, %v10948_v1  ;;  %335 = vst.msk [vmem:[#allocation3 + $0xe0] sm:$0xff] %vm251_vm0, %v10948_v1 }
  0x40   : > { %337 = vst.msk [vmem:[#allocation3 + $0xf0] sm:$0xff] %vm251_vm0, %v10948_v1  ;;  %338 = vst.msk [vmem:[#allocation3 + $0xf8] sm:$0xff] %vm251_vm0, %v10948_v1 }
  0x41   : > { %339 = vst.msk [vmem:[#allocation3 + $0x100] sm:$0x3] %vm254_vm1, %v10948_v1  ;;  %342 = vst.msk [vmem:[#allocation3 + $0x118] sm:$0x3] %vm254_vm1, %v10948_v1 }
  0x42   : > { %340 = vst.msk [vmem:[#allocation3 + $0x108] sm:$0xff] %vm251_vm0, %v10948_v1  ;;  %341 = vst.msk [vmem:[#allocation3 + $0x110] sm:$0xff] %vm251_vm0, %v10948_v1 }
  0x43   : > { %343 = vst.msk [vmem:[#allocation3 + $0x120] sm:$0xff] %vm251_vm0, %v10948_v1  ;;  %344 = vst.msk [vmem:[#allocation3 + $0x128] sm:$0xff] %vm251_vm0, %v10948_v1 }
  0x44   : > { %345 = vst.msk [vmem:[#allocation3 + $0x130] sm:$0x3] %vm254_vm1, %v10948_v1  ;;  %348 = vst.msk [vmem:[#allocation3 + $0x148] sm:$0x3] %vm254_vm1, %v10948_v1 }
  0x45   : > { %346 = vst.msk [vmem:[#allocation3 + $0x138] sm:$0xff] %vm251_vm0, %v10948_v1  ;;  %347 = vst.msk [vmem:[#allocation3 + $0x140] sm:$0xff] %vm251_vm0, %v10948_v1 }
  0x46   : > { %349 = vst.msk [vmem:[#allocation3 + $0x150] sm:$0xff] %vm251_vm0, %v10948_v1  ;;  %350 = vst.msk [vmem:[#allocation3 + $0x158] sm:$0xff] %vm251_vm0, %v10948_v1 }
  0x47   : > { %351 = vst.msk [vmem:[#allocation3 + $0x160] sm:$0x3] %vm254_vm1, %v10948_v1  ;;  %354 = vst.msk [vmem:[#allocation3 + $0x178] sm:$0x3] %vm254_vm1, %v10948_v1 }
  0x48   : > { %352 = vst.msk [vmem:[#allocation3 + $0x168] sm:$0xff] %vm251_vm0, %v10948_v1  ;;  %353 = vst.msk [vmem:[#allocation3 + $0x170] sm:$0xff] %vm251_vm0, %v10948_v1 }
  0x49   : > { %355 = vst.msk [vmem:[#allocation3 + $0x180] sm:$0xff] %vm251_vm0, %v10948_v1  ;;  %356 = vst.msk [vmem:[#allocation3 + $0x188] sm:$0xff] %vm251_vm0, %v10948_v1 }
  0x4a   : > { %357 = vst.msk [vmem:[#allocation3 + $0x190] sm:$0x3] %vm254_vm1, %v10948_v1  ;;  %360 = vst.msk [vmem:[#allocation3 + $0x1a8] sm:$0x3] %vm254_vm1, %v10948_v1 }
  0x4b   : > { %358 = vst.msk [vmem:[#allocation3 + $0x198] sm:$0xff] %vm251_vm0, %v10948_v1  ;;  %359 = vst.msk [vmem:[#allocation3 + $0x1a0] sm:$0xff] %vm251_vm0, %v10948_v1 }
  0x4c   : > { %394 = vst.msk [vmem:[#allocation2 + $0x19] sm:$0xff] %vm251_vm0, %v361_v6  ;;  %395 = vst.msk [vmem:[#allocation2 + $0x21] sm:$0xff] %vm251_vm0, %v362_v7 }
  0x4d   : > { %396 = vst.msk [vmem:[#allocation2 + $0x31] sm:$0xff] %vm251_vm0, %v363_v8  ;;  %397 = vst.msk [vmem:[#allocation2 + $0x39] sm:$0xff] %vm251_vm0, %v364_v9 }
  0x4e   : > { %398 = vst.msk [vmem:[#allocation2 + $0x49] sm:$0xff] %vm251_vm0, %v365_v10  ;;  %399 = vst.msk [vmem:[#allocation2 + $0x51] sm:$0xff] %vm251_vm0, %v366_v11  ;;  %v383_v11 = vld [vmem:[%s11274_s26 + $0xb0] sm:$0xff] }
  0x4f   : > { %400 = vst.msk [vmem:[#allocation2 + $0x61] sm:$0xff] %vm251_vm0, %v367_v12  ;;  %401 = vst.msk [vmem:[#allocation2 + $0x69] sm:$0xff] %vm251_vm0, %v368_v13  ;;  %v384_v12 = vld [vmem:[%s11274_s26 + $0xb8] sm:$0xff] }
  0x50   : > { %402 = vst.msk [vmem:[#allocation2 + $0x79] sm:$0xff] %vm251_vm0, %v369_v14  ;;  %403 = vst.msk [vmem:[#allocation2 + $0x81] sm:$0xff] %vm251_vm0, %v370_v15  ;;  %v385_v15 = vld [vmem:[%s11274_s26 + $0xc0] sm:$0xff] }
  0x51   : > { %404 = vst.msk [vmem:[#allocation2 + $0x91] sm:$0xff] %vm251_vm0, %v371_v16  ;;  %405 = vst.msk [vmem:[#allocation2 + $0x99] sm:$0xff] %vm251_vm0, %v372_v17  ;;  %v386_v16 = vld [vmem:[%s11274_s26 + $0xc8] sm:$0xff] }
  0x52   : > { %406 = vst.msk [vmem:[#allocation2 + $0xa9] sm:$0xff] %vm251_vm0, %v373_v18  ;;  %407 = vst.msk [vmem:[#allocation2 + $0xb1] sm:$0xff] %vm251_vm0, %v374_v19  ;;  %v387_v18 = vld [vmem:[%s11274_s26 + $0xd0] sm:$0xff]  ;;  %v388_v19 = vld [vmem:[%s11274_s26 + $0xd8] sm:$0xff] }
  0x53   : > { %408 = vst.msk [vmem:[#allocation2 + $0xc1] sm:$0xff] %vm251_vm0, %v375_v20  ;;  %409 = vst.msk [vmem:[#allocation2 + $0xc9] sm:$0xff] %vm251_vm0, %v376_v21  ;;  %v683_v30 = vld [vmem:[#allocation2 + $0x18] sm:$0xff]  ;;  %v684_v31 = vld [vmem:[#allocation2 + $0x20] sm:$0xff] }
  0x54   : > { %410 = vst.msk [vmem:[#allocation2 + $0xd9] sm:$0xff] %vm251_vm0, %v377_v24  ;;  %411 = vst.msk [vmem:[#allocation2 + $0xe1] sm:$0xff] %vm251_vm0, %v378_v25  ;;  %v685_v32 = vld [vmem:[#allocation2 + $0x30] sm:$0xff]  ;;  %v715_v33 = vpack.c.bf16 %v684_v31, %v683_v30  ;;  %v686_v34 = vld [vmem:[#allocation2 + $0x38] sm:$0xff] }
  0x55   : > { %412 = vst.msk [vmem:[#allocation2 + $0xf1] sm:$0xff] %vm251_vm0, %v379_v26  ;;  %413 = vst.msk [vmem:[#allocation2 + $0xf9] sm:$0xff] %vm251_vm0, %v380_v27  ;;  %v492_v35 = vld [vmem:[#allocation2 + $0x19] sm:$0xff]  ;;  %v493_v36 = vld [vmem:[#allocation2 + $0x21] sm:$0xff]  ;;  %v716_v37 = vpack.c.bf16 %v686_v34, %v685_v32 }
  0x56   : > { %414 = vst.msk [vmem:[#allocation2 + $0x109] sm:$0xff] %vm251_vm0, %v381_v28  ;;  %415 = vst.msk [vmem:[#allocation2 + $0x111] sm:$0xff] %vm251_vm0, %v382_v29  ;;  %v687_v38 = vld [vmem:[#allocation2 + $0x48] sm:$0xff]  ;;  %v688_v39 = vld [vmem:[#allocation2 + $0x50] sm:$0xff]  ;;  %747 = vrot.lane.b32.xlu0 %v715_v33, %s10949_s9  ;;  %v523_v44 = vpack.c.bf16 %v493_v36, %v492_v35 }
  0x57   : > { %v717_v41 = vpack.c.bf16 %v688_v39, %v687_v38  ;;  %v689_v42 = vld [vmem:[#allocation2 + $0x60] sm:$0xff]  ;;  %v690_v43 = vld [vmem:[#allocation2 + $0x68] sm:$0xff]  ;;  %475 = vst.msk [vmem:[#allocation4 + $0x28] sm:$0xff] %vm251_vm0, %v715_v33  ;;  %749 = vrot.lane.b32.xlu1 %v716_v37, %s10949_s9  ;;  %v691_v46 = vld [vmem:[#allocation2 + $0x78] sm:$0xff] }
  0x58   : > { %v718_v45 = vpack.c.bf16 %v690_v43, %v689_v42  ;;  %476 = vst.msk [vmem:[#allocation4 + $0x50] sm:$0xff] %vm251_vm0, %v716_v37  ;;  %v494_v47 = vld [vmem:[#allocation2 + $0x31] sm:$0xff]  ;;  %v495_v48 = vld [vmem:[#allocation2 + $0x39] sm:$0xff]  ;;  %v496_v59 = vld [vmem:[#allocation2 + $0x49] sm:$0xff] }
  0x59   : > { %v692_v49 = vld [vmem:[#allocation2 + $0x80] sm:$0xff]  ;;  %477 = vst.msk [vmem:[#allocation4 + $0x78] sm:$0xff] %vm251_vm0, %v717_v41  ;;  %v693_v51 = vld [vmem:[#allocation2 + $0x90] sm:$0xff]  ;;  %v694_v52 = vld [vmem:[#allocation2 + $0x98] sm:$0xff]  ;;  %v11335_v56 = vpack.c.bf16 %v495_v48, %v494_v47 }
  0x5a   : > { %v11328_v50 = vpack.c.bf16 %v692_v49, %v691_v46  ;;  %478 = vst.msk [vmem:[#allocation4 + $0xa0] sm:$0xff] %vm251_vm0, %v718_v45  ;;  %554 = vrot.lane.b32.xlu0 %v522_v40, %s10949_s9  ;;  %v11332_v53 = vpack.c.bf16 %v694_v52, %v693_v51  ;;  %v695_v54 = vld [vmem:[#allocation2 + $0xa8] sm:$0xff]  ;;  %v696_v55 = vld [vmem:[#allocation2 + $0xb0] sm:$0xff]  ;;  %v697_v58 = vld [vmem:[#allocation2 + $0xc0] sm:$0xff] }
  0x5b   : > { %556 = vrot.lane.b32.xlu1 %v523_v44, %s10949_s9  ;;  %v11337_v57 = vpack.c.bf16 %v696_v55, %v695_v54  ;;  %v497_v60 = vld [vmem:[#allocation2 + $0x51] sm:$0xff]  ;;  %v698_v61 = vld [vmem:[#allocation2 + $0xc8] sm:$0xff]  ;;  %v700_v0 = vld [vmem:[#allocation2 + $0xe0] sm:$0xff]  ;;  %416 = vst.msk [vmem:[#allocation2 + $0x121] sm:$0xff] %vm251_vm0, %v383_v11 }
  0x5c   : > { %479 = vst.msk [vmem:[#allocation4 + $0xc8] sm:$0xff] %vm251_vm0, %v11328_v50  ;;  %480 = vst.msk [vmem:[#allocation4 + $0xf0] sm:$0xff] %vm251_vm0, %v11332_v53  ;;  %v11343_v62 = vpack.c.bf16 %v698_v61, %v697_v58  ;;  %v699_v63 = vld [vmem:[#allocation2 + $0xd8] sm:$0xff]  ;;  %v701_v2 = vld [vmem:[#allocation2 + $0xf0] sm:$0xff]  ;;  %v11352_v4 = vpack.c.bf16 %v497_v60, %v496_v59 }
  0x5d   : > { %481 = vst.msk [vmem:[#allocation4 + $0x118] sm:$0xff] %vm251_vm0, %v11337_v57  ;;  %v11348_v1 = vpack.c.bf16 %v700_v0, %v699_v63  ;;  %v702_v3 = vld [vmem:[#allocation2 + $0xf8] sm:$0xff]  ;;  %v703_v6 = vld [vmem:[#allocation2 + $0x108] sm:$0xff]  ;;  %v704_v9 = vld [vmem:[#allocation2 + $0x110] sm:$0xff] }
  0x5e   : > { %751 = vrot.lane.b32.xlu0 %v717_v41, %s10949_s9  ;;  %v11354_v5 = vpack.c.bf16 %v702_v3, %v701_v2  ;;  %482 = vst.msk [vmem:[#allocation4 + $0x140] sm:$0xff] %vm251_vm0, %v11343_v62  ;;  %v498_v7 = vld [vmem:[#allocation2 + $0x61] sm:$0xff]  ;;  %v499_v8 = vld [vmem:[#allocation2 + $0x69] sm:$0xff]  ;;  %v11360_v10 = vpack.c.bf16 %v704_v9, %v703_v6  ;;  %v500_v13 = vld [vmem:[#allocation2 + $0x79] sm:$0xff] }
  0x5f   : > { %558 = vrot.lane.b32.xlu1 %v11335_v56, %s10949_s9  ;;  %483 = vst.msk [vmem:[#allocation4 + $0x168] sm:$0xff] %vm251_vm0, %v11348_v1  ;;  %v501_v14 = vld [vmem:[#allocation2 + $0x81] sm:$0xff]  ;;  %417 = vst.msk [vmem:[#allocation2 + $0x129] sm:$0xff] %vm251_vm0, %v384_v12  ;;  %v11373_v17 = vpack.c.bf16 %v499_v8, %v498_v7  ;;  %v877_v26 = vld [vmem:[#allocation2 + $0x32] sm:$0xff] }
  0x60   : > { %484 = vst.msk [vmem:[#allocation4 + $0x190] sm:$0xff] %vm251_vm0, %v11354_v5  ;;  %418 = vst.msk [vmem:[#allocation2 + $0x139] sm:$0xff] %vm251_vm0, %v385_v15  ;;  %v389_v20 = vld [vmem:[%s11274_s26 + $0xe0] sm:$0xff]  ;;  %v390_v21 = vld [vmem:[%s11274_s26 + $0xe8] sm:$0xff]  ;;  %v11397_v33 = vpack.c.bf16 %v501_v14, %v500_v13  ;;  %s10884_s26 = scalar_lea.vmem %s15353_s17, 4096 }
  0x61   : > { %419 = vst.msk [vmem:[#allocation2 + $0x141] sm:$0xff] %vm251_vm0, %v386_v16  ;;  %485 = vst.msk [vmem:[#allocation4 + $0x1b8] sm:$0xff] %vm251_vm0, %v11360_v10  ;;  %v875_v24 = vld [vmem:[#allocation2 + $0x1a] sm:$0xff]  ;;  %v876_v25 = vld [vmem:[#allocation2 + $0x22] sm:$0xff]  ;;  %p10885_p11 = scmp.ne.s32.totalorder %s15353_s17, %s10884_s26  ;;  %p10892_p1 = scmp.lt.s32.totalorder %s10890_s10, %s10884_s26 }
  0x62   : > { %753 = vrot.lane.b32.xlu0 %v718_v45, %s10949_s9  ;;  %420 = vst.msk [vmem:[#allocation2 + $0x151] sm:$0xff] %vm251_vm0, %v387_v18  ;;  %421 = vst.msk [vmem:[#allocation2 + $0x159] sm:$0xff] %vm251_vm0, %v388_v19  ;;  %v502_v27 = vld [vmem:[#allocation2 + $0x91] sm:$0xff]  ;;  %v503_v28 = vld [vmem:[#allocation2 + $0x99] sm:$0xff]  ;;  %v11393_v29 = vpack.c.bf16 %v876_v25, %v875_v24 }
  0x63   : > { %560 = vrot.lane.b32.xlu1 %v11352_v4, %s10949_s9  ;;  %422 = vst.msk [vmem:[#allocation2 + $0x169] sm:$0xff] %vm251_vm0, %v389_v20  ;;  %423 = vst.msk [vmem:[#allocation2 + $0x171] sm:$0xff] %vm251_vm0, %v390_v21  ;;  %v878_v30 = vld [vmem:[#allocation2 + $0x3a] sm:$0xff]  ;;  %v879_v31 = vld [vmem:[#allocation2 + $0x4a] sm:$0xff]  ;;  %v11424_v48 = vpack.c.bf16 %v503_v28, %v502_v27  ;;  %p10886_p12 = pnand %p10885_p11, %p11026_p5  ;;  %p10893_p2 = por %p10892_p1, %p10891_p0 }
  0x64   : > { %424 = vst.msk [vmem:[#allocation2 + $0x181] sm:$0xff] %vm251_vm0, %v391_v22  ;;  %425 = vst.msk [vmem:[#allocation2 + $0x189] sm:$0xff] %vm251_vm0, %v392_v23  ;;  %v880_v32 = vld [vmem:[#allocation2 + $0x52] sm:$0xff]  ;;  %v11399_v34 = vpack.c.bf16 %v878_v30, %v877_v26  ;;  %v881_v36 = vld [vmem:[#allocation2 + $0x62] sm:$0xff] }
  0x65   : > { %v11401_v35 = vpack.c.bf16 %v880_v32, %v879_v31  ;;  %v882_v37 = vld [vmem:[#allocation2 + $0x6a] sm:$0xff]  ;;  %v883_v38 = vld [vmem:[#allocation2 + $0x7a] sm:$0xff]  ;;  %v884_v40 = vld [vmem:[#allocation2 + $0x82] sm:$0xff]  ;;  %668 = vst.msk [vmem:[#allocation4 + $0x30] sm:$0xff] %vm251_vm0, %v11393_v29  ;;  %p10887_p13 = pneg %p10886_p12 }
  0x66   : > { %755 = vrot.lane.b32.xlu0 %v11328_v50, %s10949_s9  ;;  %v11403_v39 = vpack.c.bf16 %v882_v37, %v881_v36  ;;  %v10230_v41 = vld [vmem:[%s15402_s1 + $0x10] sm:$0xff]   ;;  %v705_v42 = vld [vmem:[#allocation2 + $0x120] sm:$0xff]  ;;  %v706_v43 = vld [vmem:[#allocation2 + $0x128] sm:$0xff]  ;;  %v11410_v44 = vpack.c.bf16 %v884_v40, %v883_v38  ;;  %669 = vst.msk [vmem:[#allocation4 + $0x58] sm:$0xff] %vm251_vm0, %v11399_v34 }
  0x67   : > { %562 = vrot.lane.b32.xlu1 %v11373_v17, %s10949_s9  ;;  %670 = vst.msk [vmem:[#allocation4 + $0x80] sm:$0xff] %vm251_vm0, %v11401_v35  ;;  %v11418_v45 = vpack.c.bf16 %v706_v43, %v705_v42  ;;  %v707_v46 = vld [vmem:[#allocation2 + $0x138] sm:$0xff]  ;;  %9051 = vmatpush3.bf16.msra.mxu0 %v10230_v41  ;;  %v504_v49 = vld [vmem:[#allocation2 + $0xa9] sm:$0xff]  ;;  %v506_v60 = vld [vmem:[#allocation2 + $0xc1] sm:$0xff]  ;;  %p10894_p3 = pnand %p10893_p2, %p10887_p13 }
  0x68   : > { %v708_v47 = vld [vmem:[#allocation2 + $0x140] sm:$0xff]  ;;  %671 = vst.msk [vmem:[#allocation4 + $0xa8] sm:$0xff] %vm251_vm0, %v11403_v39  ;;  %672 = vst.msk [vmem:[#allocation4 + $0xd0] sm:$0xff] %vm251_vm0, %v11410_v44  ;;  %v507_v61 = vld [vmem:[#allocation2 + $0xc9] sm:$0xff] }
  0x69   : > { %v11426_v50 = vpack.c.bf16 %v708_v47, %v707_v46  ;;  %v709_v51 = vld [vmem:[#allocation2 + $0x150] sm:$0xff]  ;;  %v710_v52 = vld [vmem:[#allocation2 + $0x158] sm:$0xff]  ;;  %486 = vst.msk [vmem:[#allocation4 + $0x1e0] sm:$0xff] %vm251_vm0, %v11418_v45  ;;  %v509_v8 = vld [vmem:[#allocation2 + $0xe1] sm:$0xff]  ;;  %v11465_v11 = vpack.c.bf16 %v507_v61, %v506_v60 }
  0x6a   : > { %757 = vrot.lane.b32.xlu0 %v11332_v53, %s10949_s9  ;;  %v505_v53 = vld [vmem:[#allocation2 + $0xb1] sm:$0xff]  ;;  %v11430_v54 = vpack.c.bf16 %v710_v52, %v709_v51  ;;  %v711_v55 = vld [vmem:[#allocation2 + $0x168] sm:$0xff]  ;;  %v886_v2 = vld [vmem:[#allocation2 + $0x9a] sm:$0xff] }
  0x6b   : > { %564 = vrot.lane.b32.xlu1 %v11397_v33, %s10949_s9  ;;  %v712_v58 = vld [vmem:[#allocation2 + $0x170] sm:$0xff]  ;;  %487 = vst.msk [vmem:[#allocation4 + $0x208] sm:$0xff] %vm251_vm0, %v11426_v50  ;;  %v11444_v63 = vpack.c.bf16 %v505_v53, %v504_v49  ;;  %v10232_v6 = vld [vmem:[%s15402_s1 + $0x18] sm:$0xff]   ;;  %v10233_v9 = vld [vmem:[%s15402_s1 + $0x60] sm:$0xff]  }
  0x6c   : > { %v11434_v59 = vpack.c.bf16 %v712_v58, %v711_v55  ;;  %488 = vst.msk [vmem:[#allocation4 + $0x230] sm:$0xff] %vm251_vm0, %v11430_v54  ;;  %v885_v0 = vld [vmem:[#allocation2 + $0x92] sm:$0xff]  ;;  %v887_v12 = vld [vmem:[#allocation2 + $0xaa] sm:$0xff]  ;;  %v619_v16 = vld [vmem:[#allocation2 + $0x2] sm:$0xff] }
  0x6d   : > { %v11448_v3 = vpack.c.bf16 %v886_v2, %v885_v0  ;;  %v508_v7 = vld [vmem:[#allocation2 + $0xd9] sm:$0xff]  ;;  %v10235_v15 = vld [vmem:[%s15402_s1 + $0x68] sm:$0xff]   ;;  %v510_v19 = vld [vmem:[#allocation2 + $0xf1] sm:$0xff] }
  0x6e   : > { %759 = vrot.lane.b32.xlu0 %v11337_v57, %s10949_s9  ;;  %489 = vst.msk [vmem:[#allocation4 + $0x258] sm:$0xff] %vm251_vm0, %v11434_v59  ;;  %v10231_v57 = vld [vmem:[%s15402_s1 + $0x58] sm:$0xff]   ;;  %v620_v18 = vld [vmem:[#allocation2 + $0xa] sm:$0xff]  ;;  %v11482_v23 = vpack.c.bf16 %v509_v8, %v508_v7  ;;  %v889_v27 = vld [vmem:[#allocation2 + $0xc2] sm:$0xff] }
  0x6f   : > { %566 = vrot.lane.b32.xlu1 %v11424_v48, %s10949_s9  ;;  %9052 = vmatprep.subr.bf16.mxu0 %v10231_v57  ;;  %673 = vst.msk [vmem:[#allocation4 + $0xf8] sm:$0xff] %vm251_vm0, %v11448_v3  ;;  %v888_v13 = vld [vmem:[#allocation2 + $0xb2] sm:$0xff]  ;;  %v651_v21 = vpack.c.bf16 %v620_v18, %v619_v16  ;;  %v10236_v22 = vld [vmem:[%s15402_s1 + $0x28] sm:$0xff]   ;;  %v891_v40 = vld [vmem:[#allocation2 + $0xda] sm:$0xff] }
  0x70   : > { %9053 = vmatpush3.bf16.msra.mxu0 %v10232_v6  ;;  %v11470_v14 = vpack.c.bf16 %v888_v13, %v887_v12  ;;  %v511_v20 = vld [vmem:[#allocation2 + $0xf9] sm:$0xff]  ;;  %v10237_v24 = vld [vmem:[%s15402_s1 + $0x70] sm:$0xff]   ;;  %v427_v25 = vld [vmem:[#allocation2 + $0x8] sm:$0xff] }
  0x71   : > { %9054 = vmatprep.subr.bf16.mxu0 %v10233_v9  ;;  %667 = vst.msk [vmem:[#allocation4 + $0x8] sm:$0xff] %vm251_vm0, %v651_v21  ;;  %v512_v28 = vld [vmem:[#allocation2 + $0x109] sm:$0xff]  ;;  %v513_v30 = vld [vmem:[#allocation2 + $0x111] sm:$0xff]  ;;  %v11494_v32 = vpack.c.bf16 %v511_v20, %v510_v19  ;;  %v514_v42 = vld [vmem:[#allocation2 + $0x121] sm:$0xff] }
  0x72   : > { %761 = vrot.lane.b32.xlu0 %v11343_v62, %s10949_s9  ;;  %v10234_v62 = vld [vmem:[%s15402_s1 + $0x20] sm:$0xff]   ;;  %674 = vst.msk [vmem:[#allocation4 + $0x120] sm:$0xff] %vm251_vm0, %v11470_v14  ;;  %v890_v31 = vld [vmem:[#allocation2 + $0xca] sm:$0xff]  ;;  %v10240_v38 = vld [vmem:[%s15402_s1 + $0x38] sm:$0xff]   ;;  %v11521_v53 = vpack.c.bf16 %v513_v30, %v512_v28 }
  0x73   : > { %568 = vrot.lane.b32.xlu1 %v11444_v63, %s10949_s9  ;;  %v10238_v36 = vld [vmem:[%s15402_s1 + $0x30] sm:$0xff]   ;;  %v11500_v37 = vpack.c.bf16 %v890_v31, %v889_v27  ;;  %v892_v41 = vld [vmem:[#allocation2 + $0xe2] sm:$0xff]  ;;  %v894_v51 = vld [vmem:[#allocation2 + $0xfa] sm:$0xff] }
  0x74   : > { %9055 = vmatpush3.bf16.msra.mxu0 %v10234_v62  ;;  %v515_v43 = vld [vmem:[#allocation2 + $0x129] sm:$0xff]  ;;  %v11515_v46 = vld [vmem:[%s15402_s1 + $0x100] sm:$0xff]   ;;  %v11517_v47 = vpack.c.bf16 %v892_v41, %v891_v40  ;;  %v893_v49 = vld [vmem:[#allocation2 + $0xf2] sm:$0xff] }
  0x75   : > { %9056 = vmatprep.subr.bf16.mxu0 %v10235_v15  ;;  %675 = vst.msk [vmem:[#allocation4 + $0x148] sm:$0xff] %vm251_vm0, %v11500_v37  ;;  %v895_v52 = vld [vmem:[#allocation2 + $0x10a] sm:$0xff]  ;;  %v11523_v55 = vpack.c.bf16 %v894_v51, %v893_v49  ;;  %v897_v58 = vld [vmem:[#allocation2 + $0x122] sm:$0xff]  ;;  %v516_v6 = vld [vmem:[#allocation2 + $0x139] sm:$0xff]  ;;  %v11547_v8 = vpack.c.bf16 %v515_v43, %v514_v42 }
  0x76   : > { %763 = vrot.lane.b32.xlu0 %v11348_v1, %s10949_s9  ;;  %v426_v1 = vld [vmem:[#allocation2] sm:$0xff]  ;;  %v898_v60 = vld [vmem:[#allocation2 + $0x12a] sm:$0xff]  ;;  %676 = vst.msk [vmem:[#allocation4 + $0x170] sm:$0xff] %vm251_vm0, %v11517_v47  ;;  %v10250_v30 = vld [vmem:[%s15402_s1 + $0x98] sm:$0xff]  }
  0x77   : > { %570 = vrot.lane.b32.xlu1 %v11465_v11, %s10949_s9  ;;  %v458_v26 = vpack.c.bf16 %v427_v25, %v426_v1  ;;  %v11529_v0 = vpack.c.bf16 %v898_v60, %v897_v58  ;;  %v10242_v2 = vld [vmem:[%s15402_s1 + $0xc0] sm:$0xff]   ;;  %677 = vst.msk [vmem:[#allocation4 + $0x198] sm:$0xff] %vm251_vm0, %v11523_v55  ;;  %v10245_v9 = vld [vmem:[%s15402_s1 + $0xc8] sm:$0xff]   ;;  %v518_v13 = vld [vmem:[#allocation2 + $0x151] sm:$0xff] }
  0x78   : > { %9057 = vmatpush3.bf16.msra.mxu0 %v10236_v22  ;;  %v10243_v57 = vld [vmem:[%s15402_s1 + $0x80] sm:$0xff]   ;;  %9158 = vmatprep.subr.bf16.mxu1 %v10242_v2  ;;  %v10247_v16 = vld [vmem:[%s15402_s1 + $0xd0] sm:$0xff]   ;;  %v714_v21 = vld [vmem:[#allocation2 + $0x188] sm:$0xff] }
  0x79   : > { %474 = vst.msk [vmem:[#allocation4] sm:$0xff] %vm251_vm0, %v458_v26  ;;  %9058 = vmatprep.subr.bf16.mxu0 %v10237_v24  ;;  %v517_v7 = vld [vmem:[#allocation2 + $0x141] sm:$0xff]  ;;  %679 = vst.msk [vmem:[#allocation4 + $0x1e8] sm:$0xff] %vm251_vm0, %v11529_v0  ;;  %9159 = vmatpush3.bf16.msra.mxu1 %v10243_v57  ;;  %v519_v19 = vld [vmem:[#allocation2 + $0x159] sm:$0xff] }
  0x7a   : > { %765 = vrot.lane.b32.xlu0 %v11354_v5, %s10949_s9  ;;  %v10239_v5 = vld [vmem:[%s15402_s1 + $0x78] sm:$0xff]   ;;  %9160 = vmatprep.subr.bf16.mxu1 %v10245_v9  ;;  %v900_v12 = vld [vmem:[#allocation2 + $0x142] sm:$0xff]  ;;  %v11565_v18 = vpack.c.bf16 %v517_v7, %v516_v6  ;;  %v10248_v20 = vld [vmem:[%s15402_s1 + $0x90] sm:$0xff]   ;;  %v11581_v26 = vpack.c.bf16 %v519_v19, %v518_v13 }
  0x7b   : > { %572 = vrot.lane.b32.xlu1 %v11482_v23, %s10949_s9  ;;  %v899_v62 = vld [vmem:[#allocation2 + $0x13a] sm:$0xff]  ;;  %v901_v24 = vld [vmem:[#allocation2 + $0x152] sm:$0xff]  ;;  %v520_v1 = vld [vmem:[#allocation2 + $0x169] sm:$0xff] }
  0x7c   : > { %9059 = vmatpush3.bf16.msra.mxu0 %v10238_v36  ;;  %v11558_v15 = vpack.c.bf16 %v900_v12, %v899_v62  ;;  %v10249_v22 = vld [vmem:[%s15402_s1 + $0xd8] sm:$0xff]   ;;  %v649_v31 = vld [vmem:[#allocation2 + $0x16a] sm:$0xff]  ;;  %v1096_v40 = vld [vmem:[#allocation2 + $0x181] sm:$0xff] }
  0x7d   : > { %9060 = vmatprep.subr.bf16.mxu0 %v10239_v5  ;;  %v902_v25 = vld [vmem:[#allocation2 + $0x15a] sm:$0xff]  ;;  %v521_v27 = vld [vmem:[#allocation2 + $0x171] sm:$0xff]  ;;  %v1097_v41 = vld [vmem:[#allocation2 + $0x189] sm:$0xff] }
  0x7e   : > { %767 = vrot.lane.b32.xlu0 %v11360_v10, %s10949_s9  ;;  %v896_v10 = vld [vmem:[#allocation2 + $0x112] sm:$0xff]  ;;  %680 = vst.msk [vmem:[#allocation4 + $0x210] sm:$0xff] %vm251_vm0, %v11558_v15  ;;  %1255 = vst.msk [vmem:[#allocation4 + $0x1d8] sm:$0xff] %vm251_vm0, %v11558_v15  ;;  %v11583_v28 = vpack.c.bf16 %v902_v25, %v901_v24  ;;  %v11601_v42 = vpack.c.bf16 %v521_v27, %v520_v1  ;;  %v10252_v43 = vld [vmem:[%s15402_s1 + $0xa0] sm:$0xff]   ;;  %v11608_v49 = vpack.c.bf16 %v1097_v41, %v1096_v40 }
  0x7f   : > { %574 = vrot.lane.b32.xlu1 %v11494_v32, %s10949_s9  ;;  %v11525_v61 = vpack.c.bf16 %v896_v10, %v895_v52  ;;  %v650_v36 = vld [vmem:[#allocation2 + $0x172] sm:$0xff]  ;;  %v812_v10 = vld [vmem:[#allocation2 + $0x21] sm:$0xff]  ;;  %v815_v24 = vld [vmem:[#allocation2 + $0x49] sm:$0xff] }
  0x80   : > { %9061 = vmatpush3.bf16.msra.mxu0 %v10240_v38  ;;  %681 = vst.msk [vmem:[#allocation4 + $0x238] sm:$0xff] %vm251_vm0, %v11583_v28  ;;  %v11593_v5 = vpack.c.bf16 %v650_v36, %v649_v31  ;;  %1256 = vst.msk [vmem:[#allocation4 + $0x200] sm:$0xff] %vm251_vm0, %v11583_v28  ;;  %v1004_v51 = vld [vmem:[#allocation2 + $0x30] sm:$0xff]  ;;  %v811_v52 = vld [vmem:[#allocation2 + $0x19] sm:$0xff] }
  0x81   : > { %678 = vst.msk [vmem:[#allocation4 + $0x1c0] sm:$0xff] %vm251_vm0, %v11525_v61  ;;  %10022 = vmatprep.subr.bf16.mxu0 %v11515_v46  ;;  %v10253_v58 = vld [vmem:[%s15402_s1 + $0xe8] sm:$0xff]   ;;  %v843_v2 = vpack.c.bf16 %v812_v10, %v811_v52  ;;  %874 = vst.msk [vmem:[#allocation4 + $0x268] sm:$0xff] %vm251_vm0, %v11608_v49  ;;  %v10255_v6 = vld [vmem:[%s15402_s1 + $0xf0] sm:$0xff]  }
  0x82   : > { %769 = vrot.lane.b32.xlu0 %v11418_v45, %s10949_s9  ;;  %v10246_v45 = vld [vmem:[%s15402_s1 + $0x88] sm:$0xff]   ;;  %682 = vst.msk [vmem:[#allocation4 + $0x260] sm:$0xff] %vm251_vm0, %v11593_v5  ;;  %1257 = vst.msk [vmem:[#allocation4 + $0x228] sm:$0xff] %vm251_vm0, %v11593_v5  ;;  %v10256_v9 = vld [vmem:[%s15402_s1 + $0xb0] sm:$0xff]  }
  0x83   : > { %576 = vrot.lane.b32.xlu1 %v11521_v53, %s10949_s9  ;;  %9161 = vmatpush3.bf16.msra.mxu1 %v10246_v45  ;;  %859 = vst.msk [vmem:[#allocation4 + $0x10] sm:$0xff] %vm251_vm0, %v843_v2  ;;  %v10254_v57 = vld [vmem:[%s15402_s1 + $0xa8] sm:$0xff]   ;;  %v1007_v12 = vld [vmem:[#allocation2 + $0x50] sm:$0xff]  ;;  %v1011_v31 = vld [vmem:[#allocation2 + $0x80] sm:$0xff] }
  0x84   : > { %9162 = vmatprep.subr.bf16.mxu1 %v10247_v16  ;;  %v905_v7 = vld [vmem:[#allocation2 + $0x182] sm:$0xff]  ;;  %v906_v45 = vld [vmem:[#allocation2 + $0x18a] sm:$0xff]  ;;  %v1013_v40 = vld [vmem:[#allocation2 + $0x98] sm:$0xff] }
  0x85   : > { %v1006_v62 = vld [vmem:[#allocation2 + $0x48] sm:$0xff]  ;;  %v11635_v13 = vpack.c.bf16 %v906_v45, %v905_v7  ;;  %v813_v19 = vld [vmem:[#allocation2 + $0x31] sm:$0xff]  ;;  %v827_v2 = vld [vmem:[#allocation2 + $0xd9] sm:$0xff] }
  0x86   : > { %771 = vrot.lane.b32.xlu0 %v11426_v50, %s10949_s9  ;;  %v713_v50 = vld [vmem:[#allocation2 + $0x180] sm:$0xff]  ;;  %v1037_v16 = vpack.c.bf16 %v1007_v12, %v1006_v62  ;;  %v816_v1 = vld [vmem:[#allocation2 + $0x51] sm:$0xff]  ;;  %v823_v52 = vld [vmem:[#allocation2 + $0xa9] sm:$0xff] }
  0x87   : > { %578 = vrot.lane.b32.xlu1 %v11547_v8, %s10949_s9  ;;  %9163 = vmatpush3.bf16.msra.mxu1 %v10248_v20  ;;  %v730_v38 = vpack.c.bf16 %v714_v21, %v713_v50  ;;  %v814_v20 = vld [vmem:[#allocation2 + $0x39] sm:$0xff]  ;;  %1258 = vst.msk [vmem:[#allocation4 + $0x250] sm:$0xff] %vm251_vm0, %v11635_v13  ;;  %v845_v27 = vpack.c.bf16 %v816_v1, %v815_v24  ;;  %v824_v10 = vld [vmem:[#allocation2 + $0xb1] sm:$0xff]  ;;  %v1099_v7 = vld [vmem:[#allocation2 + $0x1a1] sm:$0xff] }
  0x88   : > { %9164 = vmatprep.subr.bf16.mxu1 %v10249_v22  ;;  %v844_v50 = vpack.c.bf16 %v814_v20, %v813_v19  ;;  %v1008_v21 = vld [vmem:[#allocation2 + $0x60] sm:$0xff]  ;;  %1053 = vst.msk [vmem:[#allocation4 + $0x40] sm:$0xff] %vm251_vm0, %v1037_v16  ;;  %v1009_v22 = vld [vmem:[#allocation2 + $0x68] sm:$0xff]  ;;  %v1199_v62 = vld [vmem:[#allocation2 + $0x52] sm:$0xff] }
  0x89   : > { %v1038_v25 = vpack.c.bf16 %v1009_v22, %v1008_v21  ;;  %861 = vst.msk [vmem:[#allocation4 + $0x60] sm:$0xff] %vm251_vm0, %v845_v27  ;;  %v1197_v45 = vld [vmem:[#allocation2 + $0x3a] sm:$0xff]  ;;  %v1022_v20 = vld [vmem:[#allocation2 + $0x108] sm:$0xff] }
  0x8a   : > { %773 = vrot.lane.b32.xlu0 %v11430_v54, %s10949_s9  ;;  %v10251_v54 = vld [vmem:[%s15402_s1 + $0xe0] sm:$0xff]   ;;  %860 = vst.msk [vmem:[#allocation4 + $0x38] sm:$0xff] %vm251_vm0, %v844_v50  ;;  %v829_v50 = vld [vmem:[#allocation2 + $0xf1] sm:$0xff] }
  0x8b   : > { %580 = vrot.lane.b32.xlu1 %v11565_v18, %s10949_s9  ;;  %9165 = vmatpush3.bf16.msra.mxu1 %v10250_v30  ;;  %1054 = vst.msk [vmem:[#allocation4 + $0x68] sm:$0xff] %vm251_vm0, %v1038_v25  ;;  %v1010_v30 = vld [vmem:[#allocation2 + $0x78] sm:$0xff]  ;;  %v10244_v25 = vld [vmem:[%s15402_s1 + $0x108] sm:$0xff]  }
  0x8c   : > { %9166 = vmatprep.subr.bf16.mxu1 %v10251_v54  ;;  %v1039_v36 = vpack.c.bf16 %v1011_v31, %v1010_v30  ;;  %v818_v54 = vld [vmem:[#allocation2 + $0x69] sm:$0xff]  ;;  %v1202_v30 = vld [vmem:[#allocation2 + $0x7a] sm:$0xff] }
  0x8d   : > { %v1201_v27 = vld [vmem:[#allocation2 + $0x6a] sm:$0xff]  ;;  %v1203_v31 = vld [vmem:[#allocation2 + $0x82] sm:$0xff] }
  0x8e   : > { %775 = vrot.lane.b32.xlu0 %v11434_v59, %s10949_s9  ;;  %v1005_v59 = vld [vmem:[#allocation2 + $0x38] sm:$0xff]  ;;  %1055 = vst.msk [vmem:[#allocation4 + $0x90] sm:$0xff] %vm251_vm0, %v1039_v36  ;;  %v1231_v36 = vpack.c.bf16 %v1203_v31, %v1202_v30  ;;  %v1031_v30 = vld [vmem:[#allocation2 + $0x170] sm:$0xff] }
  0x8f   : > { %582 = vrot.lane.b32.xlu1 %v11581_v26, %s10949_s9  ;;  %v1036_v60 = vpack.c.bf16 %v1005_v59, %v1004_v51  ;;  %9167 = vmatpush3.bf16.msra.mxu1 %v10252_v43  ;;  %v821_v51 = vld [vmem:[#allocation2 + $0x91] sm:$0xff]  ;;  %v822_v59 = vld [vmem:[#allocation2 + $0x99] sm:$0xff] }
  0x90   : > { %9168 = vmatprep.subr.bf16.mxu1 %v10253_v58  ;;  %v825_v58 = vld [vmem:[#allocation2 + $0xc1] sm:$0xff]  ;;  %1247 = vst.msk [vmem:[#allocation4 + $0x98] sm:$0xff] %vm251_vm0, %v1231_v36  ;;  %v838_v36 = vld [vmem:[#allocation2 + $0x159] sm:$0xff] }
  0x91   : > { %1052 = vst.msk [vmem:[#allocation4 + $0x18] sm:$0xff] %vm251_vm0, %v1036_v60  ;;  %v826_v60 = vld [vmem:[#allocation2 + $0xc9] sm:$0xff] }
  0x92   : > { %777 = vrot.lane.b32.xlu0 %v730_v38, %s10949_s9 }
  0x93   : > { %584 = vrot.lane.b32.xlu1 %v11601_v42, %s10949_s9  ;;  %9169 = vmatpush3.bf16.msra.mxu1 %v10254_v57 }
  0x94   : > { %9170 = vmatprep.subr.bf16.mxu1 %v10255_v6 }
  0x96   : > { %1132 = vrot.lane.b32.xlu0 %v11335_v56, %s10949_s9  ;;  %v10257_v56 = vld [vmem:[%s15402_s1 + $0xf8] sm:$0xff]  }
  0x97   : > { %939 = vrot.lane.b32.xlu1 %v11393_v29, %s10949_s9  ;;  %v10258_v29 = vld [vmem:[%s15402_s1 + $0xb8] sm:$0xff]   ;;  %9171 = vmatpush3.bf16.msra.mxu1 %v10256_v9 }
  0x98   : > { %9172 = vmatprep.subr.bf16.mxu1 %v10257_v56  ;;  %v1196_v9 = vld [vmem:[#allocation2 + $0x32] sm:$0xff] }
  0x99   : > { %v1023_v56 = vld [vmem:[#allocation2 + $0x110] sm:$0xff] }
  0x9a   : > { %1134 = vrot.lane.b32.xlu0 %v11352_v4, %s10949_s9  ;;  %v817_v4 = vld [vmem:[#allocation2 + $0x61] sm:$0xff]  ;;  %v1045_v21 = vpack.c.bf16 %v1023_v56, %v1022_v20 }
  0x9b   : > { %941 = vrot.lane.b32.xlu1 %v11399_v34, %s10949_s9  ;;  %v846_v38 = vpack.c.bf16 %v818_v54, %v817_v4  ;;  %9173 = vmatpush3.bf16.msra.mxu1 %v10258_v29  ;;  %v1012_v34 = vld [vmem:[#allocation2 + $0x90] sm:$0xff] }
  0x9c   : > { %v1040_v41 = vpack.c.bf16 %v1013_v40, %v1012_v34  ;;  %1061 = vst.msk [vmem:[#allocation4 + $0x180] sm:$0xff] %vm251_vm0, %v1045_v21  ;;  %v10259_v40 = vld [vmem:[%s15402_s1 + $0x110] sm:$0xff]  }
  0x9d   : > { %862 = vst.msk [vmem:[#allocation4 + $0x88] sm:$0xff] %vm251_vm0, %v846_v38  ;;  %v1212_v21 = vld [vmem:[#allocation2 + $0xf2] sm:$0xff] }
  0x9e   : > { %1136 = vrot.lane.b32.xlu0 %v11373_v17, %s10949_s9  ;;  %v819_v17 = vld [vmem:[#allocation2 + $0x79] sm:$0xff]  ;;  %1056 = vst.msk [vmem:[#allocation4 + $0xb8] sm:$0xff] %vm251_vm0, %v1040_v41  ;;  %v1025_v41 = vld [vmem:[#allocation2 + $0x128] sm:$0xff] }
  0x9f   : > { %943 = vrot.lane.b32.xlu1 %v11401_v35, %s10949_s9  ;;  %v820_v35 = vld [vmem:[#allocation2 + $0x81] sm:$0xff] }
  0xa0   : > { %v847_v43 = vpack.c.bf16 %v820_v35, %v819_v17  ;;  %v1024_v17 = vld [vmem:[#allocation2 + $0x120] sm:$0xff]  ;;  %v831_v35 = vld [vmem:[#allocation2 + $0x109] sm:$0xff] }
  0xa2   : > { %1138 = vrot.lane.b32.xlu0 %v11397_v33, %s10949_s9  ;;  %863 = vst.msk [vmem:[#allocation4 + $0xb0] sm:$0xff] %vm251_vm0, %v847_v43  ;;  %v1014_v33 = vld [vmem:[#allocation2 + $0xa8] sm:$0xff]  ;;  %v832_v43 = vld [vmem:[#allocation2 + $0x111] sm:$0xff] }
  0xa3   : > { %945 = vrot.lane.b32.xlu1 %v11403_v39, %s10949_s9  ;;  %v1015_v39 = vld [vmem:[#allocation2 + $0xb0] sm:$0xff] }
  0xa6   : > { %1140 = vrot.lane.b32.xlu0 %v11424_v48, %s10949_s9  ;;  %v1041_v48 = vpack.c.bf16 %v1015_v39, %v1014_v33  ;;  %v853_v33 = vpack.c.bf16 %v832_v43, %v831_v35 }
  0xa7   : > { %947 = vrot.lane.b32.xlu1 %v11410_v44, %s10949_s9  ;;  %v848_v44 = vpack.c.bf16 %v822_v59, %v821_v51  ;;  %v10260_v59 = vld [vmem:[%s15402_s1 + $0x118] sm:$0xff]  }
  0xa8   : > { %1057 = vst.msk [vmem:[#allocation4 + $0xe0] sm:$0xff] %vm251_vm0, %v1041_v48  ;;  %869 = vst.msk [vmem:[#allocation4 + $0x1a0] sm:$0xff] %vm251_vm0, %v853_v33 }
  0xa9   : > { %864 = vst.msk [vmem:[#allocation4 + $0xd8] sm:$0xff] %vm251_vm0, %v848_v44  ;;  %v1205_v44 = vld [vmem:[#allocation2 + $0x9a] sm:$0xff] }
  0xaa   : > { %1142 = vrot.lane.b32.xlu0 %v11444_v63, %s10949_s9  ;;  %v1016_v63 = vld [vmem:[#allocation2 + $0xc0] sm:$0xff] }
  0xab   : > { %949 = vrot.lane.b32.xlu1 %v11448_v3, %s10949_s9  ;;  %v1017_v3 = vld [vmem:[#allocation2 + $0xc8] sm:$0xff] }
  0xae   : > { %1144 = vrot.lane.b32.xlu0 %v11465_v11, %s10949_s9  ;;  %v1042_v11 = vpack.c.bf16 %v1017_v3, %v1016_v63  ;;  %v1206_v3 = vld [vmem:[#allocation2 + $0xaa] sm:$0xff] }
  0xaf   : > { %951 = vrot.lane.b32.xlu1 %v11470_v14, %s10949_s9  ;;  %v849_v14 = vpack.c.bf16 %v824_v10, %v823_v52  ;;  %v1207_v52 = vld [vmem:[#allocation2 + $0xb2] sm:$0xff] }
  0xb0   : > { %1058 = vst.msk [vmem:[#allocation4 + $0x108] sm:$0xff] %vm251_vm0, %v1042_v11  ;;  %v1233_v10 = vpack.c.bf16 %v1207_v52, %v1206_v3 }
  0xb1   : > { %865 = vst.msk [vmem:[#allocation4 + $0x100] sm:$0xff] %vm251_vm0, %v849_v14 }
  0xb2   : > { %1146 = vrot.lane.b32.xlu0 %v11482_v23, %s10949_s9  ;;  %v1018_v23 = vld [vmem:[#allocation2 + $0xd8] sm:$0xff]  ;;  %1249 = vst.msk [vmem:[#allocation4 + $0xe8] sm:$0xff] %vm251_vm0, %v1233_v10 }
  0xb3   : > { %953 = vrot.lane.b32.xlu1 %v11500_v37, %s10949_s9  ;;  %v1019_v37 = vld [vmem:[#allocation2 + $0xe0] sm:$0xff] }
  0xb6   : > { %1148 = vrot.lane.b32.xlu0 %v11494_v32, %s10949_s9  ;;  %v1043_v32 = vpack.c.bf16 %v1019_v37, %v1018_v23  ;;  %v1026_v37 = vld [vmem:[#allocation2 + $0x138] sm:$0xff] }
  0xb7   : > { %955 = vrot.lane.b32.xlu1 %v11517_v47, %s10949_s9  ;;  %v850_v47 = vpack.c.bf16 %v826_v60, %v825_v58  ;;  %v1027_v58 = vld [vmem:[#allocation2 + $0x140] sm:$0xff] }
  0xb8   : > { %1059 = vst.msk [vmem:[#allocation4 + $0x130] sm:$0xff] %vm251_vm0, %v1043_v32  ;;  %v1047_v32 = vpack.c.bf16 %v1027_v58, %v1026_v37  ;;  %v833_v60 = vld [vmem:[#allocation2 + $0x121] sm:$0xff] }
  0xb9   : > { %866 = vst.msk [vmem:[#allocation4 + $0x128] sm:$0xff] %vm251_vm0, %v850_v47  ;;  %v834_v47 = vld [vmem:[#allocation2 + $0x129] sm:$0xff]  ;;  %v1035_v37 = vld [vmem:[#allocation2 + $0x1a0] sm:$0xff] }
  0xba   : > { %1150 = vrot.lane.b32.xlu0 %v11521_v53, %s10949_s9  ;;  %v1020_v53 = vld [vmem:[#allocation2 + $0xf0] sm:$0xff]  ;;  %1063 = vst.msk [vmem:[#allocation4 + $0x1d0] sm:$0xff] %vm251_vm0, %v1047_v32 }
  0xbb   : > { %957 = vrot.lane.b32.xlu1 %v11523_v55, %s10949_s9  ;;  %v1021_v55 = vld [vmem:[#allocation2 + $0xf8] sm:$0xff] }
  0xbe   : > { %1152 = vrot.lane.b32.xlu0 %v11547_v8, %s10949_s9  ;;  %v1044_v8 = vpack.c.bf16 %v1021_v55, %v1020_v53  ;;  %v854_v53 = vpack.c.bf16 %v834_v47, %v833_v60 }
  0xbf   : > { %959 = vrot.lane.b32.xlu1 %v11525_v61, %s10949_s9  ;;  %v828_v61 = vld [vmem:[#allocation2 + $0xe1] sm:$0xff] }
  0xc0   : > { %v851_v57 = vpack.c.bf16 %v828_v61, %v827_v2  ;;  %1060 = vst.msk [vmem:[#allocation4 + $0x158] sm:$0xff] %vm251_vm0, %v1044_v8  ;;  %870 = vst.msk [vmem:[#allocation4 + $0x1c8] sm:$0xff] %vm251_vm0, %v854_v53  ;;  %v1208_v61 = vld [vmem:[#allocation2 + $0xc2] sm:$0xff] }
  0xc2   : > { %1154 = vrot.lane.b32.xlu0 %v11565_v18, %s10949_s9  ;;  %867 = vst.msk [vmem:[#allocation4 + $0x150] sm:$0xff] %vm251_vm0, %v851_v57  ;;  %v1209_v57 = vld [vmem:[#allocation2 + $0xca] sm:$0xff] }
  0xc3   : > { %961 = vrot.lane.b32.xlu1 %v11529_v0, %s10949_s9  ;;  %v1098_v0 = vld [vmem:[#allocation2 + $0x199] sm:$0xff] }
  0xc6   : > { %1156 = vrot.lane.b32.xlu0 %v11581_v26, %s10949_s9  ;;  %v1228_v26 = vpack.c.bf16 %v1197_v45, %v1196_v9 }
  0xc7   : > { %963 = vrot.lane.b32.xlu1 %v11558_v15, %s10949_s9  ;;  %v1198_v15 = vld [vmem:[#allocation2 + $0x4a] sm:$0xff] }
  0xc8   : > { %v748_v6 = vpop.permute.xlu0 %747  ;;  %v1229_v12 = vpack.c.bf16 %v1199_v62, %v1198_v15  ;;  %1244 = vst.msk [vmem:[#allocation4 + $0x20] sm:$0xff] %vm251_vm0, %v1228_v26  ;;  %v1028_v15 = vld [vmem:[#allocation2 + $0x150] sm:$0xff]  ;;  %v1029_v62 = vld [vmem:[#allocation2 + $0x158] sm:$0xff] }
  0xc9   : > { %795 = vst.msk [vmem:[#allocation4 + $0x8] sm:$0xff] %vm602_vm2, %v748_v6  ;;  %v750_v18 = vpop.permute.xlu1 %749  ;;  %v1234_v6 = vpack.c.bf16 %v1209_v57, %v1208_v61 }
  0xca   : > { %796 = vst.msk [vmem:[#allocation4 + $0x30] sm:$0xff] %vm602_vm2, %v750_v18  ;;  %1158 = vrot.lane.b32.xlu0 %v11601_v42, %s10949_s9  ;;  %v1115_v42 = vpack.c.bf16 %v1099_v7, %v1098_v0  ;;  %v1210_v18 = vld [vmem:[#allocation2 + $0xda] sm:$0xff]  ;;  %v1211_v0 = vld [vmem:[#allocation2 + $0xe2] sm:$0xff] }
  0xcb   : > { %965 = vrot.lane.b32.xlu1 %v11583_v28, %s10949_s9  ;;  %1245 = vst.msk [vmem:[#allocation4 + $0x48] sm:$0xff] %vm251_vm0, %v1229_v12  ;;  %v830_v28 = vld [vmem:[#allocation2 + $0xf9] sm:$0xff]  ;;  %v1235_v9 = vpack.c.bf16 %v1211_v0, %v1210_v18  ;;  %1250 = vst.msk [vmem:[#allocation4 + $0x110] sm:$0xff] %vm251_vm0, %v1234_v6  ;;  %v1048_v12 = vpack.c.bf16 %v1029_v62, %v1028_v15 }
  0xcc   : > { %v555_v16 = vpop.permute.xlu0 %554  ;;  %v852_v22 = vpack.c.bf16 %v830_v28, %v829_v50  ;;  %v1213_v28 = vld [vmem:[#allocation2 + $0xfa] sm:$0xff]  ;;  %v3294_v15 = vld [vmem:[#allocation3 + $0x1a2] sm:$0xff] }
  0xcd   : > { %603 = vst.msk [vmem:[#allocation4] sm:$0xff] %vm602_vm2, %v555_v16  ;;  %v557_v19 = vpop.permute.xlu1 %556  ;;  %v835_v16 = vld [vmem:[#allocation2 + $0x139] sm:$0xff] }
  0xce   : > { %604 = vst.msk [vmem:[#allocation4 + $0x28] sm:$0xff] %vm602_vm2, %v557_v19  ;;  %1160 = vrot.lane.b32.xlu0 %v11608_v49, %s10949_s9  ;;  %v1200_v49 = vld [vmem:[#allocation2 + $0x62] sm:$0xff] }
  0xcf   : > { %967 = vrot.lane.b32.xlu1 %v11593_v5, %s10949_s9  ;;  %868 = vst.msk [vmem:[#allocation4 + $0x178] sm:$0xff] %vm251_vm0, %v852_v22  ;;  %v1230_v5 = vpack.c.bf16 %v1201_v27, %v1200_v49  ;;  %1251 = vst.msk [vmem:[#allocation4 + $0x138] sm:$0xff] %vm251_vm0, %v1235_v9  ;;  %v836_v19 = vld [vmem:[#allocation2 + $0x141] sm:$0xff]  ;;  %v1236_v22 = vpack.c.bf16 %v1213_v28, %v1212_v21 }
  0xd0   : > { %v752_v24 = vpop.permute.xlu0 %751  ;;  %v1261_v1 = vld [vmem:[#allocation4 + $0x8] sm:$0xff]  ;;  %v855_v20 = vpack.c.bf16 %v836_v19, %v835_v16  ;;  %1064 = vst.msk [vmem:[#allocation4 + $0x1f8] sm:$0xff] %vm251_vm0, %v1048_v12 }
  0xd1   : > { %797 = vst.msk [vmem:[#allocation4 + $0x58] sm:$0xff] %vm602_vm2, %v752_v24  ;;  %1708 = vmatprep.mubr.bf16.mxu0 %v1261_v1  ;;  %v559_v29 = vpop.permute.xlu1 %558  ;;  %v1266_v4 = vld [vmem:[#allocation4 + $0x30] sm:$0xff] }
  0xd2   : > { %605 = vst.msk [vmem:[#allocation4 + $0x50] sm:$0xff] %vm602_vm2, %v559_v29  ;;  %1162 = vrot.lane.b32.xlu0 %v1115_v42, %s10949_s9  ;;  %v1214_v24 = vld [vmem:[#allocation2 + $0x10a] sm:$0xff]  ;;  %v1215_v1 = vld [vmem:[#allocation2 + $0x112] sm:$0xff] }
  0xd3   : > { %969 = vrot.lane.b32.xlu1 %v11635_v13, %s10949_s9  ;;  %1246 = vst.msk [vmem:[#allocation4 + $0x70] sm:$0xff] %vm251_vm0, %v1230_v5  ;;  %v1046_v13 = vpack.c.bf16 %v1025_v41, %v1024_v17  ;;  %871 = vst.msk [vmem:[#allocation4 + $0x1f0] sm:$0xff] %vm251_vm0, %v855_v20  ;;  %v1030_v5 = vld [vmem:[#allocation2 + $0x168] sm:$0xff] }
  0xd4   : > { %v754_v54 = vpop.permute.xlu0 %753  ;;  %v1260_v38 = vld [vmem:[#allocation4] sm:$0xff]  ;;  %1252 = vst.msk [vmem:[#allocation4 + $0x160] sm:$0xff] %vm251_vm0, %v1236_v22  ;;  %v1049_v31 = vpack.c.bf16 %v1031_v30, %v1030_v5  ;;  %v1217_v41 = vld [vmem:[#allocation2 + $0x12a] sm:$0xff] }
  0xd5   : > { %798 = vst.msk [vmem:[#allocation4 + $0x80] sm:$0xff] %vm602_vm2, %v754_v54  ;;  %1709 = vmatmul.mubr.bf16.vlgmr.msra.gmra.mrb[0].mxu0 %v1260_v38  ;;  %v561_v34 = vpop.permute.xlu1 %560  ;;  %v1265_v48 = vld [vmem:[#allocation4 + $0x28] sm:$0xff] }
  0xd6   : > { %10023 = vmatpush3.bf16.msra.mxu0 %v11515_v46  ;;  %606 = vst.msk [vmem:[#allocation4 + $0x78] sm:$0xff] %vm602_vm2, %v561_v34  ;;  %1716 = vmatprep.mubr.bf16.mxu0 %v1266_v4  ;;  %v1204_v46 = vld [vmem:[#allocation2 + $0x92] sm:$0xff]  ;;  %v1216_v17 = vld [vmem:[#allocation2 + $0x122] sm:$0xff] }
  0xd7   : > { %10024 = vmatprep.subr.bf16.mxu0 %v10244_v25  ;;  %1062 = vst.msk [vmem:[#allocation4 + $0x1a8] sm:$0xff] %vm251_vm0, %v1046_v13  ;;  %v1232_v63 = vpack.c.bf16 %v1205_v44, %v1204_v46  ;;  %v837_v4 = vld [vmem:[#allocation2 + $0x151] sm:$0xff]  ;;  %1065 = vst.msk [vmem:[#allocation4 + $0x220] sm:$0xff] %vm251_vm0, %v1049_v31  ;;  %v1238_v13 = vpack.c.bf16 %v1217_v41, %v1216_v17 }
  0xd8   : > { %v756_v39 = vpop.permute.xlu0 %755  ;;  %v1271_v11 = vld [vmem:[#allocation4 + $0x58] sm:$0xff]  ;;  %v856_v54 = vpack.c.bf16 %v838_v36, %v837_v4 }
  0xd9   : > { %799 = vst.msk [vmem:[#allocation4 + $0xa8] sm:$0xff] %vm602_vm2, %v756_v39  ;;  %v563_v51 = vpop.permute.xlu1 %562  ;;  %v1270_v8 = vld [vmem:[#allocation4 + $0x50] sm:$0xff]  ;;  %v1032_v39 = vld [vmem:[#allocation2 + $0x180] sm:$0xff] }
  0xda   : > { %607 = vst.msk [vmem:[#allocation4 + $0xa0] sm:$0xff] %vm602_vm2, %v563_v51  ;;  %10025 = vmatpush3.bf16.msra.mxu0 %v10244_v25  ;;  %v1237_v25 = vpack.c.bf16 %v1215_v1, %v1214_v24  ;;  %v1033_v51 = vld [vmem:[#allocation2 + $0x188] sm:$0xff]  ;;  %v840_v46 = vld [vmem:[#allocation2 + $0x171] sm:$0xff] }
  0xdb   : > { %10026 = vmatprep.subr.bf16.mxu0 %v10259_v40  ;;  %1248 = vst.msk [vmem:[#allocation4 + $0xc0] sm:$0xff] %vm251_vm0, %v1232_v63  ;;  %872 = vst.msk [vmem:[#allocation4 + $0x218] sm:$0xff] %vm251_vm0, %v856_v54 }
  0xdc   : > { %v758_v14 = vpop.permute.xlu0 %757  ;;  %v1276_v7 = vld [vmem:[#allocation4 + $0x80] sm:$0xff]  ;;  %1253 = vst.msk [vmem:[#allocation4 + $0x188] sm:$0xff] %vm251_vm0, %v1237_v25  ;;  %1254 = vst.msk [vmem:[#allocation4 + $0x1b0] sm:$0xff] %vm251_vm0, %v1238_v13 }
  0xdd   : > { %800 = vst.msk [vmem:[#allocation4 + $0xd0] sm:$0xff] %vm602_vm2, %v758_v14  ;;  %v565_v23 = vpop.permute.xlu1 %564  ;;  %1717 = vmatmul.mubr.bf16.gmra.mrb[4].mxu0 %v1265_v48  ;;  %v1275_v42 = vld [vmem:[#allocation4 + $0x78] sm:$0xff]  ;;  %v1050_v48 = vpack.c.bf16 %v1033_v51, %v1032_v39 }
  0xde   : > { %608 = vst.msk [vmem:[#allocation4 + $0xc8] sm:$0xff] %vm602_vm2, %v565_v23  ;;  %1724 = vmatprep.mubr.bf16.mxu0 %v1271_v11  ;;  %10027 = vmatpush3.bf16.msra.mxu0 %v10259_v40  ;;  %v1034_v23 = vld [vmem:[#allocation2 + $0x198] sm:$0xff] }
  0xdf   : > { %10028 = vmatprep.subr.bf16.mxu0 %v10260_v59  ;;  %1066 = vst.msk [vmem:[#allocation4 + $0x248] sm:$0xff] %vm251_vm0, %v1050_v48  ;;  %v1051_v58 = vpack.c.bf16 %v1035_v37, %v1034_v23 }
  0xe0   : > { %v760_v55 = vpop.permute.xlu0 %759  ;;  %v1281_v29 = vld [vmem:[#allocation4 + $0xa8] sm:$0xff] }
  0xe1   : > { %801 = vst.msk [vmem:[#allocation4 + $0xf8] sm:$0xff] %vm602_vm2, %v760_v55  ;;  %v567_v2 = vpop.permute.xlu1 %566  ;;  %v1280_v40 = vld [vmem:[#allocation4 + $0xa0] sm:$0xff] }
  0xe2   : > { %609 = vst.msk [vmem:[#allocation4 + $0xf0] sm:$0xff] %vm602_vm2, %v567_v2  ;;  %10029 = vmatpush3.bf16.msra.mxu0 %v10260_v59  ;;  %v839_v59 = vld [vmem:[#allocation2 + $0x169] sm:$0xff]  ;;  %v1226_v55 = vld [vmem:[#allocation2 + $0x19a] sm:$0xff] }
  0xe3   : > { %v857_v44 = vpack.c.bf16 %v840_v46, %v839_v59  ;;  %1067 = vst.msk [vmem:[#allocation4 + $0x270] sm:$0xff] %vm251_vm0, %v1051_v58  ;;  %v1227_v2 = vld [vmem:[#allocation2 + $0x1a2] sm:$0xff] }
  0xe4   : > { %v762_v45 = vpop.permute.xlu0 %761  ;;  %v1286_v35 = vld [vmem:[#allocation4 + $0xd0] sm:$0xff]  ;;  %v1243_v61 = vpack.c.bf16 %v1227_v2, %v1226_v55 }
  0xe5   : > { %802 = vst.msk [vmem:[#allocation4 + $0x120] sm:$0xff] %vm602_vm2, %v762_v45  ;;  %v569_v26 = vpop.permute.xlu1 %568  ;;  %1725 = vmatmul.mubr.bf16.gmra.mrb[8].mxu0 %v1270_v8  ;;  %v1285_v52 = vld [vmem:[#allocation4 + $0xc8] sm:$0xff] }
  0xe6   : > { %610 = vst.msk [vmem:[#allocation4 + $0x118] sm:$0xff] %vm602_vm2, %v569_v26  ;;  %1732 = vmatprep.mubr.bf16.mxu0 %v1276_v7  ;;  %v3293_v26 = vld [vmem:[#allocation3 + $0x19a] sm:$0xff] }
  0xe7   : > { %873 = vst.msk [vmem:[#allocation4 + $0x240] sm:$0xff] %vm251_vm0, %v857_v44  ;;  %1259 = vst.msk [vmem:[#allocation4 + $0x278] sm:$0xff] %vm251_vm0, %v1243_v61  ;;  %v3310_v62 = vpack.c.bf16 %v3294_v15, %v3293_v26  ;;  %v1264_v26 = vld [vmem:[#allocation4 + $0x20] sm:$0xff] }
  0xe8   : > { %v764_v56 = vpop.permute.xlu0 %763  ;;  %v1291_v11 = vld [vmem:[#allocation4 + $0xf8] sm:$0xff] }
  0xe9   : > { %803 = vst.msk [vmem:[#allocation4 + $0x148] sm:$0xff] %vm602_vm2, %v764_v56  ;;  %v571_v50 = vpop.permute.xlu1 %570  ;;  %v1290_v47 = vld [vmem:[#allocation4 + $0xf0] sm:$0xff] }
  0xea   : > { %611 = vst.msk [vmem:[#allocation4 + $0x140] sm:$0xff] %vm602_vm2, %v571_v50 }
  0xec   : > { %v766_v49 = vpop.permute.xlu0 %765  ;;  %v1296_v53 = vld [vmem:[#allocation4 + $0x120] sm:$0xff] }
  0xed   : > { %804 = vst.msk [vmem:[#allocation4 + $0x170] sm:$0xff] %vm602_vm2, %v766_v49  ;;  %v573_v27 = vpop.permute.xlu1 %572  ;;  %1733 = vmatmul.mubr.bf16.gmra.mrb[12].mxu0 %v1275_v42  ;;  %v1295_v0 = vld [vmem:[#allocation4 + $0x118] sm:$0xff] }
  0xee   : > { %612 = vst.msk [vmem:[#allocation4 + $0x168] sm:$0xff] %vm602_vm2, %v573_v27  ;;  %1740 = vmatprep.mubr.bf16.mxu0 %v1281_v29  ;;  %v11791_v19 = vld [vmem:[#allocation4 + $0x278] sm:$0xff] }
  0xef   : > { %3326 = vst.msk [vmem:[#allocation4 + $0x278] sm:$0xff] %vm251_vm0, %v3310_v62 }
  0xf0   : > { %v768_v38 = vpop.permute.xlu0 %767  ;;  %v1301_v7 = vld [vmem:[#allocation4 + $0x148] sm:$0xff] }
  0xf1   : > { %805 = vst.msk [vmem:[#allocation4 + $0x198] sm:$0xff] %vm602_vm2, %v768_v38  ;;  %v575_v34 = vpop.permute.xlu1 %574  ;;  %v1300_v50 = vld [vmem:[#allocation4 + $0x140] sm:$0xff] }
  0xf2   : > { %613 = vst.msk [vmem:[#allocation4 + $0x190] sm:$0xff] %vm602_vm2, %v575_v34 }
  0xf4   : > { %v770_v43 = vpop.permute.xlu0 %769  ;;  %v1306_v42 = vld [vmem:[#allocation4 + $0x170] sm:$0xff] }
  0xf5   : > { %806 = vst.msk [vmem:[#allocation4 + $0x1c0] sm:$0xff] %vm602_vm2, %v770_v43  ;;  %v577_v33 = vpop.permute.xlu1 %576  ;;  %1741 = vmatmul.mubr.bf16.gmra.mrb[16].mxu0 %v1280_v40  ;;  %v1305_v49 = vld [vmem:[#allocation4 + $0x168] sm:$0xff] }
  0xf6   : > { %614 = vst.msk [vmem:[#allocation4 + $0x1b8] sm:$0xff] %vm602_vm2, %v577_v33  ;;  %1748 = vmatprep.mubr.bf16.mxu0 %v1286_v35 }
  0xf8   : > { %v772_v63 = vpop.permute.xlu0 %771  ;;  %v1311_v27 = vld [vmem:[#allocation4 + $0x198] sm:$0xff] }
  0xf9   : > { %807 = vst.msk [vmem:[#allocation4 + $0x1e8] sm:$0xff] %vm602_vm2, %v772_v63  ;;  %v579_v3 = vpop.permute.xlu1 %578  ;;  %v1310_v38 = vld [vmem:[#allocation4 + $0x190] sm:$0xff] }
  0xfa   : > { %615 = vst.msk [vmem:[#allocation4 + $0x1e0] sm:$0xff] %vm602_vm2, %v579_v3 }
  0xfc   : > { %v774_v10 = vpop.permute.xlu0 %773  ;;  %v1316_v34 = vld [vmem:[#allocation4 + $0x1c0] sm:$0xff] }
  0xfd   : > { %808 = vst.msk [vmem:[#allocation4 + $0x210] sm:$0xff] %vm602_vm2, %v774_v10  ;;  %v581_v14 = vpop.permute.xlu1 %580  ;;  %1749 = vmatmul.mubr.bf16.gmra.mrb[20].mxu0 %v1285_v52  ;;  %v1315_v33 = vld [vmem:[#allocation4 + $0x1b8] sm:$0xff] }
  0xfe   : > { %616 = vst.msk [vmem:[#allocation4 + $0x208] sm:$0xff] %vm602_vm2, %v581_v14  ;;  %1756 = vmatprep.mubr.bf16.mxu0 %v1291_v11 }
 0x100   : > { %v776_v32 = vpop.permute.xlu0 %775  ;;  %v1321_v39 = vld [vmem:[#allocation4 + $0x1e8] sm:$0xff] }
 0x101   : > { %809 = vst.msk [vmem:[#allocation4 + $0x238] sm:$0xff] %vm602_vm2, %v776_v32  ;;  %v583_v60 = vpop.permute.xlu1 %582  ;;  %v1320_v3 = vld [vmem:[#allocation4 + $0x1e0] sm:$0xff] }
 0x102   : > { %617 = vst.msk [vmem:[#allocation4 + $0x230] sm:$0xff] %vm602_vm2, %v583_v60 }
 0x104   : > { %v778_v8 = vpop.permute.xlu0 %777  ;;  %v1326_v52 = vld [vmem:[#allocation4 + $0x210] sm:$0xff] }
 0x105   : > { %810 = vst.msk [vmem:[#allocation4 + $0x260] sm:$0xff] %vm602_vm2, %v778_v8  ;;  %v585_v57 = vpop.permute.xlu1 %584  ;;  %1757 = vmatmul.mubr.bf16.gmra.mrb[24].mxu0 %v1290_v47  ;;  %v1325_v32 = vld [vmem:[#allocation4 + $0x208] sm:$0xff] }
 0x106   : > { %618 = vst.msk [vmem:[#allocation4 + $0x258] sm:$0xff] %vm602_vm2, %v585_v57  ;;  %1764 = vmatprep.mubr.bf16.mxu0 %v1296_v53 }
 0x108   : > { %v1133_v6 = vpop.permute.xlu0 %1132  ;;  %v1331_v60 = vld [vmem:[#allocation4 + $0x238] sm:$0xff] }
 0x109   : > { %1180 = vst.msk [vmem:[#allocation4 + $0x18] sm:$0xff] %vm602_vm2, %v1133_v6  ;;  %v940_v18 = vpop.permute.xlu1 %939  ;;  %v1330_v57 = vld [vmem:[#allocation4 + $0x230] sm:$0xff] }
 0x10a   : > { %987 = vst.msk [vmem:[#allocation4 + $0x10] sm:$0xff] %vm602_vm2, %v940_v18 }
 0x10c   : > { %v1135_v9 = vpop.permute.xlu0 %1134  ;;  %v1336_v6 = vld [vmem:[#allocation4 + $0x260] sm:$0xff] }
 0x10d   : > { %1765 = vmatmul.mubr.bf16.gmra.mrb[28].mxu0 %v1295_v0  ;;  %1181 = vst.msk [vmem:[#allocation4 + $0x40] sm:$0xff] %vm602_vm2, %v1135_v9  ;;  %v942_v45 = vpop.permute.xlu1 %941 }
 0x10e   : > { %988 = vst.msk [vmem:[#allocation4 + $0x38] sm:$0xff] %vm602_vm2, %v942_v45  ;;  %1772 = vmatprep.mubr.bf16.mxu0 %v1301_v7  ;;  %v1335_v45 = vld [vmem:[#allocation4 + $0x258] sm:$0xff] }
 0x110   : > { %v1263_v12 = vld [vmem:[#allocation4 + $0x18] sm:$0xff]  ;;  %v1137_v16 = vpop.permute.xlu0 %1136 }
 0x111   : > { %1869 = vmatprep.mubr.bf16.mxu1 %v1263_v12  ;;  %v1262_v20 = vld [vmem:[#allocation4 + $0x10] sm:$0xff]  ;;  %1182 = vst.msk [vmem:[#allocation4 + $0x68] sm:$0xff] %vm602_vm2, %v1137_v16  ;;  %v944_v56 = vpop.permute.xlu1 %943  ;;  %v1269_v12 = vld [vmem:[#allocation4 + $0x48] sm:$0xff] }
 0x112   : > { %1870 = vmatmul.mubr.bf16.vlgmr.msra.gmra.mrb[0].mxu1 %v1262_v20  ;;  %989 = vst.msk [vmem:[#allocation4 + $0x60] sm:$0xff] %vm602_vm2, %v944_v56  ;;  %v1274_v16 = vld [vmem:[#allocation4 + $0x70] sm:$0xff] }
 0x114   : > { %v1268_v21 = vld [vmem:[#allocation4 + $0x40] sm:$0xff]  ;;  %v1139_v28 = vpop.permute.xlu0 %1138 }
 0x115   : > { %1773 = vmatmul.mubr.bf16.gmra.mrb[32].mxu0 %v1300_v50  ;;  %1877 = vmatprep.mubr.bf16.mxu1 %v1268_v21  ;;  %1183 = vst.msk [vmem:[#allocation4 + $0x90] sm:$0xff] %vm602_vm2, %v1139_v28  ;;  %v946_v22 = vpop.permute.xlu1 %945  ;;  %v1267_v24 = vld [vmem:[#allocation4 + $0x38] sm:$0xff] }
 0x116   : > { %1780 = vmatprep.mubr.bf16.mxu0 %v1306_v42  ;;  %990 = vst.msk [vmem:[#allocation4 + $0x88] sm:$0xff] %vm602_vm2, %v946_v22  ;;  %v1279_v50 = vld [vmem:[#allocation4 + $0x98] sm:$0xff]  ;;  %v1284_v42 = vld [vmem:[#allocation4 + $0xc0] sm:$0xff]  ;;  %v1289_v22 = vld [vmem:[#allocation4 + $0xe8] sm:$0xff] }
 0x118   : > { %v1273_v1 = vld [vmem:[#allocation4 + $0x68] sm:$0xff]  ;;  %v1141_v29 = vpop.permute.xlu0 %1140 }
 0x119   : > { %1184 = vst.msk [vmem:[#allocation4 + $0xb8] sm:$0xff] %vm602_vm2, %v1141_v29  ;;  %v948_v25 = vpop.permute.xlu1 %947  ;;  %v1272_v31 = vld [vmem:[#allocation4 + $0x60] sm:$0xff] }
 0x11a   : > { %1878 = vmatmul.mubr.bf16.gmra.mrb[4].mxu1 %v1267_v24  ;;  %991 = vst.msk [vmem:[#allocation4 + $0xb0] sm:$0xff] %vm602_vm2, %v948_v25  ;;  %v1294_v24 = vld [vmem:[#allocation4 + $0x110] sm:$0xff]  ;;  %v1299_v25 = vld [vmem:[#allocation4 + $0x138] sm:$0xff] }
 0x11b   : > { %1885 = vmatprep.mubr.bf16.mxu1 %v1273_v1 }
 0x11c   : > { %v1143_v5 = vpop.permute.xlu0 %1142  ;;  %v1278_v4 = vld [vmem:[#allocation4 + $0x90] sm:$0xff] }
 0x11d   : > { %1781 = vmatmul.mubr.bf16.gmra.mrb[36].mxu0 %v1305_v49  ;;  %1185 = vst.msk [vmem:[#allocation4 + $0xe0] sm:$0xff] %vm602_vm2, %v1143_v5  ;;  %v950_v30 = vpop.permute.xlu1 %949  ;;  %v1277_v41 = vld [vmem:[#allocation4 + $0x88] sm:$0xff]  ;;  %v1304_v49 = vld [vmem:[#allocation4 + $0x160] sm:$0xff] }
 0x11e   : > { %1788 = vmatprep.mubr.bf16.mxu0 %v1311_v27  ;;  %992 = vst.msk [vmem:[#allocation4 + $0xd8] sm:$0xff] %vm602_vm2, %v950_v30  ;;  %v1309_v30 = vld [vmem:[#allocation4 + $0x188] sm:$0xff] }
 0x120   : > { %v1145_v36 = vpop.permute.xlu0 %1144  ;;  %v1283_v13 = vld [vmem:[#allocation4 + $0xb8] sm:$0xff] }
 0x121   : > { %1186 = vst.msk [vmem:[#allocation4 + $0x108] sm:$0xff] %vm602_vm2, %v1145_v36  ;;  %v952_v54 = vpop.permute.xlu1 %951  ;;  %v1282_v59 = vld [vmem:[#allocation4 + $0xb0] sm:$0xff] }
 0x122   : > { %1886 = vmatmul.mubr.bf16.gmra.mrb[8].mxu1 %v1272_v31  ;;  %993 = vst.msk [vmem:[#allocation4 + $0x100] sm:$0xff] %vm602_vm2, %v952_v54  ;;  %v1314_v31 = vld [vmem:[#allocation4 + $0x1b0] sm:$0xff]  ;;  %v1319_v54 = vld [vmem:[#allocation4 + $0x1d8] sm:$0xff] }
 0x123   : > { %1893 = vmatprep.mubr.bf16.mxu1 %v1278_v4 }
 0x124   : > { %v1147_v40 = vpop.permute.xlu0 %1146  ;;  %v1288_v46 = vld [vmem:[#allocation4 + $0xe0] sm:$0xff] }
 0x125   : > { %1789 = vmatmul.mubr.bf16.gmra.mrb[40].mxu0 %v1310_v38  ;;  %1187 = vst.msk [vmem:[#allocation4 + $0x130] sm:$0xff] %vm602_vm2, %v1147_v40  ;;  %v954_v17 = vpop.permute.xlu1 %953  ;;  %v1287_v14 = vld [vmem:[#allocation4 + $0xd8] sm:$0xff]  ;;  %v1324_v38 = vld [vmem:[#allocation4 + $0x200] sm:$0xff] }
 0x126   : > { %1796 = vmatprep.mubr.bf16.mxu0 %v1316_v34  ;;  %994 = vst.msk [vmem:[#allocation4 + $0x128] sm:$0xff] %vm602_vm2, %v954_v17  ;;  %v1329_v17 = vld [vmem:[#allocation4 + $0x228] sm:$0xff] }
 0x128   : > { %v1149_v35 = vpop.permute.xlu0 %1148  ;;  %v1293_v23 = vld [vmem:[#allocation4 + $0x108] sm:$0xff] }
 0x129   : > { %1188 = vst.msk [vmem:[#allocation4 + $0x158] sm:$0xff] %vm602_vm2, %v1149_v35  ;;  %v956_v43 = vpop.permute.xlu1 %955  ;;  %v1292_v55 = vld [vmem:[#allocation4 + $0x100] sm:$0xff] }
 0x12a   : > { %1894 = vmatmul.mubr.bf16.gmra.mrb[12].mxu1 %v1277_v41  ;;  %995 = vst.msk [vmem:[#allocation4 + $0x150] sm:$0xff] %vm602_vm2, %v956_v43  ;;  %v1334_v41 = vld [vmem:[#allocation4 + $0x250] sm:$0xff] }
 0x12b   : > { %1901 = vmatprep.mubr.bf16.mxu1 %v1283_v13 }
 0x12c   : > { %v1151_v51 = vpop.permute.xlu0 %1150  ;;  %v1298_v2 = vld [vmem:[#allocation4 + $0x130] sm:$0xff] }
 0x12d   : > { %1797 = vmatmul.mubr.bf16.gmra.mrb[44].mxu0 %v1315_v33  ;;  %1189 = vst.msk [vmem:[#allocation4 + $0x180] sm:$0xff] %vm602_vm2, %v1151_v51  ;;  %v958_v48 = vpop.permute.xlu1 %957  ;;  %v1297_v7 = vld [vmem:[#allocation4 + $0x128] sm:$0xff] }
 0x12e   : > { %1804 = vmatprep.mubr.bf16.mxu0 %v1321_v39  ;;  %996 = vst.msk [vmem:[#allocation4 + $0x178] sm:$0xff] %vm602_vm2, %v958_v48 }
 0x130   : > { %v1153_v44 = vpop.permute.xlu0 %1152  ;;  %v1303_v9 = vld [vmem:[#allocation4 + $0x158] sm:$0xff] }
 0x131   : > { %1190 = vst.msk [vmem:[#allocation4 + $0x1a8] sm:$0xff] %vm602_vm2, %v1153_v44  ;;  %v960_v63 = vpop.permute.xlu1 %959  ;;  %v1302_v15 = vld [vmem:[#allocation4 + $0x150] sm:$0xff] }
 0x132   : > { %1902 = vmatmul.mubr.bf16.gmra.mrb[16].mxu1 %v1282_v59  ;;  %997 = vst.msk [vmem:[#allocation4 + $0x1a0] sm:$0xff] %vm602_vm2, %v960_v63 }
 0x133   : > { %1909 = vmatprep.mubr.bf16.mxu1 %v1288_v46 }
 0x134   : > { %v1155_v11 = vpop.permute.xlu0 %1154  ;;  %v1308_v62 = vld [vmem:[#allocation4 + $0x180] sm:$0xff] }
 0x135   : > { %1805 = vmatmul.mubr.bf16.gmra.mrb[48].mxu0 %v1320_v3  ;;  %1191 = vst.msk [vmem:[#allocation4 + $0x1d0] sm:$0xff] %vm602_vm2, %v1155_v11  ;;  %v962_v10 = vpop.permute.xlu1 %961  ;;  %v1307_v20 = vld [vmem:[#allocation4 + $0x178] sm:$0xff] }
 0x136   : > { %1812 = vmatprep.mubr.bf16.mxu0 %v1326_v52  ;;  %998 = vst.msk [vmem:[#allocation4 + $0x1c8] sm:$0xff] %vm602_vm2, %v962_v10 }
 0x138   : > { %v1157_v37 = vpop.permute.xlu0 %1156  ;;  %v1313_v56 = vld [vmem:[#allocation4 + $0x1a8] sm:$0xff] }
 0x139   : > { %1192 = vst.msk [vmem:[#allocation4 + $0x1f8] sm:$0xff] %vm602_vm2, %v1157_v37  ;;  %v964_v58 = vpop.permute.xlu1 %963  ;;  %v1312_v21 = vld [vmem:[#allocation4 + $0x1a0] sm:$0xff] }
 0x13a   : > { %1910 = vmatmul.mubr.bf16.gmra.mrb[20].mxu1 %v1287_v14  ;;  %999 = vst.msk [vmem:[#allocation4 + $0x1f0] sm:$0xff] %vm602_vm2, %v964_v58 }
 0x13b   : > { %1917 = vmatprep.mubr.bf16.mxu1 %v1293_v23 }
 0x13c   : > { %v1159_v47 = vpop.permute.xlu0 %1158  ;;  %v1318_v28 = vld [vmem:[#allocation4 + $0x1d0] sm:$0xff] }
 0x13d   : > { %1813 = vmatmul.mubr.bf16.gmra.mrb[52].mxu0 %v1325_v32  ;;  %1193 = vst.msk [vmem:[#allocation4 + $0x220] sm:$0xff] %vm602_vm2, %v1159_v47  ;;  %v966_v53 = vpop.permute.xlu1 %965  ;;  %v1317_v1 = vld [vmem:[#allocation4 + $0x1c8] sm:$0xff] }
 0x13e   : > { %1820 = vmatprep.mubr.bf16.mxu0 %v1331_v60  ;;  %1000 = vst.msk [vmem:[#allocation4 + $0x218] sm:$0xff] %vm602_vm2, %v966_v53 }
 0x140   : > { %v1161_v8 = vpop.permute.xlu0 %1160  ;;  %v1323_v29 = vld [vmem:[#allocation4 + $0x1f8] sm:$0xff] }
 0x141   : > { %1194 = vst.msk [vmem:[#allocation4 + $0x248] sm:$0xff] %vm602_vm2, %v1161_v8  ;;  %v968_v61 = vpop.permute.xlu1 %967  ;;  %v1322_v27 = vld [vmem:[#allocation4 + $0x1f0] sm:$0xff] }
 0x142   : > { %1918 = vmatmul.mubr.bf16.gmra.mrb[24].mxu1 %v1292_v55  ;;  %1001 = vst.msk [vmem:[#allocation4 + $0x240] sm:$0xff] %vm602_vm2, %v968_v61 }
 0x143   : > { %1925 = vmatprep.mubr.bf16.mxu1 %v1298_v2 }
 0x144   : > { %v1163_v18 = vpop.permute.xlu0 %1162  ;;  %v1328_v5 = vld [vmem:[#allocation4 + $0x220] sm:$0xff] }
 0x145   : > { %1821 = vmatmul.mubr.bf16.gmra.mrb[56].mxu0 %v1330_v57  ;;  %1195 = vst.msk [vmem:[#allocation4 + $0x270] sm:$0xff] %vm602_vm2, %v1163_v18  ;;  %v970_v0 = vpop.permute.xlu1 %969  ;;  %v1327_v4 = vld [vmem:[#allocation4 + $0x218] sm:$0xff] }
 0x146   : > { %1828 = vmatprep.mubr.bf16.mxu0 %v1336_v6  ;;  %1002 = vst.msk [vmem:[#allocation4 + $0x268] sm:$0xff] %vm602_vm2, %v970_v0 }
 0x148   : > { %v1333_v36 = vld [vmem:[#allocation4 + $0x248] sm:$0xff] }
 0x149   : > { %v1332_v34 = vld [vmem:[#allocation4 + $0x240] sm:$0xff] }
 0x14a   : > { %1926 = vmatmul.mubr.bf16.gmra.mrb[28].mxu1 %v1297_v7 }
 0x14b   : > { %1933 = vmatprep.mubr.bf16.mxu1 %v1303_v9 }
 0x14c   : > { %v1338_v40 = vld [vmem:[#allocation4 + $0x270] sm:$0xff] }
 0x14d   : > { %1829 = vmatmul.mubr.bf16.gmra.mrb[60].mxu0 %v1335_v45  ;;  %v1337_v13 = vld [vmem:[#allocation4 + $0x268] sm:$0xff] }
 0x14e   : > { %10030 = vmatprep.mubr.msk.bf16.mxu0 %vm251_vm0, %v1264_v26 }
 0x152   : > { %1934 = vmatmul.mubr.bf16.gmra.mrb[32].mxu1 %v1302_v15 }
 0x153   : > { %1941 = vmatprep.mubr.bf16.mxu1 %v1308_v62 }
 0x155   : > { %10031 = vmatmul.mubr.msk.bf16.vlgmr.msra.gmra.mrb[64].mxu0 %vm251_vm0, %v1269_v12 }
 0x156   : > { %10034 = vmatprep.mubr.msk.bf16.mxu0 %vm251_vm0, %v1274_v16 }
 0x15a   : > { %1942 = vmatmul.mubr.bf16.gmra.mrb[36].mxu1 %v1307_v20 }
 0x15b   : > { %1949 = vmatprep.mubr.bf16.mxu1 %v1313_v56 }
 0x15d   : > { %10035 = vmatmul.mubr.msk.bf16.gmra.mrb[68].mxu0 %vm251_vm0, %v1279_v50 }
 0x15e   : > { %10038 = vmatprep.mubr.msk.bf16.mxu0 %vm251_vm0, %v1284_v42 }
 0x162   : > { %1950 = vmatmul.mubr.bf16.gmra.mrb[40].mxu1 %v1312_v21 }
 0x163   : > { %1957 = vmatprep.mubr.bf16.mxu1 %v1318_v28 }
 0x165   : > { %10039 = vmatmul.mubr.msk.bf16.gmra.mrb[72].mxu0 %vm251_vm0, %v1289_v22 }
 0x166   : > { %10042 = vmatprep.mubr.msk.bf16.mxu0 %vm251_vm0, %v1294_v24 }
 0x16a   : > { %1958 = vmatmul.mubr.bf16.gmra.mrb[44].mxu1 %v1317_v1 }
 0x16b   : > { %1965 = vmatprep.mubr.bf16.mxu1 %v1323_v29 }
 0x16d   : > { %10043 = vmatmul.mubr.msk.bf16.gmra.mrb[76].mxu0 %vm251_vm0, %v1299_v25 }
 0x16e   : > { %10046 = vmatprep.mubr.msk.bf16.mxu0 %vm251_vm0, %v1304_v49 }
 0x172   : > { %1966 = vmatmul.mubr.bf16.gmra.mrb[48].mxu1 %v1322_v27 }
 0x173   : > { %1973 = vmatprep.mubr.bf16.mxu1 %v1328_v5  ;;  %v2558_v5 = vld [vmem:[#allocation3 + $0x1] sm:$0xff] }
 0x175   : > { %10047 = vmatmul.mubr.msk.bf16.gmra.mrb[80].mxu0 %vm251_vm0, %v1309_v30  ;;  %v2559_v30 = vld [vmem:[#allocation3 + $0x9] sm:$0xff] }
 0x176   : > { %10050 = vmatprep.mubr.msk.bf16.mxu0 %vm251_vm0, %v1314_v31 }
 0x17a   : > { %1974 = vmatmul.mubr.bf16.gmra.mrb[52].mxu1 %v1327_v4 }
 0x17b   : > { %1981 = vmatprep.mubr.bf16.mxu1 %v1333_v36  ;;  %v2590_v36 = vpack.c.bf16 %v2559_v30, %v2558_v5 }
 0x17d   : > { %10051 = vmatmul.mubr.msk.bf16.gmra.mrb[84].mxu0 %vm251_vm0, %v1319_v54  ;;  %2622 = vrot.lane.b32.xlu1 %v2590_v36, %s10949_s9 }
 0x17e   : > { %10054 = vmatprep.mubr.msk.bf16.mxu0 %vm251_vm0, %v1324_v38 }
 0x182   : > { %1982 = vmatmul.mubr.bf16.gmra.mrb[56].mxu1 %v1332_v34 }
 0x183   : > { %1989 = vmatprep.mubr.bf16.mxu1 %v1338_v40 }
 0x185   : > { %10055 = vmatmul.mubr.msk.bf16.gmra.mrb[88].mxu0 %vm251_vm0, %v1329_v17 }
 0x186   : > { %10058 = vmatprep.mubr.msk.bf16.mxu0 %vm251_vm0, %v1334_v41 }
 0x18a   : > { %1990 = vmatmul.mubr.bf16.gmra.mrb[60].mxu1 %v1337_v13 }
 0x18d   : > { %10059 = vmatmul.mubr.msk.bf16.gmra.mrb[92].mxu0 %vm251_vm0, %v11791_v19 }
 0x1a8   : > { %v9062_v35 = vpop.f32.mrb[0].mxu0 }
 0x1a9   : > { %v9063_v43 = vpop.f32.mrb[1].mxu0 }
 0x1aa   : > { %v9064_v33 = vadd.f32 %v9063_v43, %v9062_v35  ;;  %v9065_v39 = vpop.f32.mrb[2].mxu0 }
 0x1ab   : > { %v9066_v51 = vpop.f32.mrb[3].mxu0 }
 0x1ac   : > { %v9067_v48 = vadd.f32 %v9066_v51, %v9065_v39 }
 0x1b0   : > { %v9068_v59 = vpop.f32.mrb[4].mxu0 }
 0x1b1   : > { %v9069_v46 = vpop.f32.mrb[5].mxu0 }
 0x1b2   : > { %v11839_v44 = vadd.f32 %v9069_v46, %v9068_v59  ;;  %v9071_v63 = vpop.f32.mrb[6].mxu0 }
 0x1b3   : > { %v9072_v3 = vpop.f32.mrb[7].mxu0 }
 0x1b4   : > { %v11841_v52 = vadd.f32 %v9072_v3, %v9071_v63 }
 0x1b8   : > { %v9074_v11 = vpop.f32.mrb[8].mxu0 }
 0x1b9   : > { %v9075_v10 = vpop.f32.mrb[9].mxu0 }
 0x1ba   : > { %v11843_v14 = vadd.f32 %v9075_v10, %v9074_v11  ;;  %v9077_v23 = vpop.f32.mrb[10].mxu0 }
 0x1bb   : > { %v9078_v19 = vpop.f32.mrb[11].mxu0 }
 0x1bc   : > { %v11845_v37 = vadd.f32 %v9078_v19, %v9077_v23 }
 0x1c0   : > { %v9080_v58 = vpop.f32.mrb[12].mxu0 }
 0x1c1   : > { %v9081_v32 = vpop.f32.mrb[13].mxu0 }
 0x1c2   : > { %v11847_v60 = vadd.f32 %v9081_v32, %v9080_v58  ;;  %v9083_v47 = vpop.f32.mrb[14].mxu0 }
 0x1c3   : > { %v9084_v53 = vpop.f32.mrb[15].mxu0 }
 0x1c4   : > { %v11849_v55 = vadd.f32 %v9084_v53, %v9083_v47 }
 0x1c8   : > { %v9086_v2 = vpop.f32.mrb[16].mxu0 }
 0x1c9   : > { %v9087_v8 = vpop.f32.mrb[17].mxu0 }
 0x1ca   : > { %v11851_v61 = vadd.f32 %v9087_v8, %v9086_v2  ;;  %v9089_v57 = vpop.f32.mrb[18].mxu0 }
 0x1cb   : > { %v9090_v6 = vpop.f32.mrb[19].mxu0 }
 0x1cc   : > { %v11853_v18 = vadd.f32 %v9090_v6, %v9089_v57 }
 0x1d0   : > { %v9092_v0 = vpop.f32.mrb[20].mxu0 }
 0x1d1   : > { %v9093_v7 = vpop.f32.mrb[21].mxu0 }
 0x1d2   : > { %v11855_v9 = vadd.f32 %v9093_v7, %v9092_v0  ;;  %v9095_v45 = vpop.f32.mrb[22].mxu0 }
 0x1d3   : > { %v9096_v26 = vpop.f32.mrb[23].mxu0 }
 0x1d4   : > { %v11857_v15 = vadd.f32 %v9096_v26, %v9095_v45 }
 0x1d8   : > { %v9098_v62 = vpop.f32.mrb[24].mxu0 }
 0x1d9   : > { %v9099_v12 = vpop.f32.mrb[25].mxu0 }
 0x1da   : > { %v11859_v16 = vadd.f32 %v9099_v12, %v9098_v62  ;;  %v9101_v20 = vpop.f32.mrb[26].mxu0 }
 0x1db   : > { %v9102_v56 = vpop.f32.mrb[27].mxu0 }
 0x1dc   : > { %v11861_v50 = vadd.f32 %v9102_v56, %v9101_v20 }
 0x1e0   : > { %v9104_v42 = vpop.f32.mrb[28].mxu0 }
 0x1e1   : > { %v9105_v21 = vpop.f32.mrb[29].mxu0 }
 0x1e2   : > { %v11863_v28 = vadd.f32 %v9105_v21, %v9104_v42  ;;  %v9107_v22 = vpop.f32.mrb[30].mxu0 }
 0x1e3   : > { %v9108_v24 = vpop.f32.mrb[31].mxu0 }
 0x1e4   : > { %v11865_v1 = vadd.f32 %v9108_v24, %v9107_v22 }
 0x1e5   : > { %v9174_v29 = vpop.f32.mrb[0].mxu1 }
 0x1e6   : > { %v9175_v25 = vpop.f32.mrb[1].mxu1 }
 0x1e7   : > { %v9176_v49 = vadd.f32 %v9175_v25, %v9174_v29  ;;  %v9177_v27 = vpop.f32.mrb[2].mxu1  ;;  %v10261_v25 = vld [vmem:[%s15402_s1 + $0x160] sm:$0xff]  }
 0x1e8   : > { %v9110_v31 = vpop.f32.mrb[32].mxu0  ;;  %v9178_v4 = vpop.f32.mrb[3].mxu1  ;;  %9290 = vmatprep.subr.bf16.mxu1 %v10261_v25  ;;  %v10264_v25 = vld [vmem:[%s15402_s1 + $0x128] sm:$0xff]  }
 0x1e9   : > { %v9179_v54 = vadd.f32 %v9178_v4, %v9177_v27  ;;  %v9111_v38 = vpop.f32.mrb[33].mxu0  ;;  %v11867_v34 = vadd.f32 %v9176_v49, %v9064_v33 }
 0x1ea   : > { %v11869_v40 = vadd.f32 %v9111_v38, %v9110_v31  ;;  %v9113_v17 = vpop.f32.mrb[34].mxu0 }
 0x1eb   : > { %v9114_v41 = vpop.f32.mrb[35].mxu0  ;;  %v11872_v13 = vadd.f32 %v9179_v54, %v9067_v48 }
 0x1ec   : > { %v11874_v35 = vadd.f32 %v9114_v41, %v9113_v17 }
 0x1ed   : > { %v9180_v43 = vpop.f32.mrb[4].mxu1 }
 0x1ee   : > { %v9181_v39 = vpop.f32.mrb[5].mxu1 }
 0x1ef   : > { %v9182_v51 = vadd.f32 %v9181_v39, %v9180_v43  ;;  %v9183_v59 = vpop.f32.mrb[6].mxu1 }
 0x1f0   : > { %v9116_v46 = vpop.f32.mrb[36].mxu0  ;;  %v9184_v63 = vpop.f32.mrb[7].mxu1 }
 0x1f1   : > { %v9185_v3 = vadd.f32 %v9184_v63, %v9183_v59  ;;  %v9117_v11 = vpop.f32.mrb[37].mxu0  ;;  %v11877_v33 = vadd.f32 %v9182_v51, %v11839_v44 }
 0x1f2   : > { %v11879_v10 = vadd.f32 %v9117_v11, %v9116_v46  ;;  %v9119_v23 = vpop.f32.mrb[38].mxu0 }
 0x1f3   : > { %v9120_v19 = vpop.f32.mrb[39].mxu0  ;;  %v11882_v48 = vadd.f32 %v9185_v3, %v11841_v52 }
 0x1f4   : > { %v11884_v58 = vadd.f32 %v9120_v19, %v9119_v23 }
 0x1f5   : > { %v9186_v32 = vpop.f32.mrb[8].mxu1 }
 0x1f6   : > { %v9187_v47 = vpop.f32.mrb[9].mxu1 }
 0x1f7   : > { %v9188_v53 = vadd.f32 %v9187_v47, %v9186_v32  ;;  %v9189_v2 = vpop.f32.mrb[10].mxu1 }
 0x1f8   : > { %v9122_v8 = vpop.f32.mrb[40].mxu0  ;;  %v9190_v57 = vpop.f32.mrb[11].mxu1 }
 0x1f9   : > { %v9191_v6 = vadd.f32 %v9190_v57, %v9189_v2  ;;  %v9123_v0 = vpop.f32.mrb[41].mxu0  ;;  %v11887_v44 = vadd.f32 %v9188_v53, %v11843_v14 }
 0x1fa   : > { %v11889_v7 = vadd.f32 %v9123_v0, %v9122_v8  ;;  %v9125_v45 = vpop.f32.mrb[42].mxu0 }
 0x1fb   : > { %v9126_v26 = vpop.f32.mrb[43].mxu0  ;;  %v11892_v52 = vadd.f32 %v9191_v6, %v11845_v37  ;;  %v10262_v37 = vld [vmem:[%s15402_s1 + $0x120] sm:$0xff]  }
 0x1fc   : > { %v11894_v62 = vadd.f32 %v9126_v26, %v9125_v45  ;;  %9291 = vmatpush3.bf16.msra.mxu1 %v10262_v37  ;;  %v10265_v37 = vld [vmem:[%s15402_s1 + $0x170] sm:$0xff]  }
 0x1fd   : > { %v9192_v12 = vpop.f32.mrb[12].mxu1 }
 0x1fe   : > { %v9193_v20 = vpop.f32.mrb[13].mxu1 }
 0x1ff   : > { %v9194_v56 = vadd.f32 %v9193_v20, %v9192_v12  ;;  %v9195_v42 = vpop.f32.mrb[14].mxu1 }
 0x200   : > { %v9128_v21 = vpop.f32.mrb[44].mxu0  ;;  %v9196_v22 = vpop.f32.mrb[15].mxu1 }
 0x201   : > { %v9197_v24 = vadd.f32 %v9196_v22, %v9195_v42  ;;  %v9129_v29 = vpop.f32.mrb[45].mxu0  ;;  %v11897_v14 = vadd.f32 %v9194_v56, %v11847_v60 }
 0x202   : > { %v11905_v49 = vadd.f32 %v9129_v29, %v9128_v21  ;;  %v9131_v27 = vpop.f32.mrb[46].mxu0 }
 0x203   : > { %v9132_v5 = vpop.f32.mrb[47].mxu0  ;;  %v11908_v30 = vadd.f32 %v9197_v24, %v11849_v55 }
 0x204   : > { %v11910_v31 = vadd.f32 %v9132_v5, %v9131_v27 }
 0x205   : > { %v9198_v60 = vpop.f32.mrb[16].mxu1 }
 0x206   : > { %v9199_v4 = vpop.f32.mrb[17].mxu1 }
 0x207   : > { %v9200_v36 = vadd.f32 %v9199_v4, %v9198_v60  ;;  %v9201_v54 = vpop.f32.mrb[18].mxu1  ;;  %v10266_v4 = vld [vmem:[%s15402_s1 + $0x130] sm:$0xff]  }
 0x208   : > { %v9134_v38 = vpop.f32.mrb[48].mxu0  ;;  %v9202_v17 = vpop.f32.mrb[19].mxu1 }
 0x209   : > { %v9203_v41 = vadd.f32 %v9202_v17, %v9201_v54  ;;  %v9135_v43 = vpop.f32.mrb[49].mxu0  ;;  %v11913_v39 = vadd.f32 %v9200_v36, %v11851_v61  ;;  %v10267_v54 = vld [vmem:[%s15402_s1 + $0x178] sm:$0xff]  }
 0x20a   : > { %v11915_v51 = vadd.f32 %v9135_v43, %v9134_v38  ;;  %v9137_v59 = vpop.f32.mrb[50].mxu0 }
 0x20b   : > { %v9138_v55 = vpop.f32.mrb[51].mxu0  ;;  %v11918_v46 = vadd.f32 %v9203_v41, %v11853_v18 }
 0x20c   : > { %v11920_v63 = vadd.f32 %v9138_v55, %v9137_v59 }
 0x20d   : > { %v9204_v3 = vpop.f32.mrb[20].mxu1 }
 0x20e   : > { %v9205_v11 = vpop.f32.mrb[21].mxu1 }
 0x20f   : > { %v9206_v23 = vadd.f32 %v9205_v11, %v9204_v3  ;;  %v9207_v19 = vpop.f32.mrb[22].mxu1  ;;  %v10268_v3 = vld [vmem:[%s15402_s1 + $0x138] sm:$0xff]  }
 0x210   : > { %v9140_v32 = vpop.f32.mrb[52].mxu0  ;;  %v9208_v47 = vpop.f32.mrb[23].mxu1 }
 0x211   : > { %v9209_v53 = vadd.f32 %v9208_v47, %v9207_v19  ;;  %v9141_v2 = vpop.f32.mrb[53].mxu0  ;;  %v11923_v61 = vadd.f32 %v9206_v23, %v11855_v9 }
 0x212   : > { %v11925_v8 = vadd.f32 %v9141_v2, %v9140_v32  ;;  %v9143_v57 = vpop.f32.mrb[54].mxu0  ;;  %v10270_v2 = vld [vmem:[%s15402_s1 + $0x140] sm:$0xff]  }
 0x213   : > { %v9144_v6 = vpop.f32.mrb[55].mxu0  ;;  %v11928_v18 = vadd.f32 %v9209_v53, %v11857_v15  ;;  %v10263_v15 = vld [vmem:[%s15402_s1 + $0x168] sm:$0xff]  }
 0x214   : > { %v11930_v0 = vadd.f32 %v9144_v6, %v9143_v57  ;;  %9292 = vmatprep.subr.bf16.mxu1 %v10263_v15 }
 0x215   : > { %v9210_v45 = vpop.f32.mrb[24].mxu1  ;;  %9293 = vmatpush3.bf16.msra.mxu1 %v10264_v25 }
 0x216   : > { %v9211_v26 = vpop.f32.mrb[25].mxu1  ;;  %9294 = vmatprep.subr.bf16.mxu1 %v10265_v37 }
 0x217   : > { %v9212_v12 = vadd.f32 %v9211_v26, %v9210_v45  ;;  %v9213_v20 = vpop.f32.mrb[26].mxu1 }
 0x218   : > { %v9146_v56 = vpop.f32.mrb[56].mxu0  ;;  %v9214_v42 = vpop.f32.mrb[27].mxu1 }
 0x219   : > { %v9215_v21 = vadd.f32 %v9214_v42, %v9213_v20  ;;  %v9147_v22 = vpop.f32.mrb[57].mxu0  ;;  %v11933_v9 = vadd.f32 %v9212_v12, %v11859_v16  ;;  %9295 = vmatpush3.bf16.msra.mxu1 %v10266_v4 }
 0x21a   : > { %v11935_v24 = vadd.f32 %v9147_v22, %v9146_v56  ;;  %v9149_v29 = vpop.f32.mrb[58].mxu0  ;;  %9296 = vmatprep.subr.bf16.mxu1 %v10267_v54  ;;  %v11988_v22 = vld [vmem:[%s15404_s3] ss:$0 sm:$0xff] }
 0x21b   : > { %v9150_v27 = vpop.f32.mrb[59].mxu0  ;;  %v11947_v5 = vadd.f32 %v9215_v21, %v11861_v50 }
 0x21c   : > { %v11949_v16 = vadd.f32 %v9150_v27, %v9149_v29 }
 0x21d   : > { %v9216_v60 = vpop.f32.mrb[28].mxu1  ;;  %9297 = vmatpush3.bf16.msra.mxu1 %v10268_v3 }
 0x21e   : > { %v9217_v36 = vpop.f32.mrb[29].mxu1 }
 0x21f   : > { %v9218_v38 = vadd.f32 %v9217_v36, %v9216_v60  ;;  %v9219_v17 = vpop.f32.mrb[30].mxu1 }
 0x220   : > { %v9152_v41 = vpop.f32.mrb[60].mxu0  ;;  %v9220_v50 = vpop.f32.mrb[31].mxu1 }
 0x221   : > { %v9221_v43 = vadd.f32 %v9220_v50, %v9219_v17  ;;  %v9153_v59 = vpop.f32.mrb[61].mxu0  ;;  %v11958_v55 = vadd.f32 %v9218_v38, %v11863_v28  ;;  %v10269_v28 = vld [vmem:[%s15402_s1 + $0x180] sm:$0xff]  }
 0x222   : > { %v11963_v11 = vadd.f32 %v9153_v59, %v9152_v41  ;;  %v9155_v23 = vpop.f32.mrb[62].mxu0  ;;  %9298 = vmatprep.subr.bf16.mxu1 %v10269_v28 }
 0x223   : > { %v9156_v19 = vpop.f32.mrb[63].mxu0  ;;  %v11966_v32 = vadd.f32 %v9221_v43, %v11865_v1  ;;  %v11979_v1 = vld [vmem:[%s15403_s2] ss:$0 sm:$0xff]  ;;  %9299 = vmatpush3.bf16.msra.mxu1 %v10270_v2 }
 0x224   : > { %v11968_v47 = vadd.f32 %v9156_v19, %v9155_v23 }
 0x225   : > { %v9222_v53 = vpop.f32.mrb[32].mxu1 }
 0x226   : > { %v9223_v57 = vpop.f32.mrb[33].mxu1 }
 0x227   : > { %v9224_v6 = vadd.f32 %v9223_v57, %v9222_v53  ;;  %v9225_v45 = vpop.f32.mrb[34].mxu1 }
 0x228   : > { %v9226_v26 = vpop.f32.mrb[35].mxu1  ;;  %v10032_v12 = vpop.f32.mrb[64].mxu0 }
 0x229   : > { %v9227_v20 = vadd.f32 %v9226_v26, %v9225_v45  ;;  %v2041_v56 = vadd.f32 %v10032_v12, %v11877_v33  ;;  %v2032_v42 = vpop.f32.mrb[65].mxu0  ;;  %v11983_v21 = vadd.f32 %v9224_v6, %v11869_v40 }
 0x22a   : > { %v2033_v29 = vadd.f32 %v2032_v42, %v11867_v34  ;;  %v10033_v15 = vpop.f32.mrb[66].mxu0 }
 0x22b   : > { %v2168_v25 = vmul.f32 %v11979_v1, %v2041_v56  ;;  %v2044_v37 = vadd.f32 %v10033_v15, %v11882_v48  ;;  %v2035_v27 = vpop.f32.mrb[67].mxu0  ;;  %v11994_v33 = vadd.f32 %v9227_v20, %v11874_v35 }
 0x22c   : > { %v2166_v40 = vmul.f32 %v11979_v1, %v2033_v29  ;;  %v2036_v60 = vadd.f32 %v2035_v27, %v11872_v13 }
 0x22d   : > { %v11999_v4 = vadd.f32 %v11988_v22, %v2168_v25  ;;  %v2169_v36 = vmul.f32 %v11979_v1, %v2044_v37  ;;  %v9228_v54 = vpop.f32.mrb[36].mxu1 }
 0x22e   : > { %v12003_v34 = vadd.f32 %v11988_v22, %v2166_v40  ;;  %v2167_v38 = vmul.f32 %v11979_v1, %v2036_v60  ;;  %v9229_v48 = vpop.f32.mrb[37].mxu1  ;;  %v10272_v40 = vld [vmem:[%s15402_s1 + $0x148] sm:$0xff]  }
 0x22f   : > { %v2239_v17 = vsub.f32 0.0, %v11999_v4  ;;  %v12008_v35 = vadd.f32 %v11988_v22, %v2169_v36  ;;  %v9230_v41 = vadd.f32 %v9229_v48, %v9228_v54  ;;  %v9231_v50 = vpop.f32.mrb[38].mxu1 }
 0x230   : > { %v2237_v13 = vsub.f32 0.0, %v12003_v34  ;;  %v12012_v43 = vadd.f32 %v11988_v22, %v2167_v38  ;;  %v9232_v59 = vpop.f32.mrb[39].mxu1  ;;  %v10036_v3 = vpop.f32.mrb[68].mxu0 }
 0x231   : > { %v2273_v23 = vmul.f32 1.442695, %v2239_v17  ;;  %v2240_v19 = vsub.f32 0.0, %v12008_v35  ;;  %v9233_v53 = vadd.f32 %v9232_v59, %v9231_v50  ;;  %v2057_v28 = vadd.f32 %v10036_v3, %v11897_v14  ;;  %v2048_v2 = vpop.f32.mrb[69].mxu0 }
 0x232   : > { %v2269_v57 = vmul.f32 1.442695, %v2237_v13  ;;  %v2238_v6 = vsub.f32 0.0, %v12012_v43  ;;  %v2049_v45 = vadd.f32 %v2048_v2, %v11887_v44  ;;  %v10037_v26 = vpop.f32.mrb[70].mxu0  ;;  %v12019_v12 = vadd.f32 %v9230_v41, %v11879_v10 }
 0x233   : > { %10369 = vpow2.f32 %v2273_v23  ;;  %v2275_v20 = vmul.f32 1.442695, %v2240_v19  ;;  %v2172_v56 = vmul.f32 %v11979_v1, %v2057_v28  ;;  %v2060_v42 = vadd.f32 %v10037_v26, %v11908_v30  ;;  %v2051_v29 = vpop.f32.mrb[71].mxu0  ;;  %v10271_v30 = vld [vmem:[%s15402_s1 + $0x188] sm:$0xff]  }
 0x234   : > { %10371 = vpow2.f32 %v2269_v57  ;;  %v2271_v15 = vmul.f32 1.442695, %v2238_v6  ;;  %v2170_v14 = vmul.f32 %v11979_v1, %v2049_v45  ;;  %v2052_v25 = vadd.f32 %v2051_v29, %v11892_v52  ;;  %9300 = vmatprep.subr.bf16.mxu1 %v10271_v30 }
 0x235   : > { %10373 = vpow2.f32 %v2275_v20  ;;  %v12026_v44 = vadd.f32 %v11988_v22, %v2172_v56  ;;  %v2173_v10 = vmul.f32 %v11979_v1, %v2060_v42  ;;  %v9234_v37 = vpop.f32.mrb[40].mxu1  ;;  %v12030_v27 = vadd.f32 %v9233_v53, %v11884_v58  ;;  %9301 = vmatpush3.bf16.msra.mxu1 %v10272_v40 }
 0x236   : > { %10375 = vpow2.f32 %v2271_v15  ;;  %v12039_v52 = vadd.f32 %v11988_v22, %v2170_v14  ;;  %v2171_v60 = vmul.f32 %v11979_v1, %v2052_v25  ;;  %v9235_v36 = vpop.f32.mrb[41].mxu1 }
 0x237   : > { %v2243_v54 = vsub.f32 0.0, %v12026_v44  ;;  %v12044_v58 = vadd.f32 %v11988_v22, %v2173_v10  ;;  %v9236_v38 = vadd.f32 %v9235_v36, %v9234_v37  ;;  %v9237_v48 = vpop.f32.mrb[42].mxu1 }
 0x238   : > { %v2241_v17 = vsub.f32 0.0, %v12039_v52  ;;  %v12048_v41 = vadd.f32 %v11988_v22, %v2171_v60  ;;  %v9238_v50 = vpop.f32.mrb[43].mxu1  ;;  %v10040_v13 = vpop.f32.mrb[72].mxu0 }
 0x239   : > { %v2281_v59 = vmul.f32 1.442695, %v2243_v54  ;;  %v2244_v3 = vsub.f32 0.0, %v12044_v58  ;;  %v9239_v23 = vadd.f32 %v9238_v50, %v9237_v48  ;;  %v2073_v19 = vadd.f32 %v10040_v13, %v11923_v61  ;;  %v2064_v53 = vpop.f32.mrb[73].mxu0 }
 0x23a   : > { %v2277_v28 = vmul.f32 1.442695, %v2241_v17  ;;  %v2242_v2 = vsub.f32 0.0, %v12048_v41  ;;  %v2065_v57 = vadd.f32 %v2064_v53, %v11913_v39  ;;  %v10041_v6 = vpop.f32.mrb[74].mxu0  ;;  %v12055_v45 = vadd.f32 %v9236_v38, %v11889_v7 }
 0x23b   : > { %10377 = vpow2.f32 %v2281_v59  ;;  %v2283_v26 = vmul.f32 1.442695, %v2244_v3  ;;  %v2176_v20 = vmul.f32 %v11979_v1, %v2073_v19  ;;  %v2076_v56 = vadd.f32 %v10041_v6, %v11928_v18  ;;  %v2067_v42 = vpop.f32.mrb[75].mxu0 }
 0x23c   : > { %10379 = vpow2.f32 %v2277_v28  ;;  %v2279_v29 = vmul.f32 1.442695, %v2242_v2  ;;  %v2174_v61 = vmul.f32 %v11979_v1, %v2065_v57  ;;  %v2068_v15 = vadd.f32 %v2067_v42, %v11918_v46 }
 0x23d   : > { %v10370_v14 = vpop.eup %10369  ;;  %10381 = vpow2.f32 %v2283_v26  ;;  %v12062_v39 = vadd.f32 %v11988_v22, %v2176_v20  ;;  %v2177_v7 = vmul.f32 %v11979_v1, %v2076_v56  ;;  %v9240_v25 = vpop.f32.mrb[44].mxu1  ;;  %v12066_v10 = vadd.f32 %v9239_v23, %v11894_v62 }
 0x23e   : > { %v10372_v37 = vpop.eup %10371  ;;  %v2335_v18 = vadd.f32 1.0, %v10370_v14  ;;  %10383 = vpow2.f32 %v2279_v29  ;;  %v12069_v30 = vadd.f32 %v11988_v22, %v2174_v61  ;;  %v2175_v40 = vmul.f32 %v11979_v1, %v2068_v15  ;;  %v9241_v46 = vpop.f32.mrb[45].mxu1 }
 0x23f   : > { %v10374_v60 = vpop.eup %10373  ;;  %v2333_v36 = vadd.f32 1.0, %v10372_v37  ;;  %v2247_v54 = vsub.f32 0.0, %v12062_v39  ;;  %v12074_v38 = vadd.f32 %v11988_v22, %v2177_v7  ;;  %v9242_v48 = vadd.f32 %v9241_v46, %v9240_v25  ;;  %v9243_v17 = vpop.f32.mrb[46].mxu1 }
 0x240   : > { %v10376_v62 = vpop.eup %10375  ;;  %10385 = vrcp.f32 %v2335_v18  ;;  %v2336_v50 = vadd.f32 1.0, %v10374_v60  ;;  %v2245_v13 = vsub.f32 0.0, %v12069_v30  ;;  %v12078_v59 = vadd.f32 %v11988_v22, %v2175_v40  ;;  %v9244_v3 = vpop.f32.mrb[47].mxu1 }
 0x241   : > { %v10044_v23 = vpop.f32.mrb[76].mxu0  ;;  %10387 = vrcp.f32 %v2333_v36  ;;  %v2334_v19 = vadd.f32 1.0, %v10376_v62  ;;  %v2289_v53 = vmul.f32 1.442695, %v2247_v54  ;;  %v2248_v28 = vsub.f32 0.0, %v12074_v38 }
 0x242   : > { %v2080_v2 = vpop.f32.mrb[77].mxu0  ;;  %10389 = vrcp.f32 %v2336_v50  ;;  %v2285_v57 = vmul.f32 1.442695, %v2245_v13  ;;  %v2246_v6 = vsub.f32 0.0, %v12078_v59  ;;  %v12082_v26 = vadd.f32 %v9244_v3, %v9243_v17 }
 0x243   : > { %v10045_v20 = vpop.f32.mrb[78].mxu0  ;;  %10391 = vrcp.f32 %v2334_v19  ;;  %v2291_v56 = vmul.f32 1.442695, %v2248_v28  ;;  %v2089_v42 = vadd.f32 %v10044_v23, %v11958_v55  ;;  %v2081_v29 = vadd.f32 %v2080_v2, %v11933_v9  ;;  %v10273_v9 = vld [vmem:[%s15402_s1 + $0x190] sm:$0xff]  }
 0x244   : > { %v2083_v61 = vpop.f32.mrb[79].mxu0  ;;  %10393 = vpow2.f32 %v2289_v53  ;;  %v2287_v15 = vmul.f32 1.442695, %v2246_v6  ;;  %v2092_v14 = vadd.f32 %v10045_v20, %v11966_v32  ;;  %v12091_v46 = vadd.f32 %v9242_v48, %v11905_v49  ;;  %v10274_v55 = vld [vmem:[%s15402_s1 + $0x150] sm:$0xff]   ;;  %9302 = vmatprep.subr.bf16.mxu1 %v10273_v9 }
 0x245   : > { %v2084_v7 = vadd.f32 %v2083_v61, %v11947_v5  ;;  %v10378_v25 = vpop.eup %10377  ;;  %10395 = vpow2.f32 %v2285_v57  ;;  %v2180_v37 = vmul.f32 %v11979_v1, %v2089_v42  ;;  %v2178_v18 = vmul.f32 %v11979_v1, %v2081_v29  ;;  %v9246_v40 = vpop.f32.mrb[48].mxu1  ;;  %9303 = vmatpush3.bf16.msra.mxu1 %v10274_v55 }
 0x246   : > { %v10380_v32 = vpop.eup %10379  ;;  %v2339_v5 = vadd.f32 1.0, %v10378_v25  ;;  %10397 = vpow2.f32 %v2291_v56  ;;  %v2181_v60 = vmul.f32 %v11979_v1, %v2092_v14  ;;  %v9247_v54 = vpop.f32.mrb[49].mxu1 }
 0x247   : > { %v2179_v36 = vmul.f32 %v11979_v1, %v2084_v7  ;;  %v10382_v17 = vpop.eup %10381  ;;  %v2337_v62 = vadd.f32 1.0, %v10380_v32  ;;  %10399 = vpow2.f32 %v2287_v15  ;;  %v12102_v49 = vadd.f32 %v11988_v22, %v2180_v37  ;;  %v9249_v50 = vpop.f32.mrb[50].mxu1 }
 0x248   : > { %v12105_v48 = vadd.f32 %v11988_v22, %v2178_v18  ;;  %v10384_v13 = vpop.eup %10383  ;;  %10401 = vrcp.f32 %v2339_v5  ;;  %v2340_v3 = vadd.f32 1.0, %v10382_v17  ;;  %v12108_v23 = vadd.f32 %v11988_v22, %v2181_v60  ;;  %v9250_v53 = vpop.f32.mrb[51].mxu1 }
 0x249   : > { %v12111_v19 = vadd.f32 %v11988_v22, %v2179_v36  ;;  %v10048_v28 = vpop.f32.mrb[80].mxu0  ;;  %10403 = vrcp.f32 %v2337_v62  ;;  %v2338_v2 = vadd.f32 1.0, %v10384_v13  ;;  %v2251_v57 = vsub.f32 0.0, %v12102_v49 }
 0x24a   : > { %v2249_v6 = vsub.f32 0.0, %v12105_v48  ;;  %v2096_v20 = vpop.f32.mrb[81].mxu0  ;;  %v10386_v56 = vpop.eup %10385  ;;  %10405 = vrcp.f32 %v2340_v3  ;;  %v2252_v42 = vsub.f32 0.0, %v12108_v23  ;;  %v12117_v61 = vadd.f32 %v9247_v54, %v9246_v40 }
 0x24b   : > { %v2250_v29 = vsub.f32 0.0, %v12111_v19  ;;  %v10049_v15 = vpop.f32.mrb[82].mxu0  ;;  %v10388_v14 = vpop.eup %10387  ;;  %v2431_v7 = vmul.f32 %v10386_v56, %v11999_v4  ;;  %10407 = vrcp.f32 %v2338_v2  ;;  %v2297_v25 = vmul.f32 1.442695, %v2251_v57 }
 0x24c   : > { %v2293_v37 = vmul.f32 1.442695, %v2249_v6  ;;  %v2099_v18 = vpop.f32.mrb[83].mxu0  ;;  %v10390_v9 = vpop.eup %10389  ;;  %v2429_v55 = vmul.f32 %v10388_v14, %v12003_v34  ;;  %v2299_v32 = vmul.f32 1.442695, %v2252_v42  ;;  %v12121_v60 = vadd.f32 %v9250_v53, %v9249_v50 }
 0x24d   : > { %v2295_v5 = vmul.f32 1.442695, %v2250_v29  ;;  %v10392_v36 = vpop.eup %10391  ;;  %2464 = vst.msk [vmem:[#allocation3 + $0x31] sm:$0xff] %vm251_vm0, %v2431_v7  ;;  %v2432_v40 = vmul.f32 %v10390_v9, %v12008_v35  ;;  %10409 = vpow2.f32 %v2297_v25  ;;  %v2105_v54 = vadd.f32 %v10048_v28, %v12019_v12  ;;  %v9252_v17 = vpop.f32.mrb[52].mxu1 }
 0x24e   : > { %v2097_v4 = vadd.f32 %v2096_v20, %v11983_v21  ;;  %v10394_v62 = vpop.eup %10393  ;;  %2462 = vst.msk [vmem:[#allocation3 + $0x19] sm:$0xff] %vm251_vm0, %v2429_v55  ;;  %v2430_v34 = vmul.f32 %v10392_v36, %v12012_v43  ;;  %10411 = vpow2.f32 %v2293_v37  ;;  %v2108_v50 = vadd.f32 %v10049_v15, %v12030_v27  ;;  %v9253_v3 = vpop.f32.mrb[53].mxu1 }
 0x24f   : > { %v2100_v13 = vadd.f32 %v2099_v18, %v11994_v33  ;;  %v10396_v53 = vpop.eup %10395  ;;  %2465 = vst.msk [vmem:[#allocation3 + $0x39] sm:$0xff] %vm251_vm0, %v2432_v40  ;;  %v2343_v35 = vadd.f32 1.0, %v10394_v62  ;;  %10413 = vpow2.f32 %v2299_v32  ;;  %v2184_v12 = vmul.f32 %v11979_v1, %v2105_v54  ;;  %v9255_v28 = vpop.f32.mrb[54].mxu1 }
 0x250   : > { %v2182_v21 = vmul.f32 %v11979_v1, %v2097_v4  ;;  %v10398_v2 = vpop.eup %10397  ;;  %2463 = vst.msk [vmem:[#allocation3 + $0x21] sm:$0xff] %vm251_vm0, %v2430_v34  ;;  %v2341_v43 = vadd.f32 1.0, %v10396_v53  ;;  %10415 = vpow2.f32 %v2295_v5  ;;  %v2185_v27 = vmul.f32 %v11979_v1, %v2108_v50  ;;  %v9256_v57 = vpop.f32.mrb[55].mxu1 }
 0x251   : > { %v2183_v33 = vmul.f32 %v11979_v1, %v2100_v13  ;;  %v10052_v6 = vpop.f32.mrb[84].mxu0  ;;  %v10400_v20 = vpop.eup %10399  ;;  %10417 = vrcp.f32 %v2343_v35  ;;  %v2344_v56 = vadd.f32 1.0, %v10398_v2  ;;  %v12138_v42 = vadd.f32 %v11988_v22, %v2184_v12 }
 0x252   : > { %v12141_v29 = vadd.f32 %v11988_v22, %v2182_v21  ;;  %v2112_v15 = vpop.f32.mrb[85].mxu0  ;;  %v10402_v14 = vpop.eup %10401  ;;  %10419 = vrcp.f32 %v2341_v43  ;;  %v2342_v7 = vadd.f32 1.0, %v10400_v20  ;;  %v12144_v25 = vadd.f32 %v11988_v22, %v2185_v27 }
 0x253   : > { %v12147_v37 = vadd.f32 %v11988_v22, %v2183_v33  ;;  %v10053_v18 = vpop.f32.mrb[86].mxu0  ;;  %v10404_v9 = vpop.eup %10403  ;;  %v2435_v55 = vmul.f32 %v10402_v14, %v12026_v44  ;;  %10421 = vrcp.f32 %v2344_v56  ;;  %v2255_v32 = vsub.f32 0.0, %v12138_v42 }
 0x254   : > { %v2253_v5 = vsub.f32 0.0, %v12141_v29  ;;  %v2115_v36 = vpop.f32.mrb[87].mxu0  ;;  %v10406_v40 = vpop.eup %10405  ;;  %v2433_v54 = vmul.f32 %v10404_v9, %v12039_v52  ;;  %10423 = vrcp.f32 %v2342_v7  ;;  %v2256_v4 = vsub.f32 0.0, %v12144_v25 }
 0x255   : > { %v2254_v62 = vsub.f32 0.0, %v12147_v37  ;;  %v10408_v34 = vpop.eup %10407  ;;  %2468 = vst.msk [vmem:[#allocation3 + $0x61] sm:$0xff] %vm251_vm0, %v2435_v55  ;;  %v2436_v50 = vmul.f32 %v10406_v40, %v12044_v58  ;;  %v2305_v44 = vmul.f32 1.442695, %v2255_v32  ;;  %v12157_v53 = vadd.f32 %v9253_v3, %v9252_v17  ;;  %v9258_v35 = vpop.f32.mrb[56].mxu1 }
 0x256   : > { %v2301_v13 = vmul.f32 1.442695, %v2253_v5  ;;  %2466 = vst.msk [vmem:[#allocation3 + $0x49] sm:$0xff] %vm251_vm0, %v2433_v54  ;;  %v2434_v12 = vmul.f32 %v10408_v34, %v12048_v41  ;;  %v2307_v52 = vmul.f32 1.442695, %v2256_v4  ;;  %v12161_v2 = vadd.f32 %v9256_v57, %v9255_v28  ;;  %v9259_v43 = vpop.f32.mrb[57].mxu1 }
 0x257   : > { %v2303_v21 = vmul.f32 1.442695, %v2254_v62  ;;  %v10410_v27 = vpop.eup %10409  ;;  %2469 = vst.msk [vmem:[#allocation3 + $0x69] sm:$0xff] %vm251_vm0, %v2436_v50  ;;  %10425 = vpow2.f32 %v2305_v44  ;;  %v2121_v58 = vadd.f32 %v10052_v6, %v12091_v46  ;;  %v2113_v33 = vadd.f32 %v2112_v15, %v12055_v45  ;;  %v9261_v3 = vpop.f32.mrb[58].mxu1  ;;  %v10275_v6 = vld [vmem:[%s15402_s1 + $0x198] sm:$0xff]  }
 0x258   : > { %v1963_v17 = vadd.f32 %v12082_v26, %v11910_v31  ;;  %v10412_v20 = vpop.eup %10411  ;;  %2467 = vst.msk [vmem:[#allocation3 + $0x51] sm:$0xff] %vm251_vm0, %v2434_v12  ;;  %v2347_v41 = vadd.f32 1.0, %v10410_v27  ;;  %10427 = vpow2.f32 %v2301_v13  ;;  %v2116_v28 = vadd.f32 %v2115_v36, %v12066_v10  ;;  %v9262_v56 = vpop.f32.mrb[59].mxu1  ;;  %v10276_v5 = vld [vmem:[%s15402_s1 + $0x158] sm:$0xff]   ;;  %9304 = vmatprep.subr.bf16.mxu1 %v10275_v6 }
 0x259   : > { %v12170_v57 = vadd.f32 %v9259_v43, %v9258_v35  ;;  %v12172_v14 = vpop.f32.mrb[88].mxu0  ;;  %v10414_v7 = vpop.eup %10413  ;;  %v2345_v46 = vadd.f32 1.0, %v10412_v20  ;;  %10429 = vpow2.f32 %v2307_v52  ;;  %v2188_v45 = vmul.f32 %v11979_v1, %v2121_v58  ;;  %9305 = vmatpush3.bf16.msra.mxu1 %v10276_v5  ;;  %v2561_v5 = vld [vmem:[#allocation3 + $0x21] sm:$0xff] }
 0x25a   : > { %v2186_v31 = vmul.f32 %v11979_v1, %v2113_v33  ;;  %v12176_v26 = vpop.f32.mrb[89].mxu0  ;;  %v10416_v15 = vpop.eup %10415  ;;  %10431 = vrcp.f32 %v2347_v41  ;;  %v2348_v10 = vadd.f32 1.0, %v10414_v7  ;;  %v2124_v9 = vadd.f32 %v10053_v18, %v1963_v17  ;;  %v2751_v17 = vld [vmem:[#allocation3 + $0x20] sm:$0xff] }
 0x25b   : > { %v2187_v55 = vmul.f32 %v11979_v1, %v2116_v28  ;;  %v12182_v32 = vpop.f32.mrb[90].mxu0  ;;  %v10418_v36 = vpop.eup %10417  ;;  %10433 = vrcp.f32 %v2345_v46  ;;  %v2346_v40 = vadd.f32 1.0, %v10416_v15  ;;  %v12188_v54 = vadd.f32 %v11988_v22, %v2188_v45  ;;  %v2750_v15 = vld [vmem:[#allocation3 + $0x18] sm:$0xff] }
 0x25c   : > { %v12191_v4 = vadd.f32 %v11988_v22, %v2186_v31  ;;  %v12193_v62 = vpop.f32.mrb[91].mxu0  ;;  %v10420_v18 = vpop.eup %10419  ;;  %v2439_v34 = vmul.f32 %v10418_v36, %v12062_v39  ;;  %10435 = vrcp.f32 %v2348_v10  ;;  %v2189_v50 = vmul.f32 %v11979_v1, %v2124_v9 }
 0x25d   : > { %v12198_v44 = vadd.f32 %v11988_v22, %v2187_v55  ;;  %v10422_v13 = vpop.eup %10421  ;;  %v2437_v35 = vmul.f32 %v10420_v18, %v12069_v30  ;;  %10437 = vrcp.f32 %v2346_v40  ;;  %v2259_v12 = vsub.f32 0.0, %v12188_v54  ;;  %v12203_v43 = vpop.f32.mrb[60].mxu1 }
 0x25e   : > { %v2257_v52 = vsub.f32 0.0, %v12191_v4  ;;  %v10424_v27 = vpop.eup %10423  ;;  %2472 = vst.msk [vmem:[#allocation3 + $0x91] sm:$0xff] %vm251_vm0, %v2439_v34  ;;  %v2440_v39 = vmul.f32 %v10422_v13, %v12074_v38  ;;  %10439 = vpow2.f32 %v2303_v21  ;;  %v12208_v58 = vadd.f32 %v11988_v22, %v2189_v50  ;;  %v12211_v30 = vpop.f32.mrb[61].mxu1  ;;  %v2560_v13 = vld [vmem:[#allocation3 + $0x19] sm:$0xff] }
 0x25f   : > { %v2258_v33 = vsub.f32 0.0, %v12198_v44  ;;  %v3265_v20 = vld [vmem:[#allocation3 + $0x4a] sm:$0xff]  ;;  %v3266_v41 = vld [vmem:[#allocation3 + $0x52] sm:$0xff]  ;;  %2470 = vst.msk [vmem:[#allocation3 + $0x79] sm:$0xff] %vm251_vm0, %v2437_v35  ;;  %v2438_v28 = vmul.f32 %v10424_v27, %v12078_v59  ;;  %v2313_v7 = vmul.f32 1.442695, %v2259_v12  ;;  %v12215_v45 = vadd.f32 %v9262_v56, %v9261_v3 }
 0x260   : > { %v2309_v46 = vmul.f32 1.442695, %v2257_v52  ;;  %v12217_v38 = vpack.c.bf16 %v3266_v41, %v3265_v20  ;;  %2473 = vst.msk [vmem:[#allocation3 + $0x99] sm:$0xff] %vm251_vm0, %v2440_v39  ;;  %v2260_v21 = vsub.f32 0.0, %v12208_v58  ;;  %v1976_v6 = vadd.f32 %v12157_v53, %v11925_v8  ;;  %v12223_v10 = vpop.f32.mrb[62].mxu1  ;;  %v12225_v9 = vpop.f32.mrb[92].mxu0 }
 0x261   : > { %v2311_v31 = vmul.f32 1.442695, %v2258_v33  ;;  %v10426_v59 = vpop.eup %10425  ;;  %2471 = vst.msk [vmem:[#allocation3 + $0x81] sm:$0xff] %vm251_vm0, %v2438_v28  ;;  %10441 = vpow2.f32 %v2313_v7  ;;  %v1968_v3 = vadd.f32 %v12117_v61, %v11915_v51  ;;  %v1979_v56 = vadd.f32 %v12161_v2, %v11930_v0  ;;  %v9268_v36 = vpop.f32.mrb[63].mxu1  ;;  %v2753_v7 = vld [vmem:[#allocation3 + $0x38] sm:$0xff] }
 0x262   : > { %v2782_v55 = vpack.c.bf16 %v2751_v17, %v2750_v15  ;;  %v12232_v40 = vpop.f32.mrb[93].mxu0  ;;  %v10428_v8 = vpop.eup %10427  ;;  %3312 = vst.msk [vmem:[#allocation4 + $0x48] sm:$0xff] %vm251_vm0, %v12217_v38  ;;  %v2351_v53 = vadd.f32 1.0, %v10426_v59  ;;  %10443 = vpow2.f32 %v2309_v46  ;;  %v2315_v18 = vmul.f32 1.442695, %v2260_v21  ;;  %v2752_v59 = vld [vmem:[#allocation3 + $0x30] sm:$0xff] }
 0x263   : > { %v2137_v34 = vadd.f32 %v12172_v14, %v1976_v6  ;;  %v12237_v50 = vpop.f32.mrb[94].mxu0  ;;  %v10430_v51 = vpop.eup %10429  ;;  %v2349_v61 = vadd.f32 1.0, %v10428_v8  ;;  %10445 = vpow2.f32 %v2311_v31  ;;  %v2129_v0 = vadd.f32 %v12176_v26, %v1968_v3  ;;  %v2563_v31 = vld [vmem:[#allocation3 + $0x39] sm:$0xff]  ;;  %v2562_v8 = vld [vmem:[#allocation3 + $0x31] sm:$0xff] }
 0x264   : > { %v2140_v2 = vadd.f32 %v12182_v32, %v1979_v56  ;;  %2814 = vrot.lane.b32.xlu0 %v2782_v55, %s10949_s9  ;;  %v12242_v35 = vpop.f32.mrb[95].mxu0  ;;  %2543 = vst.msk [vmem:[#allocation4 + $0x28] sm:$0xff] %vm251_vm0, %v2782_v55  ;;  %v10432_v12 = vpop.eup %10431  ;;  %10447 = vrcp.f32 %v2351_v53  ;;  %v2352_v52 = vadd.f32 1.0, %v10430_v51  ;;  %v2591_v27 = vpack.c.bf16 %v2561_v5, %v2560_v13 }
 0x265   : > { %v2192_v14 = vmul.f32 %v11979_v1, %v2137_v34  ;;  %v10434_v39 = vpop.eup %10433  ;;  %v2443_v33 = vmul.f32 %v10432_v12, %v12102_v49  ;;  %10449 = vrcp.f32 %v2349_v61  ;;  %v2190_v26 = vmul.f32 %v11979_v1, %v2129_v0 }
 0x266   : > { %v2193_v32 = vmul.f32 %v11979_v1, %v2140_v2  ;;  %v10436_v17 = vpop.eup %10435  ;;  %v2441_v20 = vmul.f32 %v10434_v39, %v12105_v48  ;;  %10451 = vrcp.f32 %v2352_v52  ;;  %2624 = vrot.lane.b32.xlu1 %v2591_v27, %s10949_s9  ;;  %v1971_v28 = vadd.f32 %v12121_v60, %v11920_v63 }
 0x267   : > { %v12251_v41 = vadd.f32 %v11988_v22, %v2192_v14  ;;  %v10438_v46 = vpop.eup %10437  ;;  %2476 = vst.msk [vmem:[#allocation3 + $0xc1] sm:$0xff] %vm251_vm0, %v2443_v33  ;;  %v2444_v49 = vmul.f32 %v10436_v17, %v12108_v23  ;;  %10453 = vpow2.f32 %v2315_v18  ;;  %v12259_v21 = vadd.f32 %v11988_v22, %v2190_v26  ;;  %v2755_v17 = vld [vmem:[#allocation3 + $0x50] sm:$0xff] }
 0x268   : > { %v12262_v48 = vadd.f32 %v11988_v22, %v2193_v32  ;;  %v10440_v6 = vpop.eup %10439  ;;  %2474 = vst.msk [vmem:[#allocation3 + $0xa9] sm:$0xff] %vm251_vm0, %v2441_v20  ;;  %v2442_v15 = vmul.f32 %v10438_v46, %v12111_v19  ;;  %v2132_v60 = vadd.f32 %v12193_v62, %v1971_v28  ;;  %v9266_v23 = vadd.f32 %v12211_v30, %v12203_v43  ;;  %v10277_v19 = vld [vmem:[%s15402_s1 + $0x220] sm:$0xff]  }
 0x269   : > { %v2263_v63 = vsub.f32 0.0, %v12251_v41  ;;  %2477 = vst.msk [vmem:[#allocation3 + $0xc9] sm:$0xff] %vm251_vm0, %v2444_v49  ;;  %v2350_v3 = vadd.f32 1.0, %v10440_v6  ;;  %v2261_v56 = vsub.f32 0.0, %v12259_v21  ;;  %v2783_v5 = vpack.c.bf16 %v2753_v7, %v2752_v59  ;;  %10062 = vmatprep.subr.bf16.mxu1 %v10277_v19  ;;  %v2565_v7 = vld [vmem:[#allocation3 + $0x51] sm:$0xff]  ;;  %v2754_v49 = vld [vmem:[#allocation3 + $0x48] sm:$0xff] }
 0x26a   : > { %v2264_v55 = vsub.f32 0.0, %v12262_v48  ;;  %2475 = vst.msk [vmem:[#allocation3 + $0xb1] sm:$0xff] %vm251_vm0, %v2442_v15  ;;  %v2191_v53 = vmul.f32 %v11979_v1, %v2132_v60  ;;  %v12278_v43 = vpack.c.bf16 %v2563_v31, %v2562_v8  ;;  %v9269_v30 = vadd.f32 %v9268_v36, %v12223_v10  ;;  %v2757_v31 = vld [vmem:[#allocation3 + $0x68] sm:$0xff]  ;;  %v2759_v60 = vld [vmem:[#allocation3 + $0x80] sm:$0xff] }
 0x26b   : > { %v2321_v62 = vmul.f32 1.442695, %v2263_v63  ;;  %v10442_v18 = vpop.eup %10441  ;;  %10455 = vrcp.f32 %v2350_v3  ;;  %v2317_v34 = vmul.f32 1.442695, %v2261_v56  ;;  %2816 = vrot.lane.b32.xlu0 %v2783_v5, %s10949_s9  ;;  %v1992_v61 = vadd.f32 %v9266_v23, %v11963_v11  ;;  %2544 = vst.msk [vmem:[#allocation4 + $0x50] sm:$0xff] %vm251_vm0, %v2783_v5  ;;  %v2564_v63 = vld [vmem:[#allocation3 + $0x49] sm:$0xff] }
 0x26c   : > { %v2323_v51 = vmul.f32 1.442695, %v2264_v55  ;;  %v10444_v0 = vpop.eup %10443  ;;  %v2355_v2 = vadd.f32 1.0, %v10442_v18  ;;  %v12285_v13 = vadd.f32 %v11988_v22, %v2191_v53  ;;  %2626 = vrot.lane.b32.xlu1 %v12278_v43, %s10949_s9  ;;  %v1984_v10 = vadd.f32 %v12170_v57, %v11935_v24  ;;  %v2756_v56 = vld [vmem:[#allocation3 + $0x60] sm:$0xff]  ;;  %v2567_v55 = vld [vmem:[#allocation3 + $0x69] sm:$0xff]  ;;  %v2761_v5 = vld [vmem:[#allocation3 + $0x98] sm:$0xff] }
 0x26d   : > { %10457 = vpow2.f32 %v2321_v62  ;;  %v10446_v36 = vpop.eup %10445  ;;  %v2353_v12 = vadd.f32 1.0, %v10444_v0  ;;  %v2153_v11 = vadd.f32 %v12225_v9, %v1992_v61  ;;  %v1995_v52 = vadd.f32 %v9269_v30, %v11968_v47  ;;  %v2758_v62 = vld [vmem:[#allocation3 + $0x78] sm:$0xff] }
 0x26e   : > { %10459 = vpow2.f32 %v2317_v34  ;;  %v10448_v14 = vpop.eup %10447  ;;  %v2354_v27 = vadd.f32 1.0, %v10446_v36  ;;  %v2262_v39 = vsub.f32 0.0, %v12285_v13  ;;  %v2145_v33 = vadd.f32 %v12232_v40, %v1984_v10 }
 0x26f   : > { %10461 = vrcp.f32 %v2355_v2  ;;  %v10450_v26 = vpop.eup %10449  ;;  %v2447_v32 = vmul.f32 %v10448_v14, %v12138_v42  ;;  %v2196_v24 = vmul.f32 %v11979_v1, %v2153_v11  ;;  %v2156_v57 = vadd.f32 %v12237_v50, %v1995_v52 }
 0x270   : > { %10463 = vrcp.f32 %v2353_v12  ;;  %v10452_v20 = vpop.eup %10451  ;;  %v2445_v9 = vmul.f32 %v10450_v26, %v12141_v29  ;;  %v2319_v47 = vmul.f32 1.442695, %v2262_v39  ;;  %v2194_v28 = vmul.f32 %v11979_v1, %v2145_v33  ;;  %v2569_v12 = vld [vmem:[#allocation3 + $0x81] sm:$0xff] }
 0x271   : > { %10465 = vrcp.f32 %v2354_v27  ;;  %v10454_v46 = vpop.eup %10453  ;;  %2480 = vst.msk [vmem:[#allocation3 + $0xf1] sm:$0xff] %vm251_vm0, %v2447_v32  ;;  %v2448_v40 = vmul.f32 %v10452_v20, %v12144_v25  ;;  %v12303_v42 = vadd.f32 %v11988_v22, %v2196_v24  ;;  %v2197_v50 = vmul.f32 %v11979_v1, %v2156_v57  ;;  %v2763_v61 = vld [vmem:[#allocation3 + $0xb0] sm:$0xff]  ;;  %v2762_v39 = vld [vmem:[#allocation3 + $0xa8] sm:$0xff]  ;;  %v2942_v26 = vld [vmem:[#allocation3 + $0x1a] sm:$0xff] }
 0x272   : > { %10467 = vpow2.f32 %v2323_v51  ;;  %2478 = vst.msk [vmem:[#allocation3 + $0xd9] sm:$0xff] %vm251_vm0, %v2445_v9  ;;  %v2356_v29 = vadd.f32 1.0, %v10454_v46  ;;  %v12308_v6 = vadd.f32 %v11988_v22, %v2194_v28  ;;  %v2784_v15 = vpack.c.bf16 %v2755_v17, %v2754_v49  ;;  %v2760_v51 = vld [vmem:[#allocation3 + $0x90] sm:$0xff]  ;;  %v2765_v33 = vld [vmem:[#allocation3 + $0xc8] sm:$0xff]  ;;  %v2568_v20 = vld [vmem:[#allocation3 + $0x79] sm:$0xff] }
 0x273   : > { %10469 = vpow2.f32 %v2319_v47  ;;  %2481 = vst.msk [vmem:[#allocation3 + $0xf9] sm:$0xff] %vm251_vm0, %v2448_v40  ;;  %v2267_v25 = vsub.f32 0.0, %v12303_v42  ;;  %v12313_v23 = vadd.f32 %v11988_v22, %v2197_v50  ;;  %v12315_v59 = vpack.c.bf16 %v2565_v7, %v2564_v63  ;;  %v2943_v32 = vld [vmem:[#allocation3 + $0x22] sm:$0xff]  ;;  %v2944_v24 = vld [vmem:[#allocation3 + $0x32] sm:$0xff]  ;;  %v2949_v28 = vld [vmem:[#allocation3 + $0x6a] sm:$0xff] }
 0x274   : > { %v1987_v3 = vadd.f32 %v12215_v45, %v11949_v16  ;;  %10471 = vrcp.f32 %v2356_v29  ;;  %v2265_v8 = vsub.f32 0.0, %v12308_v6  ;;  %2818 = vrot.lane.b32.xlu0 %v2784_v15, %s10949_s9  ;;  %v2785_v19 = vpack.c.bf16 %v2757_v31, %v2756_v56  ;;  %2545 = vst.msk [vmem:[#allocation4 + $0x78] sm:$0xff] %vm251_vm0, %v2784_v15  ;;  %v2566_v45 = vld [vmem:[#allocation3 + $0x61] sm:$0xff]  ;;  %v2571_v9 = vld [vmem:[#allocation3 + $0x99] sm:$0xff]  ;;  %v2570_v31 = vld [vmem:[#allocation3 + $0x91] sm:$0xff] }
 0x275   : > { %v10456_v53 = vpop.eup %10455  ;;  %v2329_v30 = vmul.f32 1.442695, %v2267_v25  ;;  %v2268_v18 = vsub.f32 0.0, %v12313_v23  ;;  %2628 = vrot.lane.b32.xlu1 %v12315_v59, %s10949_s9  ;;  %v12326_v34 = vpack.c.bf16 %v2759_v60, %v2758_v62  ;;  %v12329_v36 = vpack.c.bf16 %v2567_v55, %v2566_v45  ;;  %v2950_v7 = vld [vmem:[#allocation3 + $0x7a] sm:$0xff]  ;;  %v2951_v15 = vld [vmem:[#allocation3 + $0x82] sm:$0xff]  ;;  %v2952_v63 = vld [vmem:[#allocation3 + $0x92] sm:$0xff] }
 0x276   : > { %v2148_v16 = vadd.f32 %v12242_v35, %v1987_v3  ;;  %v2446_v2 = vmul.f32 %v10456_v53, %v12147_v37  ;;  %v2325_v10 = vmul.f32 1.442695, %v2265_v8  ;;  %v12331_v11 = vpack.c.bf16 %v2761_v5, %v2760_v51  ;;  %2546 = vst.msk [vmem:[#allocation4 + $0xa0] sm:$0xff] %vm251_vm0, %v2785_v19  ;;  %v2945_v37 = vld [vmem:[#allocation3 + $0x3a] sm:$0xff]  ;;  %v12356_v8 = vld [vmem:[#allocation3 + $0x8] sm:$0xff] }
 0x277   : > { %v10458_v0 = vpop.eup %10457  ;;  %10473 = vpow2.f32 %v2329_v30  ;;  %v2331_v35 = vmul.f32 1.442695, %v2268_v18  ;;  %2547 = vst.msk [vmem:[#allocation4 + $0xc8] sm:$0xff] %vm251_vm0, %v12326_v34  ;;  %v12339_v47 = vpack.c.bf16 %v2763_v61, %v2762_v39  ;;  %v12349_v49 = vpack.c.bf16 %v2569_v12, %v2568_v20  ;;  %v2764_v29 = vld [vmem:[#allocation3 + $0xc0] sm:$0xff]  ;;  %v2954_v30 = vld [vmem:[#allocation3 + $0xaa] sm:$0xff]  ;;  %v2955_v18 = vld [vmem:[#allocation3 + $0xb2] sm:$0xff] }
 0x278   : > { %v10460_v52 = vpop.eup %10459  ;;  %v2359_v14 = vadd.f32 1.0, %v10458_v0  ;;  %v2195_v27 = vmul.f32 %v11979_v1, %v2148_v16  ;;  %2479 = vst.msk [vmem:[#allocation3 + $0xe1] sm:$0xff] %vm251_vm0, %v2446_v2  ;;  %10475 = vpow2.f32 %v2325_v10  ;;  %2820 = vrot.lane.b32.xlu0 %v2785_v19, %s10949_s9  ;;  %v2948_v1 = vld [vmem:[#allocation3 + $0x62] sm:$0xff]  ;;  %2548 = vst.msk [vmem:[#allocation4 + $0xf0] sm:$0xff] %vm251_vm0, %v12331_v11  ;;  %v2953_v60 = vld [vmem:[#allocation3 + $0x9a] sm:$0xff]  ;;  %v12352_v56 = vpack.c.bf16 %v2765_v33, %v2764_v29 }
 0x279   : > { %v10462_v57 = vpop.eup %10461  ;;  %v2357_v17 = vadd.f32 1.0, %v10460_v52  ;;  %2630 = vrot.lane.b32.xlu1 %v12329_v36, %s10949_s9  ;;  %v12354_v5 = vld [vmem:[#allocation3] sm:$0xff]  ;;  %2549 = vst.msk [vmem:[#allocation4 + $0x118] sm:$0xff] %vm251_vm0, %v12339_v47  ;;  %v2957_v16 = vld [vmem:[#allocation3 + $0xca] sm:$0xff]  ;;  %v12374_v2 = vpack.c.bf16 %v2943_v32, %v2942_v26  ;;  %v12376_v10 = vpack.c.bf16 %v2945_v37, %v2944_v24  ;;  %v12386_v39 = vld [vmem:[#allocation3 + $0x38] sm:$0xff]  ;;  %v12391_v32 = vpack.c.bf16 %v2949_v28, %v2948_v1 }
 0x27a   : > { %v10464_v46 = vpop.eup %10463  ;;  %v2451_v40 = vmul.f32 %v10462_v57, %v12188_v54  ;;  %10477 = vrcp.f32 %v2359_v14  ;;  %v12345_v50 = vadd.f32 %v11988_v22, %v2195_v27  ;;  %v2768_v54 = vld [vmem:[#allocation3 + $0xf0] sm:$0xff]  ;;  %v2769_v55 = vld [vmem:[#allocation3 + $0xf8] sm:$0xff]  ;;  %v2956_v22 = vld [vmem:[#allocation3 + $0xc2] sm:$0xff]  ;;  %2550 = vst.msk [vmem:[#allocation4 + $0x140] sm:$0xff] %vm251_vm0, %v12352_v56  ;;  %v12393_v24 = vpack.c.bf16 %v2951_v15, %v2950_v7 }
 0x27b   : > { %v10466_v25 = vpop.eup %10465  ;;  %v2449_v3 = vmul.f32 %v10464_v46, %v12191_v4  ;;  %10479 = vrcp.f32 %v2357_v17  ;;  %v12363_v53 = vpack.c.bf16 %v2769_v55, %v2768_v54  ;;  %v12365_v45 = vld [vmem:[#allocation3 + $0x2] sm:$0xff]  ;;  %v12367_v51 = vld [vmem:[#allocation3 + $0xa] sm:$0xff]  ;;  %v2960_v12 = vld [vmem:[#allocation3 + $0xf2] sm:$0xff]  ;;  %v12403_v46 = vpack.c.bf16 %v2953_v60, %v2952_v63  ;;  %2735 = vst.msk [vmem:[#allocation4 + $0x30] sm:$0xff] %vm251_vm0, %v12374_v2 }
 0x27c   : > { %v10468_v19 = vpop.eup %10467  ;;  %2484 = vst.msk [vmem:[#allocation3 + $0x121] sm:$0xff] %vm251_vm0, %v2451_v40  ;;  %v2450_v62 = vmul.f32 %v10466_v25, %v12198_v44  ;;  %10481 = vpow2.f32 %v2331_v35  ;;  %v2266_v4 = vsub.f32 0.0, %v12345_v50  ;;  %2822 = vrot.lane.b32.xlu0 %v12326_v34, %s10949_s9  ;;  %v12372_v44 = vpack.c.bf16 %v2571_v9, %v2570_v31  ;;  %v2961_v52 = vld [vmem:[#allocation3 + $0xfa] sm:$0xff]  ;;  %v12378_v14 = vld [vmem:[#allocation3 + $0x4a] sm:$0xff]  ;;  %v12380_v35 = vld [vmem:[#allocation3 + $0x52] sm:$0xff] }
 0x27d   : > { %v10470_v61 = vpop.eup %10469  ;;  %2482 = vst.msk [vmem:[#allocation3 + $0x109] sm:$0xff] %vm251_vm0, %v2449_v3  ;;  %v2360_v0 = vadd.f32 1.0, %v10468_v19  ;;  %v12384_v27 = vld [vmem:[#allocation3 + $0x21] sm:$0xff]  ;;  %2632 = vrot.lane.b32.xlu1 %v12349_v49, %s10949_s9  ;;  %v2573_v26 = vld [vmem:[#allocation3 + $0xb1] sm:$0xff]  ;;  %2552 = vst.msk [vmem:[#allocation4 + $0x190] sm:$0xff] %vm251_vm0, %v12363_v53  ;;  %v12405_v40 = vpack.c.bf16 %v2955_v18, %v2954_v30  ;;  %v12407_v1 = vpack.c.bf16 %v2957_v16, %v2956_v22 }
 0x27e   : > { %2483 = vst.msk [vmem:[#allocation3 + $0x111] sm:$0xff] %vm251_vm0, %v2450_v62  ;;  %v2358_v34 = vadd.f32 1.0, %v10470_v61  ;;  %v2327_v33 = vmul.f32 1.442695, %v2266_v4  ;;  %v12397_v37 = vld [vmem:[#allocation3 + $0x39] sm:$0xff]  ;;  %v12399_v57 = vld [vmem:[#allocation3 + $0x50] sm:$0xff]  ;;  %v10472_v20 = vpop.eup %10471  ;;  %v12418_v3 = vpack.c.bf16 %v2961_v52, %v2960_v12  ;;  %v2526_v54 = vpack.c.bf16 %v12356_v8, %v12354_v5 }
 0x27f   : > { %v12401_v17 = vld [vmem:[#allocation3 + $0x51] sm:$0xff]  ;;  %10483 = vrcp.f32 %v2360_v0  ;;  %v2572_v9 = vld [vmem:[#allocation3 + $0xa9] sm:$0xff]  ;;  %15417 = vst [vmem:[#allocation8_spill] sm:$0xff] %v12407_v1  ;;  %2736 = vst.msk [vmem:[#allocation4 + $0x58] sm:$0xff] %vm251_vm0, %v12376_v10  ;;  %v2452_v15 = vmul.f32 %v10472_v20, %v12208_v58  ;;  %v2718_v8 = vpack.c.bf16 %v12367_v51, %v12365_v45  ;;  %v2623_v0 = vpop.permute.xlu1 %2622  ;;  %v2721_v12 = vpack.c.bf16 %v12380_v35, %v12378_v14 }
 0x280   : > { %v2878_v28 = vld [vmem:[#allocation3 + $0x19] sm:$0xff]  ;;  %v3071_v7 = vld [vmem:[#allocation3 + $0x30] sm:$0xff]  ;;  %v12413_v31 = vld [vmem:[#allocation3 + $0x68] sm:$0xff]  ;;  %10485 = vrcp.f32 %v2358_v34  ;;  %15418 = vst [vmem:[#allocation9_spill] sm:$0xff] %v12418_v3  ;;  %2824 = vrot.lane.b32.xlu0 %v12331_v11, %s10949_s9  ;;  %v12434_v19 = vpack.c.bf16 %v2573_v26, %v2572_v9 }
 0x281   : > { %v12415_v29 = vld [vmem:[#allocation3 + $0x69] sm:$0xff]  ;;  %v2766_v63 = vld [vmem:[#allocation3 + $0xd8] sm:$0xff]  ;;  %v2767_v60 = vld [vmem:[#allocation3 + $0xe0] sm:$0xff]  ;;  %2738 = vst.msk [vmem:[#allocation4 + $0xa8] sm:$0xff] %vm251_vm0, %v12391_v32  ;;  %10487 = vpow2.f32 %v2327_v33  ;;  %v10474_v45 = vpop.eup %10473  ;;  %2634 = vrot.lane.b32.xlu1 %v12372_v44, %s10949_s9  ;;  %v2910_v52 = vpack.c.bf16 %v12384_v27, %v2878_v28  ;;  %v3103_v34 = vpack.c.bf16 %v12386_v39, %v3071_v7 }
 0x282   : > { %v2958_v25 = vld [vmem:[#allocation3 + $0xda] sm:$0xff]  ;;  %2739 = vst.msk [vmem:[#allocation4 + $0xd0] sm:$0xff] %vm251_vm0, %v12393_v24  ;;  %v12426_v55 = vld [vmem:[#allocation3 + $0x31] sm:$0xff]  ;;  %v12428_v22 = vld [vmem:[#allocation3 + $0x48] sm:$0xff]  ;;  %v12436_v62 = vpack.c.bf16 %v2767_v60, %v2766_v63  ;;  %v2363_v63 = vadd.f32 1.0, %v10474_v45 }
 0x283   : > { %v12430_v58 = vld [vmem:[#allocation3 + $0x49] sm:$0xff]  ;;  %2740 = vst.msk [vmem:[#allocation4 + $0xf8] sm:$0xff] %vm251_vm0, %v12403_v46  ;;  %2741 = vst.msk [vmem:[#allocation4 + $0x120] sm:$0xff] %vm251_vm0, %v12405_v40  ;;  %v12446_v4 = vld [vmem:[#allocation3 + $0x60] sm:$0xff]  ;;  %v2911_v14 = vpack.c.bf16 %v12397_v37, %v12426_v55  ;;  %v3104_v35 = vpack.c.bf16 %v12399_v57, %v12428_v22 }
 0x284   : > { %v2959_v5 = vld [vmem:[#allocation3 + $0xe2] sm:$0xff]  ;;  %2742 = vst.msk [vmem:[#allocation4 + $0x148] sm:$0xff] %vm251_vm0, %v12407_v1  ;;  %v12450_v30 = vld [vmem:[#allocation3 + $0x78] sm:$0xff]  ;;  %2485 = vst.msk [vmem:[#allocation3 + $0x129] sm:$0xff] %vm251_vm0, %v2452_v15  ;;  %v10476_v15 = vpop.eup %10475  ;;  %v2912_v27 = vpack.c.bf16 %v12401_v17, %v12430_v58  ;;  %v3105_v37 = vpack.c.bf16 %v12413_v31, %v12446_v4  ;;  %10489 = vrcp.f32 %v2363_v63  ;;  %2826 = vrot.lane.b32.xlu0 %v12339_v47, %s10949_s9 }
 0x285   : > { %v12448_v11 = vld [vmem:[#allocation3 + $0x61] sm:$0xff]  ;;  %v2575_v51 = vld [vmem:[#allocation3 + $0xc9] sm:$0xff]  ;;  %v12459_v61 = vpack.c.bf16 %v2959_v5, %v2958_v25  ;;  %2542 = vst.msk [vmem:[#allocation4] sm:$0xff] %vm251_vm0, %v2526_v54  ;;  %2744 = vst.msk [vmem:[#allocation4 + $0x198] sm:$0xff] %vm251_vm0, %v12418_v3  ;;  %v10478_v25 = vpop.eup %10477  ;;  %v2361_v54 = vadd.f32 1.0, %v10476_v15  ;;  %2636 = vrot.lane.b32.xlu1 %v12434_v19, %s10949_s9 }
 0x286   : > { %v12452_v18 = vld [vmem:[#allocation3 + $0x80] sm:$0xff]  ;;  %v12470_v26 = vld [vmem:[#allocation3 + $0x90] sm:$0xff]  ;;  %v12472_v20 = vld [vmem:[#allocation3 + $0x98] sm:$0xff]  ;;  %2670 = vst.msk [vmem:[#allocation4] sm:$0xff] %vm602_vm2, %v2623_v0  ;;  %v2913_v57 = vpack.c.bf16 %v12415_v29, %v12448_v11  ;;  %v10480_v45 = vpop.eup %10479  ;;  %v2455_v0 = vmul.f32 %v10478_v25, %v12251_v41 }
 0x287   : > { %v12454_v16 = vld [vmem:[#allocation3 + $0x81] sm:$0xff]  ;;  %15419 = vst [vmem:[#allocation10_spill] sm:$0xff] %v12459_v61  ;;  %v12468_v33 = vld [vmem:[#allocation3 + $0x79] sm:$0xff]  ;;  %2734 = vst.msk [vmem:[#allocation4 + $0x8] sm:$0xff] %vm251_vm0, %v2718_v8  ;;  %v3106_v17 = vpack.c.bf16 %v12452_v18, %v12450_v30  ;;  %v3107_v30 = vpack.c.bf16 %v12472_v20, %v12470_v26  ;;  %10491 = vrcp.f32 %v2361_v54 }
 0x288   : > { %v12474_v9 = vld [vmem:[#allocation3 + $0x99] sm:$0xff]  ;;  %v2574_v60 = vld [vmem:[#allocation3 + $0xc1] sm:$0xff]  ;;  %2551 = vst.msk [vmem:[#allocation4 + $0x168] sm:$0xff] %vm251_vm0, %v12436_v62  ;;  %v12486_v39 = vld [vmem:[#allocation3 + $0xb0] sm:$0xff]  ;;  %v2914_v11 = vpack.c.bf16 %v12454_v16, %v12468_v33  ;;  %2828 = vrot.lane.b32.xlu0 %v12352_v56, %s10949_s9 }
 0x289   : > { %v12488_v28 = vld [vmem:[#allocation3 + $0xb1] sm:$0xff]  ;;  %v12490_v7 = vld [vmem:[#allocation3 + $0xc8] sm:$0xff]  ;;  %2737 = vst.msk [vmem:[#allocation4 + $0x80] sm:$0xff] %vm251_vm0, %v2721_v12  ;;  %2743 = vst.msk [vmem:[#allocation4 + $0x170] sm:$0xff] %vm251_vm0, %v12459_v61  ;;  %v12534_v15 = vpack.c.bf16 %v2575_v51, %v2574_v60 }
 0x28a   : > { %2926 = vst.msk [vmem:[#allocation4 + $0x10] sm:$0xff] %vm251_vm0, %v2910_v52  ;;  %3119 = vst.msk [vmem:[#allocation4 + $0x18] sm:$0xff] %vm251_vm0, %v3103_v34  ;;  %v12503_v55 = vld [vmem:[#allocation3 + $0x91] sm:$0xff]  ;;  %v12505_v22 = vld [vmem:[#allocation3 + $0xa8] sm:$0xff]  ;;  %v10482_v52 = vpop.eup %10481  ;;  %v2453_v34 = vmul.f32 %v10480_v45, %v12259_v21 }
 0x28b   : > { %v12507_v58 = vld [vmem:[#allocation3 + $0xc9] sm:$0xff]  ;;  %v12509_v5 = vld [vmem:[#allocation3 + $0xe0] sm:$0xff]  ;;  %v12511_v8 = vld [vmem:[#allocation3 + $0xf8] sm:$0xff]  ;;  %2927 = vst.msk [vmem:[#allocation4 + $0x38] sm:$0xff] %vm251_vm0, %v2911_v14  ;;  %v2364_v60 = vadd.f32 1.0, %v10482_v52  ;;  %v2915_v54 = vpack.c.bf16 %v12474_v9, %v12503_v55  ;;  %2638 = vrot.lane.b32.xlu1 %v12534_v15, %s10949_s9 }
 0x28c   : > { %v2770_v31 = vld [vmem:[#allocation3 + $0x108] sm:$0xff]  ;;  %v2771_v29 = vld [vmem:[#allocation3 + $0x110] sm:$0xff]  ;;  %3120 = vst.msk [vmem:[#allocation4 + $0x40] sm:$0xff] %vm251_vm0, %v3104_v35  ;;  %2928 = vst.msk [vmem:[#allocation4 + $0x60] sm:$0xff] %vm251_vm0, %v2912_v27  ;;  %2830 = vrot.lane.b32.xlu0 %v12436_v62, %s10949_s9 }
 0x28d   : > { %v2962_v4 = vld [vmem:[#allocation3 + $0x10a] sm:$0xff]  ;;  %v12525_v18 = vld [vmem:[#allocation3 + $0xc0] sm:$0xff]  ;;  %v12529_v12 = vld [vmem:[#allocation3 + $0xd8] sm:$0xff]  ;;  %v12536_v16 = vpack.c.bf16 %v2771_v29, %v2770_v31  ;;  %3121 = vst.msk [vmem:[#allocation4 + $0x68] sm:$0xff] %vm251_vm0, %v3105_v37  ;;  %v3108_v37 = vpack.c.bf16 %v12486_v39, %v12505_v22  ;;  %10493 = vrcp.f32 %v2364_v60 }
 0x28e   : > { %v12523_v41 = vld [vmem:[#allocation3 + $0xa9] sm:$0xff]  ;;  %v12527_v47 = vld [vmem:[#allocation3 + $0xc1] sm:$0xff]  ;;  %v2963_v33 = vld [vmem:[#allocation3 + $0x112] sm:$0xff]  ;;  %2929 = vst.msk [vmem:[#allocation4 + $0x88] sm:$0xff] %vm251_vm0, %v2913_v57  ;;  %v3109_v39 = vpack.c.bf16 %v12490_v7, %v12525_v18  ;;  %v3110_v22 = vpack.c.bf16 %v12509_v5, %v12529_v12 }
 0x28f   : > { %3122 = vst.msk [vmem:[#allocation4 + $0x90] sm:$0xff] %vm251_vm0, %v3106_v17  ;;  %v12541_v26 = vld [vmem:[#allocation3 + $0xd9] sm:$0xff]  ;;  %v12543_v20 = vld [vmem:[#allocation3 + $0xe1] sm:$0xff]  ;;  %v12545_v21 = vld [vmem:[#allocation3 + $0xf0] sm:$0xff]  ;;  %v12554_v25 = vpack.c.bf16 %v2963_v33, %v2962_v4  ;;  %v2916_v9 = vpack.c.bf16 %v12488_v28, %v12523_v41  ;;  %v2917_v55 = vpack.c.bf16 %v12507_v58, %v12527_v47  ;;  %v10484_v28 = vpop.eup %10483 }
 0x290   : > { %v12547_v63 = vld [vmem:[#allocation3 + $0xf9] sm:$0xff]  ;;  %2488 = vst.msk [vmem:[#allocation3 + $0x151] sm:$0xff] %vm251_vm0, %v2455_v0  ;;  %v2577_v27 = vld [vmem:[#allocation3 + $0xe1] sm:$0xff]  ;;  %2930 = vst.msk [vmem:[#allocation4 + $0xb0] sm:$0xff] %vm251_vm0, %v2914_v11  ;;  %v2918_v5 = vpack.c.bf16 %v12543_v20, %v12541_v26  ;;  %v3111_v41 = vpack.c.bf16 %v12511_v8, %v12545_v21  ;;  %v10486_v26 = vpop.eup %10485  ;;  %v2456_v20 = vmul.f32 %v10484_v28, %v12262_v48  ;;  %2832 = vrot.lane.b32.xlu0 %v12363_v53, %s10949_s9 }
 0x291   : > { %v12549_v14 = vld [vmem:[#allocation3 + $0x32] sm:$0xff]  ;;  %v12551_v51 = vld [vmem:[#allocation3 + $0x3a] sm:$0xff]  ;;  %15420 = vst [vmem:[#allocation11_spill] sm:$0xff] %v12554_v25  ;;  %3123 = vst.msk [vmem:[#allocation4 + $0xb8] sm:$0xff] %vm251_vm0, %v3107_v30 }
 0x292   : > { %v2576_v35 = vld [vmem:[#allocation3 + $0xd9] sm:$0xff]  ;;  %v2896_v57 = vld [vmem:[#allocation3 + $0xf1] sm:$0xff]  ;;  %v12564_v45 = vld [vmem:[#allocation3 + $0x62] sm:$0xff]  ;;  %2486 = vst.msk [vmem:[#allocation3 + $0x139] sm:$0xff] %vm251_vm0, %v2453_v34 }
 0x293   : > { %v12562_v17 = vld [vmem:[#allocation3 + $0x110] sm:$0xff]  ;;  %v12568_v31 = vld [vmem:[#allocation3 + $0x7a] sm:$0xff]  ;;  %v12570_v29 = vld [vmem:[#allocation3 + $0x82] sm:$0xff]  ;;  %2553 = vst.msk [vmem:[#allocation4 + $0x1b8] sm:$0xff] %vm251_vm0, %v12536_v16  ;;  %v2919_v18 = vpack.c.bf16 %v12547_v63, %v2896_v57  ;;  %v12619_v8 = vpack.c.bf16 %v2577_v27, %v2576_v35  ;;  %v10488_v35 = vpop.eup %10487  ;;  %v2454_v27 = vmul.f32 %v10486_v26, %v12285_v13  ;;  %v3295_v13 = vpack.c.bf16 %v12551_v51, %v12549_v14 }
 0x294   : > { %v12566_v0 = vld [vmem:[#allocation3 + $0x6a] sm:$0xff]  ;;  %v2772_v4 = vld [vmem:[#allocation3 + $0x120] sm:$0xff]  ;;  %v12585_v52 = vld [vmem:[#allocation3 + $0x92] sm:$0xff]  ;;  %2745 = vst.msk [vmem:[#allocation4 + $0x1c0] sm:$0xff] %vm251_vm0, %v12554_v25  ;;  %2834 = vrot.lane.b32.xlu0 %v12536_v16, %s10949_s9 }
 0x295   : > { %v3089_v11 = vld [vmem:[#allocation3 + $0x108] sm:$0xff]  ;;  %v12583_v30 = vld [vmem:[#allocation3 + $0x111] sm:$0xff]  ;;  %v12587_v34 = vld [vmem:[#allocation3 + $0x9a] sm:$0xff]  ;;  %2931 = vst.msk [vmem:[#allocation4 + $0xd8] sm:$0xff] %vm251_vm0, %v2915_v54  ;;  %2640 = vrot.lane.b32.xlu1 %v12619_v8, %s10949_s9 }
 0x296   : > { %v12589_v33 = vld [vmem:[#allocation3 + $0xaa] sm:$0xff]  ;;  %v12591_v3 = vld [vmem:[#allocation3 + $0xb2] sm:$0xff]  ;;  %v2964_v58 = vld [vmem:[#allocation3 + $0x122] sm:$0xff]  ;;  %3124 = vst.msk [vmem:[#allocation4 + $0xe0] sm:$0xff] %vm251_vm0, %v3108_v37  ;;  %v3112_v57 = vpack.c.bf16 %v12562_v17, %v3089_v11 }
 0x297   : > { %v2773_v7 = vld [vmem:[#allocation3 + $0x128] sm:$0xff]  ;;  %v3091_v12 = vld [vmem:[#allocation3 + $0x120] sm:$0xff]  ;;  %v12612_v54 = vld [vmem:[#allocation3 + $0xf2] sm:$0xff]  ;;  %2932 = vst.msk [vmem:[#allocation4 + $0x100] sm:$0xff] %vm251_vm0, %v2916_v9  ;;  %v3300_v62 = vpack.c.bf16 %v12591_v3, %v12589_v33 }
 0x298   : > { %v2898_v47 = vld [vmem:[#allocation3 + $0x109] sm:$0xff]  ;;  %v12608_v61 = vld [vmem:[#allocation3 + $0xda] sm:$0xff]  ;;  %v12621_v21 = vpack.c.bf16 %v2773_v7, %v2772_v4  ;;  %3125 = vst.msk [vmem:[#allocation4 + $0x108] sm:$0xff] %vm251_vm0, %v3109_v39  ;;  %2933 = vst.msk [vmem:[#allocation4 + $0x128] sm:$0xff] %vm251_vm0, %v2917_v55 }
 0x299   : > { %v12604_v56 = vld [vmem:[#allocation3 + $0xc2] sm:$0xff]  ;;  %v12606_v60 = vld [vmem:[#allocation3 + $0xca] sm:$0xff]  ;;  %v12614_v37 = vld [vmem:[#allocation3 + $0xfa] sm:$0xff]  ;;  %3126 = vst.msk [vmem:[#allocation4 + $0x130] sm:$0xff] %vm251_vm0, %v3110_v22  ;;  %v2920_v17 = vpack.c.bf16 %v12583_v30, %v2898_v47  ;;  %v2362_v22 = vadd.f32 1.0, %v10488_v35  ;;  %v3298_v30 = vpack.c.bf16 %v12570_v29, %v12568_v31 }
 0x29a   : > { %v12610_v25 = vld [vmem:[#allocation3 + $0xe2] sm:$0xff]  ;;  %v2965_v63 = vld [vmem:[#allocation3 + $0x12a] sm:$0xff]  ;;  %v12630_v28 = vld [vmem:[#allocation3 + $0x112] sm:$0xff]  ;;  %2934 = vst.msk [vmem:[#allocation4 + $0x150] sm:$0xff] %vm251_vm0, %v2918_v5  ;;  %v3303_v29 = vpack.c.bf16 %v12614_v37, %v12612_v54  ;;  %2836 = vrot.lane.b32.xlu0 %v12621_v21, %s10949_s9 }
 0x29b   : > { %v2900_v1 = vld [vmem:[#allocation3 + $0x121] sm:$0xff]  ;;  %v12628_v48 = vld [vmem:[#allocation3 + $0x10a] sm:$0xff]  ;;  %v12633_v4 = vpack.c.bf16 %v2965_v63, %v2964_v58  ;;  %3127 = vst.msk [vmem:[#allocation4 + $0x158] sm:$0xff] %vm251_vm0, %v3111_v41  ;;  %2935 = vst.msk [vmem:[#allocation4 + $0x178] sm:$0xff] %vm251_vm0, %v2919_v18  ;;  %v3297_v58 = vpack.c.bf16 %v12566_v0, %v12564_v45  ;;  %v3299_v0 = vpack.c.bf16 %v12587_v34, %v12585_v52  ;;  %10495 = vrcp.f32 %v2362_v22  ;;  %v10490_v52 = vpop.eup %10489 }
 0x29c   : > { %v10279_v9 = vld [vmem:[%s15402_s1 + $0x1e0] sm:$0xff]   ;;  %v3092_v55 = vld [vmem:[#allocation3 + $0x128] sm:$0xff]  ;;  %2489 = vst.msk [vmem:[#allocation3 + $0x159] sm:$0xff] %vm251_vm0, %v2456_v20  ;;  %2554 = vst.msk [vmem:[#allocation4 + $0x1e0] sm:$0xff] %vm251_vm0, %v12621_v21  ;;  %v3302_v3 = vpack.c.bf16 %v12610_v25, %v12608_v61  ;;  %v3304_v18 = vpack.c.bf16 %v12630_v28, %v12628_v48  ;;  %v2459_v61 = vmul.f32 %v10490_v52, %v12303_v42 }
 0x29d   : > { %v10280_v39 = vld [vmem:[%s15402_s1 + $0x1a0] sm:$0xff]   ;;  %3128 = vst.msk [vmem:[#allocation4 + $0x180] sm:$0xff] %vm251_vm0, %v3112_v57  ;;  %v3113_v11 = vpack.c.bf16 %v3092_v55, %v3091_v12  ;;  %v3283_v5 = vld [vmem:[#allocation3 + $0x122] sm:$0xff]  ;;  %2487 = vst.msk [vmem:[#allocation3 + $0x141] sm:$0xff] %vm251_vm0, %v2454_v27  ;;  %9402 = vmatprep.subr.bf16.mxu0 %v10279_v9  ;;  %v10492_v12 = vpop.eup %10491 }
 0x29e   : > { %v2901_v7 = vld [vmem:[#allocation3 + $0x129] sm:$0xff]  ;;  %v2579_v14 = vld [vmem:[#allocation3 + $0xf9] sm:$0xff]  ;;  %2746 = vst.msk [vmem:[#allocation4 + $0x1e8] sm:$0xff] %vm251_vm0, %v12633_v4  ;;  %2936 = vst.msk [vmem:[#allocation4 + $0x1a0] sm:$0xff] %vm251_vm0, %v2920_v17  ;;  %9403 = vmatpush3.bf16.msra.mxu0 %v10280_v39  ;;  %v10494_v37 = vpop.eup %10493 }
 0x29f   : > { %v3284_v41 = vld [vmem:[#allocation3 + $0x12a] sm:$0xff]  ;;  %v10281_v51 = vld [vmem:[%s15402_s1 + $0x1e8] sm:$0xff]   ;;  %v2921_v45 = vpack.c.bf16 %v2901_v7, %v2900_v1  ;;  %3311 = vst.msk [vmem:[#allocation4 + $0x20] sm:$0xff] %vm251_vm0, %v3295_v13  ;;  %3129 = vst.msk [vmem:[#allocation4 + $0x1a8] sm:$0xff] %vm251_vm0, %v3113_v11  ;;  %v3301_v1 = vpack.c.bf16 %v12606_v60, %v12604_v56  ;;  %v2457_v56 = vmul.f32 %v10492_v12, %v12308_v6 }
 0x2a0   : > { %v10282_v31 = vld [vmem:[%s15402_s1 + $0x1a8] sm:$0xff]   ;;  %3313 = vst.msk [vmem:[#allocation4 + $0x70] sm:$0xff] %vm251_vm0, %v3297_v58  ;;  %3314 = vst.msk [vmem:[#allocation4 + $0x98] sm:$0xff] %vm251_vm0, %v3298_v30  ;;  %9404 = vmatprep.subr.bf16.mxu0 %v10281_v51  ;;  %v3305_v47 = vpack.c.bf16 %v3284_v41, %v3283_v5  ;;  %v2580_v60 = vld [vmem:[#allocation3 + $0x109] sm:$0xff]  ;;  %v2460_v48 = vmul.f32 %v10494_v37, %v12313_v23 }
 0x2a1   : > { %v2578_v34 = vld [vmem:[#allocation3 + $0xf1] sm:$0xff]  ;;  %2937 = vst.msk [vmem:[#allocation4 + $0x1c8] sm:$0xff] %vm251_vm0, %v2921_v45  ;;  %3315 = vst.msk [vmem:[#allocation4 + $0xc0] sm:$0xff] %vm251_vm0, %v3299_v0  ;;  %v10283_v54 = vld [vmem:[%s15402_s1 + $0x1f0] sm:$0xff]  }
 0x2a2   : > { %v2581_v33 = vld [vmem:[#allocation3 + $0x111] sm:$0xff]  ;;  %3316 = vst.msk [vmem:[#allocation4 + $0xe8] sm:$0xff] %vm251_vm0, %v3300_v62  ;;  %v12689_v25 = vpack.c.bf16 %v2579_v14, %v2578_v34  ;;  %3317 = vst.msk [vmem:[#allocation4 + $0x110] sm:$0xff] %vm251_vm0, %v3301_v1  ;;  %9405 = vmatpush3.bf16.msra.mxu0 %v10282_v31  ;;  %v10284_v53 = vld [vmem:[%s15402_s1 + $0x1b0] sm:$0xff]  }
 0x2a3   : > { %3318 = vst.msk [vmem:[#allocation4 + $0x138] sm:$0xff] %vm251_vm0, %v3302_v3  ;;  %3319 = vst.msk [vmem:[#allocation4 + $0x160] sm:$0xff] %vm251_vm0, %v3303_v29  ;;  %v12705_v42 = vpack.c.bf16 %v2581_v33, %v2580_v60  ;;  %v2776_v6 = vld [vmem:[#allocation3 + $0x150] sm:$0xff]  ;;  %v2774_v20 = vld [vmem:[#allocation3 + $0x138] sm:$0xff]  ;;  %9406 = vmatprep.subr.bf16.mxu0 %v10283_v54 }
 0x2a4   : > { %3320 = vst.msk [vmem:[#allocation4 + $0x188] sm:$0xff] %vm251_vm0, %v3304_v18  ;;  %3321 = vst.msk [vmem:[#allocation4 + $0x1b0] sm:$0xff] %vm251_vm0, %v3305_v47  ;;  %2642 = vrot.lane.b32.xlu1 %v12689_v25, %s10949_s9  ;;  %v2583_v26 = vld [vmem:[#allocation3 + $0x129] sm:$0xff]  ;;  %v2777_v63 = vld [vmem:[#allocation3 + $0x158] sm:$0xff] }
 0x2a5   : > { %2492 = vst.msk [vmem:[#allocation3 + $0x181] sm:$0xff] %vm251_vm0, %v2459_v61  ;;  %2490 = vst.msk [vmem:[#allocation3 + $0x169] sm:$0xff] %vm251_vm0, %v2457_v56  ;;  %v2968_v57 = vld [vmem:[#allocation3 + $0x152] sm:$0xff]  ;;  %v2775_v28 = vld [vmem:[#allocation3 + $0x140] sm:$0xff]  ;;  %v12712_v35 = vpack.c.bf16 %v2777_v63, %v2776_v6  ;;  %v10496_v31 = vpop.eup %10495 }
 0x2a6   : > { %v2966_v27 = vld [vmem:[#allocation3 + $0x13a] sm:$0xff]  ;;  %v2794_v55 = vpack.c.bf16 %v2775_v28, %v2774_v20  ;;  %v2967_v13 = vld [vmem:[#allocation3 + $0x142] sm:$0xff]  ;;  %v3095_v7 = vld [vmem:[#allocation3 + $0x150] sm:$0xff]  ;;  %2493 = vst.msk [vmem:[#allocation3 + $0x189] sm:$0xff] %vm251_vm0, %v2460_v48  ;;  %9407 = vmatpush3.bf16.msra.mxu0 %v10284_v53  ;;  %v2458_v52 = vmul.f32 %v10496_v31, %v12345_v50 }
 0x2a7   : > { %v3093_v9 = vld [vmem:[#allocation3 + $0x138] sm:$0xff]  ;;  %v2582_v17 = vld [vmem:[#allocation3 + $0x121] sm:$0xff]  ;;  %v12722_v23 = vpack.c.bf16 %v2967_v13, %v2966_v27  ;;  %2556 = vst.msk [vmem:[#allocation4 + $0x230] sm:$0xff] %vm251_vm0, %v12712_v35  ;;  %v10287_v33 = vld [vmem:[%s15402_s1 + $0x200] sm:$0xff]  }
 0x2a8   : > { %v2902_v39 = vld [vmem:[#allocation3 + $0x139] sm:$0xff]  ;;  %v10285_v11 = vld [vmem:[%s15402_s1 + $0x1f8] sm:$0xff]   ;;  %v2904_v58 = vld [vmem:[#allocation3 + $0x151] sm:$0xff]  ;;  %2644 = vrot.lane.b32.xlu1 %v12705_v42, %s10949_s9  ;;  %2555 = vst.msk [vmem:[#allocation4 + $0x208] sm:$0xff] %vm251_vm0, %v2794_v55  ;;  %v12732_v1 = vpack.c.bf16 %v2583_v26, %v2582_v17  ;;  %2838 = vrot.lane.b32.xlu0 %v2794_v55, %s10949_s9 }
 0x2a9   : > { %v2969_v22 = vld [vmem:[#allocation3 + $0x15a] sm:$0xff]  ;;  %v10286_v16 = vld [vmem:[%s15402_s1 + $0x1b8] sm:$0xff]   ;;  %9408 = vmatprep.subr.bf16.mxu0 %v10285_v11  ;;  %2747 = vst.msk [vmem:[#allocation4 + $0x210] sm:$0xff] %vm251_vm0, %v12722_v23  ;;  %v10288_v50 = vld [vmem:[%s15402_s1 + $0x1c0] sm:$0xff]  }
 0x2aa   : > { %v12724_v30 = vpack.c.bf16 %v2969_v22, %v2968_v57  ;;  %v3094_v5 = vld [vmem:[#allocation3 + $0x140] sm:$0xff]  ;;  %v3096_v0 = vld [vmem:[#allocation3 + $0x158] sm:$0xff]  ;;  %9409 = vmatpush3.bf16.msra.mxu0 %v10286_v16  ;;  %2491 = vst.msk [vmem:[#allocation3 + $0x171] sm:$0xff] %vm251_vm0, %v2458_v52 }
 0x2ab   : > { %v2903_v41 = vld [vmem:[#allocation3 + $0x141] sm:$0xff]  ;;  %v3114_v51 = vpack.c.bf16 %v3094_v5, %v3093_v9  ;;  %v2905_v62 = vld [vmem:[#allocation3 + $0x159] sm:$0xff]  ;;  %v3115_v3 = vpack.c.bf16 %v3096_v0, %v3095_v7  ;;  %9410 = vmatprep.subr.bf16.mxu0 %v10287_v33  ;;  %v2586_v21 = vld [vmem:[#allocation3 + $0x151] sm:$0xff] }
 0x2ac   : > { %v2585_v14 = vld [vmem:[#allocation3 + $0x141] sm:$0xff]  ;;  %v2922_v45 = vpack.c.bf16 %v2903_v41, %v2902_v39  ;;  %2748 = vst.msk [vmem:[#allocation4 + $0x238] sm:$0xff] %vm251_vm0, %v12724_v30  ;;  %v2923_v29 = vpack.c.bf16 %v2905_v62, %v2904_v58  ;;  %v2584_v34 = vld [vmem:[#allocation3 + $0x139] sm:$0xff]  ;;  %2646 = vrot.lane.b32.xlu1 %v12732_v1, %s10949_s9  ;;  %v2588_v26 = vld [vmem:[#allocation3 + $0x169] sm:$0xff]  ;;  %2840 = vrot.lane.b32.xlu0 %v12712_v35, %s10949_s9 }
 0x2ad   : > { %3130 = vst.msk [vmem:[#allocation4 + $0x1d0] sm:$0xff] %vm251_vm0, %v3114_v51  ;;  %v12748_v18 = vpack.c.bf16 %v2585_v14, %v2584_v34  ;;  %3131 = vst.msk [vmem:[#allocation4 + $0x1f8] sm:$0xff] %vm251_vm0, %v3115_v3  ;;  %v2587_v47 = vld [vmem:[#allocation3 + $0x159] sm:$0xff]  ;;  %v3100_v60 = vld [vmem:[#allocation3 + $0x188] sm:$0xff] }
 0x2ae   : > { %2938 = vst.msk [vmem:[#allocation4 + $0x1f0] sm:$0xff] %vm251_vm0, %v2922_v45  ;;  %2939 = vst.msk [vmem:[#allocation4 + $0x218] sm:$0xff] %vm251_vm0, %v2923_v29  ;;  %9411 = vmatpush3.bf16.msra.mxu0 %v10288_v50  ;;  %v10289_v12 = vld [vmem:[%s15402_s1 + $0x208] sm:$0xff]   ;;  %v3099_v56 = vld [vmem:[#allocation3 + $0x180] sm:$0xff]  ;;  %v12765_v53 = vpack.c.bf16 %v2587_v47, %v2586_v21 }
 0x2af   : > { %v10290_v61 = vld [vmem:[%s15402_s1 + $0x1c8] sm:$0xff]   ;;  %v2908_v54 = vld [vmem:[#allocation3 + $0x181] sm:$0xff]  ;;  %v2909_v6 = vld [vmem:[#allocation3 + $0x189] sm:$0xff]  ;;  %9412 = vmatprep.subr.bf16.mxu0 %v10289_v12  ;;  %v3117_v20 = vpack.c.bf16 %v3100_v60, %v3099_v56 }
 0x2b0   : > { %2648 = vrot.lane.b32.xlu1 %v12748_v18, %s10949_s9  ;;  %v2778_v37 = vld [vmem:[#allocation3 + $0x168] sm:$0xff]  ;;  %v2925_v63 = vpack.c.bf16 %v2909_v6, %v2908_v54  ;;  %v10291_v57 = vld [vmem:[%s15402_s1 + $0x210] sm:$0xff]   ;;  %v3287_v51 = vld [vmem:[#allocation3 + $0x152] sm:$0xff] }
 0x2b1   : > { %v10292_v48 = vld [vmem:[%s15402_s1 + $0x1d0] sm:$0xff]   ;;  %v3097_v28 = vld [vmem:[#allocation3 + $0x168] sm:$0xff]  ;;  %v2779_v39 = vld [vmem:[#allocation3 + $0x170] sm:$0xff]  ;;  %3133 = vst.msk [vmem:[#allocation4 + $0x248] sm:$0xff] %vm251_vm0, %v3117_v20 }
 0x2b2   : > { %v2906_v27 = vld [vmem:[#allocation3 + $0x169] sm:$0xff]  ;;  %v3285_v9 = vld [vmem:[#allocation3 + $0x13a] sm:$0xff]  ;;  %v2589_v17 = vld [vmem:[#allocation3 + $0x171] sm:$0xff]  ;;  %9413 = vmatpush3.bf16.msra.mxu0 %v10290_v61  ;;  %2941 = vst.msk [vmem:[#allocation4 + $0x268] sm:$0xff] %vm251_vm0, %v2925_v63  ;;  %v2796_v35 = vpack.c.bf16 %v2779_v39, %v2778_v37 }
 0x2b3   : > { %v2781_v55 = vld [vmem:[#allocation3 + $0x188] sm:$0xff]  ;;  %v12779_v22 = vpack.c.bf16 %v2589_v17, %v2588_v26  ;;  %v2971_v11 = vld [vmem:[#allocation3 + $0x172] sm:$0xff]  ;;  %9414 = vmatprep.subr.bf16.mxu0 %v10291_v57  ;;  %v3288_v45 = vld [vmem:[#allocation3 + $0x15a] sm:$0xff] }
 0x2b4   : > { %2650 = vrot.lane.b32.xlu1 %v12765_v53, %s10949_s9  ;;  %v2970_v13 = vld [vmem:[#allocation3 + $0x16a] sm:$0xff]  ;;  %v3286_v14 = vld [vmem:[#allocation3 + $0x142] sm:$0xff]  ;;  %2842 = vrot.lane.b32.xlu0 %v2796_v35, %s10949_s9  ;;  %2557 = vst.msk [vmem:[#allocation4 + $0x258] sm:$0xff] %vm251_vm0, %v2796_v35  ;;  %v3307_v3 = vpack.c.bf16 %v3288_v45, %v3287_v51  ;;  %v3290_v34 = vld [vmem:[#allocation3 + $0x172] sm:$0xff] }
 0x2b5   : > { %v3098_v7 = vld [vmem:[#allocation3 + $0x170] sm:$0xff]  ;;  %v12781_v16 = vpack.c.bf16 %v2971_v11, %v2970_v13  ;;  %v2780_v0 = vld [vmem:[#allocation3 + $0x180] sm:$0xff]  ;;  %v10293_v62 = vld [vmem:[%s15402_s1 + $0x218] sm:$0xff]   ;;  %v3306_v31 = vpack.c.bf16 %v3286_v14, %v3285_v9 }
 0x2b6   : > { %v2907_v58 = vld [vmem:[#allocation3 + $0x171] sm:$0xff]  ;;  %v3116_v5 = vpack.c.bf16 %v3098_v7, %v3097_v28  ;;  %9415 = vmatpush3.bf16.msra.mxu0 %v10292_v48  ;;  %v10294_v29 = vld [vmem:[%s15402_s1 + $0x1d8] sm:$0xff]   ;;  %v2797_v33 = vpack.c.bf16 %v2781_v55, %v2780_v0  ;;  %3323 = vst.msk [vmem:[#allocation4 + $0x200] sm:$0xff] %vm251_vm0, %v3307_v3 }
 0x2b7   : > { %v2924_v41 = vpack.c.bf16 %v2907_v58, %v2906_v27  ;;  %2749 = vst.msk [vmem:[#allocation4 + $0x260] sm:$0xff] %vm251_vm0, %v12781_v16  ;;  %v3289_v52 = vld [vmem:[#allocation3 + $0x16a] sm:$0xff]  ;;  %9416 = vmatprep.subr.bf16.mxu0 %v10293_v62  ;;  %3322 = vst.msk [vmem:[#allocation4 + $0x1d8] sm:$0xff] %vm251_vm0, %v3306_v31  ;;  %v3291_v21 = vld [vmem:[#allocation3 + $0x182] sm:$0xff] }
 0x2b8   : > { %2652 = vrot.lane.b32.xlu1 %v12779_v22, %s10949_s9  ;;  %3132 = vst.msk [vmem:[#allocation4 + $0x220] sm:$0xff] %vm251_vm0, %v3116_v5  ;;  %v3308_v50 = vpack.c.bf16 %v3290_v34, %v3289_v52  ;;  %v3292_v47 = vld [vmem:[#allocation3 + $0x18a] sm:$0xff]  ;;  %2844 = vrot.lane.b32.xlu0 %v2797_v33, %s10949_s9  ;;  %v3101_v34 = vld [vmem:[#allocation3 + $0x198] sm:$0xff]  ;;  %v3102_v33 = vld [vmem:[#allocation3 + $0x1a0] sm:$0xff] }
 0x2b9   : > { %2940 = vst.msk [vmem:[#allocation4 + $0x240] sm:$0xff] %vm251_vm0, %v2924_v41  ;;  %v3309_v12 = vpack.c.bf16 %v3292_v47, %v3291_v21  ;;  %v10296_v56 = vld [vmem:[%s15402_s1 + $0x238] sm:$0xff]   ;;  %v3118_v21 = vpack.c.bf16 %v3102_v33, %v3101_v34 }
 0x2ba   : > { %3324 = vst.msk [vmem:[#allocation4 + $0x228] sm:$0xff] %vm251_vm0, %v3308_v50  ;;  %9417 = vmatpush3.bf16.msra.mxu0 %v10294_v29 }
 0x2bb   : > { %3325 = vst.msk [vmem:[#allocation4 + $0x250] sm:$0xff] %vm251_vm0, %v3309_v12  ;;  %3134 = vst.msk [vmem:[#allocation4 + $0x270] sm:$0xff] %vm251_vm0, %v3118_v21 }
 0x2bc   : > { %3006 = vrot.lane.b32.xlu1 %v12374_v2, %s10949_s9  ;;  %3199 = vrot.lane.b32.xlu0 %v12278_v43, %s10949_s9  ;;  %v15422_v43 = vld [vmem:[#allocation10_spill] sm:$0xff]  ;;  %v3327_v2 = vld [vmem:[#allocation4] sm:$0xff] }
 0x2c0   : > { %3008 = vrot.lane.b32.xlu1 %v12376_v10, %s10949_s9  ;;  %3201 = vrot.lane.b32.xlu0 %v12315_v59, %s10949_s9  ;;  %v15423_v59 = vld [vmem:[#allocation9_spill] sm:$0xff] }
 0x2c4   : > { %3010 = vrot.lane.b32.xlu1 %v12217_v38, %s10949_s9  ;;  %3203 = vrot.lane.b32.xlu0 %v12329_v36, %s10949_s9  ;;  %v15421_v38 = vld [vmem:[#allocation8_spill] sm:$0xff]  ;;  %v15424_v36 = vld [vmem:[#allocation11_spill] sm:$0xff] }
 0x2c8   : > { %3012 = vrot.lane.b32.xlu1 %v12391_v32, %s10949_s9  ;;  %3205 = vrot.lane.b32.xlu0 %v12349_v49, %s10949_s9 }
 0x2cc   : > { %3014 = vrot.lane.b32.xlu1 %v12393_v24, %s10949_s9  ;;  %3207 = vrot.lane.b32.xlu0 %v12372_v44, %s10949_s9  ;;  %v10278_v24 = vld [vmem:[%s15402_s1 + $0x228] sm:$0xff]  }
 0x2d0   : > { %3016 = vrot.lane.b32.xlu1 %v12403_v46, %s10949_s9  ;;  %3209 = vrot.lane.b32.xlu0 %v12434_v19, %s10949_s9  ;;  %v3163_v19 = vld [vmem:[#allocation3 + $0x181] sm:$0xff] }
 0x2d4   : > { %3018 = vrot.lane.b32.xlu1 %v12405_v40, %s10949_s9  ;;  %3211 = vrot.lane.b32.xlu0 %v12534_v15, %s10949_s9  ;;  %v3164_v40 = vld [vmem:[#allocation3 + $0x189] sm:$0xff] }
 0x2d5   : > { %v2972_v15 = vld [vmem:[#allocation3 + $0x182] sm:$0xff] }
 0x2d6   : > { %v2815_v49 = vpop.permute.xlu0 %2814 }
 0x2d7   : > { %2862 = vst.msk [vmem:[#allocation4 + $0x8] sm:$0xff] %vm602_vm2, %v2815_v49 }
 0x2d8   : > { %3020 = vrot.lane.b32.xlu1 %v15421_v38, %s10949_s9  ;;  %3213 = vrot.lane.b32.xlu0 %v12619_v8, %s10949_s9  ;;  %v2625_v44 = vpop.permute.xlu1 %2624  ;;  %v2973_v8 = vld [vmem:[#allocation3 + $0x18a] sm:$0xff] }
 0x2d9   : > { %2671 = vst.msk [vmem:[#allocation4 + $0x28] sm:$0xff] %vm602_vm2, %v2625_v44 }
 0x2dc   : > { %3022 = vrot.lane.b32.xlu1 %v15422_v43, %s10949_s9  ;;  %3215 = vrot.lane.b32.xlu0 %v12689_v25, %s10949_s9  ;;  %v3165_v25 = vld [vmem:[#allocation3 + $0x199] sm:$0xff] }
 0x2dd   : > { %v2817_v10 = vpop.permute.xlu0 %2816 }
 0x2de   : > { %v3328_v32 = vld [vmem:[#allocation4 + $0x8] sm:$0xff]  ;;  %2863 = vst.msk [vmem:[#allocation4 + $0x30] sm:$0xff] %vm602_vm2, %v2817_v10  ;;  %v2627_v46 = vpop.permute.xlu1 %2626 }
 0x2df   : > { %3776 = vmatprep.mubr.bf16.mxu1 %v3328_v32  ;;  %2672 = vst.msk [vmem:[#allocation4 + $0x50] sm:$0xff] %vm602_vm2, %v2627_v46  ;;  %v5362_v46 = vld [vmem:[#allocation2 + $0x1a2] sm:$0xff] }
 0x2e0   : > { %3024 = vrot.lane.b32.xlu1 %v15423_v59, %s10949_s9  ;;  %3217 = vrot.lane.b32.xlu0 %v12705_v42, %s10949_s9  ;;  %v3166_v42 = vld [vmem:[#allocation3 + $0x1a1] sm:$0xff]  ;;  %v3332_v54 = vld [vmem:[#allocation4 + $0x28] sm:$0xff] }
 0x2e1   : > { %3777 = vmatmul.mubr.bf16.vlgmr.msra.gmra.mrb[64].mxu1 %v3327_v2 }
 0x2e4   : > { %3026 = vrot.lane.b32.xlu1 %v15424_v36, %s10949_s9  ;;  %3219 = vrot.lane.b32.xlu0 %v12732_v1, %s10949_s9  ;;  %v2989_v1 = vpack.c.bf16 %v2973_v8, %v2972_v15  ;;  %v12910_v15 = vld [vmem:[#allocation4 + $0x278] sm:$0xff] }
 0x2e5   : > { %v3333_v61 = vld [vmem:[#allocation4 + $0x30] sm:$0xff] }
 0x2e6   : > { %v2819_v60 = vpop.permute.xlu0 %2818  ;;  %3784 = vmatprep.mubr.bf16.mxu1 %v3333_v61  ;;  %v3337_v57 = vld [vmem:[#allocation4 + $0x50] sm:$0xff] }
 0x2e7   : > { %2864 = vst.msk [vmem:[#allocation4 + $0x58] sm:$0xff] %vm602_vm2, %v2819_v60  ;;  %v2629_v6 = vpop.permute.xlu1 %2628 }
 0x2e8   : > { %3028 = vrot.lane.b32.xlu1 %v12633_v4, %s10949_s9  ;;  %3221 = vrot.lane.b32.xlu0 %v12748_v18, %s10949_s9  ;;  %v10881_v4 = vld [vmem:[%s15402_s1 + $0x220] sm:$0xff]   ;;  %v3182_v18 = vpack.c.bf16 %v3166_v42, %v3165_v25  ;;  %2673 = vst.msk [vmem:[#allocation4 + $0x78] sm:$0xff] %vm602_vm2, %v2629_v6 }
 0x2e9   : > { %10063 = vmatpush3.bf16.msra.mxu1 %v10881_v4 }
 0x2ea   : > { %10064 = vmatprep.subr.bf16.mxu1 %v10278_v24  ;;  %3785 = vmatmul.mubr.bf16.gmra.mrb[68].mxu1 %v3332_v54 }
 0x2eb   : > { %v2631_v37 = vpop.permute.xlu1 %2630 }
 0x2ec   : > { %3030 = vrot.lane.b32.xlu1 %v12722_v23, %s10949_s9  ;;  %3223 = vrot.lane.b32.xlu0 %v12765_v53, %s10949_s9  ;;  %v10295_v23 = vld [vmem:[%s15402_s1 + $0x230] sm:$0xff]   ;;  %v2821_v53 = vpop.permute.xlu0 %2820  ;;  %2674 = vst.msk [vmem:[#allocation4 + $0xa0] sm:$0xff] %vm602_vm2, %v2631_v37 }
 0x2ed   : > { %10065 = vmatpush3.bf16.msra.mxu1 %v10278_v24  ;;  %2865 = vst.msk [vmem:[#allocation4 + $0x80] sm:$0xff] %vm602_vm2, %v2821_v53  ;;  %v5361_v24 = vld [vmem:[#allocation2 + $0x19a] sm:$0xff] }
 0x2ee   : > { %10066 = vmatprep.subr.bf16.mxu1 %v10295_v23  ;;  %v3338_v20 = vld [vmem:[#allocation4 + $0x58] sm:$0xff] }
 0x2ef   : > { %v2633_v63 = vpop.permute.xlu1 %2632  ;;  %3792 = vmatprep.mubr.bf16.mxu1 %v3338_v20  ;;  %v3342_v17 = vld [vmem:[#allocation4 + $0x78] sm:$0xff] }
 0x2f0   : > { %3032 = vrot.lane.b32.xlu1 %v12724_v30, %s10949_s9  ;;  %3225 = vrot.lane.b32.xlu0 %v12779_v22, %s10949_s9  ;;  %v3181_v30 = vpack.c.bf16 %v3164_v40, %v3163_v19  ;;  %v2823_v26 = vpop.permute.xlu0 %2822  ;;  %2675 = vst.msk [vmem:[#allocation4 + $0xc8] sm:$0xff] %vm602_vm2, %v2633_v63  ;;  %v5378_v40 = vpack.c.bf16 %v5362_v46, %v5361_v24  ;;  %v3341_v46 = vld [vmem:[#allocation4 + $0x70] sm:$0xff] }
 0x2f1   : > { %10067 = vmatpush3.bf16.msra.mxu1 %v10295_v23  ;;  %2866 = vst.msk [vmem:[#allocation4 + $0xa8] sm:$0xff] %vm602_vm2, %v2823_v26 }
 0x2f2   : > { %10068 = vmatprep.subr.bf16.mxu1 %v10296_v56  ;;  %3793 = vmatmul.mubr.bf16.gmra.mrb[72].mxu1 %v3337_v57  ;;  %5394 = vst.msk [vmem:[#allocation4 + $0x278] sm:$0xff] %vm251_vm0, %v5378_v40 }
 0x2f3   : > { %v2635_v27 = vpop.permute.xlu1 %2634  ;;  %v3347_v7 = vld [vmem:[#allocation4 + $0xa0] sm:$0xff] }
 0x2f4   : > { %3034 = vrot.lane.b32.xlu1 %v12781_v16, %s10949_s9  ;;  %3227 = vrot.lane.b32.xlu0 %v3181_v30, %s10949_s9  ;;  %v2825_v48 = vpop.permute.xlu0 %2824  ;;  %v3343_v28 = vld [vmem:[#allocation4 + $0x80] sm:$0xff]  ;;  %2676 = vst.msk [vmem:[#allocation4 + $0xf0] sm:$0xff] %vm602_vm2, %v2635_v27 }
 0x2f5   : > { %10069 = vmatpush3.bf16.msra.mxu1 %v10296_v56  ;;  %2867 = vst.msk [vmem:[#allocation4 + $0xd0] sm:$0xff] %vm602_vm2, %v2825_v48  ;;  %3800 = vmatprep.mubr.bf16.mxu1 %v3343_v28 }
 0x2f7   : > { %v2637_v39 = vpop.permute.xlu1 %2636  ;;  %v3352_v51 = vld [vmem:[#allocation4 + $0xc8] sm:$0xff] }
 0x2f8   : > { %3036 = vrot.lane.b32.xlu1 %v2989_v1, %s10949_s9  ;;  %3229 = vrot.lane.b32.xlu0 %v3182_v18, %s10949_s9  ;;  %v2827_v9 = vpop.permute.xlu0 %2826  ;;  %2677 = vst.msk [vmem:[#allocation4 + $0x118] sm:$0xff] %vm602_vm2, %v2637_v39  ;;  %v3348_v55 = vld [vmem:[#allocation4 + $0xa8] sm:$0xff] }
 0x2f9   : > { %2868 = vst.msk [vmem:[#allocation4 + $0xf8] sm:$0xff] %vm602_vm2, %v2827_v9 }
 0x2fa   : > { %3801 = vmatmul.mubr.bf16.gmra.mrb[76].mxu1 %v3342_v17 }
 0x2fb   : > { %3808 = vmatprep.mubr.bf16.mxu1 %v3348_v55  ;;  %v3357_v29 = vld [vmem:[#allocation4 + $0xf0] sm:$0xff] }
 0x2fc   : > { %v2829_v13 = vpop.permute.xlu0 %2828  ;;  %v3353_v58 = vld [vmem:[#allocation4 + $0xd0] sm:$0xff] }
 0x2fd   : > { %2869 = vst.msk [vmem:[#allocation4 + $0x120] sm:$0xff] %vm602_vm2, %v2829_v13  ;;  %v2639_v35 = vpop.permute.xlu1 %2638 }
 0x2fe   : > { %2678 = vst.msk [vmem:[#allocation4 + $0x140] sm:$0xff] %vm602_vm2, %v2639_v35 }
 0x2ff   : > { %v3362_v43 = vld [vmem:[#allocation4 + $0x118] sm:$0xff] }
 0x300   : > { %v2831_v22 = vpop.permute.xlu0 %2830  ;;  %v3358_v45 = vld [vmem:[#allocation4 + $0xf8] sm:$0xff] }
 0x301   : > { %2870 = vst.msk [vmem:[#allocation4 + $0x148] sm:$0xff] %vm602_vm2, %v2831_v22 }
 0x302   : > { %3809 = vmatmul.mubr.bf16.gmra.mrb[80].mxu1 %v3347_v7 }
 0x303   : > { %3816 = vmatprep.mubr.bf16.mxu1 %v3353_v58 }
 0x304   : > { %v2833_v16 = vpop.permute.xlu0 %2832  ;;  %v3363_v52 = vld [vmem:[#allocation4 + $0x120] sm:$0xff] }
 0x305   : > { %2871 = vst.msk [vmem:[#allocation4 + $0x170] sm:$0xff] %vm602_vm2, %v2833_v16  ;;  %v3367_v10 = vld [vmem:[#allocation4 + $0x140] sm:$0xff] }
 0x307   : > { %v2641_v11 = vpop.permute.xlu1 %2640 }
 0x308   : > { %2679 = vst.msk [vmem:[#allocation4 + $0x168] sm:$0xff] %vm602_vm2, %v2641_v11  ;;  %v2835_v41 = vpop.permute.xlu0 %2834  ;;  %v3368_v59 = vld [vmem:[#allocation4 + $0x148] sm:$0xff] }
 0x309   : > { %2872 = vst.msk [vmem:[#allocation4 + $0x198] sm:$0xff] %vm602_vm2, %v2835_v41 }
 0x30a   : > { %3817 = vmatmul.mubr.bf16.gmra.mrb[84].mxu1 %v3352_v51 }
 0x30b   : > { %3824 = vmatprep.mubr.bf16.mxu1 %v3358_v45 }
 0x30c   : > { %v2837_v0 = vpop.permute.xlu0 %2836  ;;  %v3373_v32 = vld [vmem:[#allocation4 + $0x170] sm:$0xff] }
 0x30d   : > { %2873 = vst.msk [vmem:[#allocation4 + $0x1c0] sm:$0xff] %vm602_vm2, %v2837_v0 }
 0x30f   : > { %v3372_v30 = vld [vmem:[#allocation4 + $0x168] sm:$0xff] }
 0x310   : > { %v3378_v1 = vld [vmem:[#allocation4 + $0x198] sm:$0xff] }
 0x312   : > { %3825 = vmatmul.mubr.bf16.gmra.mrb[88].mxu1 %v3357_v29 }
 0x313   : > { %3832 = vmatprep.mubr.bf16.mxu1 %v3363_v52 }
 0x314   : > { %v3383_v26 = vld [vmem:[#allocation4 + $0x1c0] sm:$0xff] }
 0x316   : > { %v2643_v5 = vpop.permute.xlu1 %2642 }
 0x317   : > { %2680 = vst.msk [vmem:[#allocation4 + $0x190] sm:$0xff] %vm602_vm2, %v2643_v5 }
 0x31a   : > { %v2645_v14 = vpop.permute.xlu1 %2644  ;;  %v2839_v31 = vpop.permute.xlu0 %2838  ;;  %3833 = vmatmul.mubr.bf16.gmra.mrb[92].mxu1 %v3362_v43 }
 0x31b   : > { %2681 = vst.msk [vmem:[#allocation4 + $0x1b8] sm:$0xff] %vm602_vm2, %v2645_v14  ;;  %2874 = vst.msk [vmem:[#allocation4 + $0x1e8] sm:$0xff] %vm602_vm2, %v2839_v31  ;;  %3840 = vmatprep.mubr.bf16.mxu1 %v3368_v59 }
 0x31e   : > { %v2647_v62 = vpop.permute.xlu1 %2646  ;;  %v2841_v50 = vpop.permute.xlu0 %2840  ;;  %v3377_v53 = vld [vmem:[#allocation4 + $0x190] sm:$0xff] }
 0x31f   : > { %2682 = vst.msk [vmem:[#allocation4 + $0x1e0] sm:$0xff] %vm602_vm2, %v2647_v62  ;;  %2875 = vst.msk [vmem:[#allocation4 + $0x210] sm:$0xff] %vm602_vm2, %v2841_v50 }
 0x322   : > { %v2649_v3 = vpop.permute.xlu1 %2648  ;;  %3841 = vmatmul.mubr.bf16.gmra.mrb[96].mxu1 %v3367_v10  ;;  %v3382_v27 = vld [vmem:[#allocation4 + $0x1b8] sm:$0xff]  ;;  %v3388_v39 = vld [vmem:[#allocation4 + $0x1e8] sm:$0xff] }
 0x323   : > { %2683 = vst.msk [vmem:[#allocation4 + $0x208] sm:$0xff] %vm602_vm2, %v2649_v3  ;;  %3848 = vmatprep.mubr.bf16.mxu1 %v3373_v32  ;;  %v3336_v32 = vld [vmem:[#allocation4 + $0x48] sm:$0xff] }
 0x326   : > { %v2651_v47 = vpop.permute.xlu1 %2650  ;;  %v2843_v12 = vpop.permute.xlu0 %2842  ;;  %v3387_v11 = vld [vmem:[#allocation4 + $0x1e0] sm:$0xff]  ;;  %v3393_v58 = vld [vmem:[#allocation4 + $0x210] sm:$0xff] }
 0x327   : > { %2684 = vst.msk [vmem:[#allocation4 + $0x230] sm:$0xff] %vm602_vm2, %v2651_v47  ;;  %2876 = vst.msk [vmem:[#allocation4 + $0x238] sm:$0xff] %vm602_vm2, %v2843_v12 }
 0x32a   : > { %v2653_v38 = vpop.permute.xlu1 %2652  ;;  %v2845_v36 = vpop.permute.xlu0 %2844  ;;  %3849 = vmatmul.mubr.bf16.gmra.mrb[100].mxu1 %v3372_v30  ;;  %v3392_v45 = vld [vmem:[#allocation4 + $0x208] sm:$0xff]  ;;  %v3361_v30 = vld [vmem:[#allocation4 + $0x110] sm:$0xff] }
 0x32b   : > { %2685 = vst.msk [vmem:[#allocation4 + $0x258] sm:$0xff] %vm602_vm2, %v2653_v38  ;;  %2877 = vst.msk [vmem:[#allocation4 + $0x260] sm:$0xff] %vm602_vm2, %v2845_v36  ;;  %3856 = vmatprep.mubr.bf16.mxu1 %v3378_v1 }
 0x32e   : > { %v3007_v49 = vpop.permute.xlu1 %3006  ;;  %v3200_v44 = vpop.permute.xlu0 %3199  ;;  %v3398_v62 = vld [vmem:[#allocation4 + $0x238] sm:$0xff]  ;;  %v3397_v33 = vld [vmem:[#allocation4 + $0x230] sm:$0xff] }
 0x32f   : > { %3054 = vst.msk [vmem:[#allocation4 + $0x10] sm:$0xff] %vm602_vm2, %v3007_v49  ;;  %3247 = vst.msk [vmem:[#allocation4 + $0x18] sm:$0xff] %vm602_vm2, %v3200_v44  ;;  %v3331_v44 = vld [vmem:[#allocation4 + $0x20] sm:$0xff] }
 0x332   : > { %v3009_v2 = vpop.permute.xlu1 %3008  ;;  %v3202_v19 = vpop.permute.xlu0 %3201  ;;  %3857 = vmatmul.mubr.bf16.gmra.mrb[104].mxu1 %v3377_v53  ;;  %v3403_v21 = vld [vmem:[#allocation4 + $0x260] sm:$0xff]  ;;  %v3402_v36 = vld [vmem:[#allocation4 + $0x258] sm:$0xff]  ;;  %v3381_v53 = vld [vmem:[#allocation4 + $0x1b0] sm:$0xff] }
 0x333   : > { %3055 = vst.msk [vmem:[#allocation4 + $0x38] sm:$0xff] %vm602_vm2, %v3009_v2  ;;  %3248 = vst.msk [vmem:[#allocation4 + $0x40] sm:$0xff] %vm602_vm2, %v3202_v19  ;;  %3864 = vmatprep.mubr.bf16.mxu1 %v3383_v26  ;;  %v3346_v19 = vld [vmem:[#allocation4 + $0x98] sm:$0xff] }
 0x334   : > { %v3386_v26 = vld [vmem:[#allocation4 + $0x1d8] sm:$0xff] }
 0x336   : > { %v3011_v8 = vpop.permute.xlu1 %3010  ;;  %v3204_v4 = vpop.permute.xlu0 %3203  ;;  %v3330_v25 = vld [vmem:[#allocation4 + $0x18] sm:$0xff]  ;;  %v3329_v23 = vld [vmem:[#allocation4 + $0x10] sm:$0xff] }
 0x337   : > { %3056 = vst.msk [vmem:[#allocation4 + $0x60] sm:$0xff] %vm602_vm2, %v3011_v8  ;;  %3249 = vst.msk [vmem:[#allocation4 + $0x68] sm:$0xff] %vm602_vm2, %v3204_v4  ;;  %3937 = vmatprep.mubr.bf16.mxu0 %v3330_v25  ;;  %v3351_v4 = vld [vmem:[#allocation4 + $0xc0] sm:$0xff] }
 0x338   : > { %3938 = vmatmul.mubr.bf16.vlgmr.msra.gmra.mrb[96].mxu0 %v3329_v23 }
 0x33a   : > { %v3013_v42 = vpop.permute.xlu1 %3012  ;;  %v3206_v18 = vpop.permute.xlu0 %3205  ;;  %v3335_v61 = vld [vmem:[#allocation4 + $0x40] sm:$0xff]  ;;  %v3334_v6 = vld [vmem:[#allocation4 + $0x38] sm:$0xff]  ;;  %3865 = vmatmul.mubr.bf16.gmra.mrb[108].mxu1 %v3382_v27  ;;  %v3401_v27 = vld [vmem:[#allocation4 + $0x250] sm:$0xff] }
 0x33b   : > { %3057 = vst.msk [vmem:[#allocation4 + $0x88] sm:$0xff] %vm602_vm2, %v3013_v42  ;;  %3250 = vst.msk [vmem:[#allocation4 + $0x90] sm:$0xff] %vm602_vm2, %v3206_v18  ;;  %3945 = vmatprep.mubr.bf16.mxu0 %v3335_v61  ;;  %3872 = vmatprep.mubr.bf16.mxu1 %v3388_v39  ;;  %v3356_v42 = vld [vmem:[#allocation4 + $0xe8] sm:$0xff]  ;;  %v3366_v18 = vld [vmem:[#allocation4 + $0x138] sm:$0xff] }
 0x33e   : > { %v3015_v56 = vpop.permute.xlu1 %3014  ;;  %v3208_v60 = vpop.permute.xlu0 %3207  ;;  %v3340_v37 = vld [vmem:[#allocation4 + $0x68] sm:$0xff]  ;;  %v3339_v28 = vld [vmem:[#allocation4 + $0x60] sm:$0xff] }
 0x33f   : > { %3058 = vst.msk [vmem:[#allocation4 + $0xb0] sm:$0xff] %vm602_vm2, %v3015_v56  ;;  %3251 = vst.msk [vmem:[#allocation4 + $0xb8] sm:$0xff] %vm602_vm2, %v3208_v60  ;;  %v3371_v56 = vld [vmem:[#allocation4 + $0x160] sm:$0xff] }
 0x340   : > { %3946 = vmatmul.mubr.bf16.gmra.mrb[100].mxu0 %v3334_v6 }
 0x341   : > { %3953 = vmatprep.mubr.bf16.mxu0 %v3340_v37 }
 0x342   : > { %v3017_v54 = vpop.permute.xlu1 %3016  ;;  %v3210_v20 = vpop.permute.xlu0 %3209  ;;  %v3345_v9 = vld [vmem:[#allocation4 + $0x90] sm:$0xff]  ;;  %v3344_v22 = vld [vmem:[#allocation4 + $0x88] sm:$0xff]  ;;  %3873 = vmatmul.mubr.bf16.gmra.mrb[112].mxu1 %v3387_v11 }
 0x343   : > { %3059 = vst.msk [vmem:[#allocation4 + $0xd8] sm:$0xff] %vm602_vm2, %v3017_v54  ;;  %3252 = vst.msk [vmem:[#allocation4 + $0xe0] sm:$0xff] %vm602_vm2, %v3210_v20  ;;  %3880 = vmatprep.mubr.bf16.mxu1 %v3393_v58  ;;  %v3376_v54 = vld [vmem:[#allocation4 + $0x188] sm:$0xff] }
 0x346   : > { %v3019_v63 = vpop.permute.xlu1 %3018  ;;  %v3212_v57 = vpop.permute.xlu0 %3211  ;;  %v3350_v7 = vld [vmem:[#allocation4 + $0xb8] sm:$0xff]  ;;  %v3349_v51 = vld [vmem:[#allocation4 + $0xb0] sm:$0xff] }
 0x347   : > { %3060 = vst.msk [vmem:[#allocation4 + $0x100] sm:$0xff] %vm602_vm2, %v3019_v63  ;;  %3253 = vst.msk [vmem:[#allocation4 + $0x108] sm:$0xff] %vm602_vm2, %v3212_v57  ;;  %v3391_v63 = vld [vmem:[#allocation4 + $0x200] sm:$0xff] }
 0x348   : > { %3954 = vmatmul.mubr.bf16.gmra.mrb[104].mxu0 %v3339_v28 }
 0x349   : > { %3961 = vmatprep.mubr.bf16.mxu0 %v3345_v9 }
 0x34a   : > { %v3021_v48 = vpop.permute.xlu1 %3020  ;;  %v3214_v17 = vpop.permute.xlu0 %3213  ;;  %v3355_v0 = vld [vmem:[#allocation4 + $0xe0] sm:$0xff]  ;;  %3881 = vmatmul.mubr.bf16.gmra.mrb[116].mxu1 %v3392_v45  ;;  %v3354_v34 = vld [vmem:[#allocation4 + $0xd8] sm:$0xff] }
 0x34b   : > { %3061 = vst.msk [vmem:[#allocation4 + $0x128] sm:$0xff] %vm602_vm2, %v3021_v48  ;;  %3254 = vst.msk [vmem:[#allocation4 + $0x130] sm:$0xff] %vm602_vm2, %v3214_v17  ;;  %3888 = vmatprep.mubr.bf16.mxu1 %v3398_v62  ;;  %v3396_v48 = vld [vmem:[#allocation4 + $0x228] sm:$0xff] }
 0x34e   : > { %v3023_v55 = vpop.permute.xlu1 %3022  ;;  %v3216_v13 = vpop.permute.xlu0 %3215  ;;  %v3360_v50 = vld [vmem:[#allocation4 + $0x108] sm:$0xff]  ;;  %v3359_v59 = vld [vmem:[#allocation4 + $0x100] sm:$0xff] }
 0x34f   : > { %3062 = vst.msk [vmem:[#allocation4 + $0x150] sm:$0xff] %vm602_vm2, %v3023_v55  ;;  %3255 = vst.msk [vmem:[#allocation4 + $0x158] sm:$0xff] %vm602_vm2, %v3216_v13 }
 0x350   : > { %3962 = vmatmul.mubr.bf16.gmra.mrb[108].mxu0 %v3344_v22 }
 0x351   : > { %3969 = vmatprep.mubr.bf16.mxu0 %v3350_v7 }
 0x352   : > { %v3025_v35 = vpop.permute.xlu1 %3024  ;;  %v3218_v16 = vpop.permute.xlu0 %3217  ;;  %3889 = vmatmul.mubr.bf16.gmra.mrb[120].mxu1 %v3397_v33  ;;  %v3365_v49 = vld [vmem:[#allocation4 + $0x130] sm:$0xff]  ;;  %v3364_v10 = vld [vmem:[#allocation4 + $0x128] sm:$0xff] }
 0x353   : > { %3063 = vst.msk [vmem:[#allocation4 + $0x178] sm:$0xff] %vm602_vm2, %v3025_v35  ;;  %3256 = vst.msk [vmem:[#allocation4 + $0x180] sm:$0xff] %vm602_vm2, %v3218_v16  ;;  %3896 = vmatprep.mubr.bf16.mxu1 %v3403_v21 }
 0x356   : > { %v3027_v5 = vpop.permute.xlu1 %3026  ;;  %v3220_v41 = vpop.permute.xlu0 %3219  ;;  %v3370_v24 = vld [vmem:[#allocation4 + $0x158] sm:$0xff]  ;;  %v3369_v40 = vld [vmem:[#allocation4 + $0x150] sm:$0xff] }
 0x357   : > { %3064 = vst.msk [vmem:[#allocation4 + $0x1a0] sm:$0xff] %vm602_vm2, %v3027_v5  ;;  %3257 = vst.msk [vmem:[#allocation4 + $0x1a8] sm:$0xff] %vm602_vm2, %v3220_v41 }
 0x358   : > { %3970 = vmatmul.mubr.bf16.gmra.mrb[112].mxu0 %v3349_v51 }
 0x359   : > { %3977 = vmatprep.mubr.bf16.mxu0 %v3355_v0 }
 0x35a   : > { %v3029_v14 = vpop.permute.xlu1 %3028  ;;  %v3222_v31 = vpop.permute.xlu0 %3221  ;;  %3897 = vmatmul.mubr.bf16.gmra.mrb[124].mxu1 %v3402_v36  ;;  %v3375_v8 = vld [vmem:[#allocation4 + $0x180] sm:$0xff]  ;;  %v3374_v25 = vld [vmem:[#allocation4 + $0x178] sm:$0xff] }
 0x35b   : > { %3065 = vst.msk [vmem:[#allocation4 + $0x1c8] sm:$0xff] %vm602_vm2, %v3029_v14  ;;  %3258 = vst.msk [vmem:[#allocation4 + $0x1d0] sm:$0xff] %vm602_vm2, %v3222_v31  ;;  %10070 = vmatprep.mubr.msk.bf16.mxu1 %vm251_vm0, %v3331_v44 }
 0x35e   : > { %v3031_v3 = vpop.permute.xlu1 %3030  ;;  %v3224_v29 = vpop.permute.xlu0 %3223  ;;  %v3380_v23 = vld [vmem:[#allocation4 + $0x1a8] sm:$0xff]  ;;  %v3379_v1 = vld [vmem:[#allocation4 + $0x1a0] sm:$0xff] }
 0x35f   : > { %3066 = vst.msk [vmem:[#allocation4 + $0x1f0] sm:$0xff] %vm602_vm2, %v3031_v3  ;;  %3259 = vst.msk [vmem:[#allocation4 + $0x1f8] sm:$0xff] %vm602_vm2, %v3224_v29 }
 0x360   : > { %3978 = vmatmul.mubr.bf16.gmra.mrb[116].mxu0 %v3354_v34 }
 0x361   : > { %3985 = vmatprep.mubr.bf16.mxu0 %v3360_v50 }
 0x362   : > { %v3033_v52 = vpop.permute.xlu1 %3032  ;;  %v3226_v47 = vpop.permute.xlu0 %3225  ;;  %10071 = vmatmul.mubr.msk.bf16.vlgmr.msra.gmra.mrb[128].mxu1 %vm251_vm0, %v3336_v32  ;;  %v3385_v61 = vld [vmem:[#allocation4 + $0x1d0] sm:$0xff]  ;;  %v3384_v60 = vld [vmem:[#allocation4 + $0x1c8] sm:$0xff] }
 0x363   : > { %3067 = vst.msk [vmem:[#allocation4 + $0x218] sm:$0xff] %vm602_vm2, %v3033_v52  ;;  %3260 = vst.msk [vmem:[#allocation4 + $0x220] sm:$0xff] %vm602_vm2, %v3226_v47  ;;  %10074 = vmatprep.mubr.msk.bf16.mxu1 %vm251_vm0, %v3341_v46 }
 0x366   : > { %v3035_v12 = vpop.permute.xlu1 %3034  ;;  %v3228_v38 = vpop.permute.xlu0 %3227  ;;  %v3390_v6 = vld [vmem:[#allocation4 + $0x1f8] sm:$0xff]  ;;  %v3389_v37 = vld [vmem:[#allocation4 + $0x1f0] sm:$0xff] }
 0x367   : > { %3068 = vst.msk [vmem:[#allocation4 + $0x240] sm:$0xff] %vm602_vm2, %v3035_v12  ;;  %3261 = vst.msk [vmem:[#allocation4 + $0x248] sm:$0xff] %vm602_vm2, %v3228_v38 }
 0x368   : > { %3986 = vmatmul.mubr.bf16.gmra.mrb[120].mxu0 %v3359_v59 }
 0x369   : > { %3993 = vmatprep.mubr.bf16.mxu0 %v3365_v49 }
 0x36a   : > { %v3037_v43 = vpop.permute.xlu1 %3036  ;;  %v3230_v2 = vpop.permute.xlu0 %3229  ;;  %10075 = vmatmul.mubr.msk.bf16.gmra.mrb[132].mxu1 %vm251_vm0, %v3346_v19  ;;  %v3395_v20 = vld [vmem:[#allocation4 + $0x220] sm:$0xff]  ;;  %v3394_v57 = vld [vmem:[#allocation4 + $0x218] sm:$0xff] }
 0x36b   : > { %3069 = vst.msk [vmem:[#allocation4 + $0x268] sm:$0xff] %vm602_vm2, %v3037_v43  ;;  %3262 = vst.msk [vmem:[#allocation4 + $0x270] sm:$0xff] %vm602_vm2, %v3230_v2  ;;  %10078 = vmatprep.mubr.msk.bf16.mxu1 %vm251_vm0, %v3351_v4 }
 0x36e   : > { %v3400_v28 = vld [vmem:[#allocation4 + $0x248] sm:$0xff]  ;;  %v3399_v39 = vld [vmem:[#allocation4 + $0x240] sm:$0xff] }
 0x370   : > { %3994 = vmatmul.mubr.bf16.gmra.mrb[124].mxu0 %v3364_v10 }
 0x371   : > { %4001 = vmatprep.mubr.bf16.mxu0 %v3370_v24 }
 0x372   : > { %10079 = vmatmul.mubr.msk.bf16.gmra.mrb[136].mxu1 %vm251_vm0, %v3356_v42  ;;  %v3405_v9 = vld [vmem:[#allocation4 + $0x270] sm:$0xff]  ;;  %v3404_v17 = vld [vmem:[#allocation4 + $0x268] sm:$0xff] }
 0x373   : > { %10082 = vmatprep.mubr.msk.bf16.mxu1 %vm251_vm0, %v3361_v30 }
 0x378   : > { %4002 = vmatmul.mubr.bf16.gmra.mrb[128].mxu0 %v3369_v40 }
 0x379   : > { %4009 = vmatprep.mubr.bf16.mxu0 %v3375_v8 }
 0x37a   : > { %10083 = vmatmul.mubr.msk.bf16.gmra.mrb[140].mxu1 %vm251_vm0, %v3366_v18 }
 0x37b   : > { %10086 = vmatprep.mubr.msk.bf16.mxu1 %vm251_vm0, %v3371_v56 }
 0x380   : > { %4010 = vmatmul.mubr.bf16.gmra.mrb[132].mxu0 %v3374_v25 }
 0x381   : > { %4017 = vmatprep.mubr.bf16.mxu0 %v3380_v23 }
 0x382   : > { %10087 = vmatmul.mubr.msk.bf16.gmra.mrb[144].mxu1 %vm251_vm0, %v3376_v54 }
 0x383   : > { %10090 = vmatprep.mubr.msk.bf16.mxu1 %vm251_vm0, %v3381_v53 }
 0x388   : > { %4018 = vmatmul.mubr.bf16.gmra.mrb[136].mxu0 %v3379_v1 }
 0x389   : > { %4025 = vmatprep.mubr.bf16.mxu0 %v3385_v61 }
 0x38a   : > { %10091 = vmatmul.mubr.msk.bf16.gmra.mrb[148].mxu1 %vm251_vm0, %v3386_v26 }
 0x38b   : > { %10094 = vmatprep.mubr.msk.bf16.mxu1 %vm251_vm0, %v3391_v63 }
 0x390   : > { %4026 = vmatmul.mubr.bf16.gmra.mrb[140].mxu0 %v3384_v60 }
 0x391   : > { %4033 = vmatprep.mubr.bf16.mxu0 %v3390_v6 }
 0x392   : > { %10095 = vmatmul.mubr.msk.bf16.gmra.mrb[152].mxu1 %vm251_vm0, %v3396_v48 }
 0x393   : > { %10098 = vmatprep.mubr.msk.bf16.mxu1 %vm251_vm0, %v3401_v27 }
 0x398   : > { %4034 = vmatmul.mubr.bf16.gmra.mrb[144].mxu0 %v3389_v37 }
 0x399   : > { %4041 = vmatprep.mubr.bf16.mxu0 %v3395_v20 }
 0x39a   : > { %10099 = vmatmul.mubr.msk.bf16.gmra.mrb[156].mxu1 %vm251_vm0, %v12910_v15 }
 0x3a0   : > { %4042 = vmatmul.mubr.bf16.gmra.mrb[148].mxu0 %v3394_v57 }
 0x3a1   : > { %4049 = vmatprep.mubr.bf16.mxu0 %v3400_v28 }
 0x3a8   : > { %4050 = vmatmul.mubr.bf16.gmra.mrb[152].mxu0 %v3399_v39 }
 0x3a9   : > { %4057 = vmatprep.mubr.bf16.mxu0 %v3405_v9 }
 0x3b0   : > { %4058 = vmatmul.mubr.bf16.gmra.mrb[156].mxu0 %v3404_v17 }
 0x3b4   : > { %v9306_v55 = vpop.f32.mrb[64].mxu1 }
 0x3b5   : > { %v9307_v13 = vpop.f32.mrb[65].mxu1 }
 0x3b6   : > { %v12959_v35 = vadd.f32 %v9307_v13, %v9306_v55  ;;  %v9309_v22 = vpop.f32.mrb[66].mxu1 }
 0x3b7   : > { %v9310_v11 = vpop.f32.mrb[67].mxu1 }
 0x3b8   : > { %v9311_v7 = vadd.f32 %v9310_v11, %v9309_v22 }
 0x3bd   : > { %v9312_v58 = vpop.f32.mrb[68].mxu1 }
 0x3be   : > { %v9313_v16 = vpop.f32.mrb[69].mxu1 }
 0x3bf   : > { %v12961_v5 = vadd.f32 %v9313_v16, %v9312_v58  ;;  %v9315_v41 = vpop.f32.mrb[70].mxu1 }
 0x3c0   : > { %v9316_v14 = vpop.f32.mrb[71].mxu1 }
 0x3c1   : > { %v12963_v51 = vadd.f32 %v9316_v14, %v9315_v41 }
 0x3c5   : > { %v9318_v45 = vpop.f32.mrb[72].mxu1 }
 0x3c6   : > { %v9319_v15 = vpop.f32.mrb[73].mxu1 }
 0x3c7   : > { %v12965_v0 = vadd.f32 %v9319_v15, %v9318_v45  ;;  %v9321_v62 = vpop.f32.mrb[74].mxu1 }
 0x3c8   : > { %v9322_v31 = vpop.f32.mrb[75].mxu1 }
 0x3c9   : > { %v12967_v3 = vadd.f32 %v9322_v31, %v9321_v62 }
 0x3cd   : > { %v9324_v29 = vpop.f32.mrb[76].mxu1 }
 0x3ce   : > { %v9325_v52 = vpop.f32.mrb[77].mxu1 }
 0x3cf   : > { %v12969_v34 = vadd.f32 %v9325_v52, %v9324_v29  ;;  %v9327_v33 = vpop.f32.mrb[78].mxu1 }
 0x3d0   : > { %v9328_v50 = vpop.f32.mrb[79].mxu1 }
 0x3d1   : > { %v12971_v21 = vadd.f32 %v9328_v50, %v9327_v33 }
 0x3d5   : > { %v9330_v47 = vpop.f32.mrb[80].mxu1 }
 0x3d6   : > { %v9331_v12 = vpop.f32.mrb[81].mxu1 }
 0x3d7   : > { %v12973_v38 = vadd.f32 %v9331_v12, %v9330_v47  ;;  %v9333_v43 = vpop.f32.mrb[82].mxu1  ;;  %v4628_v12 = vld [vmem:[#allocation2 + $0x9] sm:$0xff] }
 0x3d8   : > { %v9334_v59 = vpop.f32.mrb[83].mxu1 }
 0x3d9   : > { %v12975_v36 = vadd.f32 %v9334_v59, %v9333_v43 }
 0x3dd   : > { %v9336_v49 = vpop.f32.mrb[84].mxu1 }
 0x3de   : > { %v9337_v44 = vpop.f32.mrb[85].mxu1 }
 0x3df   : > { %v12977_v2 = vadd.f32 %v9337_v44, %v9336_v49  ;;  %v9339_v10 = vpop.f32.mrb[86].mxu1 }
 0x3e0   : > { %v9340_v32 = vpop.f32.mrb[87].mxu1 }
 0x3e1   : > { %v12979_v24 = vadd.f32 %v9340_v32, %v9339_v10 }
 0x3e5   : > { %v9342_v46 = vpop.f32.mrb[88].mxu1 }
 0x3e6   : > { %v9343_v40 = vpop.f32.mrb[89].mxu1 }
 0x3e7   : > { %v12981_v19 = vadd.f32 %v9343_v40, %v9342_v46  ;;  %v9345_v8 = vpop.f32.mrb[90].mxu1 }
 0x3e8   : > { %v9346_v4 = vpop.f32.mrb[91].mxu1 }
 0x3e9   : > { %v12983_v25 = vadd.f32 %v9346_v4, %v9345_v8 }
 0x3ed   : > { %v9348_v42 = vpop.f32.mrb[92].mxu1 }
 0x3ee   : > { %v9349_v23 = vpop.f32.mrb[93].mxu1 }
 0x3ef   : > { %v12985_v30 = vadd.f32 %v9349_v23, %v9348_v42  ;;  %v9351_v1 = vpop.f32.mrb[94].mxu1 }
 0x3f0   : > { %v9352_v18 = vpop.f32.mrb[95].mxu1 }
 0x3f1   : > { %v12987_v61 = vadd.f32 %v9352_v18, %v9351_v1  ;;  %v10297_v18 = vld [vmem:[%s15402_s1 + $0x280] sm:$0xff]  }
 0x3f2   : > { %9534 = vmatprep.subr.bf16.mxu0 %v10297_v18 }
 0x3f5   : > { %v9354_v56 = vpop.f32.mrb[96].mxu1 }
 0x3f6   : > { %v9355_v60 = vpop.f32.mrb[97].mxu1 }
 0x3f7   : > { %v12989_v54 = vadd.f32 %v9355_v60, %v9354_v56  ;;  %v9357_v6 = vpop.f32.mrb[98].mxu1  ;;  %v10298_v56 = vld [vmem:[%s15402_s1 + $0x240] sm:$0xff]  }
 0x3f8   : > { %v9358_v53 = vpop.f32.mrb[99].mxu1  ;;  %9535 = vmatpush3.bf16.msra.mxu0 %v10298_v56 }
 0x3f9   : > { %v12991_v37 = vadd.f32 %v9358_v53, %v9357_v6 }
 0x3fd   : > { %v9360_v20 = vpop.f32.mrb[100].mxu1 }
 0x3fe   : > { %v9361_v57 = vpop.f32.mrb[101].mxu1 }
 0x3ff   : > { %v12993_v27 = vadd.f32 %v9361_v57, %v9360_v20  ;;  %v9363_v9 = vpop.f32.mrb[102].mxu1 }
 0x400   : > { %v9364_v17 = vpop.f32.mrb[103].mxu1 }
 0x401   : > { %v12995_v13 = vadd.f32 %v9364_v17, %v9363_v9 }
 0x405   : > { %v9366_v16 = vpop.f32.mrb[104].mxu1 }
 0x406   : > { %v9367_v14 = vpop.f32.mrb[105].mxu1 }
 0x407   : > { %v13002_v62 = vadd.f32 %v9367_v14, %v9366_v16  ;;  %v9369_v31 = vpop.f32.mrb[106].mxu1 }
 0x408   : > { %v9370_v52 = vpop.f32.mrb[107].mxu1 }
 0x409   : > { %v13004_v50 = vadd.f32 %v9370_v52, %v9369_v31 }
 0x40b   : > { %v9418_v26 = vpop.f32.mrb[96].mxu0 }
 0x40c   : > { %v9419_v63 = vpop.f32.mrb[97].mxu0 }
 0x40d   : > { %v9420_v48 = vadd.f32 %v9419_v63, %v9418_v26  ;;  %v9421_v28 = vpop.f32.mrb[98].mxu0  ;;  %v9372_v59 = vpop.f32.mrb[108].mxu1 }
 0x40e   : > { %v9422_v39 = vpop.f32.mrb[99].mxu0  ;;  %v9373_v10 = vpop.f32.mrb[109].mxu1 }
 0x40f   : > { %v9423_v55 = vadd.f32 %v9422_v39, %v9421_v28  ;;  %v12998_v22 = vadd.f32 %v9420_v48, %v12959_v35  ;;  %v13012_v40 = vadd.f32 %v9373_v10, %v9372_v59  ;;  %v9375_v8 = vpop.f32.mrb[110].mxu1  ;;  %v10300_v10 = vld [vmem:[%s15402_s1 + $0x248] sm:$0xff]  }
 0x411   : > { %v13000_v11 = vadd.f32 %v9423_v55, %v9311_v7  ;;  %v4627_v7 = vld [vmem:[#allocation2 + $0x1] sm:$0xff] }
 0x412   : > { %v4659_v49 = vpack.c.bf16 %v4628_v12, %v4627_v7 }
 0x413   : > { %v9424_v58 = vpop.f32.mrb[100].mxu0 }
 0x414   : > { %v9425_v41 = vpop.f32.mrb[101].mxu0  ;;  %4691 = vrot.lane.b32.xlu1 %v4659_v49, %s10949_s9 }
 0x415   : > { %v9426_v45 = vadd.f32 %v9425_v41, %v9424_v58  ;;  %v9427_v15 = vpop.f32.mrb[102].mxu0 }
 0x416   : > { %v9428_v29 = vpop.f32.mrb[103].mxu0 }
 0x417   : > { %v9429_v33 = vadd.f32 %v9428_v29, %v9427_v15  ;;  %v13007_v47 = vadd.f32 %v9426_v45, %v12961_v5  ;;  %v9376_v5 = vpop.f32.mrb[111].mxu1 }
 0x418   : > { %v13015_v23 = vadd.f32 %v9376_v5, %v9375_v8  ;;  %v9378_v6 = vpop.f32.mrb[112].mxu1 }
 0x419   : > { %v13010_v35 = vadd.f32 %v9429_v33, %v12963_v51  ;;  %v9379_v26 = vpop.f32.mrb[113].mxu1 }
 0x41a   : > { %v13029_v63 = vadd.f32 %v9379_v26, %v9378_v6  ;;  %v10303_v6 = vld [vmem:[%s15402_s1 + $0x298] sm:$0xff]  }
 0x41b   : > { %v9430_v43 = vpop.f32.mrb[104].mxu0 }
 0x41c   : > { %v9431_v44 = vpop.f32.mrb[105].mxu0 }
 0x41d   : > { %v9432_v32 = vadd.f32 %v9431_v44, %v9430_v43  ;;  %v9433_v46 = vpop.f32.mrb[106].mxu0  ;;  %v10299_v44 = vld [vmem:[%s15402_s1 + $0x288] sm:$0xff]  }
 0x41e   : > { %v9434_v4 = vpop.f32.mrb[107].mxu0  ;;  %9536 = vmatprep.subr.bf16.mxu0 %v10299_v44 }
 0x41f   : > { %v9435_v42 = vadd.f32 %v9434_v4, %v9433_v46  ;;  %v13018_v51 = vadd.f32 %v9432_v32, %v12965_v0  ;;  %9537 = vmatpush3.bf16.msra.mxu0 %v10300_v10  ;;  %v13102_v10 = vld [vmem:[%s15404_s3 + $0x1] ss:$0 sm:$0xff] }
 0x421   : > { %v13021_v1 = vadd.f32 %v9435_v42, %v12967_v3  ;;  %v9381_v3 = vpop.f32.mrb[114].mxu1 }
 0x422   : > { %v9382_v48 = vpop.f32.mrb[115].mxu1 }
 0x423   : > { %v9436_v60 = vpop.f32.mrb[108].mxu0  ;;  %v13031_v9 = vadd.f32 %v9382_v48, %v9381_v3  ;;  %v9384_v58 = vpop.f32.mrb[116].mxu1 }
 0x424   : > { %v9437_v53 = vpop.f32.mrb[109].mxu0  ;;  %v9385_v41 = vpop.f32.mrb[117].mxu1 }
 0x425   : > { %v9438_v20 = vadd.f32 %v9437_v53, %v9436_v60  ;;  %v9439_v0 = vpop.f32.mrb[110].mxu0  ;;  %v13039_v15 = vadd.f32 %v9385_v41, %v9384_v58  ;;  %v9387_v31 = vpop.f32.mrb[118].mxu1  ;;  %v10302_v60 = vld [vmem:[%s15402_s1 + $0x250] sm:$0xff]  }
 0x426   : > { %v9440_v57 = vpop.f32.mrb[111].mxu0  ;;  %v9388_v52 = vpop.f32.mrb[119].mxu1 }
 0x427   : > { %v9441_v28 = vadd.f32 %v9440_v57, %v9439_v0  ;;  %v13034_v39 = vadd.f32 %v9438_v20, %v12969_v34  ;;  %v13041_v7 = vadd.f32 %v9388_v52, %v9387_v31  ;;  %v9390_v43 = vpop.f32.mrb[120].mxu1  ;;  %v10306_v31 = vld [vmem:[%s15402_s1 + $0x260] sm:$0xff]  }
 0x428   : > { %v9391_v49 = vpop.f32.mrb[121].mxu1 }
 0x429   : > { %v13037_v17 = vadd.f32 %v9441_v28, %v12971_v21  ;;  %v9393_v8 = vpop.f32.mrb[122].mxu1 }
 0x42a   : > { %v9394_v5 = vpop.f32.mrb[123].mxu1 }
 0x42b   : > { %v9442_v55 = vpop.f32.mrb[112].mxu0  ;;  %v13060_v18 = vadd.f32 %v9394_v5, %v9393_v8 }
 0x42c   : > { %v9443_v16 = vpop.f32.mrb[113].mxu0 }
 0x42d   : > { %v9444_v14 = vadd.f32 %v9443_v16, %v9442_v55  ;;  %v9445_v45 = vpop.f32.mrb[114].mxu0  ;;  %v9396_v20 = vpop.f32.mrb[124].mxu1 }
 0x42e   : > { %v9446_v29 = vpop.f32.mrb[115].mxu0  ;;  %v9397_v3 = vpop.f32.mrb[125].mxu1 }
 0x42f   : > { %v9447_v33 = vadd.f32 %v9446_v29, %v9445_v45  ;;  %v13044_v34 = vadd.f32 %v9444_v14, %v12973_v38  ;;  %v10301_v38 = vld [vmem:[%s15402_s1 + $0x290] sm:$0xff]   ;;  %v13077_v28 = vadd.f32 %v9397_v3, %v9396_v20  ;;  %v9399_v55 = vpop.f32.mrb[126].mxu1 }
 0x430   : > { %9538 = vmatprep.subr.bf16.mxu0 %v10301_v38  ;;  %v9400_v16 = vpop.f32.mrb[127].mxu1 }
 0x431   : > { %v13047_v21 = vadd.f32 %v9447_v33, %v12975_v36  ;;  %v13058_v36 = vadd.f32 %v9391_v49, %v9390_v43  ;;  %9539 = vmatpush3.bf16.msra.mxu0 %v10302_v60  ;;  %v13082_v14 = vadd.f32 %v9400_v16, %v9399_v55 }
 0x432   : > { %9540 = vmatprep.subr.bf16.mxu0 %v10303_v6 }
 0x433   : > { %v9448_v12 = vpop.f32.mrb[116].mxu0 }
 0x434   : > { %v9449_v59 = vpop.f32.mrb[117].mxu0 }
 0x435   : > { %v9450_v32 = vadd.f32 %v9449_v59, %v9448_v12  ;;  %v9451_v46 = vpop.f32.mrb[118].mxu0  ;;  %v10072_v33 = vpop.f32.mrb[128].mxu1  ;;  %v13096_v12 = vld [vmem:[%s15403_s2 + $0x1] ss:$0 sm:$0xff] }
 0x436   : > { %v9452_v4 = vpop.f32.mrb[119].mxu0  ;;  %v4100_v59 = vpop.f32.mrb[129].mxu1 }
 0x437   : > { %v9453_v42 = vadd.f32 %v9452_v4, %v9451_v46  ;;  %v13063_v56 = vadd.f32 %v9450_v32, %v12977_v2  ;;  %v10304_v2 = vld [vmem:[%s15402_s1 + $0x258] sm:$0xff]   ;;  %v10073_v38 = vpop.f32.mrb[130].mxu1 }
 0x438   : > { %9541 = vmatpush3.bf16.msra.mxu0 %v10304_v2  ;;  %v4112_v8 = vadd.f32 %v10073_v38, %v13010_v35  ;;  %v4103_v4 = vpop.f32.mrb[131].mxu1  ;;  %v10308_v38 = vld [vmem:[%s15402_s1 + $0x268] sm:$0xff]  }
 0x439   : > { %v13072_v53 = vadd.f32 %v9453_v42, %v12979_v24  ;;  %v10305_v24 = vld [vmem:[%s15402_s1 + $0x2a0] sm:$0xff]   ;;  %v4104_v42 = vadd.f32 %v4103_v4, %v13000_v11 }
 0x43a   : > { %9542 = vmatprep.subr.bf16.mxu0 %v10305_v24 }
 0x43b   : > { %v9454_v26 = vpop.f32.mrb[120].mxu0  ;;  %v4236_v20 = vmul.f32 %v13096_v12, %v4104_v42 }
 0x43c   : > { %v9455_v0 = vpop.f32.mrb[121].mxu0  ;;  %9543 = vmatpush3.bf16.msra.mxu0 %v10306_v31 }
 0x43d   : > { %v9456_v57 = vadd.f32 %v9455_v0, %v9454_v26  ;;  %v9457_v48 = vpop.f32.mrb[122].mxu0  ;;  %v13129_v3 = vadd.f32 %v13102_v10, %v4236_v20 }
 0x43e   : > { %v9458_v58 = vpop.f32.mrb[123].mxu0 }
 0x43f   : > { %v9459_v41 = vadd.f32 %v9458_v58, %v9457_v48  ;;  %v13085_v45 = vadd.f32 %v9456_v57, %v12981_v19  ;;  %v4109_v19 = vadd.f32 %v10072_v33, %v13007_v47  ;;  %v10076_v57 = vpop.f32.mrb[132].mxu1 }
 0x440   : > { %v4125_v58 = vadd.f32 %v10076_v57, %v13034_v39 }
 0x441   : > { %v13091_v29 = vadd.f32 %v9459_v41, %v12983_v25  ;;  %v4101_v25 = vadd.f32 %v4100_v59, %v12998_v22  ;;  %v4237_v46 = vmul.f32 %v13096_v12, %v4109_v19  ;;  %v4238_v22 = vmul.f32 %v13096_v12, %v4112_v8  ;;  %v10307_v19 = vld [vmem:[%s15402_s1 + $0x2a8] sm:$0xff]  }
 0x442   : > { %9544 = vmatprep.subr.bf16.mxu0 %v10307_v19 }
 0x443   : > { %v9460_v52 = vpop.f32.mrb[124].mxu0  ;;  %v4235_v47 = vmul.f32 %v13096_v12, %v4101_v25  ;;  %v13113_v6 = vadd.f32 %v13102_v10, %v4237_v46  ;;  %v13125_v11 = vadd.f32 %v13102_v10, %v4238_v22  ;;  %9545 = vmatpush3.bf16.msra.mxu0 %v10308_v38 }
 0x444   : > { %v9461_v43 = vpop.f32.mrb[125].mxu0 }
 0x445   : > { %v9462_v49 = vadd.f32 %v9461_v43, %v9460_v52  ;;  %v9463_v44 = vpop.f32.mrb[126].mxu0  ;;  %v13117_v26 = vadd.f32 %v13102_v10, %v4235_v47  ;;  %v4309_v2 = vsub.f32 0.0, %v13113_v6  ;;  %v4310_v24 = vsub.f32 0.0, %v13125_v11 }
 0x446   : > { %v9464_v32 = vpop.f32.mrb[127].mxu0  ;;  %v4308_v52 = vsub.f32 0.0, %v13129_v3 }
 0x447   : > { %v9465_v5 = vadd.f32 %v9464_v32, %v9463_v44  ;;  %v13110_v60 = vadd.f32 %v9462_v49, %v12985_v30  ;;  %v4307_v0 = vsub.f32 0.0, %v13117_v26  ;;  %v4343_v48 = vmul.f32 1.442695, %v4309_v2 }
 0x448   : > { %v4345_v59 = vmul.f32 1.442695, %v4310_v24  ;;  %v4241_v44 = vmul.f32 %v13096_v12, %v4125_v58 }
 0x449   : > { %v13121_v35 = vadd.f32 %v9465_v5, %v12987_v61  ;;  %v4116_v61 = vpop.f32.mrb[133].mxu1  ;;  %v4339_v41 = vmul.f32 1.442695, %v4307_v0  ;;  %10497 = vpow2.f32 %v4343_v48 }
 0x44a   : > { %v4117_v33 = vadd.f32 %v4116_v61, %v13018_v51  ;;  %v10077_v43 = vpop.f32.mrb[134].mxu1  ;;  %v4341_v51 = vmul.f32 1.442695, %v4308_v52  ;;  %v13145_v8 = vadd.f32 %v13102_v10, %v4241_v44 }
 0x44b   : > { %v9466_v30 = vpop.f32.mrb[128].mxu0  ;;  %v4128_v39 = vadd.f32 %v10077_v43, %v13037_v17  ;;  %v4119_v25 = vpop.f32.mrb[135].mxu1  ;;  %10499 = vpow2.f32 %v4339_v41 }
 0x44c   : > { %v9467_v55 = vpop.f32.mrb[129].mxu0  ;;  %v4239_v46 = vmul.f32 %v13096_v12, %v4117_v33  ;;  %10501 = vpow2.f32 %v4345_v59  ;;  %v4120_v5 = vadd.f32 %v4119_v25, %v13021_v1  ;;  %v4313_v22 = vsub.f32 0.0, %v13145_v8  ;;  %v10080_v0 = vpop.f32.mrb[136].mxu1 }
 0x44d   : > { %v9468_v16 = vadd.f32 %v9467_v55, %v9466_v30  ;;  %v9469_v31 = vpop.f32.mrb[130].mxu0  ;;  %v4242_v4 = vmul.f32 %v13096_v12, %v4128_v39  ;;  %10503 = vpow2.f32 %v4341_v51  ;;  %v4132_v24 = vpop.f32.mrb[137].mxu1 }
 0x44e   : > { %v9470_v49 = vpop.f32.mrb[131].mxu0  ;;  %v13150_v17 = vadd.f32 %v13102_v10, %v4239_v46  ;;  %v4240_v2 = vmul.f32 %v13096_v12, %v4120_v5  ;;  %v4351_v57 = vmul.f32 1.442695, %v4313_v22  ;;  %v4133_v41 = vadd.f32 %v4132_v24, %v13044_v34 }
 0x44f   : > { %v9471_v32 = vadd.f32 %v9470_v49, %v9469_v31  ;;  %v13153_v47 = vadd.f32 %v9468_v16, %v12989_v54  ;;  %v13160_v20 = vadd.f32 %v13102_v10, %v4242_v4  ;;  %v10081_v31 = vpop.f32.mrb[138].mxu1 }
 0x450   : > { %v4311_v1 = vsub.f32 0.0, %v13150_v17  ;;  %v13166_v54 = vadd.f32 %v13102_v10, %v4240_v2  ;;  %10505 = vpow2.f32 %v4351_v57  ;;  %v4135_v59 = vpop.f32.mrb[139].mxu1  ;;  %v4144_v44 = vadd.f32 %v10081_v31, %v13072_v53 }
 0x451   : > { %v13156_v42 = vadd.f32 %v9471_v32, %v12991_v37  ;;  %v4314_v55 = vsub.f32 0.0, %v13160_v20  ;;  %v4141_v37 = vadd.f32 %v10080_v0, %v13063_v56  ;;  %v4243_v56 = vmul.f32 %v13096_v12, %v4133_v41 }
 0x452   : > { %v4347_v61 = vmul.f32 1.442695, %v4311_v1  ;;  %v4312_v43 = vsub.f32 0.0, %v13166_v54  ;;  %v4136_v38 = vadd.f32 %v4135_v59, %v13047_v21  ;;  %v4246_v4 = vmul.f32 %v13096_v12, %v4144_v44 }
 0x453   : > { %v9472_v30 = vpop.f32.mrb[132].mxu0  ;;  %v4353_v52 = vmul.f32 1.442695, %v4314_v55  ;;  %v4245_v19 = vmul.f32 %v13096_v12, %v4141_v37  ;;  %v10498_v39 = vpop.eup %10497  ;;  %v13181_v46 = vadd.f32 %v13102_v10, %v4243_v56 }
 0x454   : > { %v9473_v48 = vpop.f32.mrb[133].mxu0  ;;  %10507 = vpow2.f32 %v4347_v61  ;;  %v4349_v25 = vmul.f32 1.442695, %v4312_v43  ;;  %v4405_v51 = vadd.f32 1.0, %v10498_v39  ;;  %v10084_v55 = vpop.f32.mrb[140].mxu1  ;;  %v10309_v43 = vld [vmem:[%s15402_s1 + $0x2b0] sm:$0xff]  }
 0x455   : > { %v9474_v58 = vadd.f32 %v9473_v48, %v9472_v30  ;;  %v9475_v16 = vpop.f32.mrb[134].mxu0  ;;  %10509 = vpow2.f32 %v4353_v52  ;;  %v13177_v34 = vadd.f32 %v13102_v10, %v4245_v19  ;;  %v10500_v32 = vpop.eup %10499  ;;  %v4244_v30 = vmul.f32 %v13096_v12, %v4136_v38  ;;  %9546 = vmatprep.subr.bf16.mxu0 %v10309_v43 }
 0x456   : > { %v9476_v33 = vpop.f32.mrb[135].mxu0  ;;  %v10502_v22 = vpop.eup %10501  ;;  %v4403_v53 = vadd.f32 1.0, %v10500_v32  ;;  %10511 = vpow2.f32 %v4349_v25  ;;  %v4315_v57 = vsub.f32 0.0, %v13181_v46  ;;  %v13191_v48 = vadd.f32 %v13102_v10, %v4246_v4  ;;  %v10310_v25 = vld [vmem:[%s15402_s1 + $0x270] sm:$0xff]  }
 0x457   : > { %v13172_v49 = vadd.f32 %v9476_v33, %v9475_v16  ;;  %v13185_v5 = vadd.f32 %v9474_v58, %v12993_v27  ;;  %v4317_v2 = vsub.f32 0.0, %v13177_v34  ;;  %v10504_v1 = vpop.eup %10503  ;;  %10513 = vrcp.f32 %v4405_v51  ;;  %v4148_v61 = vpop.f32.mrb[141].mxu1  ;;  %9547 = vmatpush3.bf16.msra.mxu0 %v10310_v25 }
 0x458   : > { %v4406_v21 = vadd.f32 1.0, %v10502_v22  ;;  %10515 = vrcp.f32 %v4403_v53  ;;  %v4404_v27 = vadd.f32 1.0, %v10504_v1  ;;  %v13194_v58 = vadd.f32 %v13102_v10, %v4244_v30  ;;  %v10085_v33 = vpop.f32.mrb[142].mxu1 }
 0x459   : > { %v4359_v37 = vmul.f32 1.442695, %v4317_v2  ;;  %v4355_v41 = vmul.f32 1.442695, %v4315_v57  ;;  %v4318_v52 = vsub.f32 0.0, %v13191_v48  ;;  %v4157_v56 = vadd.f32 %v10084_v55, %v13110_v60  ;;  %v4151_v39 = vpop.f32.mrb[143].mxu1 }
 0x45a   : > { %10517 = vrcp.f32 %v4406_v21  ;;  %v4316_v59 = vsub.f32 0.0, %v13194_v58  ;;  %v4149_v44 = vadd.f32 %v4148_v61, %v13085_v45  ;;  %v4160_v51 = vadd.f32 %v10085_v33, %v13121_v35  ;;  %v10506_v4 = vpop.eup %10505  ;;  %v10088_v61 = vpop.f32.mrb[144].mxu1 }
 0x45b   : > { %v9478_v0 = vpop.f32.mrb[136].mxu0  ;;  %10519 = vrcp.f32 %v4404_v27  ;;  %v4361_v38 = vmul.f32 1.442695, %v4318_v52  ;;  %v4249_v53 = vmul.f32 %v13096_v12, %v4157_v56  ;;  %v4409_v2 = vadd.f32 1.0, %v10506_v4  ;;  %v4164_v43 = vpop.f32.mrb[145].mxu1 }
 0x45c   : > { %v9479_v24 = vpop.f32.mrb[137].mxu0  ;;  %10521 = vpow2.f32 %v4359_v37  ;;  %v4357_v22 = vmul.f32 1.442695, %v4316_v59  ;;  %v4247_v60 = vmul.f32 %v13096_v12, %v4149_v44  ;;  %v4250_v30 = vmul.f32 %v13096_v12, %v4160_v51  ;;  %v10089_v25 = vpop.f32.mrb[146].mxu1 }
 0x45d   : > { %v13196_v16 = vadd.f32 %v9479_v24, %v9478_v0  ;;  %v9481_v31 = vpop.f32.mrb[138].mxu0  ;;  %10523 = vpow2.f32 %v4355_v41  ;;  %v4152_v1 = vadd.f32 %v4151_v39, %v13091_v29  ;;  %v13216_v35 = vadd.f32 %v13102_v10, %v4249_v53 }
 0x45e   : > { %v9482_v19 = vpop.f32.mrb[139].mxu0  ;;  %v10508_v45 = vpop.eup %10507  ;;  %10525 = vpow2.f32 %v4361_v38  ;;  %v13219_v57 = vadd.f32 %v13102_v10, %v4247_v60  ;;  %v13222_v37 = vadd.f32 %v13102_v10, %v4250_v30  ;;  %v4173_v33 = vadd.f32 %v10088_v61, %v13185_v5 }
 0x45f   : > { %v13208_v32 = vadd.f32 %v9482_v19, %v9481_v31  ;;  %v10510_v21 = vpop.eup %10509  ;;  %v4407_v0 = vadd.f32 1.0, %v10508_v45  ;;  %10527 = vpow2.f32 %v4357_v22  ;;  %v4248_v24 = vmul.f32 %v13096_v12, %v4152_v1  ;;  %v4167_v45 = vpop.f32.mrb[147].mxu1 }
 0x460   : > { %10529 = vrcp.f32 %v4409_v2  ;;  %v4410_v55 = vadd.f32 1.0, %v10510_v21  ;;  %v10512_v41 = vpop.eup %10511  ;;  %v4321_v29 = vsub.f32 0.0, %v13216_v35  ;;  %v4319_v52 = vsub.f32 0.0, %v13219_v57 }
 0x461   : > { %10531 = vrcp.f32 %v4407_v0  ;;  %v10514_v19 = vpop.eup %10513  ;;  %v4408_v59 = vadd.f32 1.0, %v10512_v41  ;;  %v4322_v39 = vsub.f32 0.0, %v13222_v37  ;;  %v13231_v60 = vadd.f32 %v13102_v10, %v4248_v24 }
 0x462   : > { %10533 = vrcp.f32 %v4410_v55  ;;  %v10516_v38 = vpop.eup %10515  ;;  %v4501_v51 = vmul.f32 %v10514_v19, %v13113_v6  ;;  %v4367_v4 = vmul.f32 1.442695, %v4321_v29  ;;  %v4363_v22 = vmul.f32 1.442695, %v4319_v52 }
 0x463   : > { %v9484_v27 = vpop.f32.mrb[140].mxu0  ;;  %v4499_v2 = vmul.f32 %v10516_v38, %v13117_v26  ;;  %10535 = vrcp.f32 %v4408_v59  ;;  %v4369_v30 = vmul.f32 1.442695, %v4322_v39  ;;  %v4320_v6 = vsub.f32 0.0, %v13231_v60 }
 0x464   : > { %v9485_v31 = vpop.f32.mrb[141].mxu0  ;;  %v10518_v5 = vpop.eup %10517  ;;  %4533 = vst.msk [vmem:[#allocation2 + $0x31] sm:$0xff] %vm251_vm0, %v4501_v51  ;;  %10537 = vpow2.f32 %v4367_v4  ;;  %v4253_v55 = vmul.f32 %v13096_v12, %v4173_v33  ;;  %v4165_v26 = vadd.f32 %v4164_v43, %v13153_v47  ;;  %v4015_v61 = vadd.f32 %v13172_v49, %v12995_v13 }
 0x465   : > { %v9486_v56 = vadd.f32 %v9485_v31, %v9484_v27  ;;  %v9487_v44 = vpop.f32.mrb[142].mxu0  ;;  %v10520_v21 = vpop.eup %10519  ;;  %v4502_v0 = vmul.f32 %v10518_v5, %v13125_v11  ;;  %4531 = vst.msk [vmem:[#allocation2 + $0x19] sm:$0xff] %vm251_vm0, %v4499_v2  ;;  %10539 = vpow2.f32 %v4363_v22  ;;  %v4365_v29 = vmul.f32 1.442695, %v4320_v6  ;;  %v10312_v2 = vld [vmem:[%s15402_s1 + $0x278] sm:$0xff]  }
 0x466   : > { %v9488_v53 = vpop.f32.mrb[143].mxu0  ;;  %v10522_v27 = vpop.eup %10521  ;;  %v4500_v24 = vmul.f32 %v10520_v21, %v13129_v3  ;;  %10541 = vpow2.f32 %v4369_v30  ;;  %v13247_v31 = vadd.f32 %v13102_v10, %v4253_v55  ;;  %v4251_v19 = vmul.f32 %v13096_v12, %v4165_v26 }
 0x467   : > { %v13234_v1 = vadd.f32 %v9488_v53, %v9487_v44  ;;  %v10524_v41 = vpop.eup %10523  ;;  %4534 = vst.msk [vmem:[#allocation2 + $0x39] sm:$0xff] %vm251_vm0, %v4502_v0  ;;  %v4413_v11 = vadd.f32 1.0, %v10522_v27  ;;  %v4176_v47 = vadd.f32 %v10089_v25, %v4015_v61  ;;  %v4168_v43 = vadd.f32 %v4167_v45, %v13156_v42  ;;  %v10092_v13 = vpop.f32.mrb[148].mxu1  ;;  %v10311_v45 = vld [vmem:[%s15402_s1 + $0x2b8] sm:$0xff]  }
 0x468   : > { %v10526_v52 = vpop.eup %10525  ;;  %4532 = vst.msk [vmem:[#allocation2 + $0x21] sm:$0xff] %vm251_vm0, %v4500_v24  ;;  %v4411_v33 = vadd.f32 1.0, %v10524_v41  ;;  %v4325_v44 = vsub.f32 0.0, %v13247_v31  ;;  %v4028_v38 = vadd.f32 %v9486_v56, %v13012_v40  ;;  %v4180_v51 = vpop.f32.mrb[149].mxu1  ;;  %v13257_v5 = vadd.f32 %v13102_v10, %v4251_v19  ;;  %9548 = vmatprep.subr.bf16.mxu0 %v10311_v45 }
 0x469   : > { %v10528_v49 = vpop.eup %10527  ;;  %10543 = vrcp.f32 %v4413_v11  ;;  %v4414_v59 = vadd.f32 1.0, %v10526_v52  ;;  %v10093_v42 = vpop.f32.mrb[150].mxu1  ;;  %v4254_v21 = vmul.f32 %v13096_v12, %v4176_v47  ;;  %v4252_v41 = vmul.f32 %v13096_v12, %v4168_v43  ;;  %9549 = vmatpush3.bf16.msra.mxu0 %v10312_v2 }
 0x46a   : > { %v10530_v4 = vpop.eup %10529  ;;  %10545 = vrcp.f32 %v4411_v33  ;;  %v4412_v22 = vadd.f32 1.0, %v10528_v49  ;;  %v4375_v30 = vmul.f32 1.442695, %v4325_v44  ;;  %v13267_v6 = vpop.f32.mrb[151].mxu1  ;;  %v4323_v24 = vsub.f32 0.0, %v13257_v5 }
 0x46b   : > { %v9490_v3 = vpop.f32.mrb[144].mxu0  ;;  %v10532_v40 = vpop.eup %10531  ;;  %v4505_v56 = vmul.f32 %v10530_v4, %v13145_v8  ;;  %10547 = vrcp.f32 %v4414_v59  ;;  %v13276_v61 = vadd.f32 %v13102_v10, %v4254_v21  ;;  %v4189_v52 = vadd.f32 %v10092_v13, %v4028_v38 }
 0x46c   : > { %v9491_v39 = vpop.f32.mrb[145].mxu0  ;;  %v10534_v55 = vpop.eup %10533  ;;  %v4503_v27 = vmul.f32 %v10532_v40, %v13150_v17  ;;  %10549 = vrcp.f32 %v4412_v22  ;;  %v4371_v17 = vmul.f32 1.442695, %v4323_v24  ;;  %v4020_v33 = vadd.f32 %v13196_v16, %v13002_v62 }
 0x46d   : > { %v13254_v53 = vadd.f32 %v9491_v39, %v9490_v3  ;;  %v9493_v25 = vpop.f32.mrb[146].mxu0  ;;  %4537 = vst.msk [vmem:[#allocation2 + $0x61] sm:$0xff] %vm251_vm0, %v4505_v56  ;;  %v4506_v8 = vmul.f32 %v10534_v55, %v13160_v20  ;;  %10551 = vpow2.f32 %v4365_v29  ;;  %v10536_v11 = vpop.eup %10535  ;;  %v4326_v29 = vsub.f32 0.0, %v13276_v61 }
 0x46e   : > { %v9494_v0 = vpop.f32.mrb[147].mxu0  ;;  %4535 = vst.msk [vmem:[#allocation2 + $0x49] sm:$0xff] %vm251_vm0, %v4503_v27  ;;  %10553 = vpow2.f32 %v4375_v30  ;;  %v10538_v3 = vpop.eup %10537  ;;  %v4504_v20 = vmul.f32 %v10536_v11, %v13166_v54  ;;  %v13286_v19 = vadd.f32 %v13102_v10, %v4252_v41  ;;  %v4031_v47 = vadd.f32 %v13234_v1, %v13015_v23 }
 0x46f   : > { %v13271_v26 = vadd.f32 %v9494_v0, %v9493_v25  ;;  %4538 = vst.msk [vmem:[#allocation2 + $0x69] sm:$0xff] %vm251_vm0, %v4506_v8  ;;  %v10540_v43 = vpop.eup %10539  ;;  %v4417_v49 = vadd.f32 1.0, %v10538_v3  ;;  %10555 = vpow2.f32 %v4371_v17  ;;  %v4257_v59 = vmul.f32 %v13096_v12, %v4189_v52  ;;  %v10096_v16 = vpop.f32.mrb[152].mxu1 }
 0x470   : > { %v4181_v62 = vadd.f32 %v4180_v51, %v4020_v33  ;;  %v10542_v44 = vpop.eup %10541  ;;  %4536 = vst.msk [vmem:[#allocation2 + $0x51] sm:$0xff] %vm251_vm0, %v4504_v20  ;;  %v4415_v54 = vadd.f32 1.0, %v10540_v43  ;;  %v4377_v39 = vmul.f32 1.442695, %v4326_v29  ;;  %v4324_v38 = vsub.f32 0.0, %v13286_v19  ;;  %v4196_v25 = vpop.f32.mrb[153].mxu1 }
 0x471   : > { %v4192_v22 = vadd.f32 %v10093_v42, %v4031_v47  ;;  %10557 = vrcp.f32 %v4417_v49  ;;  %v4418_v23 = vadd.f32 1.0, %v10542_v44  ;;  %v13294_v1 = vadd.f32 %v13102_v10, %v4257_v59  ;;  %v13296_v40 = vpop.f32.mrb[154].mxu1 }
 0x472   : > { %10559 = vrcp.f32 %v4415_v54  ;;  %v4373_v56 = vmul.f32 1.442695, %v4324_v38  ;;  %v4255_v30 = vmul.f32 %v13096_v12, %v4181_v62  ;;  %v13300_v55 = vpop.f32.mrb[155].mxu1  ;;  %v4023_v20 = vadd.f32 %v13208_v32, %v13004_v50  ;;  %v4820_v32 = vld [vmem:[#allocation2 + $0x20] sm:$0xff] }
 0x473   : > { %v9496_v13 = vpop.f32.mrb[148].mxu0  ;;  %v10544_v51 = vpop.eup %10543  ;;  %v4258_v21 = vmul.f32 %v13096_v12, %v4192_v22  ;;  %10561 = vrcp.f32 %v4418_v23  ;;  %v4329_v24 = vsub.f32 0.0, %v13294_v1  ;;  %v4036_v50 = vadd.f32 %v13254_v53, %v13029_v63 }
 0x474   : > { %v9497_v4 = vpop.f32.mrb[149].mxu0  ;;  %v10546_v42 = vpop.eup %10545  ;;  %v4509_v27 = vmul.f32 %v10544_v51, %v13177_v34  ;;  %10563 = vpow2.f32 %v4377_v39  ;;  %v13306_v17 = vadd.f32 %v13102_v10, %v4255_v30  ;;  %v4184_v59 = vadd.f32 %v13267_v6, %v4023_v20 }
 0x475   : > { %v9498_v45 = vadd.f32 %v9497_v4, %v9496_v13  ;;  %v9499_v2 = vpop.f32.mrb[150].mxu0  ;;  %v10548_v41 = vpop.eup %10547  ;;  %v4507_v11 = vmul.f32 %v10546_v42, %v13181_v46  ;;  %v13309_v52 = vadd.f32 %v13102_v10, %v4258_v21  ;;  %10565 = vpow2.f32 %v4373_v56  ;;  %v4819_v56 = vld [vmem:[#allocation2 + $0x18] sm:$0xff] }
 0x476   : > { %v9500_v0 = vpop.f32.mrb[151].mxu0  ;;  %v10550_v33 = vpop.eup %10549  ;;  %4541 = vst.msk [vmem:[#allocation2 + $0x91] sm:$0xff] %vm251_vm0, %v4509_v27  ;;  %v4510_v3 = vmul.f32 %v10548_v41, %v13191_v48  ;;  %v4383_v34 = vmul.f32 1.442695, %v4329_v24  ;;  %v4327_v47 = vsub.f32 0.0, %v13306_v17  ;;  %v4256_v22 = vmul.f32 %v13096_v12, %v4184_v59  ;;  %v4630_v27 = vld [vmem:[#allocation2 + $0x21] sm:$0xff] }
 0x477   : > { %v9501_v8 = vadd.f32 %v9500_v0, %v9499_v2  ;;  %v10552_v29 = vpop.eup %10551  ;;  %4539 = vst.msk [vmem:[#allocation2 + $0x79] sm:$0xff] %vm251_vm0, %v4507_v11  ;;  %v4508_v46 = vmul.f32 %v10550_v33, %v13194_v58  ;;  %v4330_v43 = vsub.f32 0.0, %v13309_v52  ;;  %v4044_v49 = vadd.f32 %v9498_v45, %v13039_v15  ;;  %v13324_v44 = vpop.f32.mrb[156].mxu1  ;;  %v10313_v41 = vld [vmem:[%s15402_s1 + $0x340] sm:$0xff]  }
 0x478   : > { %v10554_v13 = vpop.eup %10553  ;;  %4542 = vst.msk [vmem:[#allocation2 + $0x99] sm:$0xff] %vm251_vm0, %v4510_v3  ;;  %v4416_v48 = vadd.f32 1.0, %v10552_v29  ;;  %10567 = vpow2.f32 %v4383_v34  ;;  %v4379_v54 = vmul.f32 1.442695, %v4327_v47  ;;  %v4197_v6 = vadd.f32 %v4196_v25, %v4036_v50  ;;  %v13330_v2 = vpop.f32.mrb[157].mxu1  ;;  %10102 = vmatprep.subr.bf16.mxu0 %v10313_v41 }
 0x479   : > { %4540 = vst.msk [vmem:[#allocation2 + $0x81] sm:$0xff] %vm251_vm0, %v4508_v46  ;;  %v4421_v58 = vadd.f32 1.0, %v10554_v13  ;;  %v4385_v39 = vmul.f32 1.442695, %v4330_v43  ;;  %v4205_v15 = vadd.f32 %v10096_v16, %v4044_v49  ;;  %v10556_v4 = vpop.eup %10555  ;;  %v4047_v51 = vadd.f32 %v9501_v8, %v13041_v7  ;;  %v13334_v16 = vpop.f32.mrb[158].mxu1  ;;  %v4629_v46 = vld [vmem:[#allocation2 + $0x19] sm:$0xff] }
 0x47a   : > { %10569 = vrcp.f32 %v4416_v48  ;;  %v4419_v63 = vadd.f32 1.0, %v10556_v4  ;;  %v13337_v0 = vadd.f32 %v13102_v10, %v4256_v22  ;;  %v4259_v25 = vmul.f32 %v13096_v12, %v4197_v6  ;;  %v13340_v24 = vpop.f32.mrb[159].mxu1  ;;  %v4822_v49 = vld [vmem:[#allocation2 + $0x38] sm:$0xff]  ;;  %v4824_v6 = vld [vmem:[#allocation2 + $0x50] sm:$0xff] }
 0x47b   : > { %v9502_v62 = vpop.f32.mrb[152].mxu0  ;;  %10571 = vrcp.f32 %v4421_v58  ;;  %v4261_v53 = vmul.f32 %v13096_v12, %v4205_v15  ;;  %v10558_v21 = vpop.eup %10557  ;;  %v4851_v42 = vpack.c.bf16 %v4820_v32, %v4819_v56  ;;  %v4208_v33 = vadd.f32 %v13296_v40, %v4047_v51  ;;  %v4632_v13 = vld [vmem:[#allocation2 + $0x39] sm:$0xff]  ;;  %v4821_v58 = vld [vmem:[#allocation2 + $0x30] sm:$0xff] }
 0x47c   : > { %v9503_v38 = vpop.f32.mrb[153].mxu0  ;;  %10573 = vpow2.f32 %v4379_v54  ;;  %v10560_v7 = vpop.eup %10559  ;;  %v4513_v8 = vmul.f32 %v10558_v21, %v13216_v35  ;;  %v4328_v20 = vsub.f32 0.0, %v13337_v0  ;;  %v13353_v29 = vadd.f32 %v13102_v10, %v4259_v25  ;;  %v4631_v4 = vld [vmem:[#allocation2 + $0x31] sm:$0xff] }
 0x47d   : > { %v13328_v23 = vadd.f32 %v9503_v38, %v9502_v62  ;;  %v9505_v45 = vpop.f32.mrb[154].mxu0  ;;  %10575 = vrcp.f32 %v4419_v63  ;;  %v13347_v11 = vadd.f32 %v13102_v10, %v4261_v53  ;;  %v10562_v3 = vpop.eup %10561  ;;  %v4511_v34 = vmul.f32 %v10560_v7, %v13219_v57  ;;  %4883 = vrot.lane.b32.xlu0 %v4851_v42, %s10949_s9  ;;  %4612 = vst.msk [vmem:[#allocation4 + $0x28] sm:$0xff] %vm251_vm0, %v4851_v42  ;;  %v4823_v42 = vld [vmem:[#allocation2 + $0x48] sm:$0xff] }
 0x47e   : > { %v9506_v30 = vpop.f32.mrb[155].mxu0  ;;  %10577 = vpow2.f32 %v4385_v39  ;;  %v10564_v35 = vpop.eup %10563  ;;  %4545 = vst.msk [vmem:[#allocation2 + $0xc1] sm:$0xff] %vm251_vm0, %v4513_v8  ;;  %v4514_v40 = vmul.f32 %v10562_v3, %v13222_v37  ;;  %v4262_v57 = vmul.f32 %v13096_v12, %v4208_v33  ;;  %v4660_v43 = vpack.c.bf16 %v4630_v27, %v4629_v46  ;;  %v4634_v8 = vld [vmem:[#allocation2 + $0x51] sm:$0xff] }
 0x47f   : > { %v4333_v47 = vsub.f32 0.0, %v13347_v11  ;;  %v10566_v48 = vpop.eup %10565  ;;  %4543 = vst.msk [vmem:[#allocation2 + $0xa9] sm:$0xff] %vm251_vm0, %v4511_v34  ;;  %v4422_v59 = vadd.f32 1.0, %v10564_v35  ;;  %v4381_v62 = vmul.f32 1.442695, %v4328_v20  ;;  %v4331_v50 = vsub.f32 0.0, %v13353_v29 }
 0x480   : > { %v13363_v32 = vadd.f32 %v9506_v30, %v9505_v45  ;;  %4546 = vst.msk [vmem:[#allocation2 + $0xc9] sm:$0xff] %vm251_vm0, %v4514_v40  ;;  %v4420_v37 = vadd.f32 1.0, %v10566_v48  ;;  %v13367_v15 = vadd.f32 %v13102_v10, %v4262_v57  ;;  %4693 = vrot.lane.b32.xlu1 %v4660_v43, %s10949_s9  ;;  %v4039_v38 = vadd.f32 %v13271_v26, %v13031_v9  ;;  %v4633_v35 = vld [vmem:[#allocation2 + $0x49] sm:$0xff] }
 0x481   : > { %v4391_v39 = vmul.f32 1.442695, %v4333_v47  ;;  %10579 = vrcp.f32 %v4422_v59  ;;  %v4387_v45 = vmul.f32 1.442695, %v4331_v50  ;;  %v4852_v53 = vpack.c.bf16 %v4822_v49, %v4821_v58  ;;  %v4826_v43 = vld [vmem:[#allocation2 + $0x68] sm:$0xff]  ;;  %v4825_v50 = vld [vmem:[#allocation2 + $0x60] sm:$0xff] }
 0x482   : > { %v10568_v63 = vpop.eup %10567  ;;  %v13372_v51 = vpack.c.bf16 %v4632_v13, %v4631_v4  ;;  %10581 = vrcp.f32 %v4420_v37  ;;  %v4334_v21 = vsub.f32 0.0, %v13367_v15  ;;  %v4200_v25 = vadd.f32 %v13300_v55, %v4039_v38  ;;  %v4636_v13 = vld [vmem:[#allocation2 + $0x69] sm:$0xff]  ;;  %v4828_v58 = vld [vmem:[#allocation2 + $0x80] sm:$0xff] }
 0x483   : > { %v9508_v54 = vpop.f32.mrb[156].mxu0  ;;  %v4425_v30 = vadd.f32 1.0, %v10568_v63  ;;  %10583 = vpow2.f32 %v4381_v62  ;;  %4885 = vrot.lane.b32.xlu0 %v4852_v53, %s10949_s9  ;;  %v4052_v26 = vadd.f32 %v13328_v23, %v13058_v36  ;;  %v4853_v7 = vpack.c.bf16 %v4824_v6, %v4823_v42  ;;  %4613 = vst.msk [vmem:[#allocation4 + $0x50] sm:$0xff] %vm251_vm0, %v4852_v53  ;;  %v4638_v38 = vld [vmem:[#allocation2 + $0x81] sm:$0xff]  ;;  %v4827_v63 = vld [vmem:[#allocation2 + $0x78] sm:$0xff] }
 0x484   : > { %v9509_v22 = vpop.f32.mrb[157].mxu0  ;;  %v10570_v41 = vpop.eup %10569  ;;  %v4393_v34 = vmul.f32 1.442695, %v4334_v21  ;;  %v4260_v55 = vmul.f32 %v13096_v12, %v4200_v25  ;;  %4695 = vrot.lane.b32.xlu1 %v13372_v51, %s10949_s9  ;;  %v13392_v57 = vpack.c.bf16 %v4634_v8, %v4633_v35  ;;  %v4854_v37 = vpack.c.bf16 %v4826_v43, %v4825_v50  ;;  %v4830_v21 = vld [vmem:[#allocation2 + $0x98] sm:$0xff]  ;;  %v4829_v8 = vld [vmem:[#allocation2 + $0x90] sm:$0xff] }
 0x485   : > { %v9511_v56 = vpop.f32.mrb[158].mxu0  ;;  %v9510_v9 = vadd.f32 %v9509_v22, %v9508_v54  ;;  %v10572_v33 = vpop.eup %10571  ;;  %v4512_v3 = vmul.f32 %v10570_v41, %v13231_v60  ;;  %10585 = vrcp.f32 %v4425_v30  ;;  %v4213_v23 = vadd.f32 %v13330_v2, %v4052_v26  ;;  %4614 = vst.msk [vmem:[#allocation4 + $0x78] sm:$0xff] %vm251_vm0, %v4853_v7  ;;  %v5013_v43 = vld [vmem:[#allocation2 + $0x32] sm:$0xff]  ;;  %v5018_v50 = vld [vmem:[#allocation2 + $0x6a] sm:$0xff] }
 0x486   : > { %v9512_v27 = vpop.f32.mrb[159].mxu0  ;;  %v10574_v20 = vpop.eup %10573  ;;  %v4517_v46 = vmul.f32 %v10572_v33, %v13247_v31  ;;  %10587 = vpow2.f32 %v4391_v39  ;;  %v13390_v47 = vadd.f32 %v13102_v10, %v4260_v55  ;;  %v4055_v54 = vadd.f32 %v13363_v32, %v13060_v18  ;;  %v4635_v39 = vld [vmem:[#allocation2 + $0x61] sm:$0xff]  ;;  %v4637_v32 = vld [vmem:[#allocation2 + $0x79] sm:$0xff]  ;;  %4615 = vst.msk [vmem:[#allocation4 + $0xa0] sm:$0xff] %vm251_vm0, %v4854_v37 }
 0x487   : > { %v4060_v36 = vadd.f32 %v9510_v9, %v13077_v28  ;;  %v10576_v40 = vpop.eup %10575  ;;  %4544 = vst.msk [vmem:[#allocation2 + $0xb1] sm:$0xff] %vm251_vm0, %v4512_v3  ;;  %v4423_v60 = vadd.f32 1.0, %v10574_v20  ;;  %10589 = vpow2.f32 %v4387_v45  ;;  %v4263_v49 = vmul.f32 %v13096_v12, %v4213_v23  ;;  %4887 = vrot.lane.b32.xlu0 %v4853_v7, %s10949_s9  ;;  %v4640_v55 = vld [vmem:[#allocation2 + $0x99] sm:$0xff]  ;;  %v4831_v23 = vld [vmem:[#allocation2 + $0xa8] sm:$0xff] }
 0x488   : > { %v10578_v31 = vpop.eup %10577  ;;  %4549 = vst.msk [vmem:[#allocation2 + $0xf1] sm:$0xff] %vm251_vm0, %v4517_v46  ;;  %v4515_v28 = vmul.f32 %v10576_v40, %v13257_v5  ;;  %10591 = vpow2.f32 %v4393_v34  ;;  %v4332_v59 = vsub.f32 0.0, %v13390_v47  ;;  %4697 = vrot.lane.b32.xlu1 %v13392_v57, %s10949_s9  ;;  %v9513_v62 = vadd.f32 %v9512_v27, %v9511_v56  ;;  %v4834_v35 = vld [vmem:[#allocation2 + $0xc8] sm:$0xff]  ;;  %v5011_v40 = vld [vmem:[#allocation2 + $0x1a] sm:$0xff] }
 0x489   : > { %v4221_v2 = vadd.f32 %v13324_v44, %v4060_v36  ;;  %10593 = vrcp.f32 %v4423_v60  ;;  %v4426_v48 = vadd.f32 1.0, %v10578_v31  ;;  %v13405_v44 = vadd.f32 %v13102_v10, %v4263_v49  ;;  %v5012_v60 = vld [vmem:[#allocation2 + $0x22] sm:$0xff] }
 0x48a   : > { %4547 = vst.msk [vmem:[#allocation2 + $0xd9] sm:$0xff] %vm251_vm0, %v4515_v28  ;;  %v4389_v4 = vmul.f32 1.442695, %v4332_v59  ;;  %v4063_v22 = vadd.f32 %v9513_v62, %v13082_v14  ;;  %v13410_v6 = vpack.c.bf16 %v4636_v13, %v4635_v39  ;;  %v4216_v30 = vadd.f32 %v13340_v24, %v4055_v54  ;;  %v5016_v59 = vld [vmem:[#allocation2 + $0x52] sm:$0xff]  ;;  %v5017_v62 = vld [vmem:[#allocation2 + $0x62] sm:$0xff]  ;;  %v5019_v39 = vld [vmem:[#allocation2 + $0x7a] sm:$0xff] }
 0x48b   : > { %v4265_v5 = vmul.f32 %v13096_v12, %v4221_v2  ;;  %10595 = vrcp.f32 %v4426_v48  ;;  %v10580_v45 = vpop.eup %10579  ;;  %v4335_v56 = vsub.f32 0.0, %v13405_v44  ;;  %4889 = vrot.lane.b32.xlu0 %v4854_v37, %s10949_s9  ;;  %v4855_v18 = vpack.c.bf16 %v4828_v58, %v4827_v63  ;;  %v5015_v48 = vld [vmem:[#allocation2 + $0x4a] sm:$0xff]  ;;  %v4833_v37 = vld [vmem:[#allocation2 + $0xc0] sm:$0xff] }
 0x48c   : > { %v10582_v25 = vpop.eup %10581  ;;  %v4518_v14 = vmul.f32 %v10580_v45, %v13276_v61  ;;  %10597 = vpow2.f32 %v4389_v4  ;;  %v4224_v42 = vadd.f32 %v13334_v16, %v4063_v22  ;;  %4699 = vrot.lane.b32.xlu1 %v13410_v6, %s10949_s9  ;;  %v13423_v27 = vpack.c.bf16 %v4638_v38, %v4637_v32  ;;  %v5020_v38 = vld [vmem:[#allocation2 + $0x82] sm:$0xff]  ;;  %v5022_v32 = vld [vmem:[#allocation2 + $0x9a] sm:$0xff] }
 0x48d   : > { %v13413_v53 = vadd.f32 %v13102_v10, %v4265_v5  ;;  %v10584_v41 = vpop.eup %10583  ;;  %v4516_v24 = vmul.f32 %v10582_v25, %v13286_v19  ;;  %v4395_v26 = vmul.f32 1.442695, %v4335_v56  ;;  %v4264_v7 = vmul.f32 %v13096_v12, %v4216_v30  ;;  %4616 = vst.msk [vmem:[#allocation4 + $0xc8] sm:$0xff] %vm251_vm0, %v4855_v18  ;;  %v4641_v45 = vld [vmem:[#allocation2 + $0xa9] sm:$0xff] }
 0x48e   : > { %v4832_v33 = vld [vmem:[#allocation2 + $0xb0] sm:$0xff]  ;;  %4550 = vst.msk [vmem:[#allocation2 + $0xf9] sm:$0xff] %vm251_vm0, %v4518_v14  ;;  %v4424_v16 = vadd.f32 1.0, %v10584_v41  ;;  %v4266_v3 = vmul.f32 %v13096_v12, %v4224_v42  ;;  %v4856_v34 = vpack.c.bf16 %v4830_v21, %v4829_v8  ;;  %v5014_v12 = vld [vmem:[#allocation2 + $0x3a] sm:$0xff]  ;;  %v13450_v56 = vpack.c.bf16 %v4834_v35, %v4833_v37 }
 0x48f   : > { %v4337_v9 = vsub.f32 0.0, %v13413_v53  ;;  %v10586_v61 = vpop.eup %10585  ;;  %4548 = vst.msk [vmem:[#allocation2 + $0xe1] sm:$0xff] %vm251_vm0, %v4516_v24  ;;  %10599 = vpow2.f32 %v4395_v26  ;;  %v13434_v36 = vadd.f32 %v13102_v10, %v4264_v7  ;;  %4891 = vrot.lane.b32.xlu0 %v4855_v18, %s10949_s9  ;;  %v13442_v49 = vpack.c.bf16 %v4832_v33, %v4831_v23  ;;  %v4642_v13 = vld [vmem:[#allocation2 + $0xb1] sm:$0xff]  ;;  %v4644_v30 = vld [vmem:[#allocation2 + $0xc9] sm:$0xff]  ;;  %v4643_v42 = vld [vmem:[#allocation2 + $0xc1] sm:$0xff] }
 0x490   : > { %v10588_v20 = vpop.eup %10587  ;;  %v4521_v19 = vmul.f32 %v10586_v61, %v13294_v1  ;;  %10601 = vrcp.f32 %v4424_v16  ;;  %v13438_v2 = vadd.f32 %v13102_v10, %v4266_v3  ;;  %4701 = vrot.lane.b32.xlu1 %v13423_v27, %s10949_s9  ;;  %v4639_v1 = vld [vmem:[#allocation2 + $0x91] sm:$0xff]  ;;  %4617 = vst.msk [vmem:[#allocation4 + $0xf0] sm:$0xff] %vm251_vm0, %v4856_v34  ;;  %v13456_v14 = vpack.c.bf16 %v4642_v13, %v4641_v45  ;;  %v5025_v24 = vld [vmem:[#allocation2 + $0xc2] sm:$0xff] }
 0x491   : > { %v4399_v46 = vmul.f32 1.442695, %v4337_v9  ;;  %v10590_v31 = vpop.eup %10589  ;;  %v4429_v28 = vadd.f32 1.0, %v10588_v20  ;;  %v4336_v10 = vsub.f32 0.0, %v13434_v36  ;;  %v13447_v54 = vpack.c.bf16 %v4640_v55, %v4639_v1  ;;  %v5021_v18 = vld [vmem:[#allocation2 + $0x92] sm:$0xff]  ;;  %4618 = vst.msk [vmem:[#allocation4 + $0x118] sm:$0xff] %vm251_vm0, %v13442_v49 }
 0x492   : > { %v10592_v58 = vpop.eup %10591  ;;  %4553 = vst.msk [vmem:[#allocation2 + $0x121] sm:$0xff] %vm251_vm0, %v4521_v19  ;;  %v4427_v5 = vadd.f32 1.0, %v10590_v31  ;;  %v4338_v63 = vsub.f32 0.0, %v13438_v2  ;;  %v5023_v41 = vld [vmem:[#allocation2 + $0xaa] sm:$0xff]  ;;  %v4835_v8 = vld [vmem:[#allocation2 + $0xd8] sm:$0xff]  ;;  %v13460_v61 = vpack.c.bf16 %v5012_v60, %v5011_v40  ;;  %v13464_v3 = vld [vmem:[#allocation2] sm:$0xff]  ;;  %v13478_v40 = vpack.c.bf16 %v5016_v59, %v5015_v48 }
 0x493   : > { %10603 = vpow2.f32 %v4399_v46  ;;  %v10594_v4 = vpop.eup %10593  ;;  %v4430_v22 = vadd.f32 1.0, %v10592_v58  ;;  %v4397_v25 = vmul.f32 1.442695, %v4336_v10  ;;  %4893 = vrot.lane.b32.xlu0 %v4856_v34, %s10949_s9  ;;  %v5026_v9 = vld [vmem:[#allocation2 + $0xca] sm:$0xff]  ;;  %v5024_v16 = vld [vmem:[#allocation2 + $0xb2] sm:$0xff]  ;;  %v13468_v55 = vld [vmem:[#allocation2 + $0x2] sm:$0xff]  ;;  %v13480_v60 = vpack.c.bf16 %v5018_v50, %v5017_v62 }
 0x494   : > { %10605 = vrcp.f32 %v4429_v28  ;;  %v4519_v21 = vmul.f32 %v10594_v4, %v13306_v17  ;;  %v4401_v7 = vmul.f32 1.442695, %v4338_v63  ;;  %4703 = vrot.lane.b32.xlu1 %v13447_v54, %s10949_s9  ;;  %v4837_v33 = vld [vmem:[#allocation2 + $0xf0] sm:$0xff]  ;;  %v13462_v17 = vpack.c.bf16 %v5014_v12, %v5013_v43  ;;  %v13466_v34 = vld [vmem:[#allocation2 + $0x8] sm:$0xff]  ;;  %4619 = vst.msk [vmem:[#allocation4 + $0x140] sm:$0xff] %vm251_vm0, %v13450_v56  ;;  %v4645_v23 = vld [vmem:[#allocation2 + $0xd9] sm:$0xff] }
 0x495   : > { %10607 = vrcp.f32 %v4427_v5  ;;  %v10596_v26 = vpop.eup %10595  ;;  %v13470_v20 = vld [vmem:[#allocation2 + $0xa] sm:$0xff]  ;;  %v13474_v19 = vld [vmem:[#allocation2 + $0x21] sm:$0xff]  ;;  %v4838_v35 = vld [vmem:[#allocation2 + $0xf8] sm:$0xff]  ;;  %v13488_v13 = vpack.c.bf16 %v4644_v30, %v4643_v42  ;;  %v13492_v10 = vpack.c.bf16 %v5020_v38, %v5019_v39  ;;  %4804 = vst.msk [vmem:[#allocation4 + $0x30] sm:$0xff] %vm251_vm0, %v13460_v61  ;;  %v13509_v38 = vpack.c.bf16 %v5022_v32, %v5021_v18 }
 0x496   : > { %10609 = vrcp.f32 %v4430_v22  ;;  %4551 = vst.msk [vmem:[#allocation2 + $0x109] sm:$0xff] %vm251_vm0, %v4519_v21  ;;  %v4522_v46 = vmul.f32 %v10596_v26, %v13309_v52  ;;  %v5029_v43 = vld [vmem:[#allocation2 + $0xf2] sm:$0xff]  ;;  %v10598_v1 = vpop.eup %10597  ;;  %v4836_v58 = vld [vmem:[#allocation2 + $0xe0] sm:$0xff]  ;;  %v13490_v5 = vpack.c.bf16 %v4838_v35, %v4837_v33  ;;  %4805 = vst.msk [vmem:[#allocation4 + $0x58] sm:$0xff] %vm251_vm0, %v13462_v17  ;;  %v13525_v18 = vpack.c.bf16 %v5024_v16, %v5023_v41 }
 0x497   : > { %10611 = vpow2.f32 %v4397_v25  ;;  %v13482_v12 = vld [vmem:[#allocation2 + $0x38] sm:$0xff]  ;;  %v13486_v28 = vld [vmem:[#allocation2 + $0x50] sm:$0xff]  ;;  %v4646_v52 = vld [vmem:[#allocation2 + $0xe1] sm:$0xff]  ;;  %v4428_v50 = vadd.f32 1.0, %v10598_v1  ;;  %4895 = vrot.lane.b32.xlu0 %v13442_v49, %s10949_s9  ;;  %v13505_v37 = vpack.c.bf16 %v4836_v58, %v4835_v8  ;;  %4806 = vst.msk [vmem:[#allocation4 + $0x80] sm:$0xff] %vm251_vm0, %v13478_v40  ;;  %v13527_v32 = vpack.c.bf16 %v5026_v9, %v5025_v24 }
 0x498   : > { %v13484_v31 = vld [vmem:[#allocation2 + $0x39] sm:$0xff]  ;;  %10613 = vpow2.f32 %v4401_v7  ;;  %v13500_v62 = vld [vmem:[#allocation2 + $0x51] sm:$0xff]  ;;  %4554 = vst.msk [vmem:[#allocation2 + $0x129] sm:$0xff] %vm251_vm0, %v4522_v46  ;;  %v13507_v39 = vpack.c.bf16 %v4646_v52, %v4645_v23  ;;  %v5028_v4 = vld [vmem:[#allocation2 + $0xe2] sm:$0xff]  ;;  %4705 = vrot.lane.b32.xlu1 %v13456_v14, %s10949_s9  ;;  %v4595_v8 = vpack.c.bf16 %v13466_v34, %v13464_v3  ;;  %v4787_v33 = vpack.c.bf16 %v13470_v20, %v13468_v55 }
 0x499   : > { %v5027_v48 = vld [vmem:[#allocation2 + $0xda] sm:$0xff]  ;;  %4807 = vst.msk [vmem:[#allocation4 + $0xa8] sm:$0xff] %vm251_vm0, %v13480_v60  ;;  %v13515_v63 = vld [vmem:[#allocation2 + $0x30] sm:$0xff]  ;;  %v13519_v30 = vld [vmem:[#allocation2 + $0x48] sm:$0xff]  ;;  %v10600_v9 = vpop.eup %10599  ;;  %10615 = vrcp.f32 %v4428_v50 }
 0x49a   : > { %v13498_v59 = vld [vmem:[#allocation2 + $0x19] sm:$0xff]  ;;  %v13517_v45 = vld [vmem:[#allocation2 + $0x31] sm:$0xff]  ;;  %v13521_v49 = vld [vmem:[#allocation2 + $0x68] sm:$0xff]  ;;  %15425 = vst [vmem:[#allocation8_spill] sm:$0xff] %v13527_v32  ;;  %v13529_v21 = vpack.c.bf16 %v5028_v4, %v5027_v48  ;;  %v10602_v34 = vpop.eup %10601  ;;  %v4431_v55 = vadd.f32 1.0, %v10600_v9  ;;  %v5171_v20 = vpack.c.bf16 %v13482_v12, %v13515_v63  ;;  %v5172_v1 = vpack.c.bf16 %v13486_v28, %v13519_v30 }
 0x49b   : > { %v5030_v22 = vld [vmem:[#allocation2 + $0xfa] sm:$0xff]  ;;  %4808 = vst.msk [vmem:[#allocation4 + $0xd0] sm:$0xff] %vm251_vm0, %v13492_v10  ;;  %4621 = vst.msk [vmem:[#allocation4 + $0x190] sm:$0xff] %vm251_vm0, %v13490_v5  ;;  %v13537_v42 = vld [vmem:[#allocation2 + $0x49] sm:$0xff]  ;;  %v4979_v16 = vpack.c.bf16 %v13474_v19, %v13498_v59  ;;  %v4980_v19 = vpack.c.bf16 %v13484_v31, %v13517_v45  ;;  %v4520_v12 = vmul.f32 %v10602_v34, %v13337_v0  ;;  %4897 = vrot.lane.b32.xlu0 %v13450_v56, %s10949_s9  ;;  %v4692_v31 = vpop.permute.xlu1 %4691 }
 0x49c   : > { %15426 = vst [vmem:[#allocation10_spill] sm:$0xff] %v13529_v21  ;;  %v13531_v25 = vpack.c.bf16 %v5030_v22, %v5029_v43  ;;  %v13539_v26 = vld [vmem:[#allocation2 + $0x60] sm:$0xff]  ;;  %v13543_v41 = vld [vmem:[#allocation2 + $0x69] sm:$0xff]  ;;  %4809 = vst.msk [vmem:[#allocation4 + $0xf8] sm:$0xff] %vm251_vm0, %v13509_v38  ;;  %v4981_v0 = vpack.c.bf16 %v13500_v62, %v13537_v42  ;;  %10617 = vrcp.f32 %v4431_v55  ;;  %4707 = vrot.lane.b32.xlu1 %v13488_v13, %s10949_s9 }
 0x49d   : > { %v13541_v7 = vld [vmem:[#allocation2 + $0x61] sm:$0xff]  ;;  %4620 = vst.msk [vmem:[#allocation4 + $0x168] sm:$0xff] %vm251_vm0, %v13505_v37  ;;  %v13557_v46 = vld [vmem:[#allocation2 + $0x78] sm:$0xff]  ;;  %4810 = vst.msk [vmem:[#allocation4 + $0x120] sm:$0xff] %vm251_vm0, %v13525_v18  ;;  %v10604_v22 = vpop.eup %10603  ;;  %v5173_v56 = vpack.c.bf16 %v13521_v49, %v13539_v26 }
 0x49e   : > { %15427 = vst [vmem:[#allocation9_spill] sm:$0xff] %v13531_v25  ;;  %v13545_v24 = vld [vmem:[#allocation2 + $0x80] sm:$0xff]  ;;  %v13563_v43 = vld [vmem:[#allocation2 + $0x98] sm:$0xff]  ;;  %4811 = vst.msk [vmem:[#allocation4 + $0x148] sm:$0xff] %vm251_vm0, %v13527_v32  ;;  %v4982_v45 = vpack.c.bf16 %v13543_v41, %v13541_v7  ;;  %v4433_v34 = vadd.f32 1.0, %v10604_v22 }
 0x49f   : > { %v13559_v23 = vld [vmem:[#allocation2 + $0x79] sm:$0xff]  ;;  %v13561_v35 = vld [vmem:[#allocation2 + $0x81] sm:$0xff]  ;;  %4812 = vst.msk [vmem:[#allocation4 + $0x170] sm:$0xff] %vm251_vm0, %v13529_v21  ;;  %4813 = vst.msk [vmem:[#allocation4 + $0x198] sm:$0xff] %vm251_vm0, %v13531_v25  ;;  %v5174_v49 = vpack.c.bf16 %v13545_v24, %v13557_v46  ;;  %4899 = vrot.lane.b32.xlu0 %v13505_v37, %s10949_s9 }
 0x4a0   : > { %v13565_v3 = vld [vmem:[#allocation2 + $0x99] sm:$0xff]  ;;  %v13581_v58 = vld [vmem:[#allocation2 + $0x90] sm:$0xff]  ;;  %v13585_v48 = vld [vmem:[#allocation2 + $0xa8] sm:$0xff]  ;;  %4611 = vst.msk [vmem:[#allocation4] sm:$0xff] %vm251_vm0, %v4595_v8  ;;  %v4983_v26 = vpack.c.bf16 %v13561_v35, %v13559_v23  ;;  %10619 = vrcp.f32 %v4433_v34  ;;  %4709 = vrot.lane.b32.xlu1 %v13507_v39, %s10949_s9 }
 0x4a1   : > { %v13583_v52 = vld [vmem:[#allocation2 + $0x91] sm:$0xff]  ;;  %v13589_v50 = vld [vmem:[#allocation2 + $0xc8] sm:$0xff]  ;;  %4803 = vst.msk [vmem:[#allocation4 + $0x8] sm:$0xff] %vm251_vm0, %v4787_v33  ;;  %v10315_v28 = vld [vmem:[%s15402_s1 + $0x300] sm:$0xff]   ;;  %v10606_v33 = vpop.eup %10605  ;;  %v5175_v24 = vpack.c.bf16 %v13563_v43, %v13581_v58 }
 0x4a2   : > { %v13587_v59 = vld [vmem:[#allocation2 + $0xb0] sm:$0xff]  ;;  %v10316_v63 = vld [vmem:[%s15402_s1 + $0x2c0] sm:$0xff]   ;;  %4995 = vst.msk [vmem:[#allocation4 + $0x10] sm:$0xff] %vm251_vm0, %v4979_v16  ;;  %5187 = vst.msk [vmem:[#allocation4 + $0x18] sm:$0xff] %vm251_vm0, %v5171_v20  ;;  %v10608_v55 = vpop.eup %10607  ;;  %v4525_v22 = vmul.f32 %v10606_v33, %v13347_v11  ;;  %9646 = vmatprep.subr.bf16.mxu1 %v10315_v28  ;;  %v4984_v46 = vpack.c.bf16 %v13565_v3, %v13583_v52 }
 0x4a3   : > { %v13591_v4 = vld [vmem:[#allocation2 + $0xc9] sm:$0xff]  ;;  %v13613_v9 = vld [vmem:[#allocation2 + $0xb1] sm:$0xff]  ;;  %v13615_v8 = vld [vmem:[#allocation2 + $0xc0] sm:$0xff]  ;;  %4739 = vst.msk [vmem:[#allocation4] sm:$0xff] %vm602_vm2, %v4692_v31  ;;  %v5176_v23 = vpack.c.bf16 %v13587_v59, %v13585_v48  ;;  %v10610_v58 = vpop.eup %10609  ;;  %v4523_v52 = vmul.f32 %v10608_v55, %v13353_v29  ;;  %9647 = vmatpush3.bf16.msra.mxu1 %v10316_v63  ;;  %4901 = vrot.lane.b32.xlu0 %v13490_v5, %s10949_s9 }
 0x4a4   : > { %v13611_v30 = vld [vmem:[#allocation2 + $0xa9] sm:$0xff]  ;;  %v4647_v16 = vld [vmem:[#allocation2 + $0xf1] sm:$0xff]  ;;  %v4648_v62 = vld [vmem:[#allocation2 + $0xf9] sm:$0xff]  ;;  %4996 = vst.msk [vmem:[#allocation4 + $0x38] sm:$0xff] %vm251_vm0, %v4980_v19 }
 0x4a5   : > { %v4841_v42 = vld [vmem:[#allocation2 + $0x120] sm:$0xff]  ;;  %5188 = vst.msk [vmem:[#allocation4 + $0x40] sm:$0xff] %vm251_vm0, %v5172_v1  ;;  %4552 = vst.msk [vmem:[#allocation2 + $0x111] sm:$0xff] %vm251_vm0, %v4520_v12  ;;  %v13642_v35 = vld [vmem:[#allocation2 + $0xd8] sm:$0xff]  ;;  %v4985_v28 = vpack.c.bf16 %v13613_v9, %v13611_v30  ;;  %v10612_v9 = vpop.eup %10611 }
 0x4a6   : > { %v13627_v7 = vld [vmem:[#allocation2 + $0xc1] sm:$0xff]  ;;  %4997 = vst.msk [vmem:[#allocation4 + $0x60] sm:$0xff] %vm251_vm0, %v4981_v0  ;;  %5189 = vst.msk [vmem:[#allocation4 + $0x68] sm:$0xff] %vm251_vm0, %v5173_v56  ;;  %v13644_v20 = vld [vmem:[#allocation2 + $0xd9] sm:$0xff]  ;;  %v5177_v0 = vpack.c.bf16 %v13589_v50, %v13615_v8  ;;  %v4526_v50 = vmul.f32 %v10610_v58, %v13367_v15  ;;  %v13689_v8 = vpack.c.bf16 %v4648_v62, %v4647_v16  ;;  %v4432_v58 = vadd.f32 1.0, %v10612_v9 }
 0x4a7   : > { %v13629_v41 = vld [vmem:[#allocation2 + $0xe0] sm:$0xff]  ;;  %4998 = vst.msk [vmem:[#allocation4 + $0x88] sm:$0xff] %vm251_vm0, %v4982_v45  ;;  %v13648_v19 = vld [vmem:[#allocation2 + $0xf8] sm:$0xff]  ;;  %v13656_v43 = vld [vmem:[#allocation2 + $0x4a] sm:$0xff]  ;;  %v4986_v15 = vpack.c.bf16 %v13591_v4, %v13627_v7 }
 0x4a8   : > { %v13646_v11 = vld [vmem:[#allocation2 + $0xe1] sm:$0xff]  ;;  %v13650_v1 = vld [vmem:[#allocation2 + $0xf9] sm:$0xff]  ;;  %5190 = vst.msk [vmem:[#allocation4 + $0x90] sm:$0xff] %vm251_vm0, %v5174_v49  ;;  %4999 = vst.msk [vmem:[#allocation4 + $0xb0] sm:$0xff] %vm251_vm0, %v4983_v26  ;;  %v5178_v4 = vpack.c.bf16 %v13629_v41, %v13642_v35  ;;  %10621 = vrcp.f32 %v4432_v58  ;;  %4711 = vrot.lane.b32.xlu1 %v13689_v8, %s10949_s9 }
 0x4a9   : > { %v13652_v12 = vld [vmem:[#allocation2 + $0x32] sm:$0xff]  ;;  %v13654_v31 = vld [vmem:[#allocation2 + $0x3a] sm:$0xff]  ;;  %v4842_v48 = vld [vmem:[#allocation2 + $0x128] sm:$0xff]  ;;  %4557 = vst.msk [vmem:[#allocation2 + $0x151] sm:$0xff] %vm251_vm0, %v4525_v22  ;;  %v10614_v22 = vpop.eup %10613  ;;  %v4987_v7 = vpack.c.bf16 %v13646_v11, %v13644_v20 }
 0x4aa   : > { %v13658_v3 = vld [vmem:[#allocation2 + $0x52] sm:$0xff]  ;;  %v5033_v59 = vld [vmem:[#allocation2 + $0x122] sm:$0xff]  ;;  %v13675_v34 = vld [vmem:[#allocation2 + $0x6a] sm:$0xff]  ;;  %v13691_v55 = vpack.c.bf16 %v4842_v48, %v4841_v42  ;;  %5191 = vst.msk [vmem:[#allocation4 + $0xb8] sm:$0xff] %vm251_vm0, %v5175_v24  ;;  %v10616_v9 = vpop.eup %10615 }
 0x4ab   : > { %v13667_v56 = vld [vmem:[#allocation2 + $0xf0] sm:$0xff]  ;;  %v13671_v33 = vld [vmem:[#allocation2 + $0x120] sm:$0xff]  ;;  %v10317_v21 = vld [vmem:[%s15402_s1 + $0x308] sm:$0xff]   ;;  %5000 = vst.msk [vmem:[#allocation4 + $0xd8] sm:$0xff] %vm251_vm0, %v4984_v46 }
 0x4ac   : > { %v13669_v45 = vld [vmem:[#allocation2 + $0xf1] sm:$0xff]  ;;  %v13673_v29 = vld [vmem:[#allocation2 + $0x62] sm:$0xff]  ;;  %v13677_v63 = vld [vmem:[#allocation2 + $0x7a] sm:$0xff]  ;;  %5192 = vst.msk [vmem:[#allocation4 + $0xe0] sm:$0xff] %vm251_vm0, %v5176_v23  ;;  %9648 = vmatprep.subr.bf16.mxu1 %v10317_v21 }
 0x4ad   : > { %v13679_v49 = vld [vmem:[#allocation2 + $0x82] sm:$0xff]  ;;  %v13681_v26 = vld [vmem:[#allocation2 + $0x92] sm:$0xff]  ;;  %v13683_v30 = vld [vmem:[#allocation2 + $0x9a] sm:$0xff]  ;;  %4555 = vst.msk [vmem:[#allocation2 + $0x139] sm:$0xff] %vm251_vm0, %v4523_v52  ;;  %v4434_v52 = vadd.f32 1.0, %v10614_v22  ;;  %v4988_v41 = vpack.c.bf16 %v13650_v1, %v13669_v45  ;;  %v5364_v1 = vpack.c.bf16 %v13658_v3, %v13656_v43  ;;  %v5365_v43 = vpack.c.bf16 %v13675_v34, %v13673_v29 }
 0x4ae   : > { %v5034_v25 = vld [vmem:[#allocation2 + $0x12a] sm:$0xff]  ;;  %v13706_v16 = vld [vmem:[#allocation2 + $0xb2] sm:$0xff]  ;;  %v13708_v62 = vld [vmem:[#allocation2 + $0xc2] sm:$0xff]  ;;  %5001 = vst.msk [vmem:[#allocation4 + $0x100] sm:$0xff] %vm251_vm0, %v4985_v28  ;;  %v5366_v5 = vpack.c.bf16 %v13679_v49, %v13677_v63  ;;  %v5367_v3 = vpack.c.bf16 %v13683_v30, %v13681_v26 }
 0x4af   : > { %v10318_v32 = vld [vmem:[%s15402_s1 + $0x2c8] sm:$0xff]   ;;  %v13715_v24 = vpack.c.bf16 %v5034_v25, %v5033_v59  ;;  %5193 = vst.msk [vmem:[#allocation4 + $0x108] sm:$0xff] %vm251_vm0, %v5177_v0  ;;  %4558 = vst.msk [vmem:[#allocation2 + $0x159] sm:$0xff] %vm251_vm0, %v4526_v50  ;;  %v5179_v25 = vpack.c.bf16 %v13648_v19, %v13667_v56  ;;  %v5345_v20 = vld [vmem:[#allocation2 + $0xda] sm:$0xff]  ;;  %v5363_v19 = vpack.c.bf16 %v13654_v31, %v13652_v12  ;;  %10623 = vrcp.f32 %v4434_v52 }
 0x4b0   : > { %v13704_v37 = vld [vmem:[#allocation2 + $0xaa] sm:$0xff]  ;;  %v4969_v23 = vld [vmem:[#allocation2 + $0x121] sm:$0xff]  ;;  %4623 = vst.msk [vmem:[#allocation4 + $0x1e0] sm:$0xff] %vm251_vm0, %v13691_v55  ;;  %5002 = vst.msk [vmem:[#allocation4 + $0x128] sm:$0xff] %vm251_vm0, %v4986_v15  ;;  %9649 = vmatpush3.bf16.msra.mxu1 %v10318_v32  ;;  %v4524_v15 = vmul.f32 %v10616_v9, %v13390_v47 }
 0x4b1   : > { %v13710_v42 = vld [vmem:[#allocation2 + $0xca] sm:$0xff]  ;;  %v5346_v11 = vld [vmem:[#allocation2 + $0xe2] sm:$0xff]  ;;  %v13732_v59 = vld [vmem:[#allocation2 + $0xf2] sm:$0xff]  ;;  %4815 = vst.msk [vmem:[#allocation4 + $0x1e8] sm:$0xff] %vm251_vm0, %v13715_v24  ;;  %v5368_v29 = vpack.c.bf16 %v13706_v16, %v13704_v37  ;;  %v10618_v16 = vpop.eup %10617 }
 0x4b2   : > { %v5160_v46 = vld [vmem:[#allocation2 + $0x128] sm:$0xff]  ;;  %5194 = vst.msk [vmem:[#allocation4 + $0x130] sm:$0xff] %vm251_vm0, %v5178_v4  ;;  %5003 = vst.msk [vmem:[#allocation4 + $0x150] sm:$0xff] %vm251_vm0, %v4987_v7  ;;  %v5348_v56 = vld [vmem:[#allocation2 + $0xfa] sm:$0xff]  ;;  %v5369_v34 = vpack.c.bf16 %v13710_v42, %v13708_v62  ;;  %v5370_v63 = vpack.c.bf16 %v5346_v11, %v5345_v20 }
 0x4b3   : > { %v4970_v48 = vld [vmem:[#allocation2 + $0x129] sm:$0xff]  ;;  %v5181_v35 = vpack.c.bf16 %v5160_v46, %v13671_v33  ;;  %5195 = vst.msk [vmem:[#allocation4 + $0x158] sm:$0xff] %vm251_vm0, %v5179_v25  ;;  %5004 = vst.msk [vmem:[#allocation4 + $0x178] sm:$0xff] %vm251_vm0, %v4988_v41  ;;  %v4650_v58 = vld [vmem:[#allocation2 + $0x111] sm:$0xff]  ;;  %v5371_v46 = vpack.c.bf16 %v5348_v56, %v13732_v59  ;;  %v10620_v41 = vpop.eup %10619 }
 0x4b4   : > { %v4839_v28 = vld [vmem:[#allocation2 + $0x108] sm:$0xff]  ;;  %v4990_v21 = vpack.c.bf16 %v4970_v48, %v4969_v23  ;;  %v10319_v32 = vld [vmem:[%s15402_s1 + $0x310] sm:$0xff]   ;;  %5379 = vst.msk [vmem:[#allocation4 + $0x20] sm:$0xff] %vm251_vm0, %v5363_v19  ;;  %5380 = vst.msk [vmem:[#allocation4 + $0x48] sm:$0xff] %vm251_vm0, %v5364_v1  ;;  %v4527_v48 = vmul.f32 %v10618_v16, %v13405_v44  ;;  %v4529_v11 = vmul.f32 %v10620_v41, %v13413_v53 }
 0x4b5   : > { %v4649_v0 = vld [vmem:[#allocation2 + $0x109] sm:$0xff]  ;;  %5197 = vst.msk [vmem:[#allocation4 + $0x1a8] sm:$0xff] %vm251_vm0, %v5181_v35  ;;  %v5032_v26 = vld [vmem:[#allocation2 + $0x112] sm:$0xff]  ;;  %9650 = vmatprep.subr.bf16.mxu1 %v10319_v32  ;;  %5381 = vst.msk [vmem:[#allocation4 + $0x70] sm:$0xff] %vm251_vm0, %v5365_v43 }
 0x4b6   : > { %v5351_v45 = vld [vmem:[#allocation2 + $0x122] sm:$0xff]  ;;  %v5352_v33 = vld [vmem:[#allocation2 + $0x12a] sm:$0xff]  ;;  %5006 = vst.msk [vmem:[#allocation4 + $0x1c8] sm:$0xff] %vm251_vm0, %v4990_v21  ;;  %v13769_v49 = vpack.c.bf16 %v4650_v58, %v4649_v0  ;;  %5382 = vst.msk [vmem:[#allocation4 + $0x98] sm:$0xff] %vm251_vm0, %v5366_v5 }
 0x4b7   : > { %v10320_v50 = vld [vmem:[%s15402_s1 + $0x2d0] sm:$0xff]   ;;  %v5157_v12 = vld [vmem:[#allocation2 + $0x108] sm:$0xff]  ;;  %5383 = vst.msk [vmem:[#allocation4 + $0xc0] sm:$0xff] %vm251_vm0, %v5367_v3  ;;  %v5373_v37 = vpack.c.bf16 %v5352_v33, %v5351_v45  ;;  %4556 = vst.msk [vmem:[#allocation2 + $0x141] sm:$0xff] %vm251_vm0, %v4524_v15 }
 0x4b8   : > { %v4967_v31 = vld [vmem:[#allocation2 + $0x109] sm:$0xff]  ;;  %v4968_v7 = vld [vmem:[#allocation2 + $0x111] sm:$0xff]  ;;  %9651 = vmatpush3.bf16.msra.mxu1 %v10320_v50  ;;  %5384 = vst.msk [vmem:[#allocation4 + $0xe8] sm:$0xff] %vm251_vm0, %v5368_v29  ;;  %5385 = vst.msk [vmem:[#allocation4 + $0x110] sm:$0xff] %vm251_vm0, %v5369_v34  ;;  %4713 = vrot.lane.b32.xlu1 %v13769_v49, %s10949_s9 }
 0x4b9   : > { %v4840_v22 = vld [vmem:[#allocation2 + $0x110] sm:$0xff]  ;;  %v4989_v23 = vpack.c.bf16 %v4968_v7, %v4967_v31  ;;  %5386 = vst.msk [vmem:[#allocation4 + $0x138] sm:$0xff] %vm251_vm0, %v5370_v63  ;;  %v10321_v25 = vld [vmem:[%s15402_s1 + $0x318] sm:$0xff]   ;;  %5387 = vst.msk [vmem:[#allocation4 + $0x160] sm:$0xff] %vm251_vm0, %v5371_v46 }
 0x4ba   : > { %v5031_v4 = vld [vmem:[#allocation2 + $0x10a] sm:$0xff]  ;;  %v4861_v47 = vpack.c.bf16 %v4840_v22, %v4839_v28  ;;  %5389 = vst.msk [vmem:[#allocation4 + $0x1b0] sm:$0xff] %vm251_vm0, %v5373_v37  ;;  %v4846_v20 = vld [vmem:[#allocation2 + $0x158] sm:$0xff]  ;;  %4559 = vst.msk [vmem:[#allocation2 + $0x169] sm:$0xff] %vm251_vm0, %v4527_v48  ;;  %9652 = vmatprep.subr.bf16.mxu1 %v10321_v25 }
 0x4bb   : > { %v5158_v30 = vld [vmem:[#allocation2 + $0x110] sm:$0xff]  ;;  %v13776_v62 = vpack.c.bf16 %v5032_v26, %v5031_v4  ;;  %5005 = vst.msk [vmem:[#allocation4 + $0x1a0] sm:$0xff] %vm251_vm0, %v4989_v23  ;;  %v4651_v59 = vld [vmem:[#allocation2 + $0x121] sm:$0xff]  ;;  %v10322_v21 = vld [vmem:[%s15402_s1 + $0x2d8] sm:$0xff]  }
 0x4bc   : > { %v5180_v42 = vpack.c.bf16 %v5158_v30, %v5157_v12  ;;  %4903 = vrot.lane.b32.xlu0 %v4861_v47, %s10949_s9  ;;  %v4652_v52 = vld [vmem:[#allocation2 + $0x129] sm:$0xff]  ;;  %4622 = vst.msk [vmem:[#allocation4 + $0x1b8] sm:$0xff] %vm251_vm0, %v4861_v47  ;;  %v5037_v44 = vld [vmem:[#allocation2 + $0x152] sm:$0xff]  ;;  %v5038_v0 = vld [vmem:[#allocation2 + $0x15a] sm:$0xff]  ;;  %9653 = vmatpush3.bf16.msra.mxu1 %v10322_v21  ;;  %v10622_v12 = vpop.eup %10621 }
 0x4bd   : > { %v4845_v35 = vld [vmem:[#allocation2 + $0x150] sm:$0xff]  ;;  %4814 = vst.msk [vmem:[#allocation4 + $0x1c0] sm:$0xff] %vm251_vm0, %v13776_v62  ;;  %v13800_v19 = vpack.c.bf16 %v4652_v52, %v4651_v59  ;;  %v13802_v1 = vpack.c.bf16 %v5038_v0, %v5037_v44  ;;  %v5164_v45 = vld [vmem:[#allocation2 + $0x158] sm:$0xff]  ;;  %4561 = vst.msk [vmem:[#allocation2 + $0x181] sm:$0xff] %vm251_vm0, %v4529_v11  ;;  %v10624_v15 = vpop.eup %10623  ;;  %v4528_v22 = vmul.f32 %v10622_v12, %v13434_v36 }
 0x4be   : > { %5196 = vst.msk [vmem:[#allocation4 + $0x180] sm:$0xff] %vm251_vm0, %v5180_v42  ;;  %v4864_v28 = vpack.c.bf16 %v4846_v20, %v4845_v35  ;;  %v5163_v56 = vld [vmem:[#allocation2 + $0x150] sm:$0xff]  ;;  %v4843_v53 = vld [vmem:[#allocation2 + $0x138] sm:$0xff]  ;;  %v10323_v31 = vld [vmem:[%s15402_s1 + $0x320] sm:$0xff]   ;;  %v4530_v34 = vmul.f32 %v10624_v15, %v13438_v2 }
 0x4bf   : > { %v4653_v33 = vld [vmem:[#allocation2 + $0x139] sm:$0xff]  ;;  %v5183_v9 = vpack.c.bf16 %v5164_v45, %v5163_v56  ;;  %v4973_v32 = vld [vmem:[#allocation2 + $0x151] sm:$0xff]  ;;  %4715 = vrot.lane.b32.xlu1 %v13800_v19, %s10949_s9  ;;  %4817 = vst.msk [vmem:[#allocation4 + $0x238] sm:$0xff] %vm251_vm0, %v13802_v1  ;;  %v4654_v4 = vld [vmem:[#allocation2 + $0x141] sm:$0xff]  ;;  %9654 = vmatprep.subr.bf16.mxu1 %v10323_v31 }
 0x4c0   : > { %4905 = vrot.lane.b32.xlu0 %v13691_v55, %s10949_s9  ;;  %4625 = vst.msk [vmem:[#allocation4 + $0x230] sm:$0xff] %vm251_vm0, %v4864_v28  ;;  %v4974_v50 = vld [vmem:[#allocation2 + $0x159] sm:$0xff]  ;;  %v13821_v47 = vpack.c.bf16 %v4654_v4, %v4653_v33  ;;  %v5036_v26 = vld [vmem:[#allocation2 + $0x142] sm:$0xff]  ;;  %4560 = vst.msk [vmem:[#allocation2 + $0x171] sm:$0xff] %vm251_vm0, %v4528_v22 }
 0x4c1   : > { %v10324_v55 = vld [vmem:[%s15402_s1 + $0x2e0] sm:$0xff]   ;;  %v5161_v43 = vld [vmem:[#allocation2 + $0x138] sm:$0xff]  ;;  %v4992_v3 = vpack.c.bf16 %v4974_v50, %v4973_v32  ;;  %5199 = vst.msk [vmem:[#allocation4 + $0x1f8] sm:$0xff] %vm251_vm0, %v5183_v9  ;;  %4562 = vst.msk [vmem:[#allocation2 + $0x189] sm:$0xff] %vm251_vm0, %v4530_v34 }
 0x4c2   : > { %v4971_v5 = vld [vmem:[#allocation2 + $0x139] sm:$0xff]  ;;  %v4972_v7 = vld [vmem:[#allocation2 + $0x141] sm:$0xff]  ;;  %9655 = vmatpush3.bf16.msra.mxu1 %v10324_v55  ;;  %v4655_v42 = vld [vmem:[#allocation2 + $0x151] sm:$0xff] }
 0x4c3   : > { %v4844_v58 = vld [vmem:[#allocation2 + $0x140] sm:$0xff]  ;;  %5008 = vst.msk [vmem:[#allocation4 + $0x218] sm:$0xff] %vm251_vm0, %v4992_v3  ;;  %v4991_v16 = vpack.c.bf16 %v4972_v7, %v4971_v5  ;;  %4717 = vrot.lane.b32.xlu1 %v13821_v47, %s10949_s9  ;;  %v10325_v2 = vld [vmem:[%s15402_s1 + $0x328] sm:$0xff]   ;;  %v10327_v25 = vld [vmem:[%s15402_s1 + $0x330] sm:$0xff]  }
 0x4c4   : > { %v5035_v29 = vld [vmem:[#allocation2 + $0x13a] sm:$0xff]  ;;  %v4863_v63 = vpack.c.bf16 %v4844_v58, %v4843_v53  ;;  %v10326_v23 = vld [vmem:[%s15402_s1 + $0x2e8] sm:$0xff]   ;;  %9656 = vmatprep.subr.bf16.mxu1 %v10325_v2  ;;  %v10328_v41 = vld [vmem:[%s15402_s1 + $0x2f0] sm:$0xff]  }
 0x4c5   : > { %v5162_v30 = vld [vmem:[#allocation2 + $0x140] sm:$0xff]  ;;  %v13825_v36 = vpack.c.bf16 %v5036_v26, %v5035_v29  ;;  %5007 = vst.msk [vmem:[#allocation4 + $0x1f0] sm:$0xff] %vm251_vm0, %v4991_v16  ;;  %v4847_v52 = vld [vmem:[#allocation2 + $0x168] sm:$0xff]  ;;  %v5350_v44 = vld [vmem:[#allocation2 + $0x112] sm:$0xff] }
 0x4c6   : > { %v4656_v46 = vld [vmem:[#allocation2 + $0x159] sm:$0xff]  ;;  %v5182_v37 = vpack.c.bf16 %v5162_v30, %v5161_v43  ;;  %4907 = vrot.lane.b32.xlu0 %v4863_v63, %s10949_s9  ;;  %4624 = vst.msk [vmem:[#allocation4 + $0x208] sm:$0xff] %vm251_vm0, %v4863_v63  ;;  %9657 = vmatpush3.bf16.msra.mxu1 %v10326_v23  ;;  %v4657_v35 = vld [vmem:[#allocation2 + $0x169] sm:$0xff]  ;;  %v4977_v5 = vld [vmem:[#allocation2 + $0x181] sm:$0xff] }
 0x4c7   : > { %4816 = vst.msk [vmem:[#allocation4 + $0x210] sm:$0xff] %vm251_vm0, %v13825_v36  ;;  %v13842_v48 = vpack.c.bf16 %v4656_v46, %v4655_v42  ;;  %v5349_v20 = vld [vmem:[#allocation2 + $0x10a] sm:$0xff]  ;;  %9658 = vmatprep.subr.bf16.mxu1 %v10327_v25  ;;  %v5040_v53 = vld [vmem:[#allocation2 + $0x172] sm:$0xff]  ;;  %v4849_v33 = vld [vmem:[#allocation2 + $0x180] sm:$0xff] }
 0x4c8   : > { %5198 = vst.msk [vmem:[#allocation4 + $0x1d0] sm:$0xff] %vm251_vm0, %v5182_v37  ;;  %v4848_v11 = vld [vmem:[#allocation2 + $0x170] sm:$0xff]  ;;  %v4850_v45 = vld [vmem:[#allocation2 + $0x188] sm:$0xff]  ;;  %v10329_v32 = vld [vmem:[%s15402_s1 + $0x338] sm:$0xff]  }
 0x4c9   : > { %4719 = vrot.lane.b32.xlu1 %v13842_v48, %s10949_s9  ;;  %v4658_v59 = vld [vmem:[#allocation2 + $0x171] sm:$0xff]  ;;  %v4865_v21 = vpack.c.bf16 %v4848_v11, %v4847_v52  ;;  %v5165_v50 = vld [vmem:[#allocation2 + $0x168] sm:$0xff]  ;;  %v4866_v31 = vpack.c.bf16 %v4850_v45, %v4849_v33  ;;  %v5167_v43 = vld [vmem:[#allocation2 + $0x180] sm:$0xff] }
 0x4ca   : > { %4909 = vrot.lane.b32.xlu0 %v4864_v28, %s10949_s9  ;;  %v5039_v0 = vld [vmem:[#allocation2 + $0x16a] sm:$0xff]  ;;  %v5372_v28 = vpack.c.bf16 %v5350_v44, %v5349_v20  ;;  %v13853_v56 = vpack.c.bf16 %v4658_v59, %v4657_v35  ;;  %9659 = vmatpush3.bf16.msra.mxu1 %v10328_v41  ;;  %v10330_v55 = vld [vmem:[%s15402_s1 + $0x2f8] sm:$0xff]   ;;  %v5354_v26 = vld [vmem:[#allocation2 + $0x142] sm:$0xff] }
 0x4cb   : > { %v13855_v9 = vpack.c.bf16 %v5040_v53, %v5039_v0  ;;  %v4975_v12 = vld [vmem:[#allocation2 + $0x169] sm:$0xff]  ;;  %4626 = vst.msk [vmem:[#allocation4 + $0x258] sm:$0xff] %vm251_vm0, %v4865_v21  ;;  %9660 = vmatprep.subr.bf16.mxu1 %v10329_v32  ;;  %v4976_v15 = vld [vmem:[#allocation2 + $0x171] sm:$0xff]  ;;  %v5353_v63 = vld [vmem:[#allocation2 + $0x13a] sm:$0xff] }
 0x4cc   : > { %5388 = vst.msk [vmem:[#allocation4 + $0x188] sm:$0xff] %vm251_vm0, %v5372_v28  ;;  %v5166_v3 = vld [vmem:[#allocation2 + $0x170] sm:$0xff]  ;;  %v5168_v22 = vld [vmem:[#allocation2 + $0x188] sm:$0xff]  ;;  %v4993_v4 = vpack.c.bf16 %v4976_v15, %v4975_v12  ;;  %v5374_v7 = vpack.c.bf16 %v5354_v26, %v5353_v63  ;;  %v5356_v37 = vld [vmem:[#allocation2 + $0x15a] sm:$0xff] }
 0x4cd   : > { %4721 = vrot.lane.b32.xlu1 %v13853_v56, %s10949_s9  ;;  %4818 = vst.msk [vmem:[#allocation4 + $0x260] sm:$0xff] %vm251_vm0, %v13855_v9  ;;  %v5184_v58 = vpack.c.bf16 %v5166_v3, %v5165_v50  ;;  %v5185_v29 = vpack.c.bf16 %v5168_v22, %v5167_v43  ;;  %v4978_v34 = vld [vmem:[#allocation2 + $0x189] sm:$0xff]  ;;  %v5355_v46 = vld [vmem:[#allocation2 + $0x152] sm:$0xff] }
 0x4ce   : > { %4911 = vrot.lane.b32.xlu0 %v4865_v21, %s10949_s9  ;;  %9661 = vmatpush3.bf16.msra.mxu1 %v10330_v55  ;;  %v4994_v30 = vpack.c.bf16 %v4978_v34, %v4977_v5  ;;  %5009 = vst.msk [vmem:[#allocation4 + $0x240] sm:$0xff] %vm251_vm0, %v4993_v4  ;;  %v5375_v16 = vpack.c.bf16 %v5356_v37, %v5355_v46  ;;  %v5357_v2 = vld [vmem:[#allocation2 + $0x16a] sm:$0xff]  ;;  %v5358_v42 = vld [vmem:[#allocation2 + $0x172] sm:$0xff]  ;;  %v5359_v23 = vld [vmem:[#allocation2 + $0x182] sm:$0xff] }
 0x4cf   : > { %5200 = vst.msk [vmem:[#allocation4 + $0x220] sm:$0xff] %vm251_vm0, %v5184_v58  ;;  %5201 = vst.msk [vmem:[#allocation4 + $0x248] sm:$0xff] %vm251_vm0, %v5185_v29  ;;  %v5376_v52 = vpack.c.bf16 %v5358_v42, %v5357_v2  ;;  %v5360_v25 = vld [vmem:[#allocation2 + $0x18a] sm:$0xff]  ;;  %v10332_v44 = vld [vmem:[%s15402_s1 + $0x358] sm:$0xff]  }
 0x4d0   : > { %5010 = vst.msk [vmem:[#allocation4 + $0x268] sm:$0xff] %vm251_vm0, %v4994_v30  ;;  %5390 = vst.msk [vmem:[#allocation4 + $0x1d8] sm:$0xff] %vm251_vm0, %v5374_v7  ;;  %v5377_v41 = vpack.c.bf16 %v5360_v25, %v5359_v23  ;;  %v5170_v2 = vld [vmem:[#allocation2 + $0x1a0] sm:$0xff] }
 0x4d1   : > { %5075 = vrot.lane.b32.xlu1 %v13460_v61, %s10949_s9  ;;  %5391 = vst.msk [vmem:[#allocation4 + $0x200] sm:$0xff] %vm251_vm0, %v5375_v16  ;;  %5392 = vst.msk [vmem:[#allocation4 + $0x228] sm:$0xff] %vm251_vm0, %v5376_v52  ;;  %v5041_v61 = vld [vmem:[#allocation2 + $0x182] sm:$0xff]  ;;  %v5169_v16 = vld [vmem:[#allocation2 + $0x198] sm:$0xff] }
 0x4d2   : > { %4913 = vrot.lane.b32.xlu0 %v4866_v31, %s10949_s9  ;;  %5393 = vst.msk [vmem:[#allocation4 + $0x250] sm:$0xff] %vm251_vm0, %v5377_v41  ;;  %v5186_v42 = vpack.c.bf16 %v5170_v2, %v5169_v16 }
 0x4d4   : > { %5202 = vst.msk [vmem:[#allocation4 + $0x270] sm:$0xff] %vm251_vm0, %v5186_v42 }
 0x4d5   : > { %5077 = vrot.lane.b32.xlu1 %v13462_v17, %s10949_s9  ;;  %v5042_v17 = vld [vmem:[#allocation2 + $0x18a] sm:$0xff] }
 0x4d6   : > { %5267 = vrot.lane.b32.xlu0 %v13372_v51, %s10949_s9  ;;  %v15428_v51 = vld [vmem:[#allocation8_spill] sm:$0xff] }
 0x4d9   : > { %5079 = vrot.lane.b32.xlu1 %v13478_v40, %s10949_s9 }
 0x4da   : > { %5269 = vrot.lane.b32.xlu0 %v13392_v57, %s10949_s9  ;;  %v15429_v57 = vld [vmem:[#allocation10_spill] sm:$0xff] }
 0x4dd   : > { %5081 = vrot.lane.b32.xlu1 %v13480_v60, %s10949_s9 }
 0x4de   : > { %5271 = vrot.lane.b32.xlu0 %v13410_v6, %s10949_s9  ;;  %v15430_v6 = vld [vmem:[#allocation9_spill] sm:$0xff] }
 0x4e1   : > { %5083 = vrot.lane.b32.xlu1 %v13492_v10, %s10949_s9  ;;  %v5233_v10 = vld [vmem:[#allocation2 + $0x199] sm:$0xff] }
 0x4e2   : > { %5273 = vrot.lane.b32.xlu0 %v13423_v27, %s10949_s9 }
 0x4e5   : > { %5085 = vrot.lane.b32.xlu1 %v13509_v38, %s10949_s9 }
 0x4e6   : > { %5275 = vrot.lane.b32.xlu0 %v13447_v54, %s10949_s9 }
 0x4e9   : > { %5087 = vrot.lane.b32.xlu1 %v13525_v18, %s10949_s9  ;;  %v5058_v18 = vpack.c.bf16 %v5042_v17, %v5041_v61  ;;  %v7429_v61 = vld [vmem:[#allocation3 + $0x19a] sm:$0xff]  ;;  %v7430_v17 = vld [vmem:[#allocation3 + $0x1a2] sm:$0xff] }
 0x4ea   : > { %5277 = vrot.lane.b32.xlu0 %v13456_v14, %s10949_s9  ;;  %v5232_v14 = vld [vmem:[#allocation2 + $0x189] sm:$0xff] }
 0x4ed   : > { %5089 = vrot.lane.b32.xlu1 %v15428_v51, %s10949_s9 }
 0x4ee   : > { %5279 = vrot.lane.b32.xlu0 %v13488_v13, %s10949_s9  ;;  %v5231_v13 = vld [vmem:[#allocation2 + $0x181] sm:$0xff] }
 0x4ef   : > { %v4884_v27 = vpop.permute.xlu0 %4883  ;;  %v5249_v38 = vpack.c.bf16 %v5232_v14, %v5231_v13 }
 0x4f0   : > { %4931 = vst.msk [vmem:[#allocation4 + $0x8] sm:$0xff] %vm602_vm2, %v4884_v27 }
 0x4f1   : > { %5091 = vrot.lane.b32.xlu1 %v15429_v57, %s10949_s9 }
 0x4f2   : > { %5281 = vrot.lane.b32.xlu0 %v13507_v39, %s10949_s9  ;;  %v4694_v54 = vpop.permute.xlu1 %4693  ;;  %v5234_v39 = vld [vmem:[#allocation2 + $0x1a1] sm:$0xff] }
 0x4f3   : > { %4740 = vst.msk [vmem:[#allocation4 + $0x28] sm:$0xff] %vm602_vm2, %v4694_v54 }
 0x4f5   : > { %5093 = vrot.lane.b32.xlu1 %v15430_v6, %s10949_s9  ;;  %v4886_v40 = vpop.permute.xlu0 %4885 }
 0x4f6   : > { %5283 = vrot.lane.b32.xlu0 %v13689_v8, %s10949_s9  ;;  %4932 = vst.msk [vmem:[#allocation4 + $0x30] sm:$0xff] %vm602_vm2, %v4886_v40  ;;  %v4696_v60 = vpop.permute.xlu1 %4695  ;;  %v7446_v40 = vpack.c.bf16 %v7430_v17, %v7429_v61 }
 0x4f7   : > { %4741 = vst.msk [vmem:[#allocation4 + $0x50] sm:$0xff] %vm602_vm2, %v4696_v60  ;;  %v5396_v8 = vld [vmem:[#allocation4 + $0x8] sm:$0xff] }
 0x4f8   : > { %5844 = vmatprep.mubr.bf16.mxu0 %v5396_v8 }
 0x4f9   : > { %5095 = vrot.lane.b32.xlu1 %v13776_v62, %s10949_s9  ;;  %v4888_v62 = vpop.permute.xlu0 %4887 }
 0x4fa   : > { %5285 = vrot.lane.b32.xlu0 %v13769_v49, %s10949_s9  ;;  %v10314_v49 = vld [vmem:[%s15402_s1 + $0x348] sm:$0xff]   ;;  %4933 = vst.msk [vmem:[#allocation4 + $0x58] sm:$0xff] %vm602_vm2, %v4888_v62 }
 0x4fb   : > { %v5400_v59 = vld [vmem:[#allocation4 + $0x28] sm:$0xff] }
 0x4fd   : > { %5097 = vrot.lane.b32.xlu1 %v13715_v24, %s10949_s9  ;;  %v5395_v24 = vld [vmem:[#allocation4] sm:$0xff]  ;;  %v5401_v35 = vld [vmem:[#allocation4 + $0x30] sm:$0xff] }
 0x4fe   : > { %5287 = vrot.lane.b32.xlu0 %v13800_v19, %s10949_s9  ;;  %v5250_v19 = vpack.c.bf16 %v5234_v39, %v5233_v10  ;;  %5845 = vmatmul.mubr.bf16.vlgmr.msra.gmra.mrb[160].mxu0 %v5395_v24  ;;  %v5405_v53 = vld [vmem:[#allocation4 + $0x50] sm:$0xff]  ;;  %v13987_v10 = vld [vmem:[#allocation4 + $0x278] sm:$0xff] }
 0x4ff   : > { %5852 = vmatprep.mubr.bf16.mxu0 %v5401_v35  ;;  %7462 = vst.msk [vmem:[#allocation4 + $0x278] sm:$0xff] %vm251_vm0, %v7446_v40  ;;  %v5404_v40 = vld [vmem:[#allocation4 + $0x48] sm:$0xff] }
 0x501   : > { %5099 = vrot.lane.b32.xlu1 %v13825_v36, %s10949_s9  ;;  %v10331_v36 = vld [vmem:[%s15402_s1 + $0x350] sm:$0xff]   ;;  %v5406_v28 = vld [vmem:[#allocation4 + $0x58] sm:$0xff] }
 0x502   : > { %5289 = vrot.lane.b32.xlu0 %v13821_v47, %s10949_s9  ;;  %v10882_v47 = vld [vmem:[%s15402_s1 + $0x340] sm:$0xff]  }
 0x503   : > { %10103 = vmatpush3.bf16.msra.mxu0 %v10882_v47 }
 0x504   : > { %10104 = vmatprep.subr.bf16.mxu0 %v10314_v49 }
 0x505   : > { %5101 = vrot.lane.b32.xlu1 %v13802_v1, %s10949_s9  ;;  %v4698_v1 = vpop.permute.xlu1 %4697 }
 0x506   : > { %5291 = vrot.lane.b32.xlu0 %v13842_v48, %s10949_s9  ;;  %4742 = vst.msk [vmem:[#allocation4 + $0x78] sm:$0xff] %vm602_vm2, %v4698_v1  ;;  %v4890_v48 = vpop.permute.xlu0 %4889  ;;  %5853 = vmatmul.mubr.bf16.gmra.mrb[164].mxu0 %v5400_v59 }
 0x507   : > { %4934 = vst.msk [vmem:[#allocation4 + $0x80] sm:$0xff] %vm602_vm2, %v4890_v48  ;;  %10105 = vmatpush3.bf16.msra.mxu0 %v10314_v49  ;;  %5860 = vmatprep.mubr.bf16.mxu0 %v5406_v28 }
 0x508   : > { %10106 = vmatprep.subr.bf16.mxu0 %v10331_v36 }
 0x509   : > { %5103 = vrot.lane.b32.xlu1 %v13855_v9, %s10949_s9  ;;  %v4700_v20 = vpop.permute.xlu1 %4699 }
 0x50a   : > { %5293 = vrot.lane.b32.xlu0 %v13853_v56, %s10949_s9  ;;  %4743 = vst.msk [vmem:[#allocation4 + $0xa0] sm:$0xff] %vm602_vm2, %v4700_v20  ;;  %v4892_v11 = vpop.permute.xlu0 %4891 }
 0x50b   : > { %4935 = vst.msk [vmem:[#allocation4 + $0xa8] sm:$0xff] %vm602_vm2, %v4892_v11  ;;  %10107 = vmatpush3.bf16.msra.mxu0 %v10331_v36 }
 0x50c   : > { %10108 = vmatprep.subr.bf16.mxu0 %v10332_v44 }
 0x50d   : > { %5105 = vrot.lane.b32.xlu1 %v5058_v18, %s10949_s9  ;;  %v4702_v0 = vpop.permute.xlu1 %4701  ;;  %v5410_v31 = vld [vmem:[#allocation4 + $0x78] sm:$0xff] }
 0x50e   : > { %5295 = vrot.lane.b32.xlu0 %v5249_v38, %s10949_s9  ;;  %4744 = vst.msk [vmem:[#allocation4 + $0xc8] sm:$0xff] %vm602_vm2, %v4702_v0  ;;  %v4894_v21 = vpop.permute.xlu0 %4893  ;;  %5861 = vmatmul.mubr.bf16.gmra.mrb[168].mxu0 %v5405_v53  ;;  %v5411_v9 = vld [vmem:[#allocation4 + $0x80] sm:$0xff] }
 0x50f   : > { %4936 = vst.msk [vmem:[#allocation4 + $0xd0] sm:$0xff] %vm602_vm2, %v4894_v21  ;;  %10109 = vmatpush3.bf16.msra.mxu0 %v10332_v44  ;;  %5868 = vmatprep.mubr.bf16.mxu0 %v5411_v9 }
 0x511   : > { %v4704_v56 = vpop.permute.xlu1 %4703  ;;  %v5415_v22 = vld [vmem:[#allocation4 + $0xa0] sm:$0xff] }
 0x512   : > { %5297 = vrot.lane.b32.xlu0 %v5250_v19, %s10949_s9  ;;  %4745 = vst.msk [vmem:[#allocation4 + $0xf0] sm:$0xff] %vm602_vm2, %v4704_v56  ;;  %v4896_v45 = vpop.permute.xlu0 %4895  ;;  %v5416_v43 = vld [vmem:[#allocation4 + $0xa8] sm:$0xff] }
 0x513   : > { %4937 = vst.msk [vmem:[#allocation4 + $0xf8] sm:$0xff] %vm602_vm2, %v4896_v45 }
 0x515   : > { %v4706_v33 = vpop.permute.xlu1 %4705  ;;  %v5420_v63 = vld [vmem:[#allocation4 + $0xc8] sm:$0xff] }
 0x516   : > { %4746 = vst.msk [vmem:[#allocation4 + $0x118] sm:$0xff] %vm602_vm2, %v4706_v33  ;;  %v4898_v32 = vpop.permute.xlu0 %4897  ;;  %5869 = vmatmul.mubr.bf16.gmra.mrb[172].mxu0 %v5410_v31  ;;  %v5421_v4 = vld [vmem:[#allocation4 + $0xd0] sm:$0xff] }
 0x517   : > { %4938 = vst.msk [vmem:[#allocation4 + $0x120] sm:$0xff] %vm602_vm2, %v4898_v32  ;;  %5876 = vmatprep.mubr.bf16.mxu0 %v5416_v43 }
 0x519   : > { %v4708_v50 = vpop.permute.xlu1 %4707  ;;  %v5425_v23 = vld [vmem:[#allocation4 + $0xf0] sm:$0xff] }
 0x51a   : > { %4747 = vst.msk [vmem:[#allocation4 + $0x140] sm:$0xff] %vm602_vm2, %v4708_v50  ;;  %v4900_v12 = vpop.permute.xlu0 %4899  ;;  %v5426_v7 = vld [vmem:[#allocation4 + $0xf8] sm:$0xff] }
 0x51b   : > { %4939 = vst.msk [vmem:[#allocation4 + $0x148] sm:$0xff] %vm602_vm2, %v4900_v12 }
 0x51d   : > { %v4710_v55 = vpop.permute.xlu1 %4709  ;;  %v5430_v6 = vld [vmem:[#allocation4 + $0x118] sm:$0xff] }
 0x51e   : > { %4748 = vst.msk [vmem:[#allocation4 + $0x168] sm:$0xff] %vm602_vm2, %v4710_v55  ;;  %v4902_v5 = vpop.permute.xlu0 %4901  ;;  %5877 = vmatmul.mubr.bf16.gmra.mrb[176].mxu0 %v5415_v22  ;;  %v5431_v52 = vld [vmem:[#allocation4 + $0x120] sm:$0xff] }
 0x51f   : > { %4940 = vst.msk [vmem:[#allocation4 + $0x170] sm:$0xff] %vm602_vm2, %v4902_v5  ;;  %5884 = vmatprep.mubr.bf16.mxu0 %v5421_v4 }
 0x521   : > { %v4712_v3 = vpop.permute.xlu1 %4711  ;;  %v5435_v39 = vld [vmem:[#allocation4 + $0x140] sm:$0xff] }
 0x522   : > { %4749 = vst.msk [vmem:[#allocation4 + $0x190] sm:$0xff] %vm602_vm2, %v4712_v3  ;;  %v5436_v27 = vld [vmem:[#allocation4 + $0x148] sm:$0xff] }
 0x525   : > { %v5440_v47 = vld [vmem:[#allocation4 + $0x168] sm:$0xff] }
 0x526   : > { %5885 = vmatmul.mubr.bf16.gmra.mrb[180].mxu0 %v5420_v63  ;;  %v5441_v38 = vld [vmem:[#allocation4 + $0x170] sm:$0xff] }
 0x527   : > { %5892 = vmatprep.mubr.bf16.mxu0 %v5426_v7 }
 0x529   : > { %v5445_v0 = vld [vmem:[#allocation4 + $0x190] sm:$0xff] }
 0x52a   : > { %v4714_v58 = vpop.permute.xlu1 %4713 }
 0x52b   : > { %4750 = vst.msk [vmem:[#allocation4 + $0x1b8] sm:$0xff] %vm602_vm2, %v4714_v58 }
 0x52e   : > { %v4904_v15 = vpop.permute.xlu0 %4903  ;;  %5893 = vmatmul.mubr.bf16.gmra.mrb[184].mxu0 %v5425_v23 }
 0x52f   : > { %4941 = vst.msk [vmem:[#allocation4 + $0x198] sm:$0xff] %vm602_vm2, %v4904_v15  ;;  %5900 = vmatprep.mubr.bf16.mxu0 %v5431_v52 }
 0x531   : > { %v4716_v34 = vpop.permute.xlu1 %4715 }
 0x532   : > { %v4906_v29 = vpop.permute.xlu0 %4905  ;;  %4751 = vst.msk [vmem:[#allocation4 + $0x1e0] sm:$0xff] %vm602_vm2, %v4716_v34  ;;  %v5450_v32 = vld [vmem:[#allocation4 + $0x1b8] sm:$0xff] }
 0x533   : > { %4942 = vst.msk [vmem:[#allocation4 + $0x1c0] sm:$0xff] %vm602_vm2, %v4906_v29 }
 0x535   : > { %v4718_v30 = vpop.permute.xlu1 %4717 }
 0x536   : > { %4752 = vst.msk [vmem:[#allocation4 + $0x208] sm:$0xff] %vm602_vm2, %v4718_v30  ;;  %5901 = vmatmul.mubr.bf16.gmra.mrb[188].mxu0 %v5430_v6  ;;  %v5446_v36 = vld [vmem:[#allocation4 + $0x198] sm:$0xff] }
 0x537   : > { %5908 = vmatprep.mubr.bf16.mxu0 %v5436_v27 }
 0x538   : > { %v4908_v26 = vpop.permute.xlu0 %4907 }
 0x539   : > { %4943 = vst.msk [vmem:[#allocation4 + $0x1e8] sm:$0xff] %vm602_vm2, %v4908_v26  ;;  %v5455_v15 = vld [vmem:[#allocation4 + $0x1e0] sm:$0xff] }
 0x53a   : > { %v5451_v28 = vld [vmem:[#allocation4 + $0x1c0] sm:$0xff] }
 0x53b   : > { %v4720_v37 = vpop.permute.xlu1 %4719 }
 0x53c   : > { %v4910_v46 = vpop.permute.xlu0 %4909  ;;  %4753 = vst.msk [vmem:[#allocation4 + $0x230] sm:$0xff] %vm602_vm2, %v4720_v37 }
 0x53d   : > { %4944 = vst.msk [vmem:[#allocation4 + $0x210] sm:$0xff] %vm602_vm2, %v4910_v46  ;;  %v5460_v30 = vld [vmem:[#allocation4 + $0x208] sm:$0xff] }
 0x53e   : > { %5909 = vmatmul.mubr.bf16.gmra.mrb[192].mxu0 %v5435_v39 }
 0x53f   : > { %v4722_v41 = vpop.permute.xlu1 %4721  ;;  %5916 = vmatprep.mubr.bf16.mxu0 %v5441_v38  ;;  %v5414_v38 = vld [vmem:[#allocation4 + $0x98] sm:$0xff] }
 0x540   : > { %v4912_v25 = vpop.permute.xlu0 %4911  ;;  %4754 = vst.msk [vmem:[#allocation4 + $0x258] sm:$0xff] %vm602_vm2, %v4722_v41  ;;  %v5456_v50 = vld [vmem:[#allocation4 + $0x1e8] sm:$0xff] }
 0x541   : > { %4945 = vst.msk [vmem:[#allocation4 + $0x238] sm:$0xff] %vm602_vm2, %v4912_v25 }
 0x543   : > { %v5076_v57 = vpop.permute.xlu1 %5075  ;;  %v5465_v52 = vld [vmem:[#allocation4 + $0x230] sm:$0xff] }
 0x544   : > { %v4914_v51 = vpop.permute.xlu0 %4913  ;;  %5123 = vst.msk [vmem:[#allocation4 + $0x10] sm:$0xff] %vm602_vm2, %v5076_v57  ;;  %v5461_v22 = vld [vmem:[#allocation4 + $0x210] sm:$0xff] }
 0x545   : > { %4946 = vst.msk [vmem:[#allocation4 + $0x260] sm:$0xff] %vm602_vm2, %v4914_v51 }
 0x546   : > { %5917 = vmatmul.mubr.bf16.gmra.mrb[196].mxu0 %v5440_v47  ;;  %v5434_v47 = vld [vmem:[#allocation4 + $0x138] sm:$0xff] }
 0x547   : > { %v5078_v14 = vpop.permute.xlu1 %5077  ;;  %5924 = vmatprep.mubr.bf16.mxu0 %v5446_v36  ;;  %v5439_v36 = vld [vmem:[#allocation4 + $0x160] sm:$0xff] }
 0x548   : > { %v5268_v54 = vpop.permute.xlu0 %5267  ;;  %5124 = vst.msk [vmem:[#allocation4 + $0x38] sm:$0xff] %vm602_vm2, %v5078_v14  ;;  %v5466_v7 = vld [vmem:[#allocation4 + $0x238] sm:$0xff]  ;;  %v5399_v14 = vld [vmem:[#allocation4 + $0x20] sm:$0xff] }
 0x549   : > { %5315 = vst.msk [vmem:[#allocation4 + $0x18] sm:$0xff] %vm602_vm2, %v5268_v54  ;;  %v5470_v54 = vld [vmem:[#allocation4 + $0x258] sm:$0xff] }
 0x54b   : > { %v5080_v13 = vpop.permute.xlu1 %5079  ;;  %v5397_v49 = vld [vmem:[#allocation4 + $0x10] sm:$0xff] }
 0x54c   : > { %v5270_v60 = vpop.permute.xlu0 %5269  ;;  %5125 = vst.msk [vmem:[#allocation4 + $0x60] sm:$0xff] %vm602_vm2, %v5080_v13  ;;  %v5471_v25 = vld [vmem:[#allocation4 + $0x260] sm:$0xff] }
 0x54d   : > { %5316 = vst.msk [vmem:[#allocation4 + $0x40] sm:$0xff] %vm602_vm2, %v5270_v60  ;;  %v5409_v60 = vld [vmem:[#allocation4 + $0x70] sm:$0xff] }
 0x54e   : > { %5925 = vmatmul.mubr.bf16.gmra.mrb[200].mxu0 %v5445_v0  ;;  %v5454_v0 = vld [vmem:[#allocation4 + $0x1d8] sm:$0xff] }
 0x54f   : > { %v5082_v8 = vpop.permute.xlu1 %5081  ;;  %v5402_v20 = vld [vmem:[#allocation4 + $0x38] sm:$0xff]  ;;  %5932 = vmatprep.mubr.bf16.mxu0 %v5451_v28  ;;  %v5459_v28 = vld [vmem:[#allocation4 + $0x200] sm:$0xff] }
 0x550   : > { %v5272_v18 = vpop.permute.xlu0 %5271  ;;  %v5398_v24 = vld [vmem:[#allocation4 + $0x18] sm:$0xff]  ;;  %5126 = vst.msk [vmem:[#allocation4 + $0x88] sm:$0xff] %vm602_vm2, %v5082_v8 }
 0x551   : > { %5317 = vst.msk [vmem:[#allocation4 + $0x68] sm:$0xff] %vm602_vm2, %v5272_v18  ;;  %6005 = vmatprep.mubr.bf16.mxu1 %v5398_v24  ;;  %v5419_v18 = vld [vmem:[#allocation4 + $0xc0] sm:$0xff] }
 0x552   : > { %6006 = vmatmul.mubr.bf16.vlgmr.msra.gmra.mrb[160].mxu1 %v5397_v49  ;;  %v5424_v49 = vld [vmem:[#allocation4 + $0xe8] sm:$0xff] }
 0x553   : > { %v5084_v19 = vpop.permute.xlu1 %5083  ;;  %v5407_v45 = vld [vmem:[#allocation4 + $0x60] sm:$0xff] }
 0x554   : > { %v5274_v62 = vpop.permute.xlu0 %5273  ;;  %v5403_v1 = vld [vmem:[#allocation4 + $0x40] sm:$0xff]  ;;  %5127 = vst.msk [vmem:[#allocation4 + $0xb0] sm:$0xff] %vm602_vm2, %v5084_v19 }
 0x555   : > { %5318 = vst.msk [vmem:[#allocation4 + $0x90] sm:$0xff] %vm602_vm2, %v5274_v62  ;;  %6013 = vmatprep.mubr.bf16.mxu1 %v5403_v1  ;;  %v5429_v62 = vld [vmem:[#allocation4 + $0x110] sm:$0xff] }
 0x556   : > { %5933 = vmatmul.mubr.bf16.gmra.mrb[204].mxu0 %v5450_v32 }
 0x557   : > { %v5086_v35 = vpop.permute.xlu1 %5085  ;;  %5940 = vmatprep.mubr.bf16.mxu0 %v5456_v50  ;;  %v5412_v55 = vld [vmem:[#allocation4 + $0x88] sm:$0xff] }
 0x558   : > { %v5276_v48 = vpop.permute.xlu0 %5275  ;;  %5128 = vst.msk [vmem:[#allocation4 + $0xd8] sm:$0xff] %vm602_vm2, %v5086_v35  ;;  %v5408_v44 = vld [vmem:[#allocation4 + $0x68] sm:$0xff] }
 0x559   : > { %5319 = vst.msk [vmem:[#allocation4 + $0xb8] sm:$0xff] %vm602_vm2, %v5276_v48 }
 0x55a   : > { %6014 = vmatmul.mubr.bf16.gmra.mrb[164].mxu1 %v5402_v20  ;;  %v5444_v20 = vld [vmem:[#allocation4 + $0x188] sm:$0xff] }
 0x55b   : > { %6021 = vmatprep.mubr.bf16.mxu1 %v5408_v44  ;;  %v5088_v59 = vpop.permute.xlu1 %5087  ;;  %v5417_v29 = vld [vmem:[#allocation4 + $0xb0] sm:$0xff] }
 0x55c   : > { %v5278_v11 = vpop.permute.xlu0 %5277  ;;  %5129 = vst.msk [vmem:[#allocation4 + $0x100] sm:$0xff] %vm602_vm2, %v5088_v59  ;;  %v5413_v53 = vld [vmem:[#allocation4 + $0x90] sm:$0xff] }
 0x55d   : > { %5320 = vst.msk [vmem:[#allocation4 + $0xe0] sm:$0xff] %vm602_vm2, %v5278_v11  ;;  %v5449_v44 = vld [vmem:[#allocation4 + $0x1b0] sm:$0xff] }
 0x55e   : > { %5941 = vmatmul.mubr.bf16.gmra.mrb[208].mxu0 %v5455_v15 }
 0x55f   : > { %v5090_v56 = vpop.permute.xlu1 %5089  ;;  %5948 = vmatprep.mubr.bf16.mxu0 %v5461_v22  ;;  %v5422_v16 = vld [vmem:[#allocation4 + $0xd8] sm:$0xff] }
 0x560   : > { %v5280_v21 = vpop.permute.xlu0 %5279  ;;  %5130 = vst.msk [vmem:[#allocation4 + $0x128] sm:$0xff] %vm602_vm2, %v5090_v56  ;;  %v5418_v43 = vld [vmem:[#allocation4 + $0xb8] sm:$0xff] }
 0x561   : > { %5321 = vst.msk [vmem:[#allocation4 + $0x108] sm:$0xff] %vm602_vm2, %v5280_v21 }
 0x562   : > { %6022 = vmatmul.mubr.bf16.gmra.mrb[168].mxu1 %v5407_v45  ;;  %v5464_v45 = vld [vmem:[#allocation4 + $0x228] sm:$0xff] }
 0x563   : > { %6029 = vmatprep.mubr.bf16.mxu1 %v5413_v53  ;;  %v5092_v9 = vpop.permute.xlu1 %5091  ;;  %v5427_v57 = vld [vmem:[#allocation4 + $0x100] sm:$0xff]  ;;  %v5469_v53 = vld [vmem:[#allocation4 + $0x250] sm:$0xff] }
 0x564   : > { %v5282_v33 = vpop.permute.xlu0 %5281  ;;  %5131 = vst.msk [vmem:[#allocation4 + $0x150] sm:$0xff] %vm602_vm2, %v5092_v9  ;;  %v5423_v34 = vld [vmem:[#allocation4 + $0xe0] sm:$0xff] }
 0x565   : > { %5322 = vst.msk [vmem:[#allocation4 + $0x130] sm:$0xff] %vm602_vm2, %v5282_v33 }
 0x566   : > { %5949 = vmatmul.mubr.bf16.gmra.mrb[212].mxu0 %v5460_v30 }
 0x567   : > { %v5094_v31 = vpop.permute.xlu1 %5093  ;;  %5956 = vmatprep.mubr.bf16.mxu0 %v5466_v7  ;;  %v5432_v61 = vld [vmem:[#allocation4 + $0x128] sm:$0xff] }
 0x568   : > { %v5284_v12 = vpop.permute.xlu0 %5283  ;;  %5132 = vst.msk [vmem:[#allocation4 + $0x178] sm:$0xff] %vm602_vm2, %v5094_v31  ;;  %v5428_v2 = vld [vmem:[#allocation4 + $0x108] sm:$0xff] }
 0x569   : > { %5323 = vst.msk [vmem:[#allocation4 + $0x158] sm:$0xff] %vm602_vm2, %v5284_v12 }
 0x56a   : > { %6030 = vmatmul.mubr.bf16.gmra.mrb[172].mxu1 %v5412_v55 }
 0x56b   : > { %6037 = vmatprep.mubr.bf16.mxu1 %v5418_v43  ;;  %v5096_v3 = vpop.permute.xlu1 %5095  ;;  %v5437_v13 = vld [vmem:[#allocation4 + $0x150] sm:$0xff] }
 0x56c   : > { %v5286_v5 = vpop.permute.xlu0 %5285  ;;  %5133 = vst.msk [vmem:[#allocation4 + $0x1a0] sm:$0xff] %vm602_vm2, %v5096_v3  ;;  %v5433_v6 = vld [vmem:[#allocation4 + $0x130] sm:$0xff] }
 0x56d   : > { %5324 = vst.msk [vmem:[#allocation4 + $0x180] sm:$0xff] %vm602_vm2, %v5286_v5 }
 0x56e   : > { %5957 = vmatmul.mubr.bf16.gmra.mrb[216].mxu0 %v5465_v52 }
 0x56f   : > { %v5098_v4 = vpop.permute.xlu1 %5097  ;;  %5964 = vmatprep.mubr.bf16.mxu0 %v5471_v25  ;;  %v5442_v8 = vld [vmem:[#allocation4 + $0x178] sm:$0xff] }
 0x570   : > { %v5288_v58 = vpop.permute.xlu0 %5287  ;;  %5134 = vst.msk [vmem:[#allocation4 + $0x1c8] sm:$0xff] %vm602_vm2, %v5098_v4  ;;  %v5438_v17 = vld [vmem:[#allocation4 + $0x158] sm:$0xff] }
 0x571   : > { %5325 = vst.msk [vmem:[#allocation4 + $0x1a8] sm:$0xff] %vm602_vm2, %v5288_v58 }
 0x572   : > { %6038 = vmatmul.mubr.bf16.gmra.mrb[176].mxu1 %v5417_v29 }
 0x573   : > { %6045 = vmatprep.mubr.bf16.mxu1 %v5423_v34  ;;  %v5100_v26 = vpop.permute.xlu1 %5099  ;;  %v5447_v19 = vld [vmem:[#allocation4 + $0x1a0] sm:$0xff] }
 0x574   : > { %v5290_v63 = vpop.permute.xlu0 %5289  ;;  %5135 = vst.msk [vmem:[#allocation4 + $0x1f0] sm:$0xff] %vm602_vm2, %v5100_v26  ;;  %v5443_v39 = vld [vmem:[#allocation4 + $0x180] sm:$0xff] }
 0x575   : > { %5326 = vst.msk [vmem:[#allocation4 + $0x1d0] sm:$0xff] %vm602_vm2, %v5290_v63 }
 0x576   : > { %5965 = vmatmul.mubr.bf16.gmra.mrb[220].mxu0 %v5470_v54 }
 0x577   : > { %v5102_v37 = vpop.permute.xlu1 %5101  ;;  %10110 = vmatprep.mubr.msk.bf16.mxu0 %vm251_vm0, %v5399_v14  ;;  %v5452_v48 = vld [vmem:[#allocation4 + $0x1c8] sm:$0xff] }
 0x578   : > { %v5292_v46 = vpop.permute.xlu0 %5291  ;;  %5136 = vst.msk [vmem:[#allocation4 + $0x218] sm:$0xff] %vm602_vm2, %v5102_v37  ;;  %v5448_v24 = vld [vmem:[#allocation4 + $0x1a8] sm:$0xff] }
 0x579   : > { %5327 = vst.msk [vmem:[#allocation4 + $0x1f8] sm:$0xff] %vm602_vm2, %v5292_v46 }
 0x57a   : > { %6046 = vmatmul.mubr.bf16.gmra.mrb[180].mxu1 %v5422_v16 }
 0x57b   : > { %6053 = vmatprep.mubr.bf16.mxu1 %v5428_v2  ;;  %v5104_v23 = vpop.permute.xlu1 %5103  ;;  %v5457_v11 = vld [vmem:[#allocation4 + $0x1f0] sm:$0xff] }
 0x57c   : > { %v5294_v42 = vpop.permute.xlu0 %5293  ;;  %5137 = vst.msk [vmem:[#allocation4 + $0x240] sm:$0xff] %vm602_vm2, %v5104_v23  ;;  %v5453_v1 = vld [vmem:[#allocation4 + $0x1d0] sm:$0xff] }
 0x57d   : > { %5328 = vst.msk [vmem:[#allocation4 + $0x220] sm:$0xff] %vm602_vm2, %v5294_v42 }
 0x57e   : > { %10111 = vmatmul.mubr.msk.bf16.vlgmr.msra.gmra.mrb[224].mxu0 %vm251_vm0, %v5404_v40 }
 0x57f   : > { %v5106_v51 = vpop.permute.xlu1 %5105  ;;  %10114 = vmatprep.mubr.msk.bf16.mxu0 %vm251_vm0, %v5409_v60  ;;  %v5462_v21 = vld [vmem:[#allocation4 + $0x218] sm:$0xff] }
 0x580   : > { %v5296_v41 = vpop.permute.xlu0 %5295  ;;  %5138 = vst.msk [vmem:[#allocation4 + $0x268] sm:$0xff] %vm602_vm2, %v5106_v51  ;;  %v5458_v35 = vld [vmem:[#allocation4 + $0x1f8] sm:$0xff] }
 0x581   : > { %5329 = vst.msk [vmem:[#allocation4 + $0x248] sm:$0xff] %vm602_vm2, %v5296_v41 }
 0x582   : > { %6054 = vmatmul.mubr.bf16.gmra.mrb[184].mxu1 %v5427_v57 }
 0x583   : > { %6061 = vmatprep.mubr.bf16.mxu1 %v5433_v6  ;;  %v5467_v9 = vld [vmem:[#allocation4 + $0x240] sm:$0xff] }
 0x584   : > { %v5298_v27 = vpop.permute.xlu0 %5297  ;;  %v5463_v59 = vld [vmem:[#allocation4 + $0x220] sm:$0xff] }
 0x585   : > { %5330 = vst.msk [vmem:[#allocation4 + $0x270] sm:$0xff] %vm602_vm2, %v5298_v27 }
 0x586   : > { %10115 = vmatmul.mubr.msk.bf16.gmra.mrb[228].mxu0 %vm251_vm0, %v5414_v38 }
 0x587   : > { %10118 = vmatprep.mubr.msk.bf16.mxu0 %vm251_vm0, %v5419_v18  ;;  %v5472_v32 = vld [vmem:[#allocation4 + $0x268] sm:$0xff] }
 0x588   : > { %v5468_v56 = vld [vmem:[#allocation4 + $0x248] sm:$0xff] }
 0x58a   : > { %6062 = vmatmul.mubr.bf16.gmra.mrb[188].mxu1 %v5432_v61 }
 0x58b   : > { %6069 = vmatprep.mubr.bf16.mxu1 %v5438_v17 }
 0x58c   : > { %v5473_v33 = vld [vmem:[#allocation4 + $0x270] sm:$0xff] }
 0x58e   : > { %10119 = vmatmul.mubr.msk.bf16.gmra.mrb[232].mxu0 %vm251_vm0, %v5424_v49 }
 0x58f   : > { %10122 = vmatprep.mubr.msk.bf16.mxu0 %vm251_vm0, %v5429_v62 }
 0x592   : > { %6070 = vmatmul.mubr.bf16.gmra.mrb[192].mxu1 %v5437_v13 }
 0x593   : > { %6077 = vmatprep.mubr.bf16.mxu1 %v5443_v39 }
 0x596   : > { %10123 = vmatmul.mubr.msk.bf16.gmra.mrb[236].mxu0 %vm251_vm0, %v5434_v47 }
 0x597   : > { %10126 = vmatprep.mubr.msk.bf16.mxu0 %vm251_vm0, %v5439_v36 }
 0x59a   : > { %6078 = vmatmul.mubr.bf16.gmra.mrb[196].mxu1 %v5442_v8 }
 0x59b   : > { %6085 = vmatprep.mubr.bf16.mxu1 %v5448_v24 }
 0x59e   : > { %10127 = vmatmul.mubr.msk.bf16.gmra.mrb[240].mxu0 %vm251_vm0, %v5444_v20 }
 0x59f   : > { %10130 = vmatprep.mubr.msk.bf16.mxu0 %vm251_vm0, %v5449_v44 }
 0x5a2   : > { %6086 = vmatmul.mubr.bf16.gmra.mrb[200].mxu1 %v5447_v19 }
 0x5a3   : > { %6093 = vmatprep.mubr.bf16.mxu1 %v5453_v1 }
 0x5a6   : > { %10131 = vmatmul.mubr.msk.bf16.gmra.mrb[244].mxu0 %vm251_vm0, %v5454_v0 }
 0x5a7   : > { %10134 = vmatprep.mubr.msk.bf16.mxu0 %vm251_vm0, %v5459_v28 }
 0x5aa   : > { %6094 = vmatmul.mubr.bf16.gmra.mrb[204].mxu1 %v5452_v48 }
 0x5ab   : > { %6101 = vmatprep.mubr.bf16.mxu1 %v5458_v35 }
 0x5ae   : > { %10135 = vmatmul.mubr.msk.bf16.gmra.mrb[248].mxu0 %vm251_vm0, %v5464_v45 }
 0x5af   : > { %10138 = vmatprep.mubr.msk.bf16.mxu0 %vm251_vm0, %v5469_v53 }
 0x5b2   : > { %6102 = vmatmul.mubr.bf16.gmra.mrb[208].mxu1 %v5457_v11 }
 0x5b3   : > { %6109 = vmatprep.mubr.bf16.mxu1 %v5463_v59 }
 0x5b6   : > { %10139 = vmatmul.mubr.msk.bf16.gmra.mrb[252].mxu0 %vm251_vm0, %v13987_v10 }
 0x5ba   : > { %6110 = vmatmul.mubr.bf16.gmra.mrb[212].mxu1 %v5462_v21 }
 0x5bb   : > { %6117 = vmatprep.mubr.bf16.mxu1 %v5468_v56 }
 0x5c2   : > { %6118 = vmatmul.mubr.bf16.gmra.mrb[216].mxu1 %v5467_v9 }
 0x5c3   : > { %6125 = vmatprep.mubr.bf16.mxu1 %v5473_v33 }
 0x5ca   : > { %6126 = vmatmul.mubr.bf16.gmra.mrb[220].mxu1 %v5472_v32 }
 0x5d1   : > { %v9550_v50 = vpop.f32.mrb[160].mxu0 }
 0x5d2   : > { %v9551_v12 = vpop.f32.mrb[161].mxu0 }
 0x5d3   : > { %v9552_v31 = vadd.f32 %v9551_v12, %v9550_v50  ;;  %v9553_v55 = vpop.f32.mrb[162].mxu0 }
 0x5d4   : > { %v9554_v43 = vpop.f32.mrb[163].mxu0 }
 0x5d5   : > { %v9555_v5 = vadd.f32 %v9554_v43, %v9553_v55 }
 0x5d9   : > { %v9556_v3 = vpop.f32.mrb[164].mxu0 }
 0x5da   : > { %v9557_v15 = vpop.f32.mrb[165].mxu0 }
 0x5db   : > { %v14036_v22 = vadd.f32 %v9557_v15, %v9556_v3  ;;  %v9559_v58 = vpop.f32.mrb[166].mxu0 }
 0x5dc   : > { %v9560_v4 = vpop.f32.mrb[167].mxu0 }
 0x5dd   : > { %v14038_v29 = vadd.f32 %v9560_v4, %v9559_v58 }
 0x5e1   : > { %v9562_v34 = vpop.f32.mrb[168].mxu0 }
 0x5e2   : > { %v9563_v63 = vpop.f32.mrb[169].mxu0 }
 0x5e3   : > { %v14040_v26 = vadd.f32 %v9563_v63, %v9562_v34  ;;  %v9565_v10 = vpop.f32.mrb[170].mxu0 }
 0x5e4   : > { %v9566_v30 = vpop.f32.mrb[171].mxu0 }
 0x5e5   : > { %v14042_v7 = vadd.f32 %v9566_v30, %v9565_v10 }
 0x5e9   : > { %v9568_v46 = vpop.f32.mrb[172].mxu0 }
 0x5ea   : > { %v9569_v37 = vpop.f32.mrb[173].mxu0 }
 0x5eb   : > { %v14044_v16 = vadd.f32 %v9569_v37, %v9568_v46  ;;  %v9571_v2 = vpop.f32.mrb[174].mxu0 }
 0x5ec   : > { %v9572_v42 = vpop.f32.mrb[175].mxu0 }
 0x5ed   : > { %v14046_v23 = vadd.f32 %v9572_v42, %v9571_v2  ;;  %v6695_v2 = vld [vmem:[#allocation3 + $0x1] sm:$0xff]  ;;  %v6696_v42 = vld [vmem:[#allocation3 + $0x9] sm:$0xff] }
 0x5f1   : > { %v9574_v52 = vpop.f32.mrb[176].mxu0 }
 0x5f2   : > { %v9575_v25 = vpop.f32.mrb[177].mxu0 }
 0x5f3   : > { %v14048_v41 = vadd.f32 %v9575_v25, %v9574_v52  ;;  %v9577_v51 = vpop.f32.mrb[178].mxu0 }
 0x5f4   : > { %v9578_v57 = vpop.f32.mrb[179].mxu0 }
 0x5f5   : > { %v14050_v6 = vadd.f32 %v9578_v57, %v9577_v51  ;;  %v6727_v51 = vpack.c.bf16 %v6696_v42, %v6695_v2 }
 0x5f7   : > { %6759 = vrot.lane.b32.xlu1 %v6727_v51, %s10949_s9 }
 0x5f9   : > { %v9580_v27 = vpop.f32.mrb[180].mxu0 }
 0x5fa   : > { %v9581_v54 = vpop.f32.mrb[181].mxu0 }
 0x5fb   : > { %v14052_v14 = vadd.f32 %v9581_v54, %v9580_v27  ;;  %v9583_v61 = vpop.f32.mrb[182].mxu0 }
 0x5fc   : > { %v9584_v17 = vpop.f32.mrb[183].mxu0 }
 0x5fd   : > { %v14054_v40 = vadd.f32 %v9584_v17, %v9583_v61 }
 0x601   : > { %v9586_v60 = vpop.f32.mrb[184].mxu0 }
 0x602   : > { %v9587_v13 = vpop.f32.mrb[185].mxu0 }
 0x603   : > { %v14056_v39 = vadd.f32 %v9587_v13, %v9586_v60  ;;  %v9589_v38 = vpop.f32.mrb[186].mxu0 }
 0x604   : > { %v9590_v18 = vpop.f32.mrb[187].mxu0 }
 0x605   : > { %v14058_v8 = vadd.f32 %v9590_v18, %v9589_v38  ;;  %v10333_v18 = vld [vmem:[%s15405_s4 + $0x40] sm:$0xff]  }
 0x606   : > { %9778 = vmatprep.subr.bf16.mxu1 %v10333_v18  ;;  %v10337_v18 = vld [vmem:[%s15405_s4 + $0x50] sm:$0xff]  }
 0x609   : > { %v9592_v24 = vpop.f32.mrb[188].mxu0 }
 0x60a   : > { %v9593_v49 = vpop.f32.mrb[189].mxu0 }
 0x60b   : > { %v14060_v62 = vadd.f32 %v9593_v49, %v9592_v24  ;;  %v9595_v19 = vpop.f32.mrb[190].mxu0  ;;  %v10334_v24 = vld [vmem:[%s15405_s4] sm:$0xff]  }
 0x60c   : > { %v9596_v1 = vpop.f32.mrb[191].mxu0  ;;  %9779 = vmatpush3.bf16.msra.mxu1 %v10334_v24 }
 0x60d   : > { %v14062_v47 = vadd.f32 %v9596_v1, %v9595_v19 }
 0x611   : > { %v9598_v36 = vpop.f32.mrb[192].mxu0 }
 0x612   : > { %v9599_v48 = vpop.f32.mrb[193].mxu0 }
 0x613   : > { %v14064_v35 = vadd.f32 %v9599_v48, %v9598_v36  ;;  %v9601_v20 = vpop.f32.mrb[194].mxu0 }
 0x614   : > { %v9602_v11 = vpop.f32.mrb[195].mxu0 }
 0x615   : > { %v14066_v0 = vadd.f32 %v9602_v11, %v9601_v20 }
 0x619   : > { %v9604_v33 = vpop.f32.mrb[196].mxu0 }
 0x61a   : > { %v9605_v9 = vpop.f32.mrb[197].mxu0 }
 0x61b   : > { %v14072_v50 = vadd.f32 %v9605_v9, %v9604_v33  ;;  %v9607_v12 = vpop.f32.mrb[198].mxu0 }
 0x61c   : > { %v9608_v43 = vpop.f32.mrb[199].mxu0 }
 0x61d   : > { %v14074_v15 = vadd.f32 %v9608_v43, %v9607_v12 }
 0x625   : > { %v9662_v44 = vpop.f32.mrb[160].mxu1 }
 0x626   : > { %v9663_v59 = vpop.f32.mrb[161].mxu1 }
 0x627   : > { %v9664_v28 = vadd.f32 %v9663_v59, %v9662_v44  ;;  %v9665_v21 = vpop.f32.mrb[162].mxu1 }
 0x628   : > { %v9666_v56 = vpop.f32.mrb[163].mxu1 }
 0x629   : > { %v9667_v45 = vadd.f32 %v9666_v56, %v9665_v21  ;;  %v14068_v53 = vadd.f32 %v9664_v28, %v9552_v31  ;;  %v9610_v31 = vpop.f32.mrb[200].mxu0 }
 0x62a   : > { %v9611_v30 = vpop.f32.mrb[201].mxu0 }
 0x62b   : > { %v14070_v32 = vadd.f32 %v9667_v45, %v9555_v5  ;;  %v14082_v46 = vadd.f32 %v9611_v30, %v9610_v31  ;;  %v9613_v37 = vpop.f32.mrb[202].mxu0 }
 0x62c   : > { %v9614_v25 = vpop.f32.mrb[203].mxu0 }
 0x62d   : > { %v9668_v55 = vpop.f32.mrb[164].mxu1  ;;  %v14084_v27 = vadd.f32 %v9614_v25, %v9613_v37  ;;  %v9616_v60 = vpop.f32.mrb[204].mxu0 }
 0x62e   : > { %v9669_v3 = vpop.f32.mrb[165].mxu1  ;;  %v9617_v13 = vpop.f32.mrb[205].mxu0 }
 0x62f   : > { %v9670_v58 = vadd.f32 %v9669_v3, %v9668_v55  ;;  %v9671_v4 = vpop.f32.mrb[166].mxu1  ;;  %v14099_v49 = vadd.f32 %v9617_v13, %v9616_v60  ;;  %v9619_v19 = vpop.f32.mrb[206].mxu0  ;;  %v10335_v60 = vld [vmem:[%s15405_s4 + $0x48] sm:$0xff]  }
 0x630   : > { %v9672_v34 = vpop.f32.mrb[167].mxu1  ;;  %v9620_v36 = vpop.f32.mrb[207].mxu0  ;;  %v10336_v13 = vld [vmem:[%s15405_s4 + $0x8] sm:$0xff]   ;;  %9780 = vmatprep.subr.bf16.mxu1 %v10335_v60  ;;  %v14182_v60 = vld [vmem:[%s15404_s3 + $0x2] ss:$0 sm:$0xff] }
 0x631   : > { %v9673_v63 = vadd.f32 %v9672_v34, %v9671_v4  ;;  %v14077_v10 = vadd.f32 %v9670_v58, %v14036_v22  ;;  %v14101_v48 = vadd.f32 %v9620_v36, %v9619_v19  ;;  %v9622_v28 = vpop.f32.mrb[208].mxu0  ;;  %9781 = vmatpush3.bf16.msra.mxu1 %v10336_v13 }
 0x632   : > { %v9623_v21 = vpop.f32.mrb[209].mxu0  ;;  %9782 = vmatprep.subr.bf16.mxu1 %v10337_v18 }
 0x633   : > { %v14080_v5 = vadd.f32 %v9673_v63, %v14038_v29  ;;  %v14109_v45 = vadd.f32 %v9623_v21, %v9622_v28  ;;  %v9625_v33 = vpop.f32.mrb[210].mxu0 }
 0x634   : > { %v9626_v12 = vpop.f32.mrb[211].mxu0 }
 0x635   : > { %v9674_v52 = vpop.f32.mrb[168].mxu1  ;;  %v14111_v43 = vadd.f32 %v9626_v12, %v9625_v33 }
 0x636   : > { %v9675_v57 = vpop.f32.mrb[169].mxu1 }
 0x637   : > { %v9676_v54 = vadd.f32 %v9675_v57, %v9674_v52  ;;  %v9677_v61 = vpop.f32.mrb[170].mxu1 }
 0x638   : > { %v9678_v22 = vpop.f32.mrb[171].mxu1 }
 0x639   : > { %v9679_v17 = vadd.f32 %v9678_v22, %v9677_v61  ;;  %v14088_v29 = vadd.f32 %v9676_v54, %v14040_v26  ;;  %v9628_v63 = vpop.f32.mrb[212].mxu0 }
 0x63a   : > { %v9629_v31 = vpop.f32.mrb[213].mxu0 }
 0x63b   : > { %v14091_v38 = vadd.f32 %v9679_v17, %v14042_v7  ;;  %v14119_v30 = vadd.f32 %v9629_v31, %v9628_v63  ;;  %v9631_v37 = vpop.f32.mrb[214].mxu0 }
 0x63c   : > { %v9632_v42 = vpop.f32.mrb[215].mxu0 }
 0x63d   : > { %v9680_v1 = vpop.f32.mrb[172].mxu1  ;;  %v14121_v25 = vadd.f32 %v9632_v42, %v9631_v37  ;;  %v10342_v37 = vld [vmem:[%s15405_s4 + $0x20] sm:$0xff]  }
 0x63e   : > { %v9681_v26 = vpop.f32.mrb[173].mxu1 }
 0x63f   : > { %v9682_v7 = vadd.f32 %v9681_v26, %v9680_v1  ;;  %v9683_v20 = vpop.f32.mrb[174].mxu1  ;;  %v10338_v26 = vld [vmem:[%s15405_s4 + $0x10] sm:$0xff]  }
 0x640   : > { %v9684_v44 = vpop.f32.mrb[175].mxu1  ;;  %9783 = vmatpush3.bf16.msra.mxu1 %v10338_v26 }
 0x641   : > { %v9685_v11 = vadd.f32 %v9684_v44, %v9683_v20  ;;  %v14104_v59 = vadd.f32 %v9682_v7, %v14044_v16  ;;  %v9634_v22 = vpop.f32.mrb[216].mxu0  ;;  %v10339_v44 = vld [vmem:[%s15405_s4 + $0x58] sm:$0xff]  }
 0x642   : > { %v9635_v17 = vpop.f32.mrb[217].mxu0  ;;  %9784 = vmatprep.subr.bf16.mxu1 %v10339_v44 }
 0x643   : > { %v14107_v56 = vadd.f32 %v9685_v11, %v14046_v23  ;;  %v14138_v24 = vadd.f32 %v9635_v17, %v9634_v22 }
 0x645   : > { %v9686_v9 = vpop.f32.mrb[176].mxu1 }
 0x646   : > { %v9687_v55 = vpop.f32.mrb[177].mxu1 }
 0x647   : > { %v9688_v3 = vadd.f32 %v9687_v55, %v9686_v9  ;;  %v9689_v58 = vpop.f32.mrb[178].mxu1  ;;  %v10340_v9 = vld [vmem:[%s15405_s4 + $0x18] sm:$0xff]  }
 0x648   : > { %v9690_v4 = vpop.f32.mrb[179].mxu1  ;;  %9785 = vmatpush3.bf16.msra.mxu1 %v10340_v9 }
 0x649   : > { %v9691_v34 = vadd.f32 %v9690_v4, %v9689_v58  ;;  %v14114_v16 = vadd.f32 %v9688_v3, %v14048_v41  ;;  %v10341_v3 = vld [vmem:[%s15405_s4 + $0x60] sm:$0xff]  }
 0x64a   : > { %9786 = vmatprep.subr.bf16.mxu1 %v10341_v3 }
 0x64b   : > { %v14117_v23 = vadd.f32 %v9691_v34, %v14050_v6 }
 0x64c   : > { %9787 = vmatpush3.bf16.msra.mxu1 %v10342_v37 }
 0x64d   : > { %v9692_v2 = vpop.f32.mrb[180].mxu1 }
 0x64e   : > { %v9693_v52 = vpop.f32.mrb[181].mxu1 }
 0x64f   : > { %v9694_v51 = vadd.f32 %v9693_v52, %v9692_v2  ;;  %v9695_v57 = vpop.f32.mrb[182].mxu1 }
 0x650   : > { %v9696_v54 = vpop.f32.mrb[183].mxu1 }
 0x651   : > { %v9697_v61 = vadd.f32 %v9696_v54, %v9695_v57  ;;  %v14124_v41 = vadd.f32 %v9694_v51, %v14052_v14  ;;  %v9637_v14 = vpop.f32.mrb[218].mxu0  ;;  %v14173_v54 = vld [vmem:[%s15403_s2 + $0x2] ss:$0 sm:$0xff] }
 0x652   : > { %v9638_v1 = vpop.f32.mrb[219].mxu0 }
 0x653   : > { %v14127_v6 = vadd.f32 %v9697_v61, %v14054_v40  ;;  %v14140_v36 = vadd.f32 %v9638_v1, %v9637_v14  ;;  %v9640_v33 = vpop.f32.mrb[220].mxu0 }
 0x654   : > { %v9641_v12 = vpop.f32.mrb[221].mxu0 }
 0x655   : > { %v9698_v19 = vpop.f32.mrb[184].mxu1  ;;  %v14160_v58 = vadd.f32 %v9641_v12, %v9640_v33  ;;  %v9643_v4 = vpop.f32.mrb[222].mxu0 }
 0x656   : > { %v9699_v40 = vpop.f32.mrb[185].mxu1  ;;  %v9644_v34 = vpop.f32.mrb[223].mxu0 }
 0x657   : > { %v9700_v7 = vadd.f32 %v9699_v40, %v9698_v19  ;;  %v9701_v20 = vpop.f32.mrb[186].mxu1  ;;  %v14162_v31 = vadd.f32 %v9644_v34, %v9643_v4  ;;  %v10112_v57 = vpop.f32.mrb[224].mxu0 }
 0x658   : > { %v9702_v11 = vpop.f32.mrb[187].mxu1  ;;  %v6177_v61 = vadd.f32 %v10112_v57, %v14077_v10  ;;  %v6168_v22 = vpop.f32.mrb[225].mxu0 }
 0x659   : > { %v9703_v28 = vadd.f32 %v9702_v11, %v9701_v20  ;;  %v14149_v21 = vadd.f32 %v9700_v7, %v14056_v39  ;;  %v10113_v13 = vpop.f32.mrb[226].mxu0 }
 0x65a   : > { %v6305_v14 = vmul.f32 %v14173_v54, %v6177_v61  ;;  %v6180_v19 = vadd.f32 %v10113_v13, %v14080_v5  ;;  %v6171_v1 = vpop.f32.mrb[227].mxu0 }
 0x65b   : > { %v14155_v55 = vadd.f32 %v9703_v28, %v14058_v8  ;;  %v10116_v4 = vpop.f32.mrb[228].mxu0 }
 0x65c   : > { %v14190_v26 = vadd.f32 %v14182_v60, %v6305_v14  ;;  %v6306_v44 = vmul.f32 %v14173_v54, %v6180_v19  ;;  %v6184_v37 = vpop.f32.mrb[229].mxu0 }
 0x65d   : > { %v9704_v39 = vpop.f32.mrb[188].mxu1  ;;  %v6185_v57 = vadd.f32 %v6184_v37, %v14088_v29  ;;  %v10117_v61 = vpop.f32.mrb[230].mxu0 }
 0x65e   : > { %v9705_v63 = vpop.f32.mrb[189].mxu1  ;;  %v6377_v5 = vsub.f32 0.0, %v14190_v26  ;;  %v14199_v33 = vadd.f32 %v14182_v60, %v6306_v44  ;;  %v6187_v13 = vpop.f32.mrb[231].mxu0 }
 0x65f   : > { %v9706_v8 = vadd.f32 %v9705_v63, %v9704_v39  ;;  %v9707_v2 = vpop.f32.mrb[190].mxu1  ;;  %v6193_v63 = vadd.f32 %v10116_v4, %v14104_v59  ;;  %v6307_v19 = vmul.f32 %v14173_v54, %v6185_v57 }
 0x660   : > { %v9708_v42 = vpop.f32.mrb[191].mxu1  ;;  %v6411_v39 = vmul.f32 1.442695, %v6377_v5  ;;  %v6378_v34 = vsub.f32 0.0, %v14199_v33 }
 0x661   : > { %v9709_v52 = vadd.f32 %v9708_v42, %v9707_v2  ;;  %v14168_v51 = vadd.f32 %v9706_v8, %v14060_v62  ;;  %v6169_v62 = vadd.f32 %v6168_v22, %v14068_v53  ;;  %v10344_v2 = vld [vmem:[%s15405_s4 + $0x28] sm:$0xff]  }
 0x662   : > { %10625 = vpow2.f32 %v6411_v39  ;;  %v6413_v59 = vmul.f32 1.442695, %v6378_v34 }
 0x663   : > { %v14177_v17 = vadd.f32 %v9709_v52, %v14062_v47  ;;  %v6303_v10 = vmul.f32 %v14173_v54, %v6169_v62  ;;  %v6172_v47 = vadd.f32 %v6171_v1, %v14070_v32  ;;  %v6196_v62 = vadd.f32 %v10117_v61, %v14107_v56 }
 0x664   : > { %v6188_v1 = vadd.f32 %v6187_v13, %v14091_v38  ;;  %v14230_v56 = vadd.f32 %v14182_v60, %v6307_v19 }
 0x665   : > { %v9710_v18 = vpop.f32.mrb[192].mxu1  ;;  %v14194_v53 = vadd.f32 %v14182_v60, %v6303_v10  ;;  %v6304_v28 = vmul.f32 %v14173_v54, %v6172_v47  ;;  %v6310_v47 = vmul.f32 %v14173_v54, %v6196_v62 }
 0x666   : > { %v9711_v40 = vpop.f32.mrb[193].mxu1  ;;  %v6379_v5 = vsub.f32 0.0, %v14230_v56 }
 0x667   : > { %v9712_v7 = vadd.f32 %v9711_v40, %v9710_v18  ;;  %v9713_v20 = vpop.f32.mrb[194].mxu1  ;;  %v6375_v12 = vsub.f32 0.0, %v14194_v53  ;;  %v14206_v3 = vadd.f32 %v14182_v60, %v6304_v28  ;;  %v14235_v38 = vadd.f32 %v14182_v60, %v6310_v47 }
 0x668   : > { %v9714_v11 = vpop.f32.mrb[195].mxu1 }
 0x669   : > { %v9715_v9 = vadd.f32 %v9714_v11, %v9713_v20  ;;  %v14202_v32 = vadd.f32 %v9712_v7, %v14064_v35  ;;  %v10343_v35 = vld [vmem:[%s15405_s4 + $0x68] sm:$0xff]   ;;  %v6407_v42 = vmul.f32 1.442695, %v6375_v12  ;;  %v6376_v52 = vsub.f32 0.0, %v14206_v3  ;;  %v10120_v12 = vpop.f32.mrb[232].mxu0 }
 0x66a   : > { %9788 = vmatprep.subr.bf16.mxu1 %v10343_v35  ;;  %v6308_v20 = vmul.f32 %v14173_v54, %v6188_v1  ;;  %v6382_v39 = vsub.f32 0.0, %v14235_v38  ;;  %v6209_v34 = vadd.f32 %v10120_v12, %v14124_v41  ;;  %v6415_v35 = vmul.f32 1.442695, %v6379_v5 }
 0x66b   : > { %v14211_v8 = vadd.f32 %v9715_v9, %v14066_v0  ;;  %v6309_v0 = vmul.f32 %v14173_v54, %v6193_v63  ;;  %10627 = vpow2.f32 %v6407_v42  ;;  %v6409_v18 = vmul.f32 1.442695, %v6376_v52  ;;  %9789 = vmatpush3.bf16.msra.mxu1 %v10344_v2  ;;  %v6200_v63 = vpop.f32.mrb[233].mxu0 }
 0x66c   : > { %10629 = vpow2.f32 %v6413_v59  ;;  %v14242_v9 = vadd.f32 %v14182_v60, %v6308_v20  ;;  %v10121_v42 = vpop.f32.mrb[234].mxu0  ;;  %v6421_v52 = vmul.f32 1.442695, %v6382_v39  ;;  %v6313_v61 = vmul.f32 %v14173_v54, %v6209_v34  ;;  %v10626_v13 = vpop.eup %10625 }
 0x66d   : > { %v9716_v22 = vpop.f32.mrb[196].mxu1  ;;  %v14226_v29 = vadd.f32 %v14182_v60, %v6309_v0  ;;  %10631 = vpow2.f32 %v6409_v18  ;;  %v6212_v59 = vadd.f32 %v10121_v42, %v14127_v6  ;;  %v6473_v6 = vadd.f32 1.0, %v10626_v13  ;;  %v10345_v42 = vld [vmem:[%s15405_s4 + $0x70] sm:$0xff]  }
 0x66e   : > { %v9717_v14 = vpop.f32.mrb[197].mxu1  ;;  %v6380_v2 = vsub.f32 0.0, %v14242_v9  ;;  %9790 = vmatprep.subr.bf16.mxu1 %v10345_v42 }
 0x66f   : > { %v9718_v40 = vadd.f32 %v9717_v14, %v9716_v22  ;;  %v9719_v10 = vpop.f32.mrb[198].mxu1  ;;  %v6381_v44 = vsub.f32 0.0, %v14226_v29  ;;  %v6203_v22 = vpop.f32.mrb[235].mxu0  ;;  %v6314_v19 = vmul.f32 %v14173_v54, %v6212_v59 }
 0x670   : > { %v9720_v7 = vpop.f32.mrb[199].mxu1  ;;  %v6417_v41 = vmul.f32 1.442695, %v6380_v2  ;;  %v6204_v62 = vadd.f32 %v6203_v22, %v14117_v23  ;;  %v10124_v34 = vpop.f32.mrb[236].mxu0  ;;  %v10346_v22 = vld [vmem:[%s15405_s4 + $0x30] sm:$0xff]  }
 0x671   : > { %v9721_v11 = vadd.f32 %v9720_v7, %v9719_v10  ;;  %v14238_v28 = vadd.f32 %v9718_v40, %v14072_v50  ;;  %v6419_v4 = vmul.f32 1.442695, %v6381_v44  ;;  %v6201_v50 = vadd.f32 %v6200_v63, %v14114_v16  ;;  %9791 = vmatpush3.bf16.msra.mxu1 %v10346_v22 }
 0x672   : > { %v14256_v16 = vadd.f32 %v14182_v60, %v6313_v61  ;;  %v6312_v47 = vmul.f32 %v14173_v54, %v6204_v62  ;;  %v14267_v44 = vadd.f32 %v14182_v60, %v6314_v19  ;;  %v6225_v61 = vadd.f32 %v10124_v34, %v14168_v51 }
 0x673   : > { %v14247_v37 = vadd.f32 %v9721_v11, %v14074_v15  ;;  %10633 = vpow2.f32 %v6419_v4  ;;  %v6311_v15 = vmul.f32 %v14173_v54, %v6201_v50  ;;  %v6216_v50 = vpop.f32.mrb[237].mxu0 }
 0x674   : > { %10635 = vpow2.f32 %v6415_v35  ;;  %v6385_v20 = vsub.f32 0.0, %v14256_v16  ;;  %v14273_v39 = vadd.f32 %v14182_v60, %v6312_v47  ;;  %v6386_v2 = vsub.f32 0.0, %v14267_v44  ;;  %v10125_v59 = vpop.f32.mrb[238].mxu0 }
 0x675   : > { %v9722_v57 = vpop.f32.mrb[200].mxu1  ;;  %10637 = vpow2.f32 %v6421_v52  ;;  %v10628_v1 = vpop.eup %10627  ;;  %v14262_v40 = vadd.f32 %v14182_v60, %v6311_v15  ;;  %v6217_v15 = vadd.f32 %v6216_v50, %v14149_v21  ;;  %v6228_v62 = vadd.f32 %v10125_v59, %v14177_v17 }
 0x676   : > { %v9723_v0 = vpop.f32.mrb[201].mxu1  ;;  %10639 = vpow2.f32 %v6417_v41  ;;  %v10630_v23 = vpop.eup %10629  ;;  %v6471_v7 = vadd.f32 1.0, %v10628_v1  ;;  %v6427_v35 = vmul.f32 1.442695, %v6385_v20  ;;  %v6429_v41 = vmul.f32 1.442695, %v6386_v2 }
 0x677   : > { %v14258_v18 = vadd.f32 %v9723_v0, %v9722_v57  ;;  %v9725_v14 = vpop.f32.mrb[202].mxu1  ;;  %v10632_v5 = vpop.eup %10631  ;;  %10641 = vrcp.f32 %v6473_v6  ;;  %v6474_v12 = vadd.f32 1.0, %v10630_v23  ;;  %v6383_v4 = vsub.f32 0.0, %v14262_v40 }
 0x678   : > { %v9726_v10 = vpop.f32.mrb[203].mxu1  ;;  %10643 = vrcp.f32 %v6471_v7  ;;  %v6472_v63 = vadd.f32 1.0, %v10632_v5  ;;  %v6384_v57 = vsub.f32 0.0, %v14273_v39  ;;  %v6219_v13 = vpop.f32.mrb[239].mxu0  ;;  %v6317_v19 = vmul.f32 %v14173_v54, %v6225_v61 }
 0x679   : > { %v14269_v11 = vadd.f32 %v9726_v10, %v9725_v14  ;;  %10645 = vrcp.f32 %v6474_v12  ;;  %v6423_v52 = vmul.f32 1.442695, %v6383_v4  ;;  %v6220_v51 = vadd.f32 %v6219_v13, %v14155_v55 }
 0x67a   : > { %10647 = vrcp.f32 %v6472_v63  ;;  %v6425_v14 = vmul.f32 1.442695, %v6384_v57  ;;  %v6315_v47 = vmul.f32 %v14173_v54, %v6217_v15  ;;  %v6318_v21 = vmul.f32 %v14173_v54, %v6228_v62 }
 0x67b   : > { %10649 = vpow2.f32 %v6427_v35  ;;  %v14293_v20 = vadd.f32 %v14182_v60, %v6317_v19  ;;  %v6316_v12 = vmul.f32 %v14173_v54, %v6220_v51 }
 0x67c   : > { %10651 = vpow2.f32 %v6423_v52  ;;  %v14297_v34 = vadd.f32 %v14182_v60, %v6315_v47  ;;  %v14300_v63 = vadd.f32 %v14182_v60, %v6318_v21  ;;  %v10128_v52 = vpop.f32.mrb[240].mxu0 }
 0x67d   : > { %v9728_v0 = vpop.f32.mrb[204].mxu1  ;;  %v10634_v6 = vpop.eup %10633  ;;  %10653 = vpow2.f32 %v6429_v41  ;;  %v6389_v50 = vsub.f32 0.0, %v14293_v20  ;;  %v14308_v15 = vadd.f32 %v14182_v60, %v6316_v12  ;;  %v6241_v62 = vadd.f32 %v10128_v52, %v14238_v28 }
 0x67e   : > { %v9729_v1 = vpop.f32.mrb[205].mxu1  ;;  %v10636_v17 = vpop.eup %10635  ;;  %v6477_v7 = vadd.f32 1.0, %v10634_v6  ;;  %10655 = vpow2.f32 %v6425_v14  ;;  %v6387_v61 = vsub.f32 0.0, %v14297_v34  ;;  %v6390_v59 = vsub.f32 0.0, %v14300_v63 }
 0x67f   : > { %v14288_v10 = vadd.f32 %v9729_v1, %v9728_v0  ;;  %v9731_v23 = vpop.f32.mrb[206].mxu1  ;;  %v10638_v55 = vpop.eup %10637  ;;  %v6475_v4 = vadd.f32 1.0, %v10636_v17  ;;  %v6435_v0 = vmul.f32 1.442695, %v6389_v50  ;;  %v6388_v17 = vsub.f32 0.0, %v14308_v15 }
 0x680   : > { %v9732_v5 = vpop.f32.mrb[207].mxu1  ;;  %v10640_v35 = vpop.eup %10639  ;;  %10657 = vrcp.f32 %v6477_v7  ;;  %v6478_v2 = vadd.f32 1.0, %v10638_v55  ;;  %v6431_v1 = vmul.f32 1.442695, %v6387_v61  ;;  %v6437_v51 = vmul.f32 1.442695, %v6390_v59 }
 0x681   : > { %v14303_v42 = vadd.f32 %v9732_v5, %v9731_v23  ;;  %10659 = vrcp.f32 %v6475_v4  ;;  %v6476_v57 = vadd.f32 1.0, %v10640_v35  ;;  %v6232_v22 = vpop.f32.mrb[241].mxu0  ;;  %v10642_v41 = vpop.eup %10641  ;;  %v6321_v7 = vmul.f32 %v14173_v54, %v6241_v62 }
 0x682   : > { %10661 = vrcp.f32 %v6478_v2  ;;  %v10129_v13 = vpop.f32.mrb[242].mxu0  ;;  %v10644_v14 = vpop.eup %10643  ;;  %v6569_v19 = vmul.f32 %v10642_v41, %v14190_v26  ;;  %v6233_v55 = vadd.f32 %v6232_v22, %v14202_v32  ;;  %v6433_v2 = vmul.f32 1.442695, %v6388_v17 }
 0x683   : > { %10663 = vrcp.f32 %v6476_v57  ;;  %v6235_v47 = vpop.f32.mrb[243].mxu0  ;;  %v10646_v23 = vpop.eup %10645  ;;  %v6567_v21 = vmul.f32 %v10644_v14, %v14194_v53  ;;  %v14323_v50 = vadd.f32 %v14182_v60, %v6321_v7  ;;  %v6244_v32 = vadd.f32 %v10129_v13, %v14247_v37 }
 0x684   : > { %10665 = vpow2.f32 %v6435_v0  ;;  %v10648_v12 = vpop.eup %10647  ;;  %6601 = vst.msk [vmem:[#allocation3 + $0x31] sm:$0xff] %vm251_vm0, %v6569_v19  ;;  %v6570_v28 = vmul.f32 %v10646_v23, %v14199_v33  ;;  %v6319_v61 = vmul.f32 %v14173_v54, %v6233_v55  ;;  %v6236_v0 = vadd.f32 %v6235_v47, %v14211_v8  ;;  %v10132_v62 = vpop.f32.mrb[244].mxu0 }
 0x685   : > { %v9734_v6 = vpop.f32.mrb[208].mxu1  ;;  %10667 = vpow2.f32 %v6431_v1  ;;  %v10650_v35 = vpop.eup %10649  ;;  %6599 = vst.msk [vmem:[#allocation3 + $0x19] sm:$0xff] %vm251_vm0, %v6567_v21  ;;  %v6568_v53 = vmul.f32 %v10648_v12, %v14206_v3  ;;  %v6393_v41 = vsub.f32 0.0, %v14323_v50  ;;  %v6322_v37 = vmul.f32 %v14173_v54, %v6244_v32 }
 0x686   : > { %v9735_v5 = vpop.f32.mrb[209].mxu1  ;;  %10669 = vpow2.f32 %v6437_v51  ;;  %v10652_v57 = vpop.eup %10651  ;;  %6602 = vst.msk [vmem:[#allocation3 + $0x39] sm:$0xff] %vm251_vm0, %v6570_v28  ;;  %v6481_v33 = vadd.f32 1.0, %v10650_v35  ;;  %v14334_v1 = vadd.f32 %v14182_v60, %v6319_v61  ;;  %v10347_v51 = vld [vmem:[%s15405_s4 + $0x78] sm:$0xff]   ;;  %v6320_v21 = vmul.f32 %v14173_v54, %v6236_v0 }
 0x687   : > { %v14317_v26 = vadd.f32 %v9735_v5, %v9734_v6  ;;  %v9737_v4 = vpop.f32.mrb[210].mxu1  ;;  %v10654_v22 = vpop.eup %10653  ;;  %6600 = vst.msk [vmem:[#allocation3 + $0x21] sm:$0xff] %vm251_vm0, %v6568_v53  ;;  %v6479_v3 = vadd.f32 1.0, %v10652_v57  ;;  %10671 = vpow2.f32 %v6433_v2  ;;  %v10348_v6 = vld [vmem:[%s15405_s4 + $0x38] sm:$0xff]   ;;  %v6443_v47 = vmul.f32 1.442695, %v6393_v41  ;;  %9792 = vmatprep.subr.bf16.mxu1 %v10347_v51 }
 0x688   : > { %v9738_v52 = vpop.f32.mrb[211].mxu1  ;;  %v10656_v14 = vpop.eup %10655  ;;  %10673 = vrcp.f32 %v6481_v33  ;;  %v6482_v19 = vadd.f32 1.0, %v10654_v22  ;;  %v6391_v12 = vsub.f32 0.0, %v14334_v1  ;;  %v14347_v28 = vadd.f32 %v14182_v60, %v6322_v37  ;;  %9793 = vmatpush3.bf16.msra.mxu1 %v10348_v6 }
 0x689   : > { %v14328_v59 = vadd.f32 %v9738_v52, %v9737_v4  ;;  %v6248_v13 = vpop.f32.mrb[245].mxu0  ;;  %10675 = vrcp.f32 %v6479_v3  ;;  %v6480_v8 = vadd.f32 1.0, %v10656_v14  ;;  %v14353_v2 = vadd.f32 %v14182_v60, %v6320_v21 }
 0x68a   : > { %v10658_v23 = vpop.eup %10657  ;;  %v10133_v17 = vpop.f32.mrb[246].mxu0  ;;  %10677 = vrcp.f32 %v6482_v19  ;;  %v6439_v61 = vmul.f32 1.442695, %v6391_v12  ;;  %v6394_v32 = vsub.f32 0.0, %v14347_v28  ;;  %v6088_v37 = vadd.f32 %v14258_v18, %v14082_v46 }
 0x68b   : > { %v10660_v7 = vpop.eup %10659  ;;  %v6573_v5 = vmul.f32 %v10658_v23, %v14226_v29  ;;  %v14349_v4 = vpop.f32.mrb[247].mxu0  ;;  %10679 = vrcp.f32 %v6480_v8  ;;  %v6096_v29 = vadd.f32 %v14288_v10, %v14099_v49  ;;  %v6392_v41 = vsub.f32 0.0, %v14353_v2 }
 0x68c   : > { %v10662_v35 = vpop.eup %10661  ;;  %v6571_v53 = vmul.f32 %v10660_v7, %v14230_v56  ;;  %10681 = vpow2.f32 %v6443_v47  ;;  %v10136_v8 = vpop.f32.mrb[248].mxu0  ;;  %v6249_v21 = vadd.f32 %v6248_v13, %v6088_v37 }
 0x68d   : > { %v9740_v55 = vpop.f32.mrb[212].mxu1  ;;  %v10664_v57 = vpop.eup %10663  ;;  %6605 = vst.msk [vmem:[#allocation3 + $0x61] sm:$0xff] %vm251_vm0, %v6573_v5  ;;  %v6574_v33 = vmul.f32 %v10662_v35, %v14235_v38  ;;  %v6257_v49 = vadd.f32 %v10132_v62, %v6096_v29  ;;  %10683 = vpow2.f32 %v6439_v61  ;;  %v6445_v38 = vmul.f32 1.442695, %v6394_v32 }
 0x68e   : > { %v9741_v52 = vpop.f32.mrb[213].mxu1  ;;  %v10666_v56 = vpop.eup %10665  ;;  %6603 = vst.msk [vmem:[#allocation3 + $0x49] sm:$0xff] %vm251_vm0, %v6571_v53  ;;  %v6572_v3 = vmul.f32 %v10664_v57, %v14242_v9  ;;  %v6441_v23 = vmul.f32 1.442695, %v6392_v41  ;;  %v6099_v62 = vadd.f32 %v14303_v42, %v14101_v48  ;;  %v6323_v42 = vmul.f32 %v14173_v54, %v6249_v21 }
 0x68f   : > { %v9743_v22 = vpop.f32.mrb[214].mxu1  ;;  %v9742_v10 = vadd.f32 %v9741_v52, %v9740_v55  ;;  %v10668_v14 = vpop.eup %10667  ;;  %6606 = vst.msk [vmem:[#allocation3 + $0x69] sm:$0xff] %vm251_vm0, %v6574_v33  ;;  %v6485_v19 = vadd.f32 1.0, %v10666_v56  ;;  %v6325_v9 = vmul.f32 %v14173_v54, %v6257_v49  ;;  %v6091_v55 = vadd.f32 %v14269_v11, %v14084_v27 }
 0x690   : > { %v9744_v0 = vpop.f32.mrb[215].mxu1  ;;  %v10670_v51 = vpop.eup %10669  ;;  %6604 = vst.msk [vmem:[#allocation3 + $0x51] sm:$0xff] %vm251_vm0, %v6572_v3  ;;  %v6483_v6 = vadd.f32 1.0, %v10668_v14  ;;  %v6260_v18 = vadd.f32 %v10133_v17, %v6099_v62 }
 0x691   : > { %10685 = vrcp.f32 %v6485_v19  ;;  %v6486_v47 = vadd.f32 1.0, %v10670_v51  ;;  %v9745_v7 = vadd.f32 %v9744_v0, %v9743_v22  ;;  %v14370_v5 = vpop.f32.mrb[249].mxu0  ;;  %v10672_v12 = vpop.eup %10671  ;;  %v14373_v46 = vadd.f32 %v14182_v60, %v6325_v9 }
 0x692   : > { %10687 = vrcp.f32 %v6483_v6  ;;  %v14377_v35 = vpop.f32.mrb[250].mxu0  ;;  %v10674_v53 = vpop.eup %10673  ;;  %v6484_v48 = vadd.f32 1.0, %v10672_v12  ;;  %v6112_v29 = vadd.f32 %v9742_v10, %v14119_v30  ;;  %v6326_v27 = vmul.f32 %v14173_v54, %v6260_v18  ;;  %v10349_v6 = vld [vmem:[%s15405_s4 + $0xc0] sm:$0xff]  }
 0x693   : > { %10689 = vrcp.f32 %v6486_v47  ;;  %v14381_v52 = vpop.f32.mrb[251].mxu0  ;;  %v10676_v57 = vpop.eup %10675  ;;  %v6577_v33 = vmul.f32 %v10674_v53, %v14256_v16  ;;  %v6397_v17 = vsub.f32 0.0, %v14373_v46  ;;  %v14388_v22 = vadd.f32 %v14182_v60, %v6323_v42  ;;  %v6888_v47 = vld [vmem:[#allocation3 + $0x20] sm:$0xff]  ;;  %v10350_v12 = vld [vmem:[%s15405_s4 + $0x80] sm:$0xff]   ;;  %9890 = vmatprep.subr.bf16.mxu0 %v10349_v6 }
 0x694   : > { %10691 = vpow2.f32 %v6445_v38  ;;  %v10678_v61 = vpop.eup %10677  ;;  %v6575_v32 = vmul.f32 %v10676_v57, %v14262_v40  ;;  %v6252_v30 = vadd.f32 %v14349_v4, %v6091_v55  ;;  %v14396_v49 = vadd.f32 %v14182_v60, %v6326_v27  ;;  %v14408_v51 = vpop.f32.mrb[252].mxu0  ;;  %v6698_v57 = vld [vmem:[#allocation3 + $0x21] sm:$0xff]  ;;  %9891 = vmatpush3.bf16.msra.mxu0 %v10350_v12 }
 0x695   : > { %v9746_v13 = vpop.f32.mrb[216].mxu1  ;;  %10693 = vrcp.f32 %v6484_v48  ;;  %v10680_v3 = vpop.eup %10679  ;;  %6609 = vst.msk [vmem:[#allocation3 + $0x91] sm:$0xff] %vm251_vm0, %v6577_v33  ;;  %v6578_v16 = vmul.f32 %v10678_v61, %v14267_v44  ;;  %v6451_v41 = vmul.f32 1.442695, %v6397_v17  ;;  %v6395_v4 = vsub.f32 0.0, %v14388_v22 }
 0x696   : > { %v9747_v11 = vpop.f32.mrb[217].mxu1  ;;  %10695 = vpow2.f32 %v6441_v23  ;;  %v10682_v40 = vpop.eup %10681  ;;  %6607 = vst.msk [vmem:[#allocation3 + $0x79] sm:$0xff] %vm251_vm0, %v6575_v32  ;;  %v6576_v0 = vmul.f32 %v10680_v3, %v14273_v39  ;;  %v6324_v14 = vmul.f32 %v14173_v54, %v6252_v30  ;;  %v6273_v19 = vadd.f32 %v10136_v8, %v6112_v29  ;;  %v6887_v29 = vld [vmem:[#allocation3 + $0x18] sm:$0xff] }
 0x697   : > { %v14391_v56 = vpop.f32.mrb[218].mxu1  ;;  %6610 = vst.msk [vmem:[#allocation3 + $0x99] sm:$0xff] %vm251_vm0, %v6578_v16  ;;  %v6489_v44 = vadd.f32 1.0, %v10682_v40  ;;  %10697 = vpow2.f32 %v6451_v41  ;;  %v6398_v38 = vsub.f32 0.0, %v14396_v49  ;;  %v14406_v37 = vadd.f32 %v9747_v11, %v9746_v13  ;;  %v10684_v39 = vpop.eup %10683  ;;  %v6697_v41 = vld [vmem:[#allocation3 + $0x19] sm:$0xff] }
 0x698   : > { %v14398_v10 = vpop.f32.mrb[219].mxu1  ;;  %6608 = vst.msk [vmem:[#allocation3 + $0x81] sm:$0xff] %vm251_vm0, %v6576_v0  ;;  %v6447_v23 = vmul.f32 1.442695, %v6395_v4  ;;  %v14415_v9 = vadd.f32 %v14182_v60, %v6324_v14  ;;  %v6329_v62 = vmul.f32 %v14173_v54, %v6273_v19  ;;  %v6104_v8 = vadd.f32 %v14317_v26, %v14109_v45  ;;  %v14420_v21 = vpop.f32.mrb[253].mxu0  ;;  %v6890_v14 = vld [vmem:[#allocation3 + $0x38] sm:$0xff] }
 0x699   : > { %10699 = vrcp.f32 %v6489_v44  ;;  %v6487_v18 = vadd.f32 1.0, %v10684_v39  ;;  %v6453_v55 = vmul.f32 1.442695, %v6398_v38  ;;  %v6115_v53 = vadd.f32 %v9745_v7, %v14121_v25  ;;  %v14426_v48 = vpop.f32.mrb[254].mxu0  ;;  %v10351_v25 = vld [vmem:[%s15405_s4 + $0x100] sm:$0xff]   ;;  %v6700_v19 = vld [vmem:[#allocation3 + $0x39] sm:$0xff] }
 0x69a   : > { %10701 = vpow2.f32 %v6447_v23  ;;  %v6396_v13 = vsub.f32 0.0, %v14415_v9  ;;  %v14430_v45 = vadd.f32 %v14182_v60, %v6329_v62  ;;  %v6265_v26 = vadd.f32 %v14370_v5, %v6104_v8  ;;  %v14433_v17 = vpop.f32.mrb[255].mxu0  ;;  %10142 = vmatprep.subr.bf16.mxu1 %v10351_v25 }
 0x69b   : > { %v10686_v42 = vpop.eup %10685  ;;  %10703 = vrcp.f32 %v6487_v18  ;;  %v6276_v11 = vadd.f32 %v14377_v35, %v6115_v53  ;;  %v6919_v61 = vpack.c.bf16 %v6888_v47, %v6887_v29  ;;  %v6107_v12 = vadd.f32 %v14328_v59, %v14111_v43  ;;  %v6889_v18 = vld [vmem:[#allocation3 + $0x30] sm:$0xff]  ;;  %v10353_v29 = vld [vmem:[%s15405_s4 + $0x88] sm:$0xff]  }
 0x69c   : > { %v10688_v7 = vpop.eup %10687  ;;  %v6581_v27 = vmul.f32 %v10686_v42, %v14293_v20  ;;  %10705 = vpow2.f32 %v6453_v55  ;;  %v6449_v3 = vmul.f32 1.442695, %v6396_v13  ;;  %v6401_v16 = vsub.f32 0.0, %v14430_v45  ;;  %v6699_v55 = vld [vmem:[#allocation3 + $0x31] sm:$0xff] }
 0x69d   : > { %v9752_v33 = vpop.f32.mrb[220].mxu1  ;;  %v10690_v30 = vpop.eup %10689  ;;  %v6579_v5 = vmul.f32 %v10688_v7, %v14297_v34  ;;  %v6327_v35 = vmul.f32 %v14173_v54, %v6265_v26  ;;  %v6330_v4 = vmul.f32 %v14173_v54, %v6276_v11  ;;  %6951 = vrot.lane.b32.xlu0 %v6919_v61, %s10949_s9  ;;  %v6728_v34 = vpack.c.bf16 %v6698_v57, %v6697_v41  ;;  %v6892_v42 = vld [vmem:[#allocation3 + $0x50] sm:$0xff] }
 0x69e   : > { %v9753_v32 = vpop.f32.mrb[221].mxu1  ;;  %v10692_v0 = vpop.eup %10691  ;;  %6613 = vst.msk [vmem:[#allocation3 + $0xc1] sm:$0xff] %vm251_vm0, %v6581_v27  ;;  %v6582_v20 = vmul.f32 %v10690_v30, %v14300_v63  ;;  %6680 = vst.msk [vmem:[#allocation4 + $0x28] sm:$0xff] %vm251_vm0, %v6919_v61  ;;  %10707 = vpow2.f32 %v6449_v3  ;;  %v6459_v39 = vmul.f32 1.442695, %v6401_v16  ;;  %v14455_v63 = vadd.f32 %v14398_v10, %v14391_v56  ;;  %v6891_v27 = vld [vmem:[#allocation3 + $0x48] sm:$0xff] }
 0x69f   : > { %v14442_v40 = vpop.f32.mrb[222].mxu1  ;;  %v10694_v38 = vpop.eup %10693  ;;  %6611 = vst.msk [vmem:[#allocation3 + $0xa9] sm:$0xff] %vm251_vm0, %v6579_v5  ;;  %v6490_v6 = vadd.f32 1.0, %v10692_v0  ;;  %v14460_v8 = vadd.f32 %v14182_v60, %v6327_v35  ;;  %v14463_v47 = vadd.f32 %v14182_v60, %v6330_v4  ;;  %6761 = vrot.lane.b32.xlu1 %v6728_v34, %s10949_s9  ;;  %v6920_v10 = vpack.c.bf16 %v6890_v14, %v6889_v18  ;;  %v6702_v11 = vld [vmem:[#allocation3 + $0x51] sm:$0xff]  ;;  %v6701_v0 = vld [vmem:[#allocation3 + $0x49] sm:$0xff] }
 0x6a0   : > { %v14449_v44 = vpop.f32.mrb[223].mxu1  ;;  %v10696_v23 = vpop.eup %10695  ;;  %6614 = vst.msk [vmem:[#allocation3 + $0xc9] sm:$0xff] %vm251_vm0, %v6582_v20  ;;  %v6580_v62 = vmul.f32 %v10694_v38, %v14308_v15  ;;  %v14468_v53 = vpack.c.bf16 %v6700_v19, %v6699_v55  ;;  %v10352_v15 = vld [vmem:[%s15405_s4 + $0xc8] sm:$0xff]   ;;  %v6268_v59 = vadd.f32 %v14381_v52, %v6107_v12  ;;  %v9754_v25 = vadd.f32 %v9753_v32, %v9752_v33  ;;  %v10354_v33 = vld [vmem:[%s15405_s4 + $0xd0] sm:$0xff]   ;;  %v6894_v14 = vld [vmem:[#allocation3 + $0x68] sm:$0xff] }
 0x6a1   : > { %10709 = vrcp.f32 %v6490_v6  ;;  %v6488_v56 = vadd.f32 1.0, %v10696_v23  ;;  %v10698_v13 = vpop.eup %10697  ;;  %v6399_v26 = vsub.f32 0.0, %v14460_v8  ;;  %v6402_v43 = vsub.f32 0.0, %v14463_v47  ;;  %6953 = vrot.lane.b32.xlu0 %v6920_v10, %s10949_s9  ;;  %6681 = vst.msk [vmem:[#allocation4 + $0x50] sm:$0xff] %vm251_vm0, %v6920_v10  ;;  %9892 = vmatprep.subr.bf16.mxu0 %v10352_v15  ;;  %v6893_v38 = vld [vmem:[#allocation3 + $0x60] sm:$0xff] }
 0x6a2   : > { %6612 = vst.msk [vmem:[#allocation3 + $0xb1] sm:$0xff] %vm251_vm0, %v6580_v62  ;;  %10711 = vpow2.f32 %v6459_v39  ;;  %v6493_v57 = vadd.f32 1.0, %v10698_v13  ;;  %v6120_v7 = vadd.f32 %v14406_v37, %v14138_v24  ;;  %v6328_v5 = vmul.f32 %v14173_v54, %v6268_v59  ;;  %9893 = vmatpush3.bf16.msra.mxu0 %v10353_v29  ;;  %v10355_v24 = vld [vmem:[%s15405_s4 + $0x90] sm:$0xff]   ;;  %v6704_v62 = vld [vmem:[#allocation3 + $0x69] sm:$0xff] }
 0x6a3   : > { %10713 = vrcp.f32 %v6488_v56  ;;  %v10700_v61 = vpop.eup %10699  ;;  %v6455_v30 = vmul.f32 1.442695, %v6399_v26  ;;  %v6461_v52 = vmul.f32 1.442695, %v6402_v43  ;;  %6763 = vrot.lane.b32.xlu1 %v14468_v53, %s10949_s9  ;;  %v6921_v3 = vpack.c.bf16 %v6892_v42, %v6891_v27  ;;  %9894 = vmatprep.subr.bf16.mxu0 %v10354_v33  ;;  %v6896_v56 = vld [vmem:[#allocation3 + $0x80] sm:$0xff] }
 0x6a4   : > { %v10702_v37 = vpop.eup %10701  ;;  %v6585_v32 = vmul.f32 %v10700_v61, %v14323_v50  ;;  %10715 = vrcp.f32 %v6493_v57  ;;  %v6128_v16 = vadd.f32 %v9754_v25, %v14160_v58  ;;  %v6281_v41 = vadd.f32 %v14420_v21, %v6120_v7  ;;  %v6703_v13 = vld [vmem:[#allocation3 + $0x61] sm:$0xff]  ;;  %v10359_v61 = vld [vmem:[%s15405_s4 + $0xa0] sm:$0xff]  }
 0x6a5   : > { %v10704_v20 = vpop.eup %10703  ;;  %v6491_v35 = vadd.f32 1.0, %v10702_v37  ;;  %10717 = vpow2.f32 %v6455_v30  ;;  %v14497_v4 = vadd.f32 %v14182_v60, %v6328_v5  ;;  %v14499_v34 = vpack.c.bf16 %v6702_v11, %v6701_v0  ;;  %6682 = vst.msk [vmem:[#allocation4 + $0x78] sm:$0xff] %vm251_vm0, %v6921_v3  ;;  %6955 = vrot.lane.b32.xlu0 %v6921_v3, %s10949_s9  ;;  %v6706_v57 = vld [vmem:[#allocation3 + $0x81] sm:$0xff]  ;;  %v6898_v11 = vld [vmem:[#allocation3 + $0x98] sm:$0xff] }
 0x6a6   : > { %v10706_v19 = vpop.eup %10705  ;;  %6617 = vst.msk [vmem:[#allocation3 + $0xf1] sm:$0xff] %vm251_vm0, %v6585_v32  ;;  %v6583_v58 = vmul.f32 %v10704_v20, %v14334_v1  ;;  %10719 = vpow2.f32 %v6461_v52  ;;  %v6289_v50 = vadd.f32 %v14408_v51, %v6128_v16  ;;  %v6331_v21 = vmul.f32 %v14173_v54, %v6281_v41  ;;  %9895 = vmatpush3.bf16.msra.mxu0 %v10355_v24  ;;  %v10356_v1 = vld [vmem:[%s15405_s4 + $0xd8] sm:$0xff]   ;;  %v6897_v32 = vld [vmem:[#allocation3 + $0x90] sm:$0xff]  ;;  %v6708_v16 = vld [vmem:[#allocation3 + $0x99] sm:$0xff] }
 0x6a7   : > { %10721 = vrcp.f32 %v6491_v35  ;;  %v6494_v6 = vadd.f32 1.0, %v10706_v19  ;;  %v6400_v39 = vsub.f32 0.0, %v14497_v4  ;;  %6765 = vrot.lane.b32.xlu1 %v14499_v34, %s10949_s9  ;;  %v9757_v23 = vadd.f32 %v14449_v44, %v14442_v40  ;;  %v10357_v51 = vld [vmem:[%s15405_s4 + $0x98] sm:$0xff]   ;;  %9896 = vmatprep.subr.bf16.mxu0 %v10356_v1  ;;  %v7079_v0 = vld [vmem:[#allocation3 + $0x1a] sm:$0xff]  ;;  %v6707_v19 = vld [vmem:[#allocation3 + $0x91] sm:$0xff] }
 0x6a8   : > { %v10708_v12 = vpop.eup %10707  ;;  %6615 = vst.msk [vmem:[#allocation3 + $0xd9] sm:$0xff] %vm251_vm0, %v6583_v58  ;;  %v6333_v18 = vmul.f32 %v14173_v54, %v6289_v50  ;;  %v14521_v55 = vadd.f32 %v14182_v60, %v6331_v21  ;;  %v6123_v40 = vadd.f32 %v14455_v63, %v14140_v36  ;;  %v6922_v44 = vpack.c.bf16 %v6894_v14, %v6893_v38  ;;  %v6895_v63 = vld [vmem:[#allocation3 + $0x78] sm:$0xff]  ;;  %v7080_v20 = vld [vmem:[#allocation3 + $0x22] sm:$0xff]  ;;  %v7083_v1 = vld [vmem:[#allocation3 + $0x4a] sm:$0xff] }
 0x6a9   : > { %10723 = vrcp.f32 %v6494_v6  ;;  %v6492_v10 = vadd.f32 1.0, %v10708_v12  ;;  %v6457_v42 = vmul.f32 1.442695, %v6400_v39  ;;  %v6131_v15 = vadd.f32 %v9757_v23, %v14162_v31  ;;  %v6900_v41 = vld [vmem:[#allocation3 + $0xb0] sm:$0xff]  ;;  %v6902_v58 = vld [vmem:[#allocation3 + $0xc8] sm:$0xff] }
 0x6aa   : > { %v14527_v43 = vadd.f32 %v14182_v60, %v6333_v18  ;;  %v6403_v59 = vsub.f32 0.0, %v14521_v55  ;;  %v6284_v29 = vadd.f32 %v14433_v17, %v6123_v40  ;;  %6957 = vrot.lane.b32.xlu0 %v6922_v44, %s10949_s9  ;;  %v14532_v36 = vpack.c.bf16 %v6704_v62, %v6703_v13  ;;  %6683 = vst.msk [vmem:[#allocation4 + $0xa0] sm:$0xff] %vm251_vm0, %v6922_v44  ;;  %v10358_v17 = vld [vmem:[%s15405_s4 + $0xe0] sm:$0xff]   ;;  %v6899_v23 = vld [vmem:[#allocation3 + $0xa8] sm:$0xff]  ;;  %v7087_v40 = vld [vmem:[#allocation3 + $0x7a] sm:$0xff] }
 0x6ab   : > { %v10710_v26 = vpop.eup %10709  ;;  %10725 = vrcp.f32 %v6492_v10  ;;  %v6292_v7 = vadd.f32 %v14426_v48, %v6131_v15  ;;  %v6923_v27 = vpack.c.bf16 %v6896_v56, %v6895_v63  ;;  %9897 = vmatpush3.bf16.msra.mxu0 %v10357_v51  ;;  %v6705_v48 = vld [vmem:[#allocation3 + $0x79] sm:$0xff]  ;;  %v6710_v62 = vld [vmem:[#allocation3 + $0xb1] sm:$0xff]  ;;  %v7085_v12 = vld [vmem:[#allocation3 + $0x62] sm:$0xff]  ;;  %v14569_v10 = vpack.c.bf16 %v6900_v41, %v6899_v23 }
 0x6ac   : > { %v10712_v25 = vpop.eup %10711  ;;  %v6586_v31 = vmul.f32 %v10710_v26, %v14347_v28  ;;  %10727 = vpow2.f32 %v6457_v42  ;;  %v6405_v5 = vsub.f32 0.0, %v14527_v43  ;;  %v6463_v28 = vmul.f32 1.442695, %v6403_v59  ;;  %6767 = vrot.lane.b32.xlu1 %v14532_v36, %s10949_s9  ;;  %9898 = vmatprep.subr.bf16.mxu0 %v10358_v17  ;;  %v7081_v50 = vld [vmem:[#allocation3 + $0x32] sm:$0xff]  ;;  %v7086_v18 = vld [vmem:[#allocation3 + $0x6a] sm:$0xff]  ;;  %v6901_v42 = vld [vmem:[#allocation3 + $0xc0] sm:$0xff] }
 0x6ad   : > { %v10714_v30 = vpop.eup %10713  ;;  %v6497_v52 = vadd.f32 1.0, %v10712_v25  ;;  %v6334_v33 = vmul.f32 %v14173_v54, %v6292_v7  ;;  %v6332_v24 = vmul.f32 %v14173_v54, %v6284_v29  ;;  %v14550_v37 = vpack.c.bf16 %v6706_v57, %v6705_v48  ;;  %6684 = vst.msk [vmem:[#allocation4 + $0xc8] sm:$0xff] %vm251_vm0, %v6923_v27  ;;  %v7082_v54 = vld [vmem:[#allocation3 + $0x3a] sm:$0xff]  ;;  %v7084_v51 = vld [vmem:[#allocation3 + $0x52] sm:$0xff]  ;;  %v7088_v15 = vld [vmem:[#allocation3 + $0x82] sm:$0xff] }
 0x6ae   : > { %6618 = vst.msk [vmem:[#allocation3 + $0xf9] sm:$0xff] %vm251_vm0, %v6586_v31  ;;  %v6584_v3 = vmul.f32 %v10714_v30, %v14353_v2  ;;  %v10716_v35 = vpop.eup %10715  ;;  %v6467_v14 = vmul.f32 1.442695, %v6405_v5  ;;  %6959 = vrot.lane.b32.xlu0 %v6923_v27, %s10949_s9  ;;  %v6924_v2 = vpack.c.bf16 %v6898_v11, %v6897_v32  ;;  %v10360_v44 = vld [vmem:[%s15405_s4 + $0xe8] sm:$0xff]   ;;  %v6709_v25 = vld [vmem:[#allocation3 + $0xa9] sm:$0xff]  ;;  %v14578_v31 = vpack.c.bf16 %v6902_v58, %v6901_v42  ;;  %v14598_v41 = vld [vmem:[#allocation3 + $0x21] sm:$0xff] }
 0x6af   : > { %10729 = vrcp.f32 %v6497_v52  ;;  %v10718_v21 = vpop.eup %10717  ;;  %v6589_v38 = vmul.f32 %v10716_v35, %v14373_v46  ;;  %v14557_v6 = vadd.f32 %v14182_v60, %v6334_v33  ;;  %v14560_v39 = vadd.f32 %v14182_v60, %v6332_v24  ;;  %9899 = vmatpush3.bf16.msra.mxu0 %v10359_v61  ;;  %v7089_v13 = vld [vmem:[#allocation3 + $0x92] sm:$0xff]  ;;  %v7090_v7 = vld [vmem:[#allocation3 + $0x9a] sm:$0xff]  ;;  %v7093_v27 = vld [vmem:[#allocation3 + $0xc2] sm:$0xff]  ;;  %6686 = vst.msk [vmem:[#allocation4 + $0x118] sm:$0xff] %vm251_vm0, %v14569_v10 }
 0x6b0   : > { %6616 = vst.msk [vmem:[#allocation3 + $0xe1] sm:$0xff] %vm251_vm0, %v6584_v3  ;;  %10731 = vpow2.f32 %v6463_v28  ;;  %v10720_v46 = vpop.eup %10719  ;;  %v6495_v56 = vadd.f32 1.0, %v10718_v21  ;;  %6769 = vrot.lane.b32.xlu1 %v14550_v37, %s10949_s9  ;;  %v14567_v60 = vpack.c.bf16 %v6708_v16, %v6707_v19  ;;  %6685 = vst.msk [vmem:[#allocation4 + $0xf0] sm:$0xff] %vm251_vm0, %v6924_v2  ;;  %v10361_v26 = vld [vmem:[%s15405_s4 + $0xa8] sm:$0xff]   ;;  %9900 = vmatprep.subr.bf16.mxu0 %v10360_v44  ;;  %v7091_v30 = vld [vmem:[#allocation3 + $0xaa] sm:$0xff] }
 0x6b1   : > { %10733 = vpow2.f32 %v6467_v14  ;;  %v10722_v59 = vpop.eup %10721  ;;  %6621 = vst.msk [vmem:[#allocation3 + $0x121] sm:$0xff] %vm251_vm0, %v6589_v38  ;;  %v6498_v29 = vadd.f32 1.0, %v10720_v46  ;;  %v6406_v63 = vsub.f32 0.0, %v14557_v6  ;;  %v6404_v57 = vsub.f32 0.0, %v14560_v39  ;;  %v7092_v52 = vld [vmem:[#allocation3 + $0xb2] sm:$0xff]  ;;  %v7094_v5 = vld [vmem:[#allocation3 + $0xca] sm:$0xff] }
 0x6b2   : > { %v6587_v11 = vmul.f32 %v10722_v59, %v14388_v22  ;;  %10735 = vrcp.f32 %v6495_v56  ;;  %6961 = vrot.lane.b32.xlu0 %v6924_v2, %s10949_s9  ;;  %v14582_v17 = vpack.c.bf16 %v6710_v62, %v6709_v25  ;;  %v14584_v61 = vpack.c.bf16 %v7080_v20, %v7079_v0  ;;  %v14590_v22 = vld [vmem:[#allocation3] sm:$0xff]  ;;  %v14592_v24 = vld [vmem:[#allocation3 + $0x8] sm:$0xff]  ;;  %6687 = vst.msk [vmem:[#allocation4 + $0x140] sm:$0xff] %vm251_vm0, %v14578_v31  ;;  %v6905_v14 = vld [vmem:[#allocation3 + $0xf0] sm:$0xff] }
 0x6b3   : > { %v10724_v28 = vpop.eup %10723  ;;  %10737 = vrcp.f32 %v6498_v29  ;;  %v6469_v48 = vmul.f32 1.442695, %v6406_v63  ;;  %v6465_v3 = vmul.f32 1.442695, %v6404_v57  ;;  %v14588_v33 = vpack.c.bf16 %v7082_v54, %v7081_v50  ;;  %v14594_v32 = vld [vmem:[#allocation3 + $0x2] sm:$0xff]  ;;  %v14596_v16 = vld [vmem:[#allocation3 + $0xa] sm:$0xff]  ;;  %9901 = vmatpush3.bf16.msra.mxu0 %v10361_v26 }
 0x6b4   : > { %v10362_v0 = vld [vmem:[%s15405_s4 + $0xf0] sm:$0xff]   ;;  %6619 = vst.msk [vmem:[#allocation3 + $0x109] sm:$0xff] %vm251_vm0, %v6587_v11  ;;  %v6590_v35 = vmul.f32 %v10724_v28, %v14396_v49  ;;  %6771 = vrot.lane.b32.xlu1 %v14567_v60, %s10949_s9  ;;  %v14612_v19 = vpack.c.bf16 %v7084_v51, %v7083_v1  ;;  %v14614_v58 = vpack.c.bf16 %v7086_v18, %v7085_v12  ;;  %6872 = vst.msk [vmem:[#allocation4 + $0x30] sm:$0xff] %vm251_vm0, %v14584_v61  ;;  %v14620_v21 = vld [vmem:[#allocation3 + $0x38] sm:$0xff] }
 0x6b5   : > { %v10363_v20 = vld [vmem:[%s15405_s4 + $0xb0] sm:$0xff]   ;;  %v6906_v2 = vld [vmem:[#allocation3 + $0xf8] sm:$0xff]  ;;  %v14616_v50 = vpack.c.bf16 %v7088_v15, %v7087_v40  ;;  %v10726_v49 = vpop.eup %10725  ;;  %10739 = vpow2.f32 %v6469_v48  ;;  %v14626_v62 = vpack.c.bf16 %v7090_v7, %v7089_v13  ;;  %6873 = vst.msk [vmem:[#allocation4 + $0x58] sm:$0xff] %vm251_vm0, %v14588_v33  ;;  %9902 = vmatprep.subr.bf16.mxu0 %v10362_v0  ;;  %v14632_v12 = vld [vmem:[#allocation3 + $0x50] sm:$0xff]  ;;  %v14640_v42 = vpack.c.bf16 %v7092_v52, %v7091_v30 }
 0x6b6   : > { %v7097_v54 = vld [vmem:[#allocation3 + $0xf2] sm:$0xff]  ;;  %v14624_v23 = vpack.c.bf16 %v6906_v2, %v6905_v14  ;;  %v7098_v1 = vld [vmem:[#allocation3 + $0xfa] sm:$0xff]  ;;  %v10728_v40 = vpop.eup %10727  ;;  %6622 = vst.msk [vmem:[#allocation3 + $0x129] sm:$0xff] %vm251_vm0, %v6590_v35  ;;  %v6588_v44 = vmul.f32 %v10726_v49, %v14415_v9  ;;  %10741 = vpow2.f32 %v6465_v3  ;;  %6963 = vrot.lane.b32.xlu0 %v14569_v10, %s10949_s9  ;;  %v14642_v15 = vpack.c.bf16 %v7094_v5, %v7093_v27  ;;  %v14650_v59 = vld [vmem:[#allocation3 + $0x68] sm:$0xff] }
 0x6b7   : > { %v14622_v38 = vld [vmem:[#allocation3 + $0x39] sm:$0xff]  ;;  %v14634_v18 = vld [vmem:[#allocation3 + $0x51] sm:$0xff]  ;;  %6874 = vst.msk [vmem:[#allocation4 + $0x80] sm:$0xff] %vm251_vm0, %v14612_v19  ;;  %6875 = vst.msk [vmem:[#allocation4 + $0xa8] sm:$0xff] %vm251_vm0, %v14614_v58  ;;  %v6496_v10 = vadd.f32 1.0, %v10728_v40  ;;  %v14654_v57 = vpack.c.bf16 %v7098_v1, %v7097_v54  ;;  %9903 = vmatpush3.bf16.msra.mxu0 %v10363_v20  ;;  %v6663_v5 = vpack.c.bf16 %v14592_v24, %v14590_v22  ;;  %v6760_v40 = vpop.permute.xlu1 %6759 }
 0x6b8   : > { %v14630_v51 = vld [vmem:[#allocation3 + $0x19] sm:$0xff]  ;;  %6876 = vst.msk [vmem:[#allocation4 + $0xd0] sm:$0xff] %vm251_vm0, %v14616_v50  ;;  %v7207_v9 = vld [vmem:[#allocation3 + $0x30] sm:$0xff]  ;;  %v7096_v63 = vld [vmem:[#allocation3 + $0xe2] sm:$0xff]  ;;  %6773 = vrot.lane.b32.xlu1 %v14582_v17, %s10949_s9  ;;  %v6855_v28 = vpack.c.bf16 %v14596_v16, %v14594_v32 }
 0x6b9   : > { %v6903_v46 = vld [vmem:[#allocation3 + $0xd8] sm:$0xff]  ;;  %v6904_v56 = vld [vmem:[#allocation3 + $0xe0] sm:$0xff]  ;;  %6877 = vst.msk [vmem:[#allocation4 + $0xf8] sm:$0xff] %vm251_vm0, %v14626_v62  ;;  %v10364_v25 = vld [vmem:[%s15405_s4 + $0xf8] sm:$0xff]   ;;  %v10730_v30 = vpop.eup %10729  ;;  %v7047_v48 = vpack.c.bf16 %v14598_v41, %v14630_v51  ;;  %10743 = vrcp.f32 %v6496_v10  ;;  %v7239_v14 = vpack.c.bf16 %v14620_v21, %v7207_v9 }
 0x6ba   : > { %v7095_v13 = vld [vmem:[#allocation3 + $0xda] sm:$0xff]  ;;  %v7017_v26 = vld [vmem:[#allocation3 + $0x31] sm:$0xff]  ;;  %v14652_v29 = vpack.c.bf16 %v6904_v56, %v6903_v46  ;;  %v14661_v7 = vld [vmem:[#allocation3 + $0x48] sm:$0xff]  ;;  %6689 = vst.msk [vmem:[#allocation4 + $0x190] sm:$0xff] %vm251_vm0, %v14624_v23  ;;  %v10732_v32 = vpop.eup %10731  ;;  %v6593_v16 = vmul.f32 %v10730_v30, %v14430_v45  ;;  %9904 = vmatprep.subr.bf16.mxu0 %v10364_v25  ;;  %6965 = vrot.lane.b32.xlu0 %v14578_v31, %s10949_s9 }
 0x6bb   : > { %v14663_v27 = vld [vmem:[#allocation3 + $0x49] sm:$0xff]  ;;  %6620 = vst.msk [vmem:[#allocation3 + $0x111] sm:$0xff] %vm251_vm0, %v6588_v44  ;;  %v14672_v52 = vpack.c.bf16 %v7096_v63, %v7095_v13  ;;  %6878 = vst.msk [vmem:[#allocation4 + $0x120] sm:$0xff] %vm251_vm0, %v14640_v42  ;;  %v14684_v3 = vld [vmem:[#allocation3 + $0x60] sm:$0xff]  ;;  %v7048_v2 = vpack.c.bf16 %v14622_v38, %v7017_v26  ;;  %v10734_v38 = vpop.eup %10733  ;;  %v6499_v51 = vadd.f32 1.0, %v10732_v32  ;;  %v7240_v44 = vpack.c.bf16 %v14632_v12, %v14661_v7 }
 0x6bc   : > { %v14667_v11 = vld [vmem:[#allocation3 + $0x69] sm:$0xff]  ;;  %6879 = vst.msk [vmem:[#allocation4 + $0x148] sm:$0xff] %vm251_vm0, %v14642_v15  ;;  %v14686_v0 = vld [vmem:[#allocation3 + $0x61] sm:$0xff]  ;;  %v14688_v20 = vld [vmem:[#allocation3 + $0x78] sm:$0xff]  ;;  %v7049_v46 = vpack.c.bf16 %v14634_v18, %v14663_v27  ;;  %v6501_v26 = vadd.f32 1.0, %v10734_v38  ;;  %v7241_v12 = vpack.c.bf16 %v14650_v59, %v14684_v3  ;;  %7143 = vrot.lane.b32.xlu1 %v14584_v61, %s10949_s9 }
 0x6bd   : > { %v14690_v35 = vld [vmem:[#allocation3 + $0x80] sm:$0xff]  ;;  %v14694_v24 = vld [vmem:[#allocation3 + $0x98] sm:$0xff]  ;;  %v14697_v41 = vld [vmem:[#allocation3 + $0xc9] sm:$0xff]  ;;  %6688 = vst.msk [vmem:[#allocation4 + $0x168] sm:$0xff] %vm251_vm0, %v14652_v29  ;;  %v7050_v18 = vpack.c.bf16 %v14667_v11, %v14686_v0  ;;  %10745 = vrcp.f32 %v6499_v51 }
 0x6be   : > { %v14692_v22 = vld [vmem:[#allocation3 + $0x81] sm:$0xff]  ;;  %6881 = vst.msk [vmem:[#allocation4 + $0x198] sm:$0xff] %vm251_vm0, %v14654_v57  ;;  %v14708_v49 = vld [vmem:[#allocation3 + $0x79] sm:$0xff]  ;;  %v14710_v45 = vld [vmem:[#allocation3 + $0x90] sm:$0xff]  ;;  %v7242_v63 = vpack.c.bf16 %v14690_v35, %v14688_v20  ;;  %10747 = vrcp.f32 %v6501_v26  ;;  %7335 = vrot.lane.b32.xlu0 %v14468_v53, %s10949_s9 }
 0x6bf   : > { %v10365_v54 = vld [vmem:[%s15405_s4 + $0xb8] sm:$0xff]   ;;  %v14712_v1 = vld [vmem:[#allocation3 + $0x91] sm:$0xff]  ;;  %v14714_v21 = vld [vmem:[#allocation3 + $0x99] sm:$0xff]  ;;  %6679 = vst.msk [vmem:[#allocation4] sm:$0xff] %vm251_vm0, %v6663_v5  ;;  %v10736_v5 = vpop.eup %10735  ;;  %v7051_v11 = vpack.c.bf16 %v14692_v22, %v14708_v49 }
 0x6c0   : > { %6871 = vst.msk [vmem:[#allocation4 + $0x8] sm:$0xff] %vm251_vm0, %v6855_v28  ;;  %7063 = vst.msk [vmem:[#allocation4 + $0x10] sm:$0xff] %vm251_vm0, %v7047_v48  ;;  %v14727_v56 = vld [vmem:[#allocation3 + $0xa8] sm:$0xff]  ;;  %v14729_v13 = vld [vmem:[#allocation3 + $0xb0] sm:$0xff]  ;;  %9905 = vmatpush3.bf16.msra.mxu0 %v10365_v54  ;;  %v7243_v28 = vpack.c.bf16 %v14694_v24, %v14710_v45  ;;  %v7052_v48 = vpack.c.bf16 %v14714_v21, %v14712_v1  ;;  %v6591_v22 = vmul.f32 %v10736_v5, %v14460_v8 }
 0x6c1   : > { %6880 = vst.msk [vmem:[#allocation4 + $0x170] sm:$0xff] %vm251_vm0, %v14672_v52  ;;  %v14731_v31 = vld [vmem:[#allocation3 + $0xa9] sm:$0xff]  ;;  %v14733_v9 = vld [vmem:[#allocation3 + $0xb1] sm:$0xff]  ;;  %6625 = vst.msk [vmem:[#allocation3 + $0x151] sm:$0xff] %vm251_vm0, %v6593_v16  ;;  %v10738_v16 = vpop.eup %10737  ;;  %v7244_v54 = vpack.c.bf16 %v14729_v13, %v14727_v56 }
 0x6c2   : > { %v6711_v10 = vld [vmem:[#allocation3 + $0xc1] sm:$0xff]  ;;  %6807 = vst.msk [vmem:[#allocation4] sm:$0xff] %vm602_vm2, %v6760_v40  ;;  %v14749_v27 = vld [vmem:[#allocation3 + $0xc9] sm:$0xff]  ;;  %v14751_v30 = vld [vmem:[#allocation3 + $0xf8] sm:$0xff]  ;;  %v7053_v49 = vpack.c.bf16 %v14733_v9, %v14731_v31  ;;  %v6594_v8 = vmul.f32 %v10738_v16, %v14463_v47  ;;  %v10740_v9 = vpop.eup %10739  ;;  %6967 = vrot.lane.b32.xlu0 %v14652_v29, %s10949_s9 }
 0x6c3   : > { %7255 = vst.msk [vmem:[#allocation4 + $0x18] sm:$0xff] %vm251_vm0, %v7239_v14  ;;  %7064 = vst.msk [vmem:[#allocation4 + $0x38] sm:$0xff] %vm251_vm0, %v7048_v2  ;;  %v14745_v25 = vld [vmem:[#allocation3 + $0xc0] sm:$0xff]  ;;  %v14747_v7 = vld [vmem:[#allocation3 + $0xc8] sm:$0xff]  ;;  %v14789_v1 = vpack.c.bf16 %v14697_v41, %v6711_v10 }
 0x6c4   : > { %v6909_v59 = vld [vmem:[#allocation3 + $0x120] sm:$0xff]  ;;  %7256 = vst.msk [vmem:[#allocation4 + $0x40] sm:$0xff] %vm251_vm0, %v7240_v44  ;;  %7065 = vst.msk [vmem:[#allocation4 + $0x60] sm:$0xff] %vm251_vm0, %v7049_v46  ;;  %v14765_v0 = vld [vmem:[#allocation3 + $0xd8] sm:$0xff]  ;;  %v7245_v51 = vpack.c.bf16 %v14747_v7, %v14745_v25 }
 0x6c5   : > { %v14763_v3 = vld [vmem:[#allocation3 + $0xc1] sm:$0xff]  ;;  %v14769_v61 = vld [vmem:[#allocation3 + $0xd9] sm:$0xff]  ;;  %7257 = vst.msk [vmem:[#allocation4 + $0x68] sm:$0xff] %vm251_vm0, %v7241_v12  ;;  %7066 = vst.msk [vmem:[#allocation4 + $0x88] sm:$0xff] %vm251_vm0, %v7050_v18  ;;  %6775 = vrot.lane.b32.xlu1 %v14789_v1, %s10949_s9 }
 0x6c6   : > { %v14767_v20 = vld [vmem:[#allocation3 + $0xe0] sm:$0xff]  ;;  %v6907_v24 = vld [vmem:[#allocation3 + $0x108] sm:$0xff]  ;;  %7258 = vst.msk [vmem:[#allocation4 + $0x90] sm:$0xff] %vm251_vm0, %v7242_v63  ;;  %v14783_v45 = vld [vmem:[#allocation3 + $0xf0] sm:$0xff]  ;;  %v7054_v18 = vpack.c.bf16 %v14749_v27, %v14763_v3  ;;  %v10742_v27 = vpop.eup %10741  ;;  %v6502_v3 = vadd.f32 1.0, %v10740_v9  ;;  %7337 = vrot.lane.b32.xlu0 %v14499_v34, %s10949_s9 }
 0x6c7   : > { %v14771_v35 = vld [vmem:[#allocation3 + $0xe1] sm:$0xff]  ;;  %v14773_v32 = vld [vmem:[#allocation3 + $0xf9] sm:$0xff]  ;;  %v7102_v38 = vld [vmem:[#allocation3 + $0x12a] sm:$0xff]  ;;  %7067 = vst.msk [vmem:[#allocation4 + $0xb0] sm:$0xff] %vm251_vm0, %v7051_v11  ;;  %v7246_v63 = vpack.c.bf16 %v14767_v20, %v14765_v0 }
 0x6c8   : > { %v6910_v14 = vld [vmem:[#allocation3 + $0x128] sm:$0xff]  ;;  %7259 = vst.msk [vmem:[#allocation4 + $0xb8] sm:$0xff] %vm251_vm0, %v7243_v28  ;;  %7068 = vst.msk [vmem:[#allocation4 + $0xd8] sm:$0xff] %vm251_vm0, %v7052_v48  ;;  %v14798_v40 = vld [vmem:[#allocation3 + $0xf1] sm:$0xff]  ;;  %v7055_v25 = vpack.c.bf16 %v14771_v35, %v14769_v61  ;;  %v7247_v61 = vpack.c.bf16 %v14751_v30, %v14783_v45  ;;  %10749 = vrcp.f32 %v6502_v3 }
 0x6c9   : > { %v7101_v2 = vld [vmem:[#allocation3 + $0x122] sm:$0xff]  ;;  %v14791_v21 = vpack.c.bf16 %v6910_v14, %v6909_v59  ;;  %v14804_v41 = vld [vmem:[#allocation3 + $0x32] sm:$0xff]  ;;  %v14806_v44 = vld [vmem:[#allocation3 + $0x3a] sm:$0xff]  ;;  %6623 = vst.msk [vmem:[#allocation3 + $0x139] sm:$0xff] %vm251_vm0, %v6591_v22  ;;  %7145 = vrot.lane.b32.xlu1 %v14588_v33, %s10949_s9 }
 0x6ca   : > { %v14800_v47 = vld [vmem:[#allocation3 + $0x108] sm:$0xff]  ;;  %v14810_v56 = vld [vmem:[#allocation3 + $0x52] sm:$0xff]  ;;  %v14817_v12 = vpack.c.bf16 %v7102_v38, %v7101_v2  ;;  %7260 = vst.msk [vmem:[#allocation4 + $0xe0] sm:$0xff] %vm251_vm0, %v7244_v54  ;;  %7069 = vst.msk [vmem:[#allocation4 + $0x100] sm:$0xff] %vm251_vm0, %v7053_v49  ;;  %v6500_v2 = vadd.f32 1.0, %v10742_v27  ;;  %v7431_v29 = vpack.c.bf16 %v14806_v44, %v14804_v41  ;;  %6969 = vrot.lane.b32.xlu0 %v14624_v23, %s10949_s9 }
 0x6cb   : > { %v14802_v53 = vld [vmem:[#allocation3 + $0x128] sm:$0xff]  ;;  %v6908_v26 = vld [vmem:[#allocation3 + $0x110] sm:$0xff]  ;;  %v7227_v7 = vld [vmem:[#allocation3 + $0x120] sm:$0xff]  ;;  %6626 = vst.msk [vmem:[#allocation3 + $0x159] sm:$0xff] %vm251_vm0, %v6594_v8 }
 0x6cc   : > { %v14808_v46 = vld [vmem:[#allocation3 + $0x4a] sm:$0xff]  ;;  %v14812_v13 = vld [vmem:[#allocation3 + $0x62] sm:$0xff]  ;;  %v14827_v11 = vld [vmem:[#allocation3 + $0x7a] sm:$0xff]  ;;  %v14840_v0 = vpack.c.bf16 %v6908_v26, %v6907_v24  ;;  %6691 = vst.msk [vmem:[#allocation4 + $0x1e0] sm:$0xff] %vm251_vm0, %v14791_v21  ;;  %v7056_v24 = vpack.c.bf16 %v14773_v32, %v14798_v40  ;;  %10751 = vrcp.f32 %v6500_v2 }
 0x6cd   : > { %v14814_v31 = vld [vmem:[#allocation3 + $0x6a] sm:$0xff]  ;;  %v7037_v5 = vld [vmem:[#allocation3 + $0x121] sm:$0xff]  ;;  %v14831_v48 = vld [vmem:[#allocation3 + $0x92] sm:$0xff]  ;;  %7261 = vst.msk [vmem:[#allocation4 + $0x108] sm:$0xff] %vm251_vm0, %v7245_v51  ;;  %v7249_v51 = vpack.c.bf16 %v14802_v53, %v7227_v7  ;;  %v7432_v53 = vpack.c.bf16 %v14810_v56, %v14808_v46 }
 0x6ce   : > { %v7099_v10 = vld [vmem:[#allocation3 + $0x10a] sm:$0xff]  ;;  %v14829_v28 = vld [vmem:[#allocation3 + $0x82] sm:$0xff]  ;;  %v14833_v16 = vld [vmem:[#allocation3 + $0x9a] sm:$0xff]  ;;  %6883 = vst.msk [vmem:[#allocation4 + $0x1e8] sm:$0xff] %vm251_vm0, %v14817_v12  ;;  %7339 = vrot.lane.b32.xlu0 %v14532_v36, %s10949_s9 }
 0x6cf   : > { %v7038_v59 = vld [vmem:[#allocation3 + $0x129] sm:$0xff]  ;;  %v7100_v20 = vld [vmem:[#allocation3 + $0x112] sm:$0xff]  ;;  %7070 = vst.msk [vmem:[#allocation4 + $0x128] sm:$0xff] %vm251_vm0, %v7054_v18  ;;  %7262 = vst.msk [vmem:[#allocation4 + $0x130] sm:$0xff] %vm251_vm0, %v7246_v63  ;;  %v7433_v18 = vpack.c.bf16 %v14814_v31, %v14812_v13  ;;  %v7434_v41 = vpack.c.bf16 %v14829_v28, %v14827_v11  ;;  %v7435_v44 = vpack.c.bf16 %v14833_v16, %v14831_v48 }
 0x6d0   : > { %v14835_v22 = vld [vmem:[#allocation3 + $0xaa] sm:$0xff]  ;;  %v14847_v54 = vpack.c.bf16 %v7100_v20, %v7099_v10  ;;  %7071 = vst.msk [vmem:[#allocation4 + $0x150] sm:$0xff] %vm251_vm0, %v7055_v25  ;;  %v7410_v45 = vld [vmem:[#allocation3 + $0xb2] sm:$0xff]  ;;  %v7411_v8 = vld [vmem:[#allocation3 + $0xc2] sm:$0xff]  ;;  %v7058_v9 = vpack.c.bf16 %v7038_v59, %v7037_v5 }
 0x6d1   : > { %v7226_v35 = vld [vmem:[#allocation3 + $0x110] sm:$0xff]  ;;  %6690 = vst.msk [vmem:[#allocation4 + $0x1b8] sm:$0xff] %vm251_vm0, %v14840_v0  ;;  %7263 = vst.msk [vmem:[#allocation4 + $0x158] sm:$0xff] %vm251_vm0, %v7247_v61  ;;  %v7413_v32 = vld [vmem:[#allocation3 + $0xda] sm:$0xff]  ;;  %v7436_v46 = vpack.c.bf16 %v7410_v45, %v14835_v22 }
 0x6d2   : > { %v7036_v14 = vld [vmem:[#allocation3 + $0x111] sm:$0xff]  ;;  %v7248_v49 = vpack.c.bf16 %v7226_v35, %v14800_v47  ;;  %v7035_v30 = vld [vmem:[#allocation3 + $0x109] sm:$0xff]  ;;  %v10744_v47 = vpop.eup %10743  ;;  %v6714_v10 = vld [vmem:[#allocation3 + $0xe1] sm:$0xff]  ;;  %6882 = vst.msk [vmem:[#allocation4 + $0x1c0] sm:$0xff] %vm251_vm0, %v14847_v54  ;;  %6971 = vrot.lane.b32.xlu0 %v14840_v0, %s10949_s9 }
 0x6d3   : > { %v7057_v38 = vpack.c.bf16 %v7036_v14, %v7035_v30  ;;  %v7412_v26 = vld [vmem:[#allocation3 + $0xca] sm:$0xff]  ;;  %v7414_v40 = vld [vmem:[#allocation3 + $0xe2] sm:$0xff]  ;;  %7072 = vst.msk [vmem:[#allocation4 + $0x178] sm:$0xff] %vm251_vm0, %v7056_v24  ;;  %v7415_v63 = vld [vmem:[#allocation3 + $0xf2] sm:$0xff]  ;;  %v6592_v25 = vmul.f32 %v10744_v47, %v14497_v4  ;;  %v10746_v27 = vpop.eup %10745 }
 0x6d4   : > { %7264 = vst.msk [vmem:[#allocation4 + $0x180] sm:$0xff] %vm251_vm0, %v7248_v49  ;;  %7265 = vst.msk [vmem:[#allocation4 + $0x1a8] sm:$0xff] %vm251_vm0, %v7249_v51  ;;  %v7416_v56 = vld [vmem:[#allocation3 + $0xfa] sm:$0xff]  ;;  %v7417_v13 = vld [vmem:[#allocation3 + $0x10a] sm:$0xff]  ;;  %v7437_v33 = vpack.c.bf16 %v7412_v26, %v7411_v8  ;;  %v7438_v7 = vpack.c.bf16 %v7414_v40, %v7413_v32  ;;  %v10748_v3 = vpop.eup %10747  ;;  %v6595_v20 = vmul.f32 %v10746_v27, %v14521_v55 }
 0x6d5   : > { %7073 = vst.msk [vmem:[#allocation4 + $0x1a0] sm:$0xff] %vm251_vm0, %v7057_v38  ;;  %7074 = vst.msk [vmem:[#allocation4 + $0x1c8] sm:$0xff] %vm251_vm0, %v7058_v9  ;;  %v7418_v4 = vld [vmem:[#allocation3 + $0x112] sm:$0xff]  ;;  %v7439_v5 = vpack.c.bf16 %v7416_v56, %v7415_v63  ;;  %v7419_v11 = vld [vmem:[#allocation3 + $0x122] sm:$0xff]  ;;  %v6597_v34 = vmul.f32 %v10748_v3, %v14527_v43  ;;  %v10750_v32 = vpop.eup %10749 }
 0x6d6   : > { %v6713_v31 = vld [vmem:[#allocation3 + $0xd9] sm:$0xff]  ;;  %7447 = vst.msk [vmem:[#allocation4 + $0x20] sm:$0xff] %vm251_vm0, %v7431_v29  ;;  %7448 = vst.msk [vmem:[#allocation4 + $0x48] sm:$0xff] %vm251_vm0, %v7432_v53  ;;  %v7440_v59 = vpack.c.bf16 %v7418_v4, %v7417_v13  ;;  %v7420_v28 = vld [vmem:[#allocation3 + $0x12a] sm:$0xff]  ;;  %v10752_v23 = vpop.eup %10751  ;;  %v6598_v29 = vmul.f32 %v10750_v32, %v14557_v6  ;;  %7341 = vrot.lane.b32.xlu0 %v14550_v37, %s10949_s9 }
 0x6d7   : > { %7449 = vst.msk [vmem:[#allocation4 + $0x70] sm:$0xff] %vm251_vm0, %v7433_v18  ;;  %6624 = vst.msk [vmem:[#allocation3 + $0x141] sm:$0xff] %vm251_vm0, %v6592_v25  ;;  %v14890_v48 = vpack.c.bf16 %v6714_v10, %v6713_v31  ;;  %v6913_v16 = vld [vmem:[#allocation3 + $0x150] sm:$0xff]  ;;  %v7441_v22 = vpack.c.bf16 %v7420_v28, %v7419_v11  ;;  %v6914_v61 = vld [vmem:[#allocation3 + $0x158] sm:$0xff]  ;;  %v6596_v25 = vmul.f32 %v10752_v23, %v14560_v39 }
 0x6d8   : > { %7450 = vst.msk [vmem:[#allocation4 + $0x98] sm:$0xff] %vm251_vm0, %v7434_v41  ;;  %7451 = vst.msk [vmem:[#allocation4 + $0xc0] sm:$0xff] %vm251_vm0, %v7435_v44  ;;  %v7105_v35 = vld [vmem:[#allocation3 + $0x152] sm:$0xff]  ;;  %v14903_v2 = vpack.c.bf16 %v6914_v61, %v6913_v16  ;;  %v7106_v24 = vld [vmem:[#allocation3 + $0x15a] sm:$0xff] }
 0x6d9   : > { %7452 = vst.msk [vmem:[#allocation4 + $0xe8] sm:$0xff] %vm251_vm0, %v7436_v46  ;;  %v7231_v14 = vld [vmem:[#allocation3 + $0x150] sm:$0xff]  ;;  %7453 = vst.msk [vmem:[#allocation4 + $0x110] sm:$0xff] %vm251_vm0, %v7437_v33  ;;  %6777 = vrot.lane.b32.xlu1 %v14890_v48, %s10949_s9  ;;  %v7232_v55 = vld [vmem:[#allocation3 + $0x158] sm:$0xff]  ;;  %v14907_v30 = vpack.c.bf16 %v7106_v24, %v7105_v35 }
 0x6da   : > { %7454 = vst.msk [vmem:[#allocation4 + $0x138] sm:$0xff] %vm251_vm0, %v7438_v7  ;;  %7455 = vst.msk [vmem:[#allocation4 + $0x160] sm:$0xff] %vm251_vm0, %v7439_v5  ;;  %v7041_v49 = vld [vmem:[#allocation3 + $0x151] sm:$0xff]  ;;  %v7251_v45 = vpack.c.bf16 %v7232_v55, %v7231_v14  ;;  %v7042_v8 = vld [vmem:[#allocation3 + $0x159] sm:$0xff]  ;;  %6973 = vrot.lane.b32.xlu0 %v14791_v21, %s10949_s9 }
 0x6db   : > { %7456 = vst.msk [vmem:[#allocation4 + $0x188] sm:$0xff] %vm251_vm0, %v7440_v59  ;;  %7457 = vst.msk [vmem:[#allocation4 + $0x1b0] sm:$0xff] %vm251_vm0, %v7441_v22  ;;  %v7423_v38 = vld [vmem:[#allocation3 + $0x152] sm:$0xff]  ;;  %v7424_v51 = vld [vmem:[#allocation3 + $0x15a] sm:$0xff]  ;;  %v7060_v43 = vpack.c.bf16 %v7042_v8, %v7041_v49 }
 0x6dc   : > { %6627 = vst.msk [vmem:[#allocation3 + $0x169] sm:$0xff] %vm251_vm0, %v6595_v20  ;;  %6629 = vst.msk [vmem:[#allocation3 + $0x181] sm:$0xff] %vm251_vm0, %v6597_v34  ;;  %v7443_v9 = vpack.c.bf16 %v7424_v51, %v7423_v38  ;;  %v6716_v26 = vld [vmem:[#allocation3 + $0xf9] sm:$0xff]  ;;  %v6715_v40 = vld [vmem:[#allocation3 + $0xf1] sm:$0xff] }
 0x6dd   : > { %6693 = vst.msk [vmem:[#allocation4 + $0x230] sm:$0xff] %vm251_vm0, %v14903_v2  ;;  %6885 = vst.msk [vmem:[#allocation4 + $0x238] sm:$0xff] %vm251_vm0, %v14907_v30  ;;  %7147 = vrot.lane.b32.xlu1 %v14612_v19, %s10949_s9  ;;  %v6911_v47 = vld [vmem:[#allocation3 + $0x138] sm:$0xff]  ;;  %v14925_v41 = vpack.c.bf16 %v6716_v26, %v6715_v40  ;;  %v6717_v33 = vld [vmem:[#allocation3 + $0x109] sm:$0xff] }
 0x6de   : > { %7267 = vst.msk [vmem:[#allocation4 + $0x1f8] sm:$0xff] %vm251_vm0, %v7251_v45  ;;  %v7229_v10 = vld [vmem:[#allocation3 + $0x138] sm:$0xff]  ;;  %7076 = vst.msk [vmem:[#allocation4 + $0x218] sm:$0xff] %vm251_vm0, %v7060_v43  ;;  %v6912_v53 = vld [vmem:[#allocation3 + $0x140] sm:$0xff]  ;;  %7343 = vrot.lane.b32.xlu0 %v14567_v60, %s10949_s9 }
 0x6df   : > { %7459 = vst.msk [vmem:[#allocation4 + $0x200] sm:$0xff] %vm251_vm0, %v7443_v9  ;;  %v7103_v18 = vld [vmem:[#allocation3 + $0x13a] sm:$0xff]  ;;  %v6931_v19 = vpack.c.bf16 %v6912_v53, %v6911_v47  ;;  %v7104_v44 = vld [vmem:[#allocation3 + $0x142] sm:$0xff]  ;;  %6630 = vst.msk [vmem:[#allocation3 + $0x189] sm:$0xff] %vm251_vm0, %v6598_v29 }
 0x6e0   : > { %v7039_v63 = vld [vmem:[#allocation3 + $0x139] sm:$0xff]  ;;  %v7040_v56 = vld [vmem:[#allocation3 + $0x141] sm:$0xff]  ;;  %v14928_v13 = vpack.c.bf16 %v7104_v44, %v7103_v18  ;;  %6628 = vst.msk [vmem:[#allocation3 + $0x171] sm:$0xff] %vm251_vm0, %v6596_v25  ;;  %v6718_v36 = vld [vmem:[#allocation3 + $0x111] sm:$0xff] }
 0x6e1   : > { %v7230_v46 = vld [vmem:[#allocation3 + $0x140] sm:$0xff]  ;;  %v7059_v6 = vpack.c.bf16 %v7040_v56, %v7039_v63  ;;  %6779 = vrot.lane.b32.xlu1 %v14925_v41, %s10949_s9  ;;  %6692 = vst.msk [vmem:[#allocation4 + $0x208] sm:$0xff] %vm251_vm0, %v6931_v19  ;;  %v14944_v5 = vpack.c.bf16 %v6718_v36, %v6717_v33  ;;  %v6720_v45 = vld [vmem:[#allocation3 + $0x129] sm:$0xff]  ;;  %v6723_v32 = vld [vmem:[#allocation3 + $0x151] sm:$0xff] }
 0x6e2   : > { %v7250_v4 = vpack.c.bf16 %v7230_v46, %v7229_v10  ;;  %6884 = vst.msk [vmem:[#allocation4 + $0x210] sm:$0xff] %vm251_vm0, %v14928_v13  ;;  %v7421_v39 = vld [vmem:[#allocation3 + $0x13a] sm:$0xff]  ;;  %v7422_v31 = vld [vmem:[#allocation3 + $0x142] sm:$0xff]  ;;  %6975 = vrot.lane.b32.xlu0 %v6931_v19, %s10949_s9  ;;  %v7463_v19 = vld [vmem:[#allocation4] sm:$0xff] }
 0x6e3   : > { %7075 = vst.msk [vmem:[#allocation4 + $0x1f0] sm:$0xff] %vm251_vm0, %v7059_v6  ;;  %v7442_v7 = vpack.c.bf16 %v7422_v31, %v7421_v39  ;;  %v6661_v59 = vld [vmem:[#allocation3 + $0x168] sm:$0xff]  ;;  %v7235_v27 = vld [vmem:[#allocation3 + $0x180] sm:$0xff]  ;;  %v10366_v56 = vld [vmem:[%s15405_s4 + $0x108] sm:$0xff]  }
 0x6e4   : > { %7266 = vst.msk [vmem:[#allocation4 + $0x1d0] sm:$0xff] %vm251_vm0, %v7250_v4  ;;  %v7043_v28 = vld [vmem:[#allocation3 + $0x169] sm:$0xff]  ;;  %v7045_v16 = vld [vmem:[#allocation3 + $0x181] sm:$0xff]  ;;  %v6721_v9 = vld [vmem:[#allocation3 + $0x139] sm:$0xff] }
 0x6e5   : > { %7149 = vrot.lane.b32.xlu1 %v14614_v58, %s10949_s9  ;;  %7458 = vst.msk [vmem:[#allocation4 + $0x1d8] sm:$0xff] %vm251_vm0, %v7442_v7  ;;  %v6719_v51 = vld [vmem:[#allocation3 + $0x121] sm:$0xff]  ;;  %v6724_v60 = vld [vmem:[#allocation3 + $0x159] sm:$0xff]  ;;  %v10883_v6 = vld [vmem:[%s15405_s4 + $0x100] sm:$0xff]  }
 0x6e6   : > { %v7236_v61 = vld [vmem:[#allocation3 + $0x188] sm:$0xff]  ;;  %v6739_v43 = vpack.c.bf16 %v6720_v45, %v6719_v51  ;;  %7345 = vrot.lane.b32.xlu0 %v14582_v17, %s10949_s9  ;;  %v6917_v29 = vld [vmem:[#allocation3 + $0x180] sm:$0xff] }
 0x6e7   : > { %v7107_v11 = vld [vmem:[#allocation3 + $0x16a] sm:$0xff]  ;;  %v7108_v0 = vld [vmem:[#allocation3 + $0x172] sm:$0xff]  ;;  %v7253_v14 = vpack.c.bf16 %v7236_v61, %v7235_v27  ;;  %v7427_v49 = vld [vmem:[#allocation3 + $0x182] sm:$0xff] }
 0x6e8   : > { %v6662_v58 = vld [vmem:[#allocation3 + $0x170] sm:$0xff]  ;;  %v14949_v22 = vpack.c.bf16 %v7108_v0, %v7107_v11  ;;  %v6915_v47 = vld [vmem:[#allocation3 + $0x168] sm:$0xff]  ;;  %v10367_v36 = vld [vmem:[%s15405_s4 + $0x110] sm:$0xff]  }
 0x6e9   : > { %6781 = vrot.lane.b32.xlu1 %v14944_v5, %s10949_s9  ;;  %v6678_v3 = vpack.c.bf16 %v6662_v58, %v6661_v59  ;;  %v7044_v20 = vld [vmem:[#allocation3 + $0x171] sm:$0xff]  ;;  %v7046_v37 = vld [vmem:[#allocation3 + $0x189] sm:$0xff]  ;;  %7269 = vst.msk [vmem:[#allocation4 + $0x248] sm:$0xff] %vm251_vm0, %v7253_v14  ;;  %v7238_v0 = vld [vmem:[#allocation3 + $0x1a0] sm:$0xff] }
 0x6ea   : > { %v7061_v35 = vpack.c.bf16 %v7044_v20, %v7043_v28  ;;  %v7062_v34 = vpack.c.bf16 %v7046_v37, %v7045_v16  ;;  %v7425_v24 = vld [vmem:[#allocation3 + $0x16a] sm:$0xff]  ;;  %v7426_v55 = vld [vmem:[#allocation3 + $0x172] sm:$0xff]  ;;  %6886 = vst.msk [vmem:[#allocation4 + $0x260] sm:$0xff] %vm251_vm0, %v14949_v22  ;;  %6977 = vrot.lane.b32.xlu0 %v14903_v2, %s10949_s9  ;;  %v7109_v53 = vld [vmem:[#allocation3 + $0x182] sm:$0xff] }
 0x6eb   : > { %6694 = vst.msk [vmem:[#allocation4 + $0x258] sm:$0xff] %vm251_vm0, %v6678_v3  ;;  %7268 = vst.msk [vmem:[#allocation4 + $0x220] sm:$0xff] %vm251_vm0, %v6678_v3  ;;  %v7444_v8 = vpack.c.bf16 %v7426_v55, %v7425_v24  ;;  %v7428_v38 = vld [vmem:[#allocation3 + $0x18a] sm:$0xff]  ;;  %v7237_v27 = vld [vmem:[#allocation3 + $0x198] sm:$0xff] }
 0x6ec   : > { %7077 = vst.msk [vmem:[#allocation4 + $0x240] sm:$0xff] %vm251_vm0, %v7061_v35  ;;  %7078 = vst.msk [vmem:[#allocation4 + $0x268] sm:$0xff] %vm251_vm0, %v7062_v34  ;;  %v7445_v21 = vpack.c.bf16 %v7428_v38, %v7427_v49  ;;  %v6916_v40 = vld [vmem:[#allocation3 + $0x170] sm:$0xff]  ;;  %v6918_v23 = vld [vmem:[#allocation3 + $0x188] sm:$0xff]  ;;  %v7254_v16 = vpack.c.bf16 %v7238_v0, %v7237_v27 }
 0x6ed   : > { %7151 = vrot.lane.b32.xlu1 %v14616_v50, %s10949_s9  ;;  %7460 = vst.msk [vmem:[#allocation4 + $0x228] sm:$0xff] %vm251_vm0, %v7444_v8  ;;  %v6722_v50 = vld [vmem:[#allocation3 + $0x141] sm:$0xff]  ;;  %v6933_v17 = vpack.c.bf16 %v6916_v40, %v6915_v47  ;;  %v6726_v10 = vld [vmem:[#allocation3 + $0x171] sm:$0xff]  ;;  %v6725_v2 = vld [vmem:[#allocation3 + $0x169] sm:$0xff] }
 0x6ee   : > { %7461 = vst.msk [vmem:[#allocation4 + $0x250] sm:$0xff] %vm251_vm0, %v7445_v21  ;;  %v6740_v26 = vpack.c.bf16 %v6722_v50, %v6721_v9  ;;  %7347 = vrot.lane.b32.xlu0 %v14789_v1, %s10949_s9  ;;  %v6934_v1 = vpack.c.bf16 %v6918_v23, %v6917_v29  ;;  %v7110_v18 = vld [vmem:[#allocation3 + $0x18a] sm:$0xff]  ;;  %7270 = vst.msk [vmem:[#allocation4 + $0x270] sm:$0xff] %vm251_vm0, %v7254_v16 }
 0x6ef   : > { %v10368_v7 = vld [vmem:[%s15405_s4 + $0x118] sm:$0xff]  }
 0x6f1   : > { %6783 = vrot.lane.b32.xlu1 %v6739_v43, %s10949_s9 }
 0x6f2   : > { %6979 = vrot.lane.b32.xlu0 %v6933_v17, %s10949_s9 }
 0x6f5   : > { %7153 = vrot.lane.b32.xlu1 %v14626_v62, %s10949_s9  ;;  %v6741_v62 = vpack.c.bf16 %v6724_v60, %v6723_v32 }
 0x6f6   : > { %7349 = vrot.lane.b32.xlu0 %v14890_v48, %s10949_s9  ;;  %v7299_v48 = vld [vmem:[#allocation3 + $0x181] sm:$0xff] }
 0x6f9   : > { %6785 = vrot.lane.b32.xlu1 %v6740_v26, %s10949_s9 }
 0x6fa   : > { %6981 = vrot.lane.b32.xlu0 %v6934_v1, %s10949_s9 }
 0x6fd   : > { %7155 = vrot.lane.b32.xlu1 %v14640_v42, %s10949_s9  ;;  %v6742_v42 = vpack.c.bf16 %v6726_v10, %v6725_v2 }
 0x6fe   : > { %7351 = vrot.lane.b32.xlu0 %v14925_v41, %s10949_s9  ;;  %v7126_v41 = vpack.c.bf16 %v7110_v18, %v7109_v53 }
 0x701   : > { %6787 = vrot.lane.b32.xlu1 %v6741_v62, %s10949_s9 }
 0x702   : > { %7353 = vrot.lane.b32.xlu0 %v14944_v5, %s10949_s9 }
 0x705   : > { %7157 = vrot.lane.b32.xlu1 %v14642_v15, %s10949_s9 }
 0x706   : > { %7355 = vrot.lane.b32.xlu0 %v6739_v43, %s10949_s9 }
 0x709   : > { %6789 = vrot.lane.b32.xlu1 %v6742_v42, %s10949_s9 }
 0x70a   : > { %7357 = vrot.lane.b32.xlu0 %v6740_v26, %s10949_s9 }
 0x70d   : > { %7159 = vrot.lane.b32.xlu1 %v14672_v52, %s10949_s9  ;;  %v7300_v52 = vld [vmem:[#allocation3 + $0x189] sm:$0xff] }
 0x70e   : > { %7359 = vrot.lane.b32.xlu0 %v6741_v62, %s10949_s9  ;;  %v7317_v25 = vpack.c.bf16 %v7300_v52, %v7299_v48 }
 0x70f   : > { %v6952_v15 = vpop.permute.xlu0 %6951 }
 0x710   : > { %6999 = vst.msk [vmem:[#allocation4 + $0x8] sm:$0xff] %vm602_vm2, %v6952_v15 }
 0x711   : > { %7161 = vrot.lane.b32.xlu1 %v14654_v57, %s10949_s9  ;;  %v6762_v57 = vpop.permute.xlu1 %6761 }
 0x712   : > { %6808 = vst.msk [vmem:[#allocation4 + $0x28] sm:$0xff] %vm602_vm2, %v6762_v57  ;;  %7361 = vrot.lane.b32.xlu0 %v6742_v42, %s10949_s9 }
 0x713   : > { %v6954_v63 = vpop.permute.xlu0 %6953 }
 0x714   : > { %7000 = vst.msk [vmem:[#allocation4 + $0x30] sm:$0xff] %vm602_vm2, %v6954_v63 }
 0x715   : > { %7163 = vrot.lane.b32.xlu1 %v14847_v54, %s10949_s9  ;;  %v7302_v54 = vld [vmem:[#allocation3 + $0x1a1] sm:$0xff] }
 0x716   : > { %7363 = vrot.lane.b32.xlu0 %v7317_v25, %s10949_s9 }
 0x717   : > { %v7464_v46 = vld [vmem:[#allocation4 + $0x8] sm:$0xff] }
 0x718   : > { %7918 = vmatprep.mubr.bf16.mxu1 %v7464_v46 }
 0x719   : > { %7165 = vrot.lane.b32.xlu1 %v14817_v12, %s10949_s9  ;;  %v7301_v12 = vld [vmem:[#allocation3 + $0x199] sm:$0xff]  ;;  %7919 = vmatmul.mubr.bf16.vlgmr.msra.gmra.mrb[224].mxu1 %v7463_v19 }
 0x71a   : > { %v7318_v44 = vpack.c.bf16 %v7302_v54, %v7301_v12  ;;  %10143 = vmatpush3.bf16.msra.mxu1 %v10883_v6  ;;  %v7468_v59 = vld [vmem:[#allocation4 + $0x28] sm:$0xff] }
 0x71b   : > { %10144 = vmatprep.subr.bf16.mxu1 %v10366_v56  ;;  %v7469_v31 = vld [vmem:[#allocation4 + $0x30] sm:$0xff] }
 0x71c   : > { %7365 = vrot.lane.b32.xlu0 %v7318_v44, %s10949_s9  ;;  %7926 = vmatprep.mubr.bf16.mxu1 %v7469_v31 }
 0x71d   : > { %7167 = vrot.lane.b32.xlu1 %v14928_v13, %s10949_s9  ;;  %v6956_v13 = vpop.permute.xlu0 %6955 }
 0x71e   : > { %7001 = vst.msk [vmem:[#allocation4 + $0x58] sm:$0xff] %vm602_vm2, %v6956_v13  ;;  %10145 = vmatpush3.bf16.msra.mxu1 %v10366_v56 }
 0x71f   : > { %10146 = vmatprep.subr.bf16.mxu1 %v10367_v36 }
 0x721   : > { %7169 = vrot.lane.b32.xlu1 %v14907_v30, %s10949_s9  ;;  %v6764_v30 = vpop.permute.xlu1 %6763  ;;  %v6958_v39 = vpop.permute.xlu0 %6957  ;;  %7927 = vmatmul.mubr.bf16.gmra.mrb[228].mxu1 %v7468_v59 }
 0x722   : > { %6809 = vst.msk [vmem:[#allocation4 + $0x50] sm:$0xff] %vm602_vm2, %v6764_v30  ;;  %7002 = vst.msk [vmem:[#allocation4 + $0x80] sm:$0xff] %vm602_vm2, %v6958_v39  ;;  %10147 = vmatpush3.bf16.msra.mxu1 %v10367_v36 }
 0x723   : > { %10148 = vmatprep.subr.bf16.mxu1 %v10368_v7 }
 0x725   : > { %7171 = vrot.lane.b32.xlu1 %v14949_v22, %s10949_s9  ;;  %v6766_v4 = vpop.permute.xlu1 %6765  ;;  %v6960_v5 = vpop.permute.xlu0 %6959  ;;  %v7474_v11 = vld [vmem:[#allocation4 + $0x58] sm:$0xff] }
 0x726   : > { %6810 = vst.msk [vmem:[#allocation4 + $0x78] sm:$0xff] %vm602_vm2, %v6766_v4  ;;  %7003 = vst.msk [vmem:[#allocation4 + $0xa8] sm:$0xff] %vm602_vm2, %v6960_v5  ;;  %7934 = vmatprep.mubr.bf16.mxu1 %v7474_v11  ;;  %10149 = vmatpush3.bf16.msra.mxu1 %v10368_v7 }
 0x729   : > { %7173 = vrot.lane.b32.xlu1 %v7126_v41, %s10949_s9  ;;  %v6768_v33 = vpop.permute.xlu1 %6767  ;;  %v6962_v58 = vpop.permute.xlu0 %6961  ;;  %v7473_v20 = vld [vmem:[#allocation4 + $0x50] sm:$0xff]  ;;  %v7479_v61 = vld [vmem:[#allocation4 + $0x80] sm:$0xff] }
 0x72a   : > { %6811 = vst.msk [vmem:[#allocation4 + $0xa0] sm:$0xff] %vm602_vm2, %v6768_v33  ;;  %7004 = vst.msk [vmem:[#allocation4 + $0xd0] sm:$0xff] %vm602_vm2, %v6962_v58  ;;  %7935 = vmatmul.mubr.bf16.gmra.mrb[232].mxu1 %v7473_v20 }
 0x72b   : > { %7942 = vmatprep.mubr.bf16.mxu1 %v7479_v61 }
 0x72d   : > { %v6770_v28 = vpop.permute.xlu1 %6769  ;;  %v6964_v3 = vpop.permute.xlu0 %6963  ;;  %v7478_v24 = vld [vmem:[#allocation4 + $0x78] sm:$0xff]  ;;  %v7484_v55 = vld [vmem:[#allocation4 + $0xa8] sm:$0xff] }
 0x72e   : > { %6812 = vst.msk [vmem:[#allocation4 + $0xc8] sm:$0xff] %vm602_vm2, %v6770_v28  ;;  %7005 = vst.msk [vmem:[#allocation4 + $0xf8] sm:$0xff] %vm602_vm2, %v6964_v3 }
 0x731   : > { %v6772_v22 = vpop.permute.xlu1 %6771  ;;  %v6966_v35 = vpop.permute.xlu0 %6965  ;;  %v7483_v51 = vld [vmem:[#allocation4 + $0xa0] sm:$0xff]  ;;  %v7489_v50 = vld [vmem:[#allocation4 + $0xd0] sm:$0xff] }
 0x732   : > { %6813 = vst.msk [vmem:[#allocation4 + $0xf0] sm:$0xff] %vm602_vm2, %v6772_v22  ;;  %7006 = vst.msk [vmem:[#allocation4 + $0x120] sm:$0xff] %vm602_vm2, %v6966_v35  ;;  %7943 = vmatmul.mubr.bf16.gmra.mrb[236].mxu1 %v7478_v24 }
 0x733   : > { %7950 = vmatprep.mubr.bf16.mxu1 %v7484_v55 }
 0x735   : > { %v6774_v37 = vpop.permute.xlu1 %6773  ;;  %v7336_v34 = vpop.permute.xlu0 %7335  ;;  %v7488_v62 = vld [vmem:[#allocation4 + $0xc8] sm:$0xff]  ;;  %v7494_v17 = vld [vmem:[#allocation4 + $0xf8] sm:$0xff] }
 0x736   : > { %6814 = vst.msk [vmem:[#allocation4 + $0x118] sm:$0xff] %vm602_vm2, %v6774_v37  ;;  %7383 = vst.msk [vmem:[#allocation4 + $0x18] sm:$0xff] %vm602_vm2, %v7336_v34 }
 0x739   : > { %v7144_v14 = vpop.permute.xlu1 %7143  ;;  %v6968_v45 = vpop.permute.xlu0 %6967  ;;  %v7493_v1 = vld [vmem:[#allocation4 + $0xf0] sm:$0xff]  ;;  %v7499_v57 = vld [vmem:[#allocation4 + $0x120] sm:$0xff] }
 0x73a   : > { %7191 = vst.msk [vmem:[#allocation4 + $0x10] sm:$0xff] %vm602_vm2, %v7144_v14  ;;  %7007 = vst.msk [vmem:[#allocation4 + $0x148] sm:$0xff] %vm602_vm2, %v6968_v45  ;;  %7951 = vmatmul.mubr.bf16.gmra.mrb[240].mxu1 %v7483_v51 }
 0x73b   : > { %7958 = vmatprep.mubr.bf16.mxu1 %v7489_v50 }
 0x73d   : > { %v6776_v49 = vpop.permute.xlu1 %6775  ;;  %v7338_v38 = vpop.permute.xlu0 %7337  ;;  %v7466_v21 = vld [vmem:[#allocation4 + $0x18] sm:$0xff] }
 0x73e   : > { %6815 = vst.msk [vmem:[#allocation4 + $0x140] sm:$0xff] %vm602_vm2, %v6776_v49  ;;  %7384 = vst.msk [vmem:[#allocation4 + $0x40] sm:$0xff] %vm602_vm2, %v7338_v38  ;;  %8079 = vmatprep.mubr.bf16.mxu0 %v7466_v21  ;;  %v7498_v18 = vld [vmem:[#allocation4 + $0x118] sm:$0xff] }
 0x741   : > { %v7146_v8 = vpop.permute.xlu1 %7145  ;;  %v7465_v43 = vld [vmem:[#allocation4 + $0x10] sm:$0xff]  ;;  %v6970_v26 = vpop.permute.xlu0 %6969  ;;  %v7504_v25 = vld [vmem:[#allocation4 + $0x148] sm:$0xff] }
 0x742   : > { %7192 = vst.msk [vmem:[#allocation4 + $0x38] sm:$0xff] %vm602_vm2, %v7146_v8  ;;  %8080 = vmatmul.mubr.bf16.vlgmr.msra.gmra.mrb[0].mxu0 %v7465_v43  ;;  %7008 = vst.msk [vmem:[#allocation4 + $0x170] sm:$0xff] %vm602_vm2, %v6970_v26  ;;  %7959 = vmatmul.mubr.bf16.gmra.mrb[244].mxu1 %v7488_v62 }
 0x743   : > { %7966 = vmatprep.mubr.bf16.mxu1 %v7494_v17 }
 0x745   : > { %v7340_v32 = vpop.permute.xlu0 %7339  ;;  %v7471_v40 = vld [vmem:[#allocation4 + $0x40] sm:$0xff] }
 0x746   : > { %7385 = vst.msk [vmem:[#allocation4 + $0x68] sm:$0xff] %vm602_vm2, %v7340_v32  ;;  %8087 = vmatprep.mubr.bf16.mxu0 %v7471_v40  ;;  %v7503_v56 = vld [vmem:[#allocation4 + $0x140] sm:$0xff] }
 0x749   : > { %v7470_v47 = vld [vmem:[#allocation4 + $0x38] sm:$0xff]  ;;  %v6972_v2 = vpop.permute.xlu0 %6971  ;;  %v7509_v4 = vld [vmem:[#allocation4 + $0x170] sm:$0xff] }
 0x74a   : > { %8088 = vmatmul.mubr.bf16.gmra.mrb[4].mxu0 %v7470_v47  ;;  %7009 = vst.msk [vmem:[#allocation4 + $0x198] sm:$0xff] %vm602_vm2, %v6972_v2  ;;  %7967 = vmatmul.mubr.bf16.gmra.mrb[248].mxu1 %v7493_v1 }
 0x74b   : > { %v6778_v9 = vpop.permute.xlu1 %6777  ;;  %7974 = vmatprep.mubr.bf16.mxu1 %v7499_v57 }
 0x74c   : > { %6816 = vst.msk [vmem:[#allocation4 + $0x168] sm:$0xff] %vm602_vm2, %v6778_v9 }
 0x74d   : > { %v7342_v42 = vpop.permute.xlu0 %7341  ;;  %v7476_v29 = vld [vmem:[#allocation4 + $0x68] sm:$0xff] }
 0x74e   : > { %7386 = vst.msk [vmem:[#allocation4 + $0x90] sm:$0xff] %vm602_vm2, %v7342_v42  ;;  %8095 = vmatprep.mubr.bf16.mxu0 %v7476_v29 }
 0x74f   : > { %v7148_v60 = vpop.permute.xlu1 %7147 }
 0x750   : > { %7193 = vst.msk [vmem:[#allocation4 + $0x60] sm:$0xff] %vm602_vm2, %v7148_v60 }
 0x751   : > { %v6974_v12 = vpop.permute.xlu0 %6973  ;;  %v7514_v59 = vld [vmem:[#allocation4 + $0x198] sm:$0xff] }
 0x752   : > { %7010 = vst.msk [vmem:[#allocation4 + $0x1c0] sm:$0xff] %vm602_vm2, %v6974_v12  ;;  %7975 = vmatmul.mubr.bf16.gmra.mrb[252].mxu1 %v7498_v18  ;;  %v7467_v18 = vld [vmem:[#allocation4 + $0x20] sm:$0xff] }
 0x753   : > { %v6780_v10 = vpop.permute.xlu1 %6779  ;;  %7982 = vmatprep.mubr.bf16.mxu1 %v7504_v25  ;;  %v7508_v7 = vld [vmem:[#allocation4 + $0x168] sm:$0xff] }
 0x754   : > { %6817 = vst.msk [vmem:[#allocation4 + $0x190] sm:$0xff] %vm602_vm2, %v6780_v10  ;;  %v7472_v25 = vld [vmem:[#allocation4 + $0x48] sm:$0xff] }
 0x755   : > { %v7344_v48 = vpop.permute.xlu0 %7343  ;;  %v7481_v53 = vld [vmem:[#allocation4 + $0x90] sm:$0xff] }
 0x756   : > { %7387 = vst.msk [vmem:[#allocation4 + $0xb8] sm:$0xff] %vm602_vm2, %v7344_v48 }
 0x757   : > { %v7150_v23 = vpop.permute.xlu1 %7149  ;;  %v7475_v15 = vld [vmem:[#allocation4 + $0x60] sm:$0xff] }
 0x758   : > { %7194 = vst.msk [vmem:[#allocation4 + $0x88] sm:$0xff] %vm602_vm2, %v7150_v23  ;;  %8096 = vmatmul.mubr.bf16.gmra.mrb[8].mxu0 %v7475_v15 }
 0x759   : > { %8103 = vmatprep.mubr.bf16.mxu0 %v7481_v53  ;;  %v6976_v41 = vpop.permute.xlu0 %6975  ;;  %v7519_v3 = vld [vmem:[#allocation4 + $0x1c0] sm:$0xff] }
 0x75a   : > { %7011 = vst.msk [vmem:[#allocation4 + $0x1e8] sm:$0xff] %vm602_vm2, %v6976_v41  ;;  %7983 = vmatmul.mubr.bf16.gmra.mrb[0].mxu1 %v7503_v56  ;;  %v7477_v41 = vld [vmem:[#allocation4 + $0x70] sm:$0xff]  ;;  %v7487_v56 = vld [vmem:[#allocation4 + $0xc0] sm:$0xff] }
 0x75b   : > { %v6782_v52 = vpop.permute.xlu1 %6781  ;;  %7990 = vmatprep.mubr.bf16.mxu1 %v7509_v4  ;;  %v7513_v16 = vld [vmem:[#allocation4 + $0x190] sm:$0xff]  ;;  %v7492_v4 = vld [vmem:[#allocation4 + $0xe8] sm:$0xff] }
 0x75c   : > { %6818 = vst.msk [vmem:[#allocation4 + $0x1b8] sm:$0xff] %vm602_vm2, %v6782_v52 }
 0x75d   : > { %v7346_v44 = vpop.permute.xlu0 %7345  ;;  %v7486_v46 = vld [vmem:[#allocation4 + $0xb8] sm:$0xff] }
 0x75e   : > { %7388 = vst.msk [vmem:[#allocation4 + $0xe0] sm:$0xff] %vm602_vm2, %v7346_v44  ;;  %v7482_v44 = vld [vmem:[#allocation4 + $0x98] sm:$0xff] }
 0x75f   : > { %v7152_v54 = vpop.permute.xlu1 %7151  ;;  %v7480_v63 = vld [vmem:[#allocation4 + $0x88] sm:$0xff] }
 0x760   : > { %7195 = vst.msk [vmem:[#allocation4 + $0xb0] sm:$0xff] %vm602_vm2, %v7152_v54  ;;  %8104 = vmatmul.mubr.bf16.gmra.mrb[12].mxu0 %v7480_v63 }
 0x761   : > { %8111 = vmatprep.mubr.bf16.mxu0 %v7486_v46  ;;  %v6978_v36 = vpop.permute.xlu0 %6977  ;;  %v7524_v55 = vld [vmem:[#allocation4 + $0x1e8] sm:$0xff] }
 0x762   : > { %7012 = vst.msk [vmem:[#allocation4 + $0x210] sm:$0xff] %vm602_vm2, %v6978_v36  ;;  %7991 = vmatmul.mubr.bf16.gmra.mrb[4].mxu1 %v7508_v7  ;;  %v7507_v7 = vld [vmem:[#allocation4 + $0x160] sm:$0xff] }
 0x763   : > { %v6784_v30 = vpop.permute.xlu1 %6783  ;;  %7998 = vmatprep.mubr.bf16.mxu1 %v7514_v59  ;;  %v7518_v34 = vld [vmem:[#allocation4 + $0x1b8] sm:$0xff]  ;;  %v7517_v59 = vld [vmem:[#allocation4 + $0x1b0] sm:$0xff] }
 0x764   : > { %6819 = vst.msk [vmem:[#allocation4 + $0x1e0] sm:$0xff] %vm602_vm2, %v6784_v30 }
 0x765   : > { %v7348_v31 = vpop.permute.xlu0 %7347  ;;  %v7491_v33 = vld [vmem:[#allocation4 + $0xe0] sm:$0xff] }
 0x766   : > { %7389 = vst.msk [vmem:[#allocation4 + $0x108] sm:$0xff] %vm602_vm2, %v7348_v31  ;;  %v7502_v31 = vld [vmem:[#allocation4 + $0x138] sm:$0xff] }
 0x767   : > { %v7154_v19 = vpop.permute.xlu1 %7153  ;;  %v7485_v13 = vld [vmem:[#allocation4 + $0xb0] sm:$0xff] }
 0x768   : > { %7196 = vst.msk [vmem:[#allocation4 + $0xd8] sm:$0xff] %vm602_vm2, %v7154_v19  ;;  %8112 = vmatmul.mubr.bf16.gmra.mrb[16].mxu0 %v7485_v13 }
 0x769   : > { %8119 = vmatprep.mubr.bf16.mxu0 %v7491_v33  ;;  %v6980_v28 = vpop.permute.xlu0 %6979  ;;  %v7529_v50 = vld [vmem:[#allocation4 + $0x210] sm:$0xff] }
 0x76a   : > { %7013 = vst.msk [vmem:[#allocation4 + $0x238] sm:$0xff] %vm602_vm2, %v6980_v28  ;;  %7999 = vmatmul.mubr.bf16.gmra.mrb[8].mxu1 %v7513_v16  ;;  %v7527_v28 = vld [vmem:[#allocation4 + $0x200] sm:$0xff] }
 0x76b   : > { %v6786_v6 = vpop.permute.xlu1 %6785  ;;  %8006 = vmatprep.mubr.bf16.mxu1 %v7519_v3  ;;  %v7523_v51 = vld [vmem:[#allocation4 + $0x1e0] sm:$0xff] }
 0x76c   : > { %6820 = vst.msk [vmem:[#allocation4 + $0x208] sm:$0xff] %vm602_vm2, %v6786_v6 }
 0x76d   : > { %v7350_v0 = vpop.permute.xlu0 %7349  ;;  %v7496_v58 = vld [vmem:[#allocation4 + $0x108] sm:$0xff] }
 0x76e   : > { %7390 = vst.msk [vmem:[#allocation4 + $0x130] sm:$0xff] %vm602_vm2, %v7350_v0  ;;  %v7537_v0 = vld [vmem:[#allocation4 + $0x250] sm:$0xff] }
 0x76f   : > { %v7156_v39 = vpop.permute.xlu1 %7155  ;;  %v7490_v5 = vld [vmem:[#allocation4 + $0xd8] sm:$0xff] }
 0x770   : > { %7197 = vst.msk [vmem:[#allocation4 + $0x100] sm:$0xff] %vm602_vm2, %v7156_v39  ;;  %8120 = vmatmul.mubr.bf16.gmra.mrb[20].mxu0 %v7490_v5  ;;  %v7497_v39 = vld [vmem:[#allocation4 + $0x110] sm:$0xff]  ;;  %v7512_v5 = vld [vmem:[#allocation4 + $0x188] sm:$0xff] }
 0x771   : > { %8127 = vmatprep.mubr.bf16.mxu0 %v7496_v58  ;;  %v6982_v61 = vpop.permute.xlu0 %6981  ;;  %v7534_v17 = vld [vmem:[#allocation4 + $0x238] sm:$0xff] }
 0x772   : > { %7014 = vst.msk [vmem:[#allocation4 + $0x260] sm:$0xff] %vm602_vm2, %v6982_v61  ;;  %8007 = vmatmul.mubr.bf16.gmra.mrb[12].mxu1 %v7518_v34  ;;  %v7542_v58 = vld [vmem:[#allocation4 + $0x278] sm:$0xff] }
 0x773   : > { %v6788_v11 = vpop.permute.xlu1 %6787  ;;  %8014 = vmatprep.mubr.bf16.mxu1 %v7524_v55  ;;  %v7528_v62 = vld [vmem:[#allocation4 + $0x208] sm:$0xff] }
 0x774   : > { %6821 = vst.msk [vmem:[#allocation4 + $0x230] sm:$0xff] %vm602_vm2, %v6788_v11  ;;  %v7522_v11 = vld [vmem:[#allocation4 + $0x1d8] sm:$0xff] }
 0x775   : > { %v7352_v35 = vpop.permute.xlu0 %7351  ;;  %v7501_v14 = vld [vmem:[#allocation4 + $0x130] sm:$0xff] }
 0x776   : > { %7391 = vst.msk [vmem:[#allocation4 + $0x158] sm:$0xff] %vm602_vm2, %v7352_v35 }
 0x777   : > { %v7158_v27 = vpop.permute.xlu1 %7157  ;;  %v7495_v22 = vld [vmem:[#allocation4 + $0x100] sm:$0xff] }
 0x778   : > { %7198 = vst.msk [vmem:[#allocation4 + $0x128] sm:$0xff] %vm602_vm2, %v7158_v27  ;;  %8128 = vmatmul.mubr.bf16.gmra.mrb[24].mxu0 %v7495_v22  ;;  %v7532_v27 = vld [vmem:[#allocation4 + $0x228] sm:$0xff] }
 0x779   : > { %8135 = vmatprep.mubr.bf16.mxu0 %v7501_v14  ;;  %v7354_v45 = vpop.permute.xlu0 %7353  ;;  %v7539_v57 = vld [vmem:[#allocation4 + $0x260] sm:$0xff] }
 0x77a   : > { %7392 = vst.msk [vmem:[#allocation4 + $0x180] sm:$0xff] %vm602_vm2, %v7354_v45  ;;  %8015 = vmatmul.mubr.bf16.gmra.mrb[16].mxu1 %v7523_v51 }
 0x77b   : > { %v6790_v20 = vpop.permute.xlu1 %6789  ;;  %8022 = vmatprep.mubr.bf16.mxu1 %v7529_v50  ;;  %v7533_v1 = vld [vmem:[#allocation4 + $0x230] sm:$0xff] }
 0x77c   : > { %6822 = vst.msk [vmem:[#allocation4 + $0x258] sm:$0xff] %vm602_vm2, %v6790_v20 }
 0x77d   : > { %v7356_v38 = vpop.permute.xlu0 %7355  ;;  %v7506_v21 = vld [vmem:[#allocation4 + $0x158] sm:$0xff] }
 0x77e   : > { %7393 = vst.msk [vmem:[#allocation4 + $0x1a8] sm:$0xff] %vm602_vm2, %v7356_v38 }
 0x77f   : > { %v7160_v37 = vpop.permute.xlu1 %7159  ;;  %v7500_v24 = vld [vmem:[#allocation4 + $0x128] sm:$0xff] }
 0x780   : > { %7199 = vst.msk [vmem:[#allocation4 + $0x150] sm:$0xff] %vm602_vm2, %v7160_v37  ;;  %8136 = vmatmul.mubr.bf16.gmra.mrb[28].mxu0 %v7500_v24 }
 0x781   : > { %8143 = vmatprep.mubr.bf16.mxu0 %v7506_v21  ;;  %v7358_v26 = vpop.permute.xlu0 %7357  ;;  %v7511_v60 = vld [vmem:[#allocation4 + $0x180] sm:$0xff] }
 0x782   : > { %7394 = vst.msk [vmem:[#allocation4 + $0x1d0] sm:$0xff] %vm602_vm2, %v7358_v26  ;;  %8023 = vmatmul.mubr.bf16.gmra.mrb[20].mxu1 %v7528_v62  ;;  %v15107_v62 = vld [vmem:[%s15406_s5] ss:$0 sm:$0xff] }
 0x783   : > { %v7162_v49 = vpop.permute.xlu1 %7161  ;;  %8030 = vmatprep.mubr.bf16.mxu1 %v7534_v17  ;;  %v7538_v48 = vld [vmem:[#allocation4 + $0x258] sm:$0xff] }
 0x784   : > { %7200 = vst.msk [vmem:[#allocation4 + $0x178] sm:$0xff] %vm602_vm2, %v7162_v49 }
 0x785   : > { %v7360_v40 = vpop.permute.xlu0 %7359  ;;  %v7516_v2 = vld [vmem:[#allocation4 + $0x1a8] sm:$0xff] }
 0x786   : > { %7395 = vst.msk [vmem:[#allocation4 + $0x1f8] sm:$0xff] %vm602_vm2, %v7360_v40 }
 0x787   : > { %v7164_v8 = vpop.permute.xlu1 %7163  ;;  %v7505_v43 = vld [vmem:[#allocation4 + $0x150] sm:$0xff] }
 0x788   : > { %7201 = vst.msk [vmem:[#allocation4 + $0x1a0] sm:$0xff] %vm602_vm2, %v7164_v8  ;;  %8144 = vmatmul.mubr.bf16.gmra.mrb[32].mxu0 %v7505_v43 }
 0x789   : > { %8151 = vmatprep.mubr.bf16.mxu0 %v7511_v60  ;;  %v7362_v23 = vpop.permute.xlu0 %7361  ;;  %v7521_v12 = vld [vmem:[#allocation4 + $0x1d0] sm:$0xff] }
 0x78a   : > { %7396 = vst.msk [vmem:[#allocation4 + $0x220] sm:$0xff] %vm602_vm2, %v7362_v23  ;;  %8031 = vmatmul.mubr.bf16.gmra.mrb[24].mxu1 %v7533_v1 }
 0x78b   : > { %v7166_v9 = vpop.permute.xlu1 %7165  ;;  %v7510_v47 = vld [vmem:[#allocation4 + $0x178] sm:$0xff]  ;;  %8038 = vmatprep.mubr.bf16.mxu1 %v7539_v57 }
 0x78c   : > { %7202 = vst.msk [vmem:[#allocation4 + $0x1c8] sm:$0xff] %vm602_vm2, %v7166_v9 }
 0x78d   : > { %v7364_v29 = vpop.permute.xlu0 %7363  ;;  %v7526_v63 = vld [vmem:[#allocation4 + $0x1f8] sm:$0xff] }
 0x78e   : > { %7397 = vst.msk [vmem:[#allocation4 + $0x248] sm:$0xff] %vm602_vm2, %v7364_v29 }
 0x78f   : > { %v7168_v32 = vpop.permute.xlu1 %7167  ;;  %v7515_v15 = vld [vmem:[#allocation4 + $0x1a0] sm:$0xff] }
 0x790   : > { %7203 = vst.msk [vmem:[#allocation4 + $0x1f0] sm:$0xff] %vm602_vm2, %v7168_v32  ;;  %8152 = vmatmul.mubr.bf16.gmra.mrb[36].mxu0 %v7510_v47 }
 0x791   : > { %8159 = vmatprep.mubr.bf16.mxu0 %v7516_v2  ;;  %v7366_v54 = vpop.permute.xlu0 %7365  ;;  %v7531_v19 = vld [vmem:[#allocation4 + $0x220] sm:$0xff] }
 0x792   : > { %7398 = vst.msk [vmem:[#allocation4 + $0x270] sm:$0xff] %vm602_vm2, %v7366_v54  ;;  %8039 = vmatmul.mubr.bf16.gmra.mrb[28].mxu1 %v7538_v48 }
 0x793   : > { %v7170_v10 = vpop.permute.xlu1 %7169  ;;  %v7520_v53 = vld [vmem:[#allocation4 + $0x1c8] sm:$0xff]  ;;  %10150 = vmatprep.mubr.msk.bf16.mxu1 %vm251_vm0, %v7467_v18 }
 0x794   : > { %7204 = vst.msk [vmem:[#allocation4 + $0x218] sm:$0xff] %vm602_vm2, %v7170_v10 }
 0x795   : > { %v7536_v13 = vld [vmem:[#allocation4 + $0x248] sm:$0xff] }
 0x797   : > { %v7172_v42 = vpop.permute.xlu1 %7171  ;;  %v7525_v30 = vld [vmem:[#allocation4 + $0x1f0] sm:$0xff] }
 0x798   : > { %7205 = vst.msk [vmem:[#allocation4 + $0x240] sm:$0xff] %vm602_vm2, %v7172_v42  ;;  %8160 = vmatmul.mubr.bf16.gmra.mrb[40].mxu0 %v7515_v15 }
 0x799   : > { %8167 = vmatprep.mubr.bf16.mxu0 %v7521_v12  ;;  %v7541_v6 = vld [vmem:[#allocation4 + $0x270] sm:$0xff] }
 0x79a   : > { %10151 = vmatmul.mubr.msk.bf16.vlgmr.msra.gmra.mrb[32].mxu1 %vm251_vm0, %v7472_v25 }
 0x79b   : > { %v7174_v52 = vpop.permute.xlu1 %7173  ;;  %10154 = vmatprep.mubr.msk.bf16.mxu1 %vm251_vm0, %v7477_v41  ;;  %v7530_v46 = vld [vmem:[#allocation4 + $0x218] sm:$0xff] }
 0x79c   : > { %7206 = vst.msk [vmem:[#allocation4 + $0x268] sm:$0xff] %vm602_vm2, %v7174_v52 }
 0x79f   : > { %v7535_v36 = vld [vmem:[#allocation4 + $0x240] sm:$0xff] }
 0x7a0   : > { %8168 = vmatmul.mubr.bf16.gmra.mrb[44].mxu0 %v7520_v53 }
 0x7a1   : > { %8175 = vmatprep.mubr.bf16.mxu0 %v7526_v63 }
 0x7a2   : > { %10155 = vmatmul.mubr.msk.bf16.gmra.mrb[36].mxu1 %vm251_vm0, %v7482_v44 }
 0x7a3   : > { %10158 = vmatprep.mubr.msk.bf16.mxu1 %vm251_vm0, %v7487_v56  ;;  %v7540_v33 = vld [vmem:[#allocation4 + $0x268] sm:$0xff] }
 0x7a8   : > { %8176 = vmatmul.mubr.bf16.gmra.mrb[48].mxu0 %v7525_v30 }
 0x7a9   : > { %8183 = vmatprep.mubr.bf16.mxu0 %v7531_v19 }
 0x7aa   : > { %10159 = vmatmul.mubr.msk.bf16.gmra.mrb[40].mxu1 %vm251_vm0, %v7492_v4 }
 0x7ab   : > { %10162 = vmatprep.mubr.msk.bf16.mxu1 %vm251_vm0, %v7497_v39 }
 0x7b0   : > { %8184 = vmatmul.mubr.bf16.gmra.mrb[52].mxu0 %v7530_v46 }
 0x7b1   : > { %8191 = vmatprep.mubr.bf16.mxu0 %v7536_v13 }
 0x7b2   : > { %10163 = vmatmul.mubr.msk.bf16.gmra.mrb[44].mxu1 %vm251_vm0, %v7502_v31 }
 0x7b3   : > { %10166 = vmatprep.mubr.msk.bf16.mxu1 %vm251_vm0, %v7507_v7 }
 0x7b8   : > { %8192 = vmatmul.mubr.bf16.gmra.mrb[56].mxu0 %v7535_v36 }
 0x7b9   : > { %8199 = vmatprep.mubr.bf16.mxu0 %v7541_v6 }
 0x7ba   : > { %10167 = vmatmul.mubr.msk.bf16.gmra.mrb[48].mxu1 %vm251_vm0, %v7512_v5 }
 0x7bb   : > { %10170 = vmatprep.mubr.msk.bf16.mxu1 %vm251_vm0, %v7517_v59 }
 0x7c0   : > { %8200 = vmatmul.mubr.bf16.gmra.mrb[60].mxu0 %v7540_v33 }
 0x7c2   : > { %10171 = vmatmul.mubr.msk.bf16.gmra.mrb[52].mxu1 %vm251_vm0, %v7522_v11 }
 0x7c3   : > { %10174 = vmatprep.mubr.msk.bf16.mxu1 %vm251_vm0, %v7527_v28 }
 0x7ca   : > { %10175 = vmatmul.mubr.msk.bf16.gmra.mrb[56].mxu1 %vm251_vm0, %v7532_v27 }
 0x7cb   : > { %10178 = vmatprep.mubr.msk.bf16.mxu1 %vm251_vm0, %v7537_v0 }
 0x7d2   : > { %10179 = vmatmul.mubr.msk.bf16.gmra.mrb[60].mxu1 %vm251_vm0, %v7542_v58 }
 0x7ec   : > { %v9794_v16 = vpop.f32.mrb[224].mxu1 }
 0x7ed   : > { %v9795_v22 = vpop.f32.mrb[225].mxu1 }
 0x7ee   : > { %v9796_v3 = vadd.f32 %v9795_v22, %v9794_v16  ;;  %v9797_v20 = vpop.f32.mrb[226].mxu1 }
 0x7ef   : > { %v9798_v61 = vpop.f32.mrb[227].mxu1 }
 0x7f0   : > { %v9799_v37 = vadd.f32 %v9798_v61, %v9797_v20  ;;  %v7921_v29 = vadd.f32 %v9796_v3, %v15107_v62 }
 0x7f2   : > { %v7924_v54 = vadd.f32 %v9799_v37, %v15107_v62 }
 0x7f4   : > { %v9800_v35 = vpop.f32.mrb[228].mxu1 }
 0x7f5   : > { %v9801_v14 = vpop.f32.mrb[229].mxu1 }
 0x7f6   : > { %v9802_v34 = vadd.f32 %v9801_v14, %v9800_v35  ;;  %v9803_v24 = vpop.f32.mrb[230].mxu1 }
 0x7f7   : > { %v9804_v55 = vpop.f32.mrb[231].mxu1 }
 0x7f8   : > { %v9805_v49 = vadd.f32 %v9804_v55, %v9803_v24  ;;  %v7929_v46 = vadd.f32 %v9802_v34, %v15107_v62 }
 0x7fa   : > { %v7932_v39 = vadd.f32 %v9805_v49, %v15107_v62 }
 0x7fd   : > { %v9806_v45 = vpop.f32.mrb[232].mxu1 }
 0x7fe   : > { %v9807_v8 = vpop.f32.mrb[233].mxu1 }
 0x7ff   : > { %v9808_v38 = vadd.f32 %v9807_v8, %v9806_v45  ;;  %v9809_v21 = vpop.f32.mrb[234].mxu1 }
 0x800   : > { %v9810_v51 = vpop.f32.mrb[235].mxu1 }
 0x801   : > { %v9811_v43 = vadd.f32 %v9810_v51, %v9809_v21  ;;  %v7937_v58 = vadd.f32 %v9808_v38, %v15107_v62 }
 0x803   : > { %v7940_v37 = vadd.f32 %v9811_v43, %v15107_v62 }
 0x805   : > { %v9812_v50 = vpop.f32.mrb[236].mxu1 }
 0x806   : > { %v9813_v9 = vpop.f32.mrb[237].mxu1 }
 0x807   : > { %v9814_v26 = vadd.f32 %v9813_v9, %v9812_v50  ;;  %v9815_v60 = vpop.f32.mrb[238].mxu1 }
 0x808   : > { %v9816_v32 = vpop.f32.mrb[239].mxu1 }
 0x809   : > { %v9817_v40 = vadd.f32 %v9816_v32, %v9815_v60  ;;  %v7945_v21 = vadd.f32 %v9814_v26, %v15107_v62 }
 0x80b   : > { %v7948_v32 = vadd.f32 %v9817_v40, %v15107_v62 }
 0x80d   : > { %v9818_v47 = vpop.f32.mrb[240].mxu1 }
 0x80e   : > { %v9819_v10 = vpop.f32.mrb[241].mxu1 }
 0x80f   : > { %v15109_v2 = vadd.f32 %v9819_v10, %v9818_v47  ;;  %v9821_v42 = vpop.f32.mrb[242].mxu1 }
 0x810   : > { %v9822_v57 = vpop.f32.mrb[243].mxu1 }
 0x811   : > { %v15112_v52 = vadd.f32 %v9822_v57, %v9821_v42  ;;  %v7953_v57 = vadd.f32 %v15109_v2, %v15107_v62 }
 0x815   : > { %v9906_v17 = vpop.f32.mrb[0].mxu0  ;;  %v9824_v63 = vpop.f32.mrb[244].mxu1 }
 0x816   : > { %v9907_v23 = vpop.f32.mrb[1].mxu0  ;;  %v9825_v30 = vpop.f32.mrb[245].mxu1 }
 0x817   : > { %v9908_v1 = vadd.f32 %v9907_v23, %v9906_v17  ;;  %v9909_v15 = vpop.f32.mrb[2].mxu0  ;;  %v15119_v41 = vadd.f32 %v9825_v30, %v9824_v63  ;;  %v9827_v44 = vpop.f32.mrb[246].mxu1 }
 0x818   : > { %v9910_v12 = vpop.f32.mrb[3].mxu0  ;;  %v9828_v4 = vpop.f32.mrb[247].mxu1 }
 0x819   : > { %v9911_v48 = vadd.f32 %v9910_v12, %v9909_v15  ;;  %v15115_v53 = vadd.f32 %v9908_v1, %v7921_v29  ;;  %v15122_v6 = vadd.f32 %v9828_v4, %v9827_v44 }
 0x81b   : > { %v15117_v18 = vadd.f32 %v9911_v48, %v7924_v54 }
 0x81d   : > { %v9912_v25 = vpop.f32.mrb[4].mxu0  ;;  %v9830_v5 = vpop.f32.mrb[248].mxu1 }
 0x81e   : > { %v9913_v19 = vpop.f32.mrb[5].mxu0  ;;  %v9831_v11 = vpop.f32.mrb[249].mxu1 }
 0x81f   : > { %v9914_v56 = vadd.f32 %v9913_v19, %v9912_v25  ;;  %v9915_v13 = vpop.f32.mrb[6].mxu0  ;;  %v15129_v28 = vadd.f32 %v9831_v11, %v9830_v5  ;;  %v9833_v0 = vpop.f32.mrb[250].mxu1  ;;  %v7956_v25 = vadd.f32 %v15112_v52, %v15107_v62 }
 0x820   : > { %v9916_v36 = vpop.f32.mrb[7].mxu0  ;;  %v9834_v3 = vpop.f32.mrb[251].mxu1 }
 0x821   : > { %v9917_v31 = vadd.f32 %v9916_v36, %v9915_v13  ;;  %v15125_v33 = vadd.f32 %v9914_v56, %v7929_v46  ;;  %v15132_v20 = vadd.f32 %v9834_v3, %v9833_v0 }
 0x823   : > { %v15127_v7 = vadd.f32 %v9917_v31, %v7932_v39  ;;  %v7961_v39 = vadd.f32 %v15119_v41, %v15107_v62 }
 0x825   : > { %v9836_v24 = vpop.f32.mrb[252].mxu1 }
 0x826   : > { %v9837_v49 = vpop.f32.mrb[253].mxu1 }
 0x827   : > { %v15139_v45 = vadd.f32 %v9837_v49, %v9836_v24  ;;  %v9839_v38 = vpop.f32.mrb[254].mxu1  ;;  %v7969_v24 = vadd.f32 %v15129_v28, %v15107_v62 }
 0x828   : > { %v9840_v9 = vpop.f32.mrb[255].mxu1 }
 0x829   : > { %v15142_v60 = vadd.f32 %v9840_v9, %v9839_v38 }
 0x82b   : > { %v9918_v59 = vpop.f32.mrb[8].mxu0 }
 0x82c   : > { %v9919_v27 = vpop.f32.mrb[9].mxu0 }
 0x82d   : > { %v9920_v16 = vadd.f32 %v9919_v27, %v9918_v59  ;;  %v9921_v22 = vpop.f32.mrb[10].mxu0  ;;  %v9842_v23 = vpop.f32.mrb[0].mxu1  ;;  %v7964_v27 = vadd.f32 %v15122_v6, %v15107_v62 }
 0x82e   : > { %v9922_v61 = vpop.f32.mrb[11].mxu0  ;;  %v9843_v29 = vpop.f32.mrb[1].mxu1 }
 0x82f   : > { %v9923_v35 = vadd.f32 %v9922_v61, %v9921_v22  ;;  %v15135_v14 = vadd.f32 %v9920_v16, %v7937_v58  ;;  %v15149_v1 = vadd.f32 %v9843_v29, %v9842_v23  ;;  %v9845_v26 = vpop.f32.mrb[2].mxu1  ;;  %v7977_v29 = vadd.f32 %v15139_v45, %v15107_v62 }
 0x830   : > { %v9846_v48 = vpop.f32.mrb[3].mxu1 }
 0x831   : > { %v15137_v34 = vadd.f32 %v9923_v35, %v7940_v37  ;;  %v15153_v63 = vadd.f32 %v9846_v48, %v9845_v26 }
 0x833   : > { %v9924_v55 = vpop.f32.mrb[12].mxu0 }
 0x834   : > { %v9925_v8 = vpop.f32.mrb[13].mxu0 }
 0x835   : > { %v9926_v51 = vadd.f32 %v9925_v8, %v9924_v55  ;;  %v9927_v50 = vpop.f32.mrb[14].mxu0  ;;  %v9848_v46 = vpop.f32.mrb[4].mxu1 }
 0x836   : > { %v9928_v43 = vpop.f32.mrb[15].mxu0  ;;  %v9849_v13 = vpop.f32.mrb[5].mxu1 }
 0x837   : > { %v9929_v47 = vadd.f32 %v9928_v43, %v9927_v50  ;;  %v15145_v17 = vadd.f32 %v9926_v51, %v7945_v21  ;;  %v15161_v4 = vadd.f32 %v9849_v13, %v9848_v46  ;;  %v9851_v36 = vpop.f32.mrb[6].mxu1  ;;  %v7972_v21 = vadd.f32 %v15132_v20, %v15107_v62 }
 0x838   : > { %v9852_v59 = vpop.f32.mrb[7].mxu1 }
 0x839   : > { %v15147_v10 = vadd.f32 %v9929_v47, %v7948_v32  ;;  %v15165_v11 = vadd.f32 %v9852_v59, %v9851_v36  ;;  %v7985_v36 = vadd.f32 %v15149_v1, %v15107_v62 }
 0x83b   : > { %v9930_v42 = vpop.f32.mrb[16].mxu0 }
 0x83c   : > { %v9931_v15 = vpop.f32.mrb[17].mxu0 }
 0x83d   : > { %v9932_v12 = vadd.f32 %v9931_v15, %v9930_v42  ;;  %v9933_v54 = vpop.f32.mrb[18].mxu0  ;;  %v9854_v22 = vpop.f32.mrb[8].mxu1 }
 0x83e   : > { %v9934_v40 = vpop.f32.mrb[19].mxu0  ;;  %v9855_v61 = vpop.f32.mrb[9].mxu1 }
 0x83f   : > { %v9935_v30 = vadd.f32 %v9934_v40, %v9933_v54  ;;  %v15157_v19 = vadd.f32 %v9932_v12, %v7953_v57  ;;  %v15173_v37 = vadd.f32 %v9855_v61, %v9854_v22  ;;  %v9857_v35 = vpop.f32.mrb[10].mxu1  ;;  %v7980_v54 = vadd.f32 %v15142_v60, %v15107_v62 }
 0x840   : > { %v9858_v8 = vpop.f32.mrb[11].mxu1 }
 0x841   : > { %v15159_v44 = vadd.f32 %v9935_v30, %v7956_v25  ;;  %v15177_v38 = vadd.f32 %v9858_v8, %v9857_v35 }
 0x843   : > { %v9936_v56 = vpop.f32.mrb[20].mxu0 }
 0x844   : > { %v9937_v2 = vpop.f32.mrb[21].mxu0 }
 0x845   : > { %v9938_v31 = vadd.f32 %v9937_v2, %v9936_v56  ;;  %v9939_v5 = vpop.f32.mrb[22].mxu0  ;;  %v9860_v43 = vpop.f32.mrb[12].mxu1 }
 0x846   : > { %v9940_v52 = vpop.f32.mrb[23].mxu0  ;;  %v9861_v47 = vpop.f32.mrb[13].mxu1 }
 0x847   : > { %v9941_v0 = vadd.f32 %v9940_v52, %v9939_v5  ;;  %v15169_v58 = vadd.f32 %v9938_v31, %v7961_v39  ;;  %v15185_v23 = vadd.f32 %v9861_v47, %v9860_v43  ;;  %v9863_v42 = vpop.f32.mrb[14].mxu1  ;;  %v7988_v52 = vadd.f32 %v15153_v63, %v15107_v62 }
 0x848   : > { %v9864_v57 = vpop.f32.mrb[15].mxu1 }
 0x849   : > { %v15171_v16 = vadd.f32 %v9941_v0, %v7964_v27  ;;  %v15189_v12 = vadd.f32 %v9864_v57, %v9863_v42  ;;  %v8001_v57 = vadd.f32 %v15173_v37, %v15107_v62 }
 0x84b   : > { %v9942_v3 = vpop.f32.mrb[24].mxu0 }
 0x84c   : > { %v9943_v41 = vpop.f32.mrb[25].mxu0 }
 0x84d   : > { %v9944_v55 = vadd.f32 %v9943_v41, %v9942_v3  ;;  %v9945_v49 = vpop.f32.mrb[26].mxu0  ;;  %v9866_v30 = vpop.f32.mrb[16].mxu1 }
 0x84e   : > { %v9946_v6 = vpop.f32.mrb[27].mxu0  ;;  %v9867_v56 = vpop.f32.mrb[17].mxu1 }
 0x84f   : > { %v9947_v51 = vadd.f32 %v9946_v6, %v9945_v49  ;;  %v15181_v50 = vadd.f32 %v9944_v55, %v7969_v24  ;;  %v15197_v13 = vadd.f32 %v9867_v56, %v9866_v30  ;;  %v9869_v2 = vpop.f32.mrb[18].mxu1  ;;  %v7993_v55 = vadd.f32 %v15161_v4, %v15107_v62 }
 0x850   : > { %v9870_v5 = vpop.f32.mrb[19].mxu1 }
 0x851   : > { %v15183_v9 = vadd.f32 %v9947_v51, %v7972_v21  ;;  %v15201_v59 = vadd.f32 %v9870_v5, %v9869_v2  ;;  %v7996_v51 = vadd.f32 %v15165_v11, %v15107_v62 }
 0x853   : > { %v9948_v32 = vpop.f32.mrb[28].mxu0 }
 0x854   : > { %v9949_v28 = vpop.f32.mrb[29].mxu0 }
 0x855   : > { %v9950_v15 = vadd.f32 %v9949_v28, %v9948_v32  ;;  %v9951_v26 = vpop.f32.mrb[30].mxu0  ;;  %v9872_v3 = vpop.f32.mrb[20].mxu1 }
 0x856   : > { %v9952_v20 = vpop.f32.mrb[31].mxu0  ;;  %v9873_v41 = vpop.f32.mrb[21].mxu1 }
 0x857   : > { %v9953_v48 = vadd.f32 %v9952_v20, %v9951_v26  ;;  %v15193_v40 = vadd.f32 %v9950_v15, %v7977_v29  ;;  %v15209_v35 = vadd.f32 %v9873_v41, %v9872_v3  ;;  %v9875_v24 = vpop.f32.mrb[22].mxu1 }
 0x858   : > { %v9876_v6 = vpop.f32.mrb[23].mxu1 }
 0x859   : > { %v15195_v25 = vadd.f32 %v9953_v48, %v7980_v54  ;;  %v15213_v21 = vadd.f32 %v9876_v6, %v9875_v24 }
 0x85b   : > { %v9954_v46 = vpop.f32.mrb[32].mxu0 }
 0x85c   : > { %v9955_v45 = vpop.f32.mrb[33].mxu0 }
 0x85d   : > { %v9956_v39 = vadd.f32 %v9955_v45, %v9954_v46  ;;  %v9957_v31 = vpop.f32.mrb[34].mxu0  ;;  %v9878_v28 = vpop.f32.mrb[24].mxu1  ;;  %v8004_v46 = vadd.f32 %v15177_v38, %v15107_v62 }
 0x85e   : > { %v9958_v60 = vpop.f32.mrb[35].mxu0  ;;  %v9879_v29 = vpop.f32.mrb[25].mxu1 }
 0x85f   : > { %v9959_v27 = vadd.f32 %v9958_v60, %v9957_v31  ;;  %v15205_v0 = vadd.f32 %v9956_v39, %v7985_v36  ;;  %v15221_v15 = vadd.f32 %v9879_v29, %v9878_v28  ;;  %v9881_v26 = vpop.f32.mrb[26].mxu1 }
 0x860   : > { %v9882_v48 = vpop.f32.mrb[27].mxu1 }
 0x861   : > { %v15207_v22 = vadd.f32 %v9959_v27, %v7988_v52  ;;  %v15225_v30 = vadd.f32 %v9882_v48, %v9881_v26  ;;  %v8009_v52 = vadd.f32 %v15185_v23, %v15107_v62 }
 0x863   : > { %v9960_v61 = vpop.f32.mrb[36].mxu0 }
 0x864   : > { %v9961_v1 = vpop.f32.mrb[37].mxu0 }
 0x865   : > { %v9962_v49 = vadd.f32 %v9961_v1, %v9960_v61  ;;  %v9963_v8 = vpop.f32.mrb[38].mxu0  ;;  %v9884_v36 = vpop.f32.mrb[28].mxu1  ;;  %v8012_v1 = vadd.f32 %v15189_v12, %v15107_v62 }
 0x866   : > { %v9964_v63 = vpop.f32.mrb[39].mxu0  ;;  %v9885_v31 = vpop.f32.mrb[29].mxu1 }
 0x867   : > { %v9965_v43 = vadd.f32 %v9964_v63, %v9963_v8  ;;  %v15217_v32 = vadd.f32 %v9962_v49, %v7993_v55  ;;  %v15233_v5 = vadd.f32 %v9885_v31, %v9884_v36  ;;  %v9887_v60 = vpop.f32.mrb[30].mxu1 }
 0x868   : > { %v9888_v61 = vpop.f32.mrb[31].mxu1 }
 0x869   : > { %v15219_v47 = vadd.f32 %v9965_v43, %v7996_v51  ;;  %v15237_v41 = vadd.f32 %v9888_v61, %v9887_v60  ;;  %v8025_v61 = vadd.f32 %v15209_v35, %v15107_v62 }
 0x86b   : > { %v9966_v42 = vpop.f32.mrb[40].mxu0 }
 0x86c   : > { %v9967_v4 = vpop.f32.mrb[41].mxu0 }
 0x86d   : > { %v9968_v20 = vadd.f32 %v9967_v4, %v9966_v42  ;;  %v9969_v54 = vpop.f32.mrb[42].mxu0  ;;  %v10152_v8 = vpop.f32.mrb[32].mxu1  ;;  %v8017_v42 = vadd.f32 %v15197_v13, %v15107_v62 }
 0x86e   : > { %v9970_v11 = vpop.f32.mrb[43].mxu0  ;;  %v8251_v63 = vadd.f32 %v10152_v8, %v15125_v33  ;;  %v8242_v51 = vpop.f32.mrb[33].mxu1 }
 0x86f   : > { %v9971_v56 = vadd.f32 %v9970_v11, %v9969_v54  ;;  %v15229_v45 = vadd.f32 %v9968_v20, %v8001_v57  ;;  %v8243_v43 = vadd.f32 %v8242_v51, %v15115_v53  ;;  %v10153_v28 = vpop.f32.mrb[34].mxu1  ;;  %v8020_v20 = vadd.f32 %v15201_v59, %v15107_v62 }
 0x870   : > { %v8371_v29 = vsub.f32 0.0, %v8251_v63  ;;  %v8254_v26 = vadd.f32 %v10153_v28, %v15127_v7  ;;  %v8245_v57 = vpop.f32.mrb[35].mxu1  ;;  %v8028_v63 = vadd.f32 %v15213_v21, %v15107_v62  ;;  %v8033_v21 = vadd.f32 %v15221_v15, %v15107_v62 }
 0x871   : > { %v15231_v2 = vadd.f32 %v9971_v56, %v8004_v46  ;;  %v8369_v54 = vsub.f32 0.0, %v8243_v43  ;;  %v8246_v33 = vadd.f32 %v8245_v57, %v15117_v18 }
 0x872   : > { %v8405_v11 = vmul.f32 1.442695, %v8371_v29  ;;  %v8372_v46 = vsub.f32 0.0, %v8254_v26 }
 0x873   : > { %v9972_v39 = vpop.f32.mrb[44].mxu0  ;;  %v8401_v36 = vmul.f32 1.442695, %v8369_v54  ;;  %v8370_v13 = vsub.f32 0.0, %v8246_v33  ;;  %v8036_v33 = vadd.f32 %v15225_v30, %v15107_v62 }
 0x874   : > { %v9973_v37 = vpop.f32.mrb[45].mxu0  ;;  %10753 = vpow2.f32 %v8405_v11 }
 0x875   : > { %v9974_v27 = vadd.f32 %v9973_v37, %v9972_v39  ;;  %v9975_v3 = vpop.f32.mrb[46].mxu0  ;;  %v8407_v39 = vmul.f32 1.442695, %v8372_v46  ;;  %10755 = vpow2.f32 %v8401_v36  ;;  %v8403_v7 = vmul.f32 1.442695, %v8370_v13  ;;  %v10156_v37 = vpop.f32.mrb[36].mxu1 }
 0x876   : > { %v9976_v38 = vpop.f32.mrb[47].mxu0  ;;  %v8267_v60 = vadd.f32 %v10156_v37, %v15145_v17 }
 0x877   : > { %v9977_v24 = vadd.f32 %v9976_v38, %v9975_v3  ;;  %v15241_v55 = vadd.f32 %v9974_v27, %v8009_v52  ;;  %10757 = vpow2.f32 %v8407_v39  ;;  %v8258_v52 = vpop.f32.mrb[37].mxu1 }
 0x878   : > { %10759 = vpow2.f32 %v8403_v7  ;;  %v8259_v27 = vadd.f32 %v8258_v52, %v15135_v14  ;;  %v10157_v3 = vpop.f32.mrb[38].mxu1  ;;  %v8375_v38 = vsub.f32 0.0, %v8267_v60 }
 0x879   : > { %v15243_v49 = vadd.f32 %v9977_v24, %v8012_v1  ;;  %v8270_v8 = vadd.f32 %v10157_v3, %v15147_v10 }
 0x87a   : > { %v8373_v51 = vsub.f32 0.0, %v8259_v27  ;;  %v8413_v43 = vmul.f32 1.442695, %v8375_v38 }
 0x87b   : > { %v9978_v6 = vpop.f32.mrb[48].mxu0  ;;  %v8376_v28 = vsub.f32 0.0, %v8270_v8 }
 0x87c   : > { %v9979_v23 = vpop.f32.mrb[49].mxu0  ;;  %v8409_v29 = vmul.f32 1.442695, %v8373_v51  ;;  %10761 = vpow2.f32 %v8413_v43 }
 0x87d   : > { %v9980_v4 = vadd.f32 %v9979_v23, %v9978_v6  ;;  %v9981_v12 = vpop.f32.mrb[50].mxu0  ;;  %v8261_v6 = vpop.f32.mrb[39].mxu1 }
 0x87e   : > { %v9982_v48 = vpop.f32.mrb[51].mxu0  ;;  %v8262_v23 = vadd.f32 %v8261_v6, %v15137_v34  ;;  %10763 = vpow2.f32 %v8409_v29  ;;  %v10160_v26 = vpop.f32.mrb[40].mxu1  ;;  %v8044_v29 = vadd.f32 %v15237_v41, %v15107_v62 }
 0x87f   : > { %v9983_v53 = vadd.f32 %v9982_v48, %v9981_v12  ;;  %v15253_v56 = vadd.f32 %v9980_v4, %v8017_v42  ;;  %v8415_v4 = vmul.f32 1.442695, %v8376_v28  ;;  %v10754_v57 = vpop.eup %10753  ;;  %v8274_v54 = vpop.f32.mrb[41].mxu1 }
 0x880   : > { %v8374_v35 = vsub.f32 0.0, %v8262_v23  ;;  %v10756_v48 = vpop.eup %10755  ;;  %v8467_v11 = vadd.f32 1.0, %v10754_v57  ;;  %v10161_v36 = vpop.f32.mrb[42].mxu1 }
 0x881   : > { %v15255_v31 = vadd.f32 %v9983_v53, %v8020_v20  ;;  %10765 = vpow2.f32 %v8415_v4  ;;  %v8283_v20 = vadd.f32 %v10160_v26, %v15169_v58  ;;  %v8275_v53 = vadd.f32 %v8274_v54, %v15157_v19  ;;  %v10758_v13 = vpop.eup %10757  ;;  %v8277_v58 = vpop.f32.mrb[43].mxu1 }
 0x882   : > { %v8411_v10 = vmul.f32 1.442695, %v8374_v35  ;;  %v8465_v39 = vadd.f32 1.0, %v10756_v48  ;;  %v10760_v60 = vpop.eup %10759  ;;  %v8468_v52 = vadd.f32 1.0, %v10758_v13  ;;  %v8278_v27 = vadd.f32 %v8277_v58, %v15159_v44 }
 0x883   : > { %v9984_v59 = vpop.f32.mrb[52].mxu0  ;;  %v8379_v7 = vsub.f32 0.0, %v8283_v20  ;;  %v8466_v3 = vadd.f32 1.0, %v10760_v60 }
 0x884   : > { %v9985_v18 = vpop.f32.mrb[53].mxu0  ;;  %10767 = vpow2.f32 %v8411_v10 }
 0x885   : > { %v9986_v1 = vadd.f32 %v9985_v18, %v9984_v59  ;;  %v9987_v24 = vpop.f32.mrb[54].mxu0  ;;  %v8286_v59 = vadd.f32 %v10161_v36, %v15171_v16  ;;  %10769 = vrcp.f32 %v8467_v11  ;;  %v8377_v18 = vsub.f32 0.0, %v8275_v53 }
 0x886   : > { %v9988_v17 = vpop.f32.mrb[55].mxu0  ;;  %10771 = vrcp.f32 %v8465_v39  ;;  %v8421_v19 = vmul.f32 1.442695, %v8379_v7  ;;  %v10762_v44 = vpop.eup %10761 }
 0x887   : > { %v9989_v14 = vadd.f32 %v9988_v17, %v9987_v24  ;;  %v15265_v42 = vadd.f32 %v9986_v1, %v8025_v61  ;;  %v8380_v61 = vsub.f32 0.0, %v8286_v59  ;;  %10773 = vrcp.f32 %v8468_v52 }
 0x888   : > { %v8417_v38 = vmul.f32 1.442695, %v8377_v18  ;;  %v8378_v24 = vsub.f32 0.0, %v8278_v27  ;;  %10775 = vrcp.f32 %v8466_v3  ;;  %v8041_v17 = vadd.f32 %v15233_v5, %v15107_v62 }
 0x889   : > { %v15267_v12 = vadd.f32 %v9989_v14, %v8028_v63  ;;  %v8423_v16 = vmul.f32 1.442695, %v8380_v61  ;;  %10777 = vpow2.f32 %v8421_v19  ;;  %v10164_v63 = vpop.f32.mrb[44].mxu1  ;;  %v10764_v14 = vpop.eup %10763  ;;  %v8471_v35 = vadd.f32 1.0, %v10762_v44 }
 0x88a   : > { %v8419_v6 = vmul.f32 1.442695, %v8378_v24  ;;  %10779 = vpow2.f32 %v8417_v38  ;;  %v8299_v43 = vadd.f32 %v10164_v63, %v15193_v40  ;;  %v8290_v28 = vpop.f32.mrb[45].mxu1  ;;  %v8469_v5 = vadd.f32 1.0, %v10764_v14 }
 0x88b   : > { %v9990_v34 = vpop.f32.mrb[56].mxu0  ;;  %10781 = vpow2.f32 %v8423_v16  ;;  %v8291_v10 = vadd.f32 %v8290_v28, %v15181_v50  ;;  %v10165_v26 = vpop.f32.mrb[46].mxu1 }
 0x88c   : > { %v9991_v46 = vpop.f32.mrb[57].mxu0  ;;  %v10766_v57 = vpop.eup %10765  ;;  %10783 = vpow2.f32 %v8419_v6  ;;  %v8302_v62 = vadd.f32 %v10165_v26, %v15195_v25 }
 0x88d   : > { %v9992_v15 = vadd.f32 %v9991_v46, %v9990_v34  ;;  %v9993_v37 = vpop.f32.mrb[58].mxu0  ;;  %v8293_v54 = vpop.f32.mrb[47].mxu1  ;;  %10785 = vrcp.f32 %v8471_v35  ;;  %v8472_v40 = vadd.f32 1.0, %v10766_v57 }
 0x88e   : > { %v9994_v30 = vpop.f32.mrb[59].mxu0  ;;  %v10768_v48 = vpop.eup %10767  ;;  %10787 = vrcp.f32 %v8469_v5  ;;  %v8384_v13 = vsub.f32 0.0, %v8302_v62  ;;  %v8294_v39 = vadd.f32 %v8293_v54, %v15183_v9 }
 0x88f   : > { %v9995_v1 = vadd.f32 %v9994_v30, %v9993_v37  ;;  %v15278_v8 = vadd.f32 %v9992_v15, %v8033_v21  ;;  %v8383_v21 = vsub.f32 0.0, %v8299_v43  ;;  %v8470_v11 = vadd.f32 1.0, %v10768_v48  ;;  %v10770_v53 = vpop.eup %10769  ;;  %v10168_v60 = vpop.f32.mrb[48].mxu1 }
 0x890   : > { %10789 = vrcp.f32 %v8472_v40  ;;  %v10772_v7 = vpop.eup %10771  ;;  %8563 = vst [vmem:[%s15295_s15 + $0x10] sm:$0xff] %v10770_v53  ;;  %v8431_v59 = vmul.f32 1.442695, %v8384_v13  ;;  %v8382_v58 = vsub.f32 0.0, %v8294_v39  ;;  %v8315_v52 = vadd.f32 %v10168_v60, %v15217_v32  ;;  %v8306_v18 = vpop.f32.mrb[49].mxu1 }
 0x891   : > { %v15280_v51 = vadd.f32 %v9995_v1, %v8036_v33  ;;  %v8381_v33 = vsub.f32 0.0, %v8291_v10  ;;  %v8429_v46 = vmul.f32 1.442695, %v8383_v21  ;;  %10791 = vrcp.f32 %v8470_v11  ;;  %v10774_v37 = vpop.eup %10773  ;;  %8561 = vst [vmem:[%s15295_s15] sm:$0xff] %v10772_v7  ;;  %v10169_v19 = vpop.f32.mrb[50].mxu1 }
 0x892   : > { %v10776_v9 = vpop.eup %10775  ;;  %8564 = vst [vmem:[%s15295_s15 + $0x18] sm:$0xff] %v10774_v37  ;;  %v8427_v27 = vmul.f32 1.442695, %v8382_v58  ;;  %v8307_v3 = vadd.f32 %v8306_v18, %v15205_v0  ;;  %v8387_v1 = vsub.f32 0.0, %v8315_v52  ;;  %v8318_v24 = vadd.f32 %v10169_v19, %v15219_v47  ;;  %v8309_v16 = vpop.f32.mrb[51].mxu1 }
 0x893   : > { %v9996_v23 = vpop.f32.mrb[60].mxu0  ;;  %v8425_v36 = vmul.f32 1.442695, %v8381_v33  ;;  %10793 = vpow2.f32 %v8429_v46  ;;  %v10778_v30 = vpop.eup %10777  ;;  %8562 = vst [vmem:[%s15295_s15 + $0x8] sm:$0xff] %v10776_v9  ;;  %v8310_v32 = vadd.f32 %v8309_v16, %v15207_v22 }
 0x894   : > { %v9997_v4 = vpop.f32.mrb[61].mxu0  ;;  %v10780_v61 = vpop.eup %10779  ;;  %v8475_v38 = vadd.f32 1.0, %v10778_v30  ;;  %v8385_v44 = vsub.f32 0.0, %v8307_v3  ;;  %v8437_v43 = vmul.f32 1.442695, %v8387_v1  ;;  %v8388_v0 = vsub.f32 0.0, %v8318_v24 }
 0x895   : > { %v9998_v34 = vadd.f32 %v9997_v4, %v9996_v23  ;;  %v9999_v20 = vpop.f32.mrb[62].mxu0  ;;  %10795 = vpow2.f32 %v8425_v36  ;;  %v10782_v6 = vpop.eup %10781  ;;  %v8473_v63 = vadd.f32 1.0, %v10780_v61  ;;  %v8386_v47 = vsub.f32 0.0, %v8310_v32 }
 0x896   : > { %v10000_v41 = vpop.f32.mrb[63].mxu0  ;;  %10797 = vpow2.f32 %v8431_v59  ;;  %v8476_v23 = vadd.f32 1.0, %v10782_v6  ;;  %v8439_v4 = vmul.f32 1.442695, %v8388_v0  ;;  %v10172_v26 = vpop.f32.mrb[52].mxu1 }
 0x897   : > { %v10001_v50 = vadd.f32 %v10000_v41, %v9999_v20  ;;  %v15298_v25 = vadd.f32 %v9998_v34, %v8041_v17  ;;  %10799 = vpow2.f32 %v8427_v27  ;;  %v10784_v17 = vpop.eup %10783  ;;  %v8435_v22 = vmul.f32 1.442695, %v8386_v47  ;;  %v8322_v21 = vpop.f32.mrb[53].mxu1 }
 0x898   : > { %10801 = vrcp.f32 %v8475_v38  ;;  %v10786_v28 = vpop.eup %10785  ;;  %v8474_v14 = vadd.f32 1.0, %v10784_v17  ;;  %v8331_v5 = vadd.f32 %v10172_v26, %v15241_v55  ;;  %v8323_v20 = vadd.f32 %v8322_v21, %v15229_v45  ;;  %v10173_v54 = vpop.f32.mrb[54].mxu1 }
 0x899   : > { %v15300_v15 = vadd.f32 %v10001_v50, %v8044_v29  ;;  %10803 = vrcp.f32 %v8473_v63  ;;  %v8433_v29 = vmul.f32 1.442695, %v8385_v44  ;;  %v10788_v35 = vpop.eup %10787  ;;  %8567 = vst [vmem:[%s15295_s15 + $0x30] sm:$0xff] %v10786_v28  ;;  %v8334_v62 = vadd.f32 %v10173_v54, %v15243_v49  ;;  %v8325_v41 = vpop.f32.mrb[55].mxu1 }
 0x89a   : > { %10805 = vrcp.f32 %v8476_v23  ;;  %v10790_v10 = vpop.eup %10789  ;;  %8565 = vst [vmem:[%s15295_s15 + $0x20] sm:$0xff] %v10788_v35  ;;  %v8391_v33 = vsub.f32 0.0, %v8331_v5  ;;  %v8389_v50 = vsub.f32 0.0, %v8323_v20  ;;  %v8326_v55 = vadd.f32 %v8325_v41, %v15231_v2 }
 0x89b   : > { %10807 = vrcp.f32 %v8474_v14  ;;  %v10792_v57 = vpop.eup %10791  ;;  %8568 = vst [vmem:[%s15295_s15 + $0x38] sm:$0xff] %v10790_v10  ;;  %v8392_v45 = vsub.f32 0.0, %v8334_v62 }
 0x89c   : > { %10809 = vpow2.f32 %v8437_v43  ;;  %8566 = vst [vmem:[%s15295_s15 + $0x28] sm:$0xff] %v10792_v57  ;;  %v8445_v36 = vmul.f32 1.442695, %v8391_v33  ;;  %v8441_v39 = vmul.f32 1.442695, %v8389_v50  ;;  %v8390_v7 = vsub.f32 0.0, %v8326_v55 }
 0x89d   : > { %v10794_v34 = vpop.eup %10793  ;;  %10811 = vpow2.f32 %v8433_v29  ;;  %v8447_v59 = vmul.f32 1.442695, %v8392_v45  ;;  %v10176_v2 = vpop.f32.mrb[56].mxu1 }
 0x89e   : > { %v8479_v40 = vadd.f32 1.0, %v10794_v34  ;;  %10813 = vpow2.f32 %v8439_v4  ;;  %v8443_v60 = vmul.f32 1.442695, %v8390_v7  ;;  %v8347_v52 = vadd.f32 %v10176_v2, %v15265_v42  ;;  %v8338_v18 = vpop.f32.mrb[57].mxu1 }
 0x89f   : > { %v10796_v48 = vpop.eup %10795  ;;  %10815 = vpow2.f32 %v8435_v22  ;;  %v8339_v27 = vadd.f32 %v8338_v18, %v15253_v56  ;;  %v10177_v3 = vpop.f32.mrb[58].mxu1 }
 0x8a0   : > { %v10798_v11 = vpop.eup %10797  ;;  %v8477_v46 = vadd.f32 1.0, %v10796_v48  ;;  %10817 = vrcp.f32 %v8479_v40  ;;  %v8395_v61 = vsub.f32 0.0, %v8347_v52  ;;  %v8350_v38 = vadd.f32 %v10177_v3, %v15267_v12  ;;  %v8341_v1 = vpop.f32.mrb[59].mxu1 }
 0x8a1   : > { %v8480_v53 = vadd.f32 1.0, %v10798_v11  ;;  %v10800_v13 = vpop.eup %10799  ;;  %v8393_v6 = vsub.f32 0.0, %v8339_v27  ;;  %v8342_v42 = vadd.f32 %v8341_v1, %v15255_v31 }
 0x8a2   : > { %10819 = vrcp.f32 %v8477_v46  ;;  %v10802_v37 = vpop.eup %10801  ;;  %v8478_v49 = vadd.f32 1.0, %v10800_v13  ;;  %v8396_v32 = vsub.f32 0.0, %v8350_v38  ;;  %v8453_v23 = vmul.f32 1.442695, %v8395_v61 }
 0x8a3   : > { %10821 = vrcp.f32 %v8480_v53  ;;  %v10804_v58 = vpop.eup %10803  ;;  %8571 = vst [vmem:[%s15295_s15 + $0x50] sm:$0xff] %v10802_v37  ;;  %v8394_v43 = vsub.f32 0.0, %v8342_v42  ;;  %v8449_v28 = vmul.f32 1.442695, %v8393_v6 }
 0x8a4   : > { %10823 = vpow2.f32 %v8445_v36  ;;  %v10806_v9 = vpop.eup %10805  ;;  %8569 = vst [vmem:[%s15295_s15 + $0x40] sm:$0xff] %v10804_v58  ;;  %v8455_v29 = vmul.f32 1.442695, %v8396_v32 }
 0x8a5   : > { %10825 = vrcp.f32 %v8478_v49  ;;  %v10808_v30 = vpop.eup %10807  ;;  %8572 = vst [vmem:[%s15295_s15 + $0x58] sm:$0xff] %v10806_v9  ;;  %v10180_v47 = vpop.f32.mrb[60].mxu1  ;;  %v8451_v22 = vmul.f32 1.442695, %v8394_v43 }
 0x8a6   : > { %10827 = vpow2.f32 %v8441_v39  ;;  %v10810_v19 = vpop.eup %10809  ;;  %8570 = vst [vmem:[%s15295_s15 + $0x48] sm:$0xff] %v10808_v30  ;;  %v8363_v35 = vadd.f32 %v10180_v47, %v15298_v25  ;;  %v8354_v4 = vpop.f32.mrb[61].mxu1 }
 0x8a7   : > { %10829 = vpow2.f32 %v8447_v59  ;;  %v10812_v24 = vpop.eup %10811  ;;  %v8483_v16 = vadd.f32 1.0, %v10810_v19  ;;  %v8355_v26 = vadd.f32 %v8354_v4, %v15278_v8  ;;  %v10181_v57 = vpop.f32.mrb[62].mxu1 }
 0x8a8   : > { %10831 = vpow2.f32 %v8443_v60  ;;  %v10814_v63 = vpop.eup %10813  ;;  %v8481_v44 = vadd.f32 1.0, %v10812_v24  ;;  %v8399_v34 = vsub.f32 0.0, %v8363_v35  ;;  %v8366_v20 = vadd.f32 %v10181_v57, %v15300_v15  ;;  %v8357_v54 = vpop.f32.mrb[63].mxu1 }
 0x8a9   : > { %v10816_v56 = vpop.eup %10815  ;;  %10833 = vrcp.f32 %v8483_v16  ;;  %v8484_v17 = vadd.f32 1.0, %v10814_v63  ;;  %v8397_v40 = vsub.f32 0.0, %v8355_v26  ;;  %v8358_v25 = vadd.f32 %v8357_v54, %v15280_v51 }
 0x8aa   : > { %v10818_v0 = vpop.eup %10817  ;;  %10835 = vrcp.f32 %v8481_v44  ;;  %v8482_v12 = vadd.f32 1.0, %v10816_v56  ;;  %v8400_v41 = vsub.f32 0.0, %v8366_v20  ;;  %v8461_v46 = vmul.f32 1.442695, %v8399_v34 }
 0x8ab   : > { %8575 = vst [vmem:[%s15295_s15 + $0x70] sm:$0xff] %v10818_v0  ;;  %10837 = vrcp.f32 %v8484_v17  ;;  %v8398_v50 = vsub.f32 0.0, %v8358_v25  ;;  %v8457_v55 = vmul.f32 1.442695, %v8397_v40 }
 0x8ac   : > { %v10820_v14 = vpop.eup %10819  ;;  %10839 = vrcp.f32 %v8482_v12  ;;  %v8463_v36 = vmul.f32 1.442695, %v8400_v41 }
 0x8ad   : > { %v10822_v31 = vpop.eup %10821  ;;  %8573 = vst [vmem:[%s15295_s15 + $0x60] sm:$0xff] %v10820_v14  ;;  %10841 = vpow2.f32 %v8453_v23  ;;  %v8459_v45 = vmul.f32 1.442695, %v8398_v50 }
 0x8ae   : > { %v10824_v10 = vpop.eup %10823  ;;  %8576 = vst [vmem:[%s15295_s15 + $0x78] sm:$0xff] %v10822_v31  ;;  %10843 = vpow2.f32 %v8449_v28 }
 0x8af   : > { %v10826_v5 = vpop.eup %10825  ;;  %v8487_v21 = vadd.f32 1.0, %v10824_v10  ;;  %10845 = vpow2.f32 %v8455_v29 }
 0x8b0   : > { %v10828_v48 = vpop.eup %10827  ;;  %8574 = vst [vmem:[%s15295_s15 + $0x68] sm:$0xff] %v10826_v5 }
 0x8b1   : > { %v10830_v33 = vpop.eup %10829  ;;  %10847 = vrcp.f32 %v8487_v21  ;;  %v8485_v62 = vadd.f32 1.0, %v10828_v48 }
 0x8b2   : > { %v10832_v8 = vpop.eup %10831  ;;  %v8488_v11 = vadd.f32 1.0, %v10830_v33  ;;  %10849 = vpow2.f32 %v8451_v22 }
 0x8b3   : > { %10851 = vrcp.f32 %v8485_v62  ;;  %v8486_v15 = vadd.f32 1.0, %v10832_v8  ;;  %v10834_v53 = vpop.eup %10833 }
 0x8b4   : > { %10853 = vrcp.f32 %v8488_v11  ;;  %v10836_v51 = vpop.eup %10835  ;;  %8579 = vst [vmem:[%s15295_s15 + $0x90] sm:$0xff] %v10834_v53 }
 0x8b5   : > { %10855 = vrcp.f32 %v8486_v15  ;;  %v10838_v13 = vpop.eup %10837  ;;  %8577 = vst [vmem:[%s15295_s15 + $0x80] sm:$0xff] %v10836_v51 }
 0x8b6   : > { %10857 = vpow2.f32 %v8461_v46  ;;  %v10840_v39 = vpop.eup %10839  ;;  %8580 = vst [vmem:[%s15295_s15 + $0x98] sm:$0xff] %v10838_v13 }
 0x8b7   : > { %10859 = vpow2.f32 %v8457_v55  ;;  %v10842_v7 = vpop.eup %10841  ;;  %8578 = vst [vmem:[%s15295_s15 + $0x88] sm:$0xff] %v10840_v39 }
 0x8b8   : > { %10861 = vpow2.f32 %v8463_v36  ;;  %v10844_v37 = vpop.eup %10843  ;;  %v8491_v49 = vadd.f32 1.0, %v10842_v7 }
 0x8b9   : > { %10863 = vpow2.f32 %v8459_v45  ;;  %v10846_v59 = vpop.eup %10845  ;;  %v8489_v58 = vadd.f32 1.0, %v10844_v37 }
 0x8ba   : > { %10865 = vrcp.f32 %v8491_v49  ;;  %v8492_v2 = vadd.f32 1.0, %v10846_v59 }
 0x8bb   : > { %v10848_v60 = vpop.eup %10847  ;;  %10867 = vrcp.f32 %v8489_v58 }
 0x8bc   : > { %v10850_v9 = vpop.eup %10849  ;;  %8583 = vst [vmem:[%s15295_s15 + $0xb0] sm:$0xff] %v10848_v60  ;;  %10869 = vrcp.f32 %v8492_v2 }
 0x8bd   : > { %v10852_v52 = vpop.eup %10851  ;;  %v8490_v18 = vadd.f32 1.0, %v10850_v9 }
 0x8be   : > { %v10854_v30 = vpop.eup %10853  ;;  %8581 = vst [vmem:[%s15295_s15 + $0xa0] sm:$0xff] %v10852_v52 }
 0x8bf   : > { %v10856_v27 = vpop.eup %10855  ;;  %8584 = vst [vmem:[%s15295_s15 + $0xb8] sm:$0xff] %v10854_v30  ;;  %10871 = vrcp.f32 %v8490_v18 }
 0x8c0   : > { %v10858_v3 = vpop.eup %10857  ;;  %8582 = vst [vmem:[%s15295_s15 + $0xa8] sm:$0xff] %v10856_v27 }
 0x8c1   : > { %v10860_v19 = vpop.eup %10859  ;;  %v8495_v61 = vadd.f32 1.0, %v10858_v3 }
 0x8c2   : > { %v10862_v38 = vpop.eup %10861  ;;  %v8493_v1 = vadd.f32 1.0, %v10860_v19 }
 0x8c3   : > { %v10864_v24 = vpop.eup %10863  ;;  %10873 = vrcp.f32 %v8495_v61  ;;  %v8496_v16 = vadd.f32 1.0, %v10862_v38 }
 0x8c4   : > { %10875 = vrcp.f32 %v8493_v1  ;;  %v8494_v6 = vadd.f32 1.0, %v10864_v24  ;;  %v10866_v42 = vpop.eup %10865 }
 0x8c5   : > { %10877 = vrcp.f32 %v8496_v16  ;;  %v10868_v63 = vpop.eup %10867  ;;  %8587 = vst [vmem:[%s15295_s15 + $0xd0] sm:$0xff] %v10866_v42 }
 0x8c6   : > { %10879 = vrcp.f32 %v8494_v6  ;;  %v10870_v44 = vpop.eup %10869  ;;  %8585 = vst [vmem:[%s15295_s15 + $0xc0] sm:$0xff] %v10868_v63 }
 0x8c7   : > { %8588 = vst [vmem:[%s15295_s15 + $0xd8] sm:$0xff] %v10870_v44 }
 0x8c9   : > { %v10872_v32 = vpop.eup %10871 }
 0x8ca   : > { %8586 = vst [vmem:[%s15295_s15 + $0xc8] sm:$0xff] %v10872_v32 }
 0x8cd   : > { %v10874_v56 = vpop.eup %10873 }
 0x8ce   : > { %v10876_v17 = vpop.eup %10875  ;;  %8591 = vst [vmem:[%s15295_s15 + $0xf0] sm:$0xff] %v10874_v56 }
 0x8cf   : > { %v10878_v23 = vpop.eup %10877  ;;  %8589 = vst [vmem:[%s15295_s15 + $0xe0] sm:$0xff] %v10876_v17 }
 0x8d0   : > { %v10880_v43 = vpop.eup %10879  ;;  %8592 = vst [vmem:[%s15295_s15 + $0xf8] sm:$0xff] %v10878_v23 }
 0x8d1   : > { %8590 = vst [vmem:[%s15295_s15 + $0xe8] sm:$0xff] %v10880_v43 }
 0x8d2   : > { %10897 = shalt.err (!%p10894_p3)
}
 0x8d3   : > { %s10898_s11 = scalar_lea.hbm %s15351_s20, 4096  ;;  %s10902_s13 = scalar_lea.hbm %s15407_s6, 8192 }
 0x8d4   : > { %p10899_p4 = scmp.ne.s32.totalorder %s15351_s20, %s10898_s11  ;;  %p10903_p9 = scmp.lt.u32.totalorder %s15351_s20, %s15407_s6 }
 0x8d5   : > { %p10904_p10 = scmp.lt.u32.totalorder %s10902_s13, %s10898_s11  ;;  %p10906_p12 = scmp.lt.u32.totalorder %s10898_s11, %s15351_s20 }
 0x8d6   : > { %p10900_p7 = pnand %p10899_p4, %p11026_p5 }
 0x8d7   : > { %p10905_p11 = por %p10904_p10, %p10903_p9 }
 0x8d8   : > { %p10901_p8 = pneg %p10900_p7 }
 0x8d9   : > { %p10907_p13 = por %p10906_p12, %p10905_p11 }
 0x8db   : > { %p10908_p0 = pnand %p10907_p13, %p10901_p8 }
 0x8dd   : > { %10911 = shalt.err (!%p10908_p0)
}
 0x8de   : > { %s10951_s16 = smov 128   ;;  %s10952_s18 = smov 8  }
 0x8df   : > { %10182 = dma.vmem_to_hbm [thread:$0]  (%p11026_p5), %s15353_s17, 4096, %s15351_s20, %s15360_s25, %s10951_s16, %s10951_s16, %s10952_s18  }
 0x8e0 PF: > { %p10188_p1 = scmp.ge.s32.totalorder %s10946_s24, 2  ;;  %s8622_s19 = sand.u32 1, %s10934_s21  }
 0x8e1   : > { %s8623_s26 = scalar_lea.sflag [#allocation6], %s8622_s19 }
 0x8e2   : > { %p10185_p2 = pnand %p10188_p1, %p11030_p6 }
 0x8e4   : > { %10929 = dma.done.wait (!%p10185_p2), %s8623_s26, 4096  }
 0x8e5   : > { %10931 = vsyncadd (!%p10185_p2), %s8623_s26, 4294963200  ;;  %p16_p3 = scmp.ge.s32.totalorder %s11013_s27, 4   ;;  %s15431_s21 = smov %s10938_s22 }
 0x8e6   : > { %s15432_s22 = smov %s10942_s23  ;;  %s15433_s23 = smov %s11024_s30 }
 0x8e7   : > { %s15434_s24 = smov %s11013_s27  ;;  %18 = sbr.rel (!%p16_p3) target bundleno = 3 (0x3), region = 89 }
 0x8ee   :  { %8628 = vsyncpa [#allocation6], 1 }
 0x8ef   :  { %8630 = vsyncpa [#allocation6 + $0x1], 1 }

</bundles_post_ra>
